<compile_context>
chip_gen: v7x
topology: tpu7x:2x2x1
jax: 0.10.0
libtpu: 0.0.40
codegen_flags: <defaults>
</compile_context>

<pallas_src>
import math
import functools

import numpy as np
import jax
import jax.numpy as jnp
from jax.experimental import pallas as pl
from jax.experimental.pallas import tpu as pltpu


# --------------------------------------------------------------------------
# tiling helpers

def _round_up(a, b):
    return (a + b - 1) // b * b


def _row_tile(m):
    """Row (sublane) tile; multiple of 16 (bf16 sublane packing)."""
    if m >= 1024:
        return 256
    if m >= 256:
        return 128
    return _round_up(max(m, 8), 16)


def _col_tile(n, n_out=1):
    """Lane tile for the weight/output N dim. >=256 preferred (v6e/v7x MXU);
    capped at 256 when several weight matrices are fused (v7x 64 MiB VMEM budget)."""
    cap = 256 if n_out > 1 else 512
    if cap >= 512 and n % 512 == 0 and n >= 1024:
        return 512
    if n % 256 == 0 and n >= 256:
        return 256
    if n % 128 == 0:
        return 128
    return n


def _divisor_tile(s, cap=256):
    for t in (cap, 128, 64, 32, 16, 8):
        if s % t == 0:
            return t
    return s


def _pad_rows(a, mp, fill=0):
    if a.shape[0] == mp:
        return a
    return jnp.pad(a, ((0, mp - a.shape[0]),) + ((0, 0),) * (a.ndim - 1),
                   constant_values=fill)


def _vmem_limit(*block_bytes):
    """Scoped VMEM limit from the actual block sizes (double-buffered) + headroom."""
    need = 2 * int(sum(block_bytes)) + (2 << 20)
    return int(min(max(need, 32 << 20), 96 << 20))


# --------------------------------------------------------------------------
# one-shot LayerNorm + adaLN modulation prep kernel
#   out = LN(x; gamma, beta) * scale_tab[seg] + shift_tab[seg]
# scale_tab already contains the (+1.0); pad rows (seg == -1) map to 0.

def _modulate_kernel(x_ref, seg_ref, g_ref, b_ref, scale_ref, shift_ref, o_ref, *, eps):
    x = x_ref[...].astype(jnp.float32)
    mu = jnp.mean(x, axis=-1, keepdims=True)
    var = jnp.mean(jnp.square(x - mu), axis=-1, keepdims=True)
    xn = (x - mu) * jax.lax.rsqrt(var + eps)
    xn = xn * g_ref[...] + b_ref[...]
    nbp = scale_ref.shape[0]
    onehot = (seg_ref[...] == jax.lax.broadcasted_iota(
        jnp.int32, (x.shape[0], nbp), 1)).astype(jnp.float32)
    scale = jnp.dot(onehot, scale_ref[...], preferred_element_type=jnp.float32)
    shift = jnp.dot(onehot, shift_ref[...], preferred_element_type=jnp.float32)
    o_ref[...] = (xn * scale + shift).astype(o_ref.dtype)


def modulate_ln(x, gamma, beta, scale_tab, shift_tab, seg, *, eps=1e-5,
                out_dtype=jnp.bfloat16):
    M, K = x.shape
    nbp = scale_tab.shape[0]
    tm = _row_tile(M)
    mp = _round_up(M, tm)
    vmem = _vmem_limit(tm * K * 4, tm * K * 2, 2 * nbp * K * 4, tm * 4)
    out = pl.pallas_call(
        functools.partial(_modulate_kernel, eps=eps),
        grid=(mp // tm,),
        in_specs=[
            pl.BlockSpec((tm, K), lambda i: (i, 0)),
            pl.BlockSpec((tm, 1), lambda i: (i, 0)),
            pl.BlockSpec((1, K), lambda i: (0, 0)),
            pl.BlockSpec((1, K), lambda i: (0, 0)),
            pl.BlockSpec((nbp, K), lambda i: (0, 0)),
            pl.BlockSpec((nbp, K), lambda i: (0, 0)),
        ],
        out_specs=pl.BlockSpec((tm, K), lambda i: (i, 0)),
        out_shape=jax.ShapeDtypeStruct((mp, K), out_dtype),
        compiler_params=pltpu.CompilerParams(
            dimension_semantics=("parallel",), vmem_limit_bytes=vmem),
    )(_pad_rows(x, mp), _pad_rows(seg, mp, fill=-1),
      gamma.reshape(1, K).astype(jnp.float32), beta.reshape(1, K).astype(jnp.float32),
      scale_tab.astype(jnp.float32), shift_tab.astype(jnp.float32))
    return out[:M] if mp != M else out


# --------------------------------------------------------------------------
# fused matmul kernel:  out_t = epilogue( act( x @ W_t + b_t ) )
# Grid = (N//tn, M//tm): weight/output N axis OUTER, row axis INNER -> each (K, tn)
# weight block is DMA'd from HBM exactly once and stays resident across all row tiles.

def _mm_kernel(*refs, n_out, has_bias, has_epi, activation):
    idx = 0
    x_ref = refs[idx]; idx += 1
    if has_epi:
        res_ref, gate_ref, seg_ref = refs[idx:idx + 3]; idx += 3
    w_refs = refs[idx:idx + n_out]; idx += n_out
    if has_bias:
        b_refs = refs[idx:idx + n_out]; idx += n_out
    o_refs = refs[idx:]

    x = x_ref[...]
    if x.dtype != w_refs[0].dtype:
        x = x.astype(w_refs[0].dtype)

    if has_epi:
        nbp = gate_ref.shape[0]
        onehot = (seg_ref[...] == jax.lax.broadcasted_iota(
            jnp.int32, (x.shape[0], nbp), 1)).astype(jnp.float32)
        gate = jnp.dot(onehot, gate_ref[...], preferred_element_type=jnp.float32)

    for t in range(n_out):
        y = jnp.dot(x, w_refs[t][...], preferred_element_type=jnp.float32)
        if has_bias:
            y = y + b_refs[t][...]
        if activation == "silu":
            y = y * jax.nn.sigmoid(y)                       # logistic -> EUP slot
        elif activation == "gelu":
            # TODO(synk): PyTorch nn.GELU default is exact-erf; tanh approximation used.
            y = 0.5 * y * (1.0 + jnp.tanh(0.7978845608028654 *
                                          (y + 0.044715 * y * y * y)))
        if has_epi:
            y = res_ref[...].astype(jnp.float32) + gate * y
        o_refs[t][...] = y.astype(o_refs[t].dtype)


def fused_matmul(x, weights, biases=None, *, epilogue=None, activation="none",
                 out_dtype=jnp.bfloat16):
    """(multi) matmul -> activation -> optional (residual + gate[seg]*y) epilogue.

    epilogue = (residual[M,N], gate_table[nbp,N], seg[M,1] int32)
    """
    M, K = x.shape
    n_out = len(weights)
    N = weights[0].shape[1]
    assert all(w.shape == (K, N) for w in weights)
    has_bias = biases is not None
    assert epilogue is None or n_out == 1

    tm = _row_tile(M)
    mp = _round_up(M, tm)
    tn = _col_tile(N, n_out)
    out_bytes = jnp.dtype(out_dtype).itemsize

    args = [_pad_rows(x.astype(jnp.bfloat16), mp)]
    in_specs = [pl.BlockSpec((tm, K), lambda j, i: (i, 0))]
    blk_bytes = [tm * K * 2]

    if epilogue is not None:
        res, gate_tab, seg = epilogue
        nbp = gate_tab.shape[0]
        args += [_pad_rows(res, mp), gate_tab.astype(jnp.float32),
                 _pad_rows(seg, mp, fill=-1)]
        in_specs += [pl.BlockSpec((tm, tn), lambda j, i: (i, j)),
                     pl.BlockSpec((nbp, tn), lambda j, i: (0, j)),
                     pl.BlockSpec((tm, 1), lambda j, i: (i, 0))]
        blk_bytes += [tm * tn * res.dtype.itemsize, nbp * tn * 4, tm * 4]
    for w in weights:
        args.append(w.astype(jnp.bfloat16))
        in_specs.append(pl.BlockSpec((K, tn), lambda j, i: (0, j)))
        blk_bytes.append(K * tn * 2)
    if has_bias:
        for b in biases:
            args.append(b.reshape(1, N).astype(jnp.float32))
            in_specs.append(pl.BlockSpec((1, tn), lambda j, i: (0, j)))
            blk_bytes.append(tn * 4)
    blk_bytes += [tm * tn * out_bytes] * n_out

    out_shape = [jax.ShapeDtypeStruct((mp, N), out_dtype) for _ in range(n_out)]
    out_specs = [pl.BlockSpec((tm, tn), lambda j, i: (i, j)) for _ in range(n_out)]

    outs = pl.pallas_call(
        functools.partial(_mm_kernel, n_out=n_out, has_bias=has_bias,
                          has_epi=epilogue is not None, activation=activation),
        grid=(N // tn, mp // tm),          # N tiles outer -> weight blocks stay resident
        in_specs=in_specs,
        out_specs=out_specs if n_out > 1 else out_specs[0],
        out_shape=out_shape if n_out > 1 else out_shape[0],
        compiler_params=pltpu.CompilerParams(
            dimension_semantics=("parallel", "parallel"),
            vmem_limit_bytes=_vmem_limit(*blk_bytes)),
    )(*args)

    if n_out == 1:
        return outs[:M] if mp != M else outs
    return tuple(o[:M] for o in outs) if mp != M else tuple(outs)


# --------------------------------------------------------------------------
# one-shot QK prep: per-head LayerNorm + 3D RoPE (+ 1/sqrt(head_dim) folded into q).
# The rotate-half sign is folded into the host-side sin table, so the in-kernel
# rotation is a plain half-swap.

def _qk_prep_kernel(q_ref, k_ref, cos_ref, sin_ref, qg_ref, qb_ref, kg_ref, kb_ref,
                    qo_ref, ko_ref, *, num_heads, head_dim, eps, q_scale):
    half = head_dim // 2
    cos = cos_ref[...][:, None, :]          # (t, 1, Dh)
    sin = sin_ref[...][:, None, :]          # pre-signed: first half already negated

    def prep(x_ref, g_ref, b_ref, scale):
        n = x_ref.shape[0]
        x = x_ref[...].astype(jnp.float32).reshape(n, num_heads, head_dim)
        mu = jnp.mean(x, axis=-1, keepdims=True)
        var = jnp.mean(jnp.square(x - mu), axis=-1, keepdims=True)
        xn = (x - mu) * jax.lax.rsqrt(var + eps) * g_ref[...] + b_ref[...]
        x_rot = jnp.concatenate([xn[..., half:], xn[..., :half]], axis=-1)
        return ((xn * cos + x_rot * sin) * scale).reshape(n, num_heads * head_dim)

    qo_ref[...] = prep(q_ref, qg_ref, qb_ref, q_scale).astype(qo_ref.dtype)
    ko_ref[...] = prep(k_ref, kg_ref, kb_ref, 1.0).astype(ko_ref.dtype)


def qk_rope_prep(q, k, cos, sin_signed, qn_g, qn_b, kn_g, kn_b,
                 *, num_heads, head_dim, eps=1e-5):
    S, D = q.shape
    assert D == num_heads * head_dim
    t = _divisor_tile(S)
    vec = lambda a: a.reshape(1, head_dim).astype(jnp.float32)
    row = pl.BlockSpec((t, D), lambda i: (i, 0))
    rope = pl.BlockSpec((t, head_dim), lambda i: (i, 0))
    unit = pl.BlockSpec((1, head_dim), lambda i: (0, 0))
    vmem = _vmem_limit(4 * t * D * 2, 2 * t * head_dim * 4, 4 * head_dim * 4)
    return pl.pallas_call(
        functools.partial(_qk_prep_kernel, num_heads=num_heads, head_dim=head_dim,
                          eps=eps, q_scale=1.0 / math.sqrt(head_dim)),
        grid=(S // t,),
        in_specs=[row, row, rope, rope, unit, unit, unit, unit],
        out_specs=[row, row],
        out_shape=[jax.ShapeDtypeStruct((S, D), jnp.bfloat16),
                   jax.ShapeDtypeStruct((S, D), jnp.bfloat16)],
        compiler_params=pltpu.CompilerParams(
            dimension_semantics=("parallel",), vmem_limit_bytes=vmem),
    )(q, k, cos, sin_signed, vec(qn_g), vec(qn_b), vec(kn_g), vec(kn_b))


# --------------------------------------------------------------------------
# flash attention (online softmax, varlen segment mask, per-tile segment-range skipping)

def _flash_attn_kernel(qmin_ref, qmax_ref, kmin_ref, kmax_ref,       # scalar prefetch
                       q_ref, k_ref, v_ref, segq_ref, segk_ref,
                       o_ref, m_scr, l_scr, acc_scr, *, num_heads, head_dim):
    qi = pl.program_id(0)
    ki = pl.program_id(1)

    @pl.when(ki == 0)
    def _():
        m_scr[...] = jnp.full(m_scr.shape, -jnp.inf, jnp.float32)
        l_scr[...] = jnp.zeros(l_scr.shape, jnp.float32)
        acc_scr[...] = jnp.zeros(acc_scr.shape, jnp.float32)

    # Packed segments are contiguous per stream, so a (q-tile, kv-tile) pair can only
    # contribute if their segment-id ranges overlap and the kv tile holds >=1 real row.
    # (Pad rows carry seg == -1 and are dropped after the model; they never unmask
    # against real rows.)
    live = jnp.logical_and(
        jnp.logical_and(qmin_ref[qi] <= kmax_ref[ki], kmin_ref[ki] <= qmax_ref[qi]),
        kmax_ref[ki] >= 0)

    @pl.when(live)
    def _():
        tq = q_ref.shape[0]
        tk = k_ref.shape[0]
        q = q_ref[...].reshape(tq, num_heads, head_dim)      # bf16, already LN+RoPE+scaled
        k = k_ref[...].reshape(tk, num_heads, head_dim)
        v = v_ref[...].reshape(tk, num_heads, head_dim)
        s = jnp.einsum("qhd,khd->hqk", q, k, preferred_element_type=jnp.float32)
        mask = (segq_ref[...] == segk_ref[...])[None, :, :]   # (1, tq, tk)
        s = jnp.where(mask, s, -1e30)
        m_prev = m_scr[...]
        m_new = jnp.maximum(m_prev, jnp.max(s, axis=-1, keepdims=True))
        alpha = jnp.exp(m_prev - m_new)
        p = jnp.exp(s - m_new)
        p = jnp.where(mask, p, 0.0)                           # rows fully masked in tile
        l_scr[...] = alpha * l_scr[...] + jnp.sum(p, axis=-1, keepdims=True)
        acc_scr[...] = alpha * acc_scr[...] + jnp.einsum(
            "hqk,khd->hqd", p.astype(v.dtype), v, preferred_element_type=jnp.float32)
        m_scr[...] = m_new

    @pl.when(ki == pl.num_programs(1) - 1)
    def _():
        l = l_scr[...]
        inv = pl.reciprocal(jnp.where(l == 0.0, 1.0, l), approx=True)
        out = acc_scr[...] * inv                              # (H, tq, Dh)
        # single lane-dense store of the whole (tq, H*Dh) tile
        o_ref[...] = jnp.concatenate(
            [out[h] for h in range(num_heads)], axis=-1).astype(o_ref.dtype)


def flash_attention(q, k, v, seg_col, seg_row, qseg_min, qseg_max, kseg_min, kseg_max,
                    *, num_heads, head_dim, tq, tkv):
    S, D = q.shape
    assert D == num_heads * head_dim
    assert S % tq == 0 and S % tkv == 0
    vmem = _vmem_limit(tq * D * 2, 2 * tkv * D * 2, tq * D * 2,
                       num_heads * tq * (head_dim + 2) * 4)
    return pl.pallas_call(
        functools.partial(_flash_attn_kernel, num_heads=num_heads, head_dim=head_dim),
        grid_spec=pltpu.PrefetchScalarGridSpec(
            num_scalar_prefetch=4,
            grid=(S // tq, S // tkv),
            in_specs=[
                pl.BlockSpec((tq, D), lambda qi, ki, *_: (qi, 0)),
                pl.BlockSpec((tkv, D), lambda qi, ki, *_: (ki, 0)),
                pl.BlockSpec((tkv, D), lambda qi, ki, *_: (ki, 0)),
                pl.BlockSpec((tq, 1), lambda qi, ki, *_: (qi, 0)),
                pl.BlockSpec((1, tkv), lambda qi, ki, *_: (0, ki)),
            ],
            out_specs=pl.BlockSpec((tq, D), lambda qi, ki, *_: (qi, 0)),
            scratch_shapes=[
                pltpu.VMEM((num_heads, tq, 1), jnp.float32),
                pltpu.VMEM((num_heads, tq, 1), jnp.float32),
                pltpu.VMEM((num_heads, tq, head_dim), jnp.float32),
            ]),
        out_shape=jax.ShapeDtypeStruct((S, D), jnp.bfloat16),
        compiler_params=pltpu.CompilerParams(
            dimension_semantics=("parallel", "arbitrary"),
            vmem_limit_bytes=vmem),
    )(qseg_min, qseg_max, kseg_min, kseg_max, q, k, v, seg_col, seg_row)


# --------------------------------------------------------------------------
# parameters

CONFIG = dict(
    in_visual_dim=4, in_text_dim=32, time_dim=32, out_visual_dim=4,
    patch_size=(1, 2, 2), model_dim=32, ff_dim=64, num_blocks=2,
    axes_dims=(4, 6, 6),            # head_dim = 16 -> num_heads = model_dim // 16 = 2
)


def init_params(key, cfg):
    md, td, ffd = cfg["model_dim"], cfg["time_dim"], cfg["ff_dim"]
    hd = sum(cfg["axes_dims"])
    ps = cfg["patch_size"]
    keys = iter(jax.random.split(key, 1024))

    def w(shape, scale=0.02):
        return (scale * jax.random.normal(next(keys), shape, jnp.float32)).astype(jnp.bfloat16)

    zeros = lambda s: jnp.zeros(s, jnp.float32)
    ones = lambda s: jnp.ones(s, jnp.float32)
    patch_in = cfg["in_visual_dim"] * ps[0] * ps[1] * ps[2]
    patch_out = cfg["out_visual_dim"] * ps[0] * ps[1] * ps[2]

    def make_block():
        return {
            "visual_mod": {"w": w((td, 6 * md)), "b": zeros((6 * md,))},
            "text_mod": {"w": w((td, 6 * md)), "b": zeros((6 * md,))},
            "sa_norm_g": ones((md,)), "sa_norm_b": zeros((md,)),
            "attn": {"wq": w((md, md)), "wk": w((md, md)), "wv": w((md, md)),
                     "wo": w((md, md)),
                     "qn_g": ones((hd,)), "qn_b": zeros((hd,)),
                     "kn_g": ones((hd,)), "kn_b": zeros((hd,))},
            "ff_norm_g": ones((md,)), "ff_norm_b": zeros((md,)),
            "ff": {"w1": w((md, ffd)), "b1": zeros((ffd,)),
                   "w2": w((ffd, md)), "b2": zeros((md,))},
        }

    return {
        "time_emb": {"in_w": w((md, td)), "in_b": zeros((td,)),
                     "out_w": w((td, td)), "out_b": zeros((td,))},
        "text_emb": {"w": w((cfg["in_text_dim"], md)), "b": zeros((md,))},
        "visual_emb": {"w": w((patch_in, md)), "b": zeros((md,))},
        "blocks": [{"local": make_block(), "global": make_block()}
                   for _ in range(cfg["num_blocks"])],
        "out_layer": {"mod_w": w((td, 2 * md)), "mod_b": zeros((2 * md,)),
                      "out_w": w((md, patch_out)), "out_b": zeros((patch_out,))},
    }


# --------------------------------------------------------------------------
# host-side static preprocessing (rope tables, segment ids, per-tile ranges, padding)

def rope_3d(visual_shape, visual_cu, scale_factor, axes_dims, theta=10000.0):
    T, H, W = visual_shape
    cu = np.asarray(visual_cu)
    frame_local = np.zeros((T,), np.float32)
    for s in range(len(cu) - 1):
        frame_local[cu[s]:cu[s + 1]] = np.arange(cu[s + 1] - cu[s], dtype=np.float32)
    t_pos = np.repeat(frame_local, H * W)
    h_pos = np.tile(np.repeat(np.arange(H, dtype=np.float32), W), T)
    w_pos = np.tile(np.arange(W, dtype=np.float32), T * H)
    pos = [t_pos / scale_factor[0], h_pos / scale_factor[1], w_pos / scale_factor[2]]
    ang = []
    for ax, d in enumerate(axes_dims):
        freqs = 1.0 / (theta ** (np.arange(0, d, 2, dtype=np.float32) / d))
        ang.append(pos[ax][:, None] * freqs[None, :])
    ang = np.concatenate(ang, axis=-1)                 # [Nv, head_dim // 2]
    cos = np.concatenate([np.cos(ang)] * 2, axis=-1)   # rotate-half convention
    sin = np.concatenate([np.sin(ang)] * 2, axis=-1)
    return cos, sin


def precompute_static(cfg, latent_shape, visual_cu, text_cu, scale_factor):
    pt, ph, pw = cfg["patch_size"]
    T, H, W, _ = latent_shape
    tp, hp, wp = T // pt, H // ph, W // pw
    nv = tp * hp * wp
    nt = int(np.asarray(text_cu)[-1])
    s_tot = nv + nt

    # attention tiles (tq >= tkv, tkv divides tq); pad the packed stream ONCE to tq
    if s_tot >= 2048:
        tq, tkv = 256, 256
    elif s_tot >= 512:
        tq, tkv = 256, 128
    elif s_tot >= 256:
        tq, tkv = 128, 128
    else:
        tq = tkv = _round_up(s_tot, 16)
    s_pad = _round_up(s_tot, tq)

    dh = sum(cfg["axes_dims"])
    half = dh // 2
    bv = len(visual_cu) - 1
    bt = len(text_cu) - 1
    nbp = _round_up(bv + bt, 8)            # padded rows of the per-sample tables

    cos = np.ones((s_pad, dh), np.float32)       # text / pad rows: identity rotation
    sin = np.zeros((s_pad, dh), np.float32)
    cos_v, sin_v = rope_3d((tp, hp, wp), visual_cu, scale_factor, cfg["axes_dims"])
    cos[:nv], sin[:nv] = cos_v, sin_v
    sign = np.concatenate([-np.ones(half, np.float32), np.ones(half, np.float32)])
    sin_signed = sin * sign[None, :]             # rotate-half sign folded into the table

    cu_v, cu_t = np.asarray(visual_cu), np.asarray(text_cu)
    vis_sample = np.repeat(np.arange(bv, dtype=np.int32), np.diff(cu_v) * (hp * wp))
    txt_sample = np.repeat(np.arange(bt, dtype=np.int32), np.diff(cu_t))
    seg_attn = np.full((s_pad,), -1, np.int32)   # joint vis+text attention per sample
    seg_attn[:nv] = vis_sample
    seg_attn[nv:s_tot] = txt_sample
    seg_mod = np.full((s_pad,), -1, np.int32)    # rows into the [vis...,text...] mod table
    seg_mod[:nv] = vis_sample
    seg_mod[nv:s_tot] = bv + txt_sample

    # per-tile segment ranges for the flash-attention tile skip (conservative overlap test)
    qt = seg_attn.reshape(s_pad // tq, tq)
    kt = seg_attn.reshape(s_pad // tkv, tkv)

    return dict(
        nv=nv, nt=nt, s_tot=s_tot, s_pad=s_pad, tp=tp, hp=hp, wp=wp, bv=bv, bt=bt,
        nbp=nbp, tq=tq, tkv=tkv,
        cos=jnp.asarray(cos), sin_signed=jnp.asarray(sin_signed),
        seg_attn_col=jnp.asarray(seg_attn.reshape(s_pad, 1)),
        seg_attn_row=jnp.asarray(seg_attn.reshape(1, s_pad)),
        seg_mod=jnp.asarray(seg_mod.reshape(s_pad, 1)),
        qseg_min=jnp.asarray(qt.min(axis=1).astype(np.int32)),
        qseg_max=jnp.asarray(qt.max(axis=1).astype(np.int32)),
        kseg_min=jnp.asarray(kt.min(axis=1).astype(np.int32)),
        kseg_max=jnp.asarray(kt.max(axis=1).astype(np.int32)),
    )


# --------------------------------------------------------------------------
# forward pieces (tiny per-sample math stays in XLA; token-stream work is Pallas)

def _silu(x):
    return x * jax.nn.sigmoid(x)


def time_embeddings(p, time, model_dim):
    # batch-sized (a handful of rows): leave to XLA instead of under-filled MXU launches
    half = model_dim // 2
    freqs = jnp.exp(-math.log(10000.0) * jnp.arange(half, dtype=jnp.float32) / half)
    args = time.astype(jnp.float32)[:, None] * freqs[None, :]
    emb = jnp.concatenate([jnp.cos(args), jnp.sin(args)], axis=-1)
    h = _silu(emb @ p["in_w"].astype(jnp.float32) + p["in_b"])
    return h @ p["out_w"].astype(jnp.float32) + p["out_b"]


def visual_embeddings(p, x, patch_size):
    T, H, W, C = x.shape
    pt, ph, pw = patch_size
    xp = x.reshape(T // pt, pt, H // ph, ph, W // pw, pw, C)
    xp = xp.transpose(0, 2, 4, 1, 3, 5, 6).reshape(-1, pt * ph * pw * C)
    return fused_matmul(xp, [p["w"]], [p["b"]], out_dtype=jnp.bfloat16)


def _block_mod_tables(blk_p, te_silu, nbp):
    """Per-sample adaLN tables (tiny, XLA): rows = [visual samples..., text samples..., 0-pad].
    scale tables already include the +1.0 so pad rows (seg=-1 -> all-zero one-hot) map to 0."""
    def proj(mp_):
        return te_silu @ mp_["w"].astype(jnp.float32) + mp_["b"]
    v_attn, v_ff = jnp.split(proj(blk_p["visual_mod"]), 2, axis=-1)
    t_attn, t_ff = jnp.split(proj(blk_p["text_mod"]), 2, axis=-1)

    def tabs(vp, tp_):
        vs, vsc, vg = jnp.split(vp, 3, axis=-1)
        ts, tsc, tg = jnp.split(tp_, 3, axis=-1)
        pad = nbp - vs.shape[0] - ts.shape[0]
        z = jnp.zeros((pad, vs.shape[1]), jnp.float32)
        scale1 = jnp.concatenate([vsc + 1.0, tsc + 1.0, z], axis=0)
        shift = jnp.concatenate([vs, ts, z], axis=0)
        gate = jnp.concatenate([vg, tg, z], axis=0)
        return scale1, shift, gate

    return tabs(v_attn, t_attn), tabs(v_ff, t_ff)


def transformer_block(p, tokens, mod_tabs, static, cfg):
    dh = sum(cfg["axes_dims"])
    nh = cfg["model_dim"] // dh
    seg_mod = static["seg_mod"]
    attn_tabs, ff_tabs = mod_tabs

    a = p["attn"]
    # one-shot LN + adaLN modulate, then fused QKV projection (weights resident per N tile)
    xhat = modulate_ln(tokens, p["sa_norm_g"], p["sa_norm_b"],
                       attn_tabs[0], attn_tabs[1], seg_mod)
    q, k, v = fused_matmul(xhat, [a["wq"], a["wk"], a["wv"]], out_dtype=jnp.bfloat16)
    # one-shot per-head QK-LayerNorm + 3D RoPE (+ softmax scale folded into q)
    qh, kh = qk_rope_prep(q, k, static["cos"], static["sin_signed"],
                          a["qn_g"], a["qn_b"], a["kn_g"], a["kn_b"],
                          num_heads=nh, head_dim=dh)
    attn_out = flash_attention(qh, kh, v,
                               static["seg_attn_col"], static["seg_attn_row"],
                               static["qseg_min"], static["qseg_max"],
                               static["kseg_min"], static["kseg_max"],
                               num_heads=nh, head_dim=dh,
                               tq=static["tq"], tkv=static["tkv"])
    # output projection + residual + gate*y, fused
    # TODO(synk): token/residual stream kept in bf16 (reference carries fp32 activations).
    tokens = fused_matmul(attn_out, [a["wo"]],
                          epilogue=(tokens, attn_tabs[2], seg_mod),
                          out_dtype=jnp.bfloat16)

    # feed-forward: LN+modulate prep, W1 + GELU, then W2 + gate + residual
    xhat = modulate_ln(tokens, p["ff_norm_g"], p["ff_norm_b"],
                       ff_tabs[0], ff_tabs[1], seg_mod)
    h = fused_matmul(xhat, [p["ff"]["w1"]], [p["ff"]["b1"]],
                     activation="gelu", out_dtype=jnp.bfloat16)
    tokens = fused_matmul(h, [p["ff"]["w2"]], [p["ff"]["b2"]],
                          epilogue=(tokens, ff_tabs[2], seg_mod),
                          out_dtype=jnp.bfloat16)
    return tokens


def out_layer_forward(p, tokens, time_embed, static, cfg):
    d = cfg["model_dim"]
    pt, ph, pw = cfg["patch_size"]
    od = cfg["out_visual_dim"]

    mod = _silu(time_embed) @ p["mod_w"].astype(jnp.float32) + p["mod_b"]   # [B, 2D] (XLA)
    shift, scale = jnp.split(mod, 2, axis=-1)
    pad = static["nbp"] - shift.shape[0]
    z = jnp.zeros((pad, d), jnp.float32)
    scale1_tab = jnp.concatenate([scale + 1.0, z], axis=0)   # text/pad rows -> 0 (dropped)
    shift_tab = jnp.concatenate([shift, z], axis=0)

    xhat = modulate_ln(tokens, jnp.ones((d,), jnp.float32), jnp.zeros((d,), jnp.float32),
                       scale1_tab, shift_tab, static["seg_mod"])
    out = fused_matmul(xhat, [p["out_w"]], [p["out_b"]], out_dtype=jnp.float32)
    out = out[:static["nv"]]                                  # drop text + pad rows
    tp, hp, wp = static["tp"], static["hp"], static["wp"]
    out = out.reshape(tp, hp, wp, pt, ph, pw, od).transpose(0, 3, 1, 4, 2, 5, 6)
    return out.reshape(tp * pt, hp * ph, wp * pw, od)


def diffusion_transformer_3d(params, cfg, static, x, text_in, time):
    # TODO(synk): local-attention grouping (num_groups != (1,1,1)) not implemented;
    # with num_groups=(1,1,1) 'local' and 'global' coincide (full per-sample attention).
    d = cfg["model_dim"]
    time_embed = time_embeddings(params["time_emb"], time, d)
    te_silu = _silu(time_embed)
    txt = fused_matmul(text_in, [params["text_emb"]["w"]], [params["text_emb"]["b"]],
                       out_dtype=jnp.bfloat16)
    vis = visual_embeddings(params["visual_emb"], x, cfg["patch_size"])

    pad = static["s_pad"] - static["s_tot"]
    parts = [vis, txt]
    if pad:
        parts.append(jnp.zeros((pad, d), jnp.bfloat16))
    tokens = jnp.concatenate(parts, axis=0)          # packed token stream, padded once

    for blk in params["blocks"]:
        for sub in ("local", "global"):
            mod_tabs = _block_mod_tables(blk[sub], te_silu, static["nbp"])
            tokens = transformer_block(blk[sub], tokens, mod_tabs, static, cfg)

    return out_layer_forward(params["out_layer"], tokens, time_embed, static, cfg)


# --------------------------------------------------------------------------
# demo

if __name__ == "__main__":
    cfg = CONFIG
    key = jax.random.PRNGKey(0)
    pkey, xkey, tkey = jax.random.split(key, 3)
    params = init_params(pkey, cfg)

    duration, height, width = 4, 8, 8     # pre-patch latent (patch (1,2,2) -> 4x4x4 tokens)
    text_len = 8
    x = jax.random.normal(xkey, (duration, height, width, cfg["in_visual_dim"]), jnp.float32)
    text = jax.random.normal(tkey, (text_len, cfg["in_text_dim"]), jnp.float32)
    time = jnp.array([100.0, 700.0], jnp.float32)                 # batch = 2 samples
    visual_cu_seqlens = np.array([0, 2, 4], np.int32)             # frames per sample
    text_cu_seqlens = np.array([0, 4, 8], np.int32)               # text tokens per sample

    static = precompute_static(cfg, x.shape, visual_cu_seqlens, text_cu_seqlens,
                               scale_factor=(1.0, 1.0, 1.0))

    def _forward(p, xx, tt, tm):
        return diffusion_transformer_3d(p, cfg, static, xx, tt, tm)

    fwd = jax.jit(_forward)
    out = jax.block_until_ready(fwd(params, x, text, time))

    assert out.shape == (duration, height, width, cfg["out_visual_dim"])
    assert bool(jnp.all(jnp.isfinite(out)))
    print("KERNEL_OK")
</pallas_src>

<mosaic_0001>
module attributes {stable_mosaic.version = 11 : i64} {
  func.func @_mm_kernel(%arg0: i32, %arg1: i32, %arg2: memref<64x16xbf16, #tpu.memory_space<vmem>>, %arg3: memref<16x32xbf16, #tpu.memory_space<vmem>>, %arg4: memref<1x32xf32, #tpu.memory_space<vmem>>, %arg5: memref<64x32xbf16, #tpu.memory_space<vmem>>) attributes {dimension_semantics = [#tpu.dimension_semantics<parallel>, #tpu.dimension_semantics<parallel>], iteration_bounds = array<i64: 1, 1>, scalar_prefetch = 0 : i64, scratch_operands = 0 : i64, tpu.core_type = #tpu.core_type<tc>, window_params = [{transform_indices = @transform_0, window_bounds = array<i64: 64, 16>}, {transform_indices = @transform_1, window_bounds = array<i64: 16, 32>}, {transform_indices = @transform_2, window_bounds = array<i64: 1, 32>}, {transform_indices = @transform_3, window_bounds = array<i64: 64, 32>}]} {
    %c0 = arith.constant 0 : index
    %c0_0 = arith.constant 0 : index
    %0 = vector.load %arg2[%c0, %c0_0] : memref<64x16xbf16, #tpu.memory_space<vmem>>, vector<64x16xbf16>
    %c0_1 = arith.constant 0 : index
    %c0_2 = arith.constant 0 : index
    %1 = vector.load %arg3[%c0_1, %c0_2] : memref<16x32xbf16, #tpu.memory_space<vmem>>, vector<16x32xbf16>
    %cst = arith.constant dense<0.000000e+00> : vector<64x32xf32>
    %2 = tpu.matmul %0, %1, %cst {dimension_numbers = #tpu.dot_dimension_numbers<[1], [0], [0], [1], [0, 0, 1, 1], [], []>} : vector<64x16xbf16>, vector<16x32xbf16>, vector<64x32xf32> -> vector<64x32xf32>
    %c0_3 = arith.constant 0 : index
    %c0_4 = arith.constant 0 : index
    %3 = vector.load %arg4[%c0_3, %c0_4] : memref<1x32xf32, #tpu.memory_space<vmem>>, vector<1x32xf32>
    %4 = vector.broadcast %3 : vector<1x32xf32> to vector<64x32xf32>
    %5 = arith.addf %2, %4 : vector<64x32xf32>
    %6 = arith.truncf %5 : vector<64x32xf32> to vector<64x32xbf16>
    %c0_5 = arith.constant 0 : index
    %c0_6 = arith.constant 0 : index
    %7 = vector.load %arg5[%c0_5, %c0_6] : memref<64x32xbf16, #tpu.memory_space<vmem>>, vector<64x32xbf16>
    tpu.vector_store %arg5[%c0_5, %c0_6], %6 {strides = array<i32>} : memref<64x32xbf16, #tpu.memory_space<vmem>>, vector<64x32xbf16>,
    return
  }
  func.func @transform_0(%arg0: i32, %arg1: i32) -> (i32, i32) {
    %c0_i32 = arith.constant 0 : i32
    %c0_i32_0 = arith.constant 0 : i32
    return %arg1, %c0_i32 : i32, i32
  }
  func.func @transform_1(%arg0: i32, %arg1: i32) -> (i32, i32) {
    %c0_i32 = arith.constant 0 : i32
    %c0_i32_0 = arith.constant 0 : i32
    return %c0_i32, %arg0 : i32, i32
  }
  func.func @transform_2(%arg0: i32, %arg1: i32) -> (i32, i32) {
    %c0_i32 = arith.constant 0 : i32
    %c0_i32_0 = arith.constant 0 : i32
    return %c0_i32, %arg0 : i32, i32
  }
  func.func @transform_3(%arg0: i32, %arg1: i32) -> (i32, i32) {
    %c0_i32 = arith.constant 0 : i32
    return %arg1, %arg0 : i32, i32
  }
}

module attributes {stable_mosaic.version = 11 : i64} {
  func.func @_mm_kernel(%arg0: i32, %arg1: i32, %arg2: memref<16x32xbf16, #tpu.memory_space<vmem>>, %arg3: memref<32x32xbf16, #tpu.memory_space<vmem>>, %arg4: memref<1x32xf32, #tpu.memory_space<vmem>>, %arg5: memref<16x32xbf16, #tpu.memory_space<vmem>>) attributes {dimension_semantics = [#tpu.dimension_semantics<parallel>, #tpu.dimension_semantics<parallel>], iteration_bounds = array<i64: 1, 1>, scalar_prefetch = 0 : i64, scratch_operands = 0 : i64, tpu.core_type = #tpu.core_type<tc>, window_params = [{transform_indices = @transform_0, window_bounds = array<i64: 16, 32>}, {transform_indices = @transform_1, window_bounds = array<i64: 32, 32>}, {transform_indices = @transform_2, window_bounds = array<i64: 1, 32>}, {transform_indices = @transform_3, window_bounds = array<i64: 16, 32>}]} {
    %c0 = arith.constant 0 : index
    %c0_0 = arith.constant 0 : index
    %0 = vector.load %arg2[%c0, %c0_0] : memref<16x32xbf16, #tpu.memory_space<vmem>>, vector<16x32xbf16>
    %c0_1 = arith.constant 0 : index
    %c0_2 = arith.constant 0 : index
    %1 = vector.load %arg3[%c0_1, %c0_2] : memref<32x32xbf16, #tpu.memory_space<vmem>>, vector<32x32xbf16>
    %cst = arith.constant dense<0.000000e+00> : vector<16x32xf32>
    %2 = tpu.matmul %0, %1, %cst {dimension_numbers = #tpu.dot_dimension_numbers<[1], [0], [0], [1], [0, 0, 1, 1], [], []>} : vector<16x32xbf16>, vector<32x32xbf16>, vector<16x32xf32> -> vector<16x32xf32>
    %c0_3 = arith.constant 0 : index
    %c0_4 = arith.constant 0 : index
    %3 = vector.load %arg4[%c0_3, %c0_4] : memref<1x32xf32, #tpu.memory_space<vmem>>, vector<1x32xf32>
    %4 = vector.broadcast %3 : vector<1x32xf32> to vector<16x32xf32>
    %5 = arith.addf %2, %4 : vector<16x32xf32>
    %6 = arith.truncf %5 : vector<16x32xf32> to vector<16x32xbf16>
    %c0_5 = arith.constant 0 : index
    %c0_6 = arith.constant 0 : index
    %7 = vector.load %arg5[%c0_5, %c0_6] : memref<16x32xbf16, #tpu.memory_space<vmem>>, vector<16x32xbf16>
    tpu.vector_store %arg5[%c0_5, %c0_6], %6 {strides = array<i32>} : memref<16x32xbf16, #tpu.memory_space<vmem>>, vector<16x32xbf16>,
    return
  }
  func.func @transform_0(%arg0: i32, %arg1: i32) -> (i32, i32) {
    %c0_i32 = arith.constant 0 : i32
    %c0_i32_0 = arith.constant 0 : i32
    return %arg1, %c0_i32 : i32, i32
  }
  func.func @transform_1(%arg0: i32, %arg1: i32) -> (i32, i32) {
    %c0_i32 = arith.constant 0 : i32
    %c0_i32_0 = arith.constant 0 : i32
    return %c0_i32, %arg0 : i32, i32
  }
  func.func @transform_2(%arg0: i32, %arg1: i32) -> (i32, i32) {
    %c0_i32 = arith.constant 0 : i32
    %c0_i32_0 = arith.constant 0 : i32
    return %c0_i32, %arg0 : i32, i32
  }
  func.func @transform_3(%arg0: i32, %arg1: i32) -> (i32, i32) {
    %c0_i32 = arith.constant 0 : i32
    return %arg1, %arg0 : i32, i32
  }
}

module attributes {stable_mosaic.version = 11 : i64} {
  func.func @_modulate_kernel(%arg0: i32, %arg1: memref<80x32xbf16, #tpu.memory_space<vmem>>, %arg2: memref<80x1xi32, #tpu.memory_space<vmem>>, %arg3: memref<1x32xf32, #tpu.memory_space<vmem>>, %arg4: memref<1x32xf32, #tpu.memory_space<vmem>>, %arg5: memref<8x32xf32, #tpu.memory_space<vmem>>, %arg6: memref<8x32xf32, #tpu.memory_space<vmem>>, %arg7: memref<80x32xbf16, #tpu.memory_space<vmem>>) attributes {dimension_semantics = [#tpu.dimension_semantics<parallel>], iteration_bounds = array<i64: 1>, scalar_prefetch = 0 : i64, scratch_operands = 0 : i64, tpu.core_type = #tpu.core_type<tc>, window_params = [{transform_indices = @transform_0, window_bounds = array<i64: 80, 32>}, {transform_indices = @transform_1, window_bounds = array<i64: 80, 1>}, {pipeline_mode = #tpu.pipeline_mode<synchronous>, transform_indices = @transform_2, window_bounds = array<i64: 1, 32>}, {pipeline_mode = #tpu.pipeline_mode<synchronous>, transform_indices = @transform_3, window_bounds = array<i64: 1, 32>}, {pipeline_mode = #tpu.pipeline_mode<synchronous>, transform_indices = @transform_4, window_bounds = array<i64: 8, 32>}, {pipeline_mode = #tpu.pipeline_mode<synchronous>, transform_indices = @transform_5, window_bounds = array<i64: 8, 32>}, {transform_indices = @transform_6, window_bounds = array<i64: 80, 32>}]} {
    %c0 = arith.constant 0 : index
    %c0_0 = arith.constant 0 : index
    %0 = vector.load %arg1[%c0, %c0_0] : memref<80x32xbf16, #tpu.memory_space<vmem>>, vector<80x32xbf16>
    %1 = arith.extf %0 : vector<80x32xbf16> to vector<80x32xf32>
    %cst = arith.constant dense<0.000000e+00> : vector<80xf32>
    %2 = vector.multi_reduction <add>, %1, %cst [1] : vector<80x32xf32> to vector<80xf32>
    %3 = vector.shape_cast %2 : vector<80xf32> to vector<80x1xf32>
    %cst_1 = arith.constant 3.200000e+01 : f32
    %4 = vector.broadcast %cst_1 : f32 to vector<80x1xf32>
    %5 = arith.divf %3, %4 : vector<80x1xf32>
    %6 = vector.broadcast %5 : vector<80x1xf32> to vector<80x32xf32>
    %7 = arith.subf %1, %6 : vector<80x32xf32>
    %8 = arith.mulf %7, %7 : vector<80x32xf32>
    %cst_2 = arith.constant dense<0.000000e+00> : vector<80xf32>
    %9 = vector.multi_reduction <add>, %8, %cst_2 [1] : vector<80x32xf32> to vector<80xf32>
    %10 = vector.shape_cast %9 : vector<80xf32> to vector<80x1xf32>
    %cst_3 = arith.constant 3.200000e+01 : f32
    %11 = vector.broadcast %cst_3 : f32 to vector<80x1xf32>
    %12 = arith.divf %10, %11 : vector<80x1xf32>
    %13 = vector.broadcast %5 : vector<80x1xf32> to vector<80x32xf32>
    %14 = arith.subf %1, %13 : vector<80x32xf32>
    %cst_4 = arith.constant 9.99999974E-6 : f32
    %15 = vector.broadcast %cst_4 : f32 to vector<80x1xf32>
    %16 = arith.addf %12, %15 : vector<80x1xf32>
    %17 = math.rsqrt %16 : vector<80x1xf32>
    %18 = vector.broadcast %17 : vector<80x1xf32> to vector<80x32xf32>
    %19 = arith.mulf %14, %18 : vector<80x32xf32>
    %c0_5 = arith.constant 0 : index
    %c0_6 = arith.constant 0 : index
    %20 = vector.load %arg3[%c0_5, %c0_6] : memref<1x32xf32, #tpu.memory_space<vmem>>, vector<1x32xf32>
    %21 = vector.broadcast %20 : vector<1x32xf32> to vector<80x32xf32>
    %22 = arith.mulf %19, %21 : vector<80x32xf32>
    %c0_7 = arith.constant 0 : index
    %c0_8 = arith.constant 0 : index
    %23 = vector.load %arg4[%c0_7, %c0_8] : memref<1x32xf32, #tpu.memory_space<vmem>>, vector<1x32xf32>
    %24 = vector.broadcast %23 : vector<1x32xf32> to vector<80x32xf32>
    %25 = arith.addf %22, %24 : vector<80x32xf32>
    %c0_9 = arith.constant 0 : index
    %c0_10 = arith.constant 0 : index
    %26 = vector.load %arg2[%c0_9, %c0_10] : memref<80x1xi32, #tpu.memory_space<vmem>>, vector<80x1xi32>
    %27 = tpu.iota {dimensions = array<i32: 1>} : vector<80x8xi32>
    %28 = vector.broadcast %26 : vector<80x1xi32> to vector<80x8xi32>
    %29 = arith.cmpi eq, %28, %27 : vector<80x8xi32>
    %30 = arith.extui %29 : vector<80x8xi1> to vector<80x8xi32>
    %31 = arith.sitofp %30 : vector<80x8xi32> to vector<80x8xf32>
    %c0_11 = arith.constant 0 : index
    %c0_12 = arith.constant 0 : index
    %32 = vector.load %arg5[%c0_11, %c0_12] : memref<8x32xf32, #tpu.memory_space<vmem>>, vector<8x32xf32>
    %cst_13 = arith.constant dense<0.000000e+00> : vector<80x32xf32>
    %33 = tpu.matmul %31, %32, %cst_13 {dimension_numbers = #tpu.dot_dimension_numbers<[1], [0], [0], [1], [0, 0, 1, 1], [], []>} : vector<80x8xf32>, vector<8x32xf32>, vector<80x32xf32> -> vector<80x32xf32>
    %c0_14 = arith.constant 0 : index
    %c0_15 = arith.constant 0 : index
    %34 = vector.load %arg6[%c0_14, %c0_15] : memref<8x32xf32, #tpu.memory_space<vmem>>, vector<8x32xf32>
    %cst_16 = arith.constant dense<0.000000e+00> : vector<80x32xf32>
    %35 = tpu.matmul %31, %34, %cst_16 {dimension_numbers = #tpu.dot_dimension_numbers<[1], [0], [0], [1], [0, 0, 1, 1], [], []>} : vector<80x8xf32>, vector<8x32xf32>, vector<80x32xf32> -> vector<80x32xf32>
    %36 = arith.mulf %25, %33 : vector<80x32xf32>
    %37 = arith.addf %36, %35 : vector<80x32xf32>
    %38 = arith.truncf %37 : vector<80x32xf32> to vector<80x32xbf16>
    %c0_17 = arith.constant 0 : index
    %c0_18 = arith.constant 0 : index
    %39 = vector.load %arg7[%c0_17, %c0_18] : memref<80x32xbf16, #tpu.memory_space<vmem>>, vector<80x32xbf16>
    tpu.vector_store %arg7[%c0_17, %c0_18], %38 {strides = array<i32>} : memref<80x32xbf16, #tpu.memory_space<vmem>>, vector<80x32xbf16>,
    return
  }
  func.func @transform_0(%arg0: i32) -> (i32, i32) {
    %c0_i32 = arith.constant 0 : i32
    %c0_i32_0 = arith.constant 0 : i32
    return %arg0, %c0_i32 : i32, i32
  }
  func.func @transform_1(%arg0: i32) -> (i32, i32) {
    %c0_i32 = arith.constant 0 : i32
    %c0_i32_0 = arith.constant 0 : i32
    return %arg0, %c0_i32 : i32, i32
  }
  func.func @transform_2(%arg0: i32) -> (i32, i32) {
    %c0_i32 = arith.constant 0 : i32
    %c0_i32_0 = arith.constant 0 : i32
    %c0_i32_1 = arith.constant 0 : i32
    return %c0_i32, %c0_i32_0 : i32, i32
  }
  func.func @transform_3(%arg0: i32) -> (i32, i32) {
    %c0_i32 = arith.constant 0 : i32
    %c0_i32_0 = arith.constant 0 : i32
    %c0_i32_1 = arith.constant 0 : i32
    return %c0_i32, %c0_i32_0 : i32, i32
  }
  func.func @transform_4(%arg0: i32) -> (i32, i32) {
    %c0_i32 = arith.constant 0 : i32
    %c0_i32_0 = arith.constant 0 : i32
    %c0_i32_1 = arith.constant 0 : i32
    return %c0_i32, %c0_i32_0 : i32, i32
  }
  func.func @transform_5(%arg0: i32) -> (i32, i32) {
    %c0_i32 = arith.constant 0 : i32
    %c0_i32_0 = arith.constant 0 : i32
    %c0_i32_1 = arith.constant 0 : i32
    return %c0_i32, %c0_i32_0 : i32, i32
  }
  func.func @transform_6(%arg0: i32) -> (i32, i32) {
    %c0_i32 = arith.constant 0 : i32
    %c0_i32_0 = arith.constant 0 : i32
    return %arg0, %c0_i32 : i32, i32
  }
}

module attributes {stable_mosaic.version = 11 : i64} {
  func.func @_flash_attn_kernel(%arg0: i32, %arg1: i32, %arg2: memref<1xi32, #tpu.memory_space<smem>>, %arg3: memref<1xi32, #tpu.memory_space<smem>>, %arg4: memref<1xi32, #tpu.memory_space<smem>>, %arg5: memref<1xi32, #tpu.memory_space<smem>>, %arg6: memref<80x32xbf16, #tpu.memory_space<vmem>>, %arg7: memref<80x32xbf16, #tpu.memory_space<vmem>>, %arg8: memref<80x32xbf16, #tpu.memory_space<vmem>>, %arg9: memref<80x1xi32, #tpu.memory_space<vmem>>, %arg10: memref<1x80xi32, #tpu.memory_space<vmem>>, %arg11: memref<80x32xbf16, #tpu.memory_space<vmem>>, %arg12: memref<2x80x1xf32, #tpu.memory_space<vmem>>, %arg13: memref<2x80x1xf32, #tpu.memory_space<vmem>>, %arg14: memref<2x80x16xf32, #tpu.memory_space<vmem>>) attributes {dimension_semantics = [#tpu.dimension_semantics<parallel>, #tpu.dimension_semantics<arbitrary>], iteration_bounds = array<i64: 1, 1>, scalar_prefetch = 4 : i64, scratch_operands = 3 : i64, tpu.core_type = #tpu.core_type<tc>, window_params = [{transform_indices = @transform_0, window_bounds = array<i64: 80, 32>}, {transform_indices = @transform_1, window_bounds = array<i64: 80, 32>}, {transform_indices = @transform_2, window_bounds = array<i64: 80, 32>}, {transform_indices = @transform_3, window_bounds = array<i64: 80, 1>}, {transform_indices = @transform_4, window_bounds = array<i64: 1, 80>}, {transform_indices = @transform_5, window_bounds = array<i64: 80, 32>}]} {
    %c0_i32 = arith.constant 0 : i32
    %0 = arith.cmpi eq, %arg1, %c0_i32 : i32
    %1 = arith.extui %0 : i1 to i32
    %c0_i32_0 = arith.constant 0 : i32
    %2 = arith.cmpi ne, %1, %c0_i32_0 : i32
    scf.if %2 {
      %cst = arith.constant 0xFF800000 : f32
      %23 = vector.broadcast %cst : f32 to vector<2x80x1xf32>
      %c0 = arith.constant 0 : index
      %c0_5 = arith.constant 0 : index
      %c0_6 = arith.constant 0 : index
      %24 = vector.load %arg12[%c0, %c0_5, %c0_6] : memref<2x80x1xf32, #tpu.memory_space<vmem>>, vector<2x80x1xf32>
      tpu.vector_store %arg12[%c0, %c0_5, %c0_6], %23 {strides = array<i32>} : memref<2x80x1xf32, #tpu.memory_space<vmem>>, vector<2x80x1xf32>,
      %cst_7 = arith.constant 0.000000e+00 : f32
      %25 = vector.broadcast %cst_7 : f32 to vector<2x80x1xf32>
      %c0_8 = arith.constant 0 : index
      %c0_9 = arith.constant 0 : index
      %c0_10 = arith.constant 0 : index
      %26 = vector.load %arg13[%c0_8, %c0_9, %c0_10] : memref<2x80x1xf32, #tpu.memory_space<vmem>>, vector<2x80x1xf32>
      tpu.vector_store %arg13[%c0_8, %c0_9, %c0_10], %25 {strides = array<i32>} : memref<2x80x1xf32, #tpu.memory_space<vmem>>, vector<2x80x1xf32>,
      %cst_11 = arith.constant 0.000000e+00 : f32
      %27 = vector.broadcast %cst_11 : f32 to vector<2x80x16xf32>
      %c0_12 = arith.constant 0 : index
      %c0_13 = arith.constant 0 : index
      %c0_14 = arith.constant 0 : index
      %28 = vector.load %arg14[%c0_12, %c0_13, %c0_14] : memref<2x80x16xf32, #tpu.memory_space<vmem>>, vector<2x80x16xf32>
      tpu.vector_store %arg14[%c0_12, %c0_13, %c0_14], %27 {strides = array<i32>} : memref<2x80x16xf32, #tpu.memory_space<vmem>>, vector<2x80x16xf32>,
    } else {
    }
    %3 = arith.index_cast %arg0 : i32 to index
    %4 = memref.load %arg2[%3] : memref<1xi32, #tpu.memory_space<smem>>
    %5 = arith.index_cast %arg1 : i32 to index
    %6 = memref.load %arg5[%5] : memref<1xi32, #tpu.memory_space<smem>>
    %7 = arith.cmpi sle, %4, %6 : i32
    %8 = arith.index_cast %arg1 : i32 to index
    %9 = memref.load %arg4[%8] : memref<1xi32, #tpu.memory_space<smem>>
    %10 = arith.index_cast %arg0 : i32 to index
    %11 = memref.load %arg3[%10] : memref<1xi32, #tpu.memory_space<smem>>
    %12 = arith.cmpi sle, %9, %11 : i32
    %13 = arith.andi %7, %12 : i1
    %14 = arith.index_cast %arg1 : i32 to index
    %15 = memref.load %arg5[%14] : memref<1xi32, #tpu.memory_space<smem>>
    %c0_i32_1 = arith.constant 0 : i32
    %16 = arith.cmpi sge, %15, %c0_i32_1 : i32
    %17 = arith.andi %13, %16 : i1
    %18 = arith.extui %17 : i1 to i32
    %c0_i32_2 = arith.constant 0 : i32
    %19 = arith.cmpi ne, %18, %c0_i32_2 : i32
    scf.if %19 {
      %c0 = arith.constant 0 : index
      %c0_5 = arith.constant 0 : index
      %23 = vector.load %arg6[%c0, %c0_5] : memref<80x32xbf16, #tpu.memory_space<vmem>>, vector<80x32xbf16>
      %24 = vector.shape_cast %23 : vector<80x32xbf16> to vector<80x2x16xbf16>
      %c0_6 = arith.constant 0 : index
      %c0_7 = arith.constant 0 : index
      %25 = vector.load %arg7[%c0_6, %c0_7] : memref<80x32xbf16, #tpu.memory_space<vmem>>, vector<80x32xbf16>
      %26 = vector.shape_cast %25 : vector<80x32xbf16> to vector<80x2x16xbf16>
      %c0_8 = arith.constant 0 : index
      %c0_9 = arith.constant 0 : index
      %27 = vector.load %arg8[%c0_8, %c0_9] : memref<80x32xbf16, #tpu.memory_space<vmem>>, vector<80x32xbf16>
      %28 = vector.shape_cast %27 : vector<80x32xbf16> to vector<80x2x16xbf16>
      "tpu.trace_start"() <{level = 10 : i32, message = "qhd,khd->hqk"}> : () -> ()
      %cst = arith.constant dense<0.000000e+00> : vector<2x80x80xf32>
      %29 = tpu.matmul %24, %26, %cst {dimension_numbers = #tpu.dot_dimension_numbers<[2], [2], [0], [0], [0, 1, 0, 0, 1, 0], [1], [1]>} : vector<80x2x16xbf16>, vector<80x2x16xbf16>, vector<2x80x80xf32> -> vector<2x80x80xf32>
      "tpu.trace_stop"() : () -> ()
      %c0_10 = arith.constant 0 : index
      %c0_11 = arith.constant 0 : index
      %30 = vector.load %arg9[%c0_10, %c0_11] : memref<80x1xi32, #tpu.memory_space<vmem>>, vector<80x1xi32>
      %c0_12 = arith.constant 0 : index
      %c0_13 = arith.constant 0 : index
      %31 = vector.load %arg10[%c0_12, %c0_13] : memref<1x80xi32, #tpu.memory_space<vmem>>, vector<1x80xi32>
      %32 = vector.broadcast %30 : vector<80x1xi32> to vector<80x80xi32>
      %33 = vector.broadcast %31 : vector<1x80xi32> to vector<80x80xi32>
      %34 = arith.cmpi eq, %32, %33 : vector<80x80xi32>
      %35 = vector.shape_cast %34 : vector<80x80xi1> to vector<1x80x80xi1>
      %cst_14 = arith.constant -1.000000e+30 : f32
      %36 = vector.shape_cast %35 : vector<1x80x80xi1> to vector<1x80x80xi1>
      %37 = vector.broadcast %36 : vector<1x80x80xi1> to vector<2x80x80xi1>
      %38 = vector.broadcast %cst_14 : f32 to vector<2x80x80xf32>
      %39 = arith.select %37, %29, %38 : vector<2x80x80xi1>, vector<2x80x80xf32>
      %c0_15 = arith.constant 0 : index
      %c0_16 = arith.constant 0 : index
      %c0_17 = arith.constant 0 : index
      %40 = vector.load %arg12[%c0_15, %c0_16, %c0_17] : memref<2x80x1xf32, #tpu.memory_space<vmem>>, vector<2x80x1xf32>
      %cst_18 = arith.constant dense<0xFF800000> : vector<2x80xf32>
      %41 = vector.multi_reduction <maximumf>, %39, %cst_18 [2] : vector<2x80x80xf32> to vector<2x80xf32>
      %42 = vector.shape_cast %41 : vector<2x80xf32> to vector<2x80x1xf32>
      %43 = arith.maximumf %40, %42 : vector<2x80x1xf32>
      %44 = arith.subf %40, %43 : vector<2x80x1xf32>
      %45 = math.exp %44 : vector<2x80x1xf32>
      %46 = vector.broadcast %43 : vector<2x80x1xf32> to vector<2x80x80xf32>
      %47 = arith.subf %39, %46 : vector<2x80x80xf32>
      %48 = math.exp %47 : vector<2x80x80xf32>
      %cst_19 = arith.constant 0.000000e+00 : f32
      %49 = vector.shape_cast %35 : vector<1x80x80xi1> to vector<1x80x80xi1>
      %50 = vector.broadcast %49 : vector<1x80x80xi1> to vector<2x80x80xi1>
      %51 = vector.broadcast %cst_19 : f32 to vector<2x80x80xf32>
      %52 = arith.select %50, %48, %51 : vector<2x80x80xi1>, vector<2x80x80xf32>
      %c0_20 = arith.constant 0 : index
      %c0_21 = arith.constant 0 : index
      %c0_22 = arith.constant 0 : index
      %53 = vector.load %arg13[%c0_20, %c0_21, %c0_22] : memref<2x80x1xf32, #tpu.memory_space<vmem>>, vector<2x80x1xf32>
      %54 = arith.mulf %45, %53 : vector<2x80x1xf32>
      %cst_23 = arith.constant dense<0.000000e+00> : vector<2x80xf32>
      %55 = vector.multi_reduction <add>, %52, %cst_23 [2] : vector<2x80x80xf32> to vector<2x80xf32>
      %56 = vector.shape_cast %55 : vector<2x80xf32> to vector<2x80x1xf32>
      %57 = arith.addf %54, %56 : vector<2x80x1xf32>
      %c0_24 = arith.constant 0 : index
      %c0_25 = arith.constant 0 : index
      %c0_26 = arith.constant 0 : index
      %58 = vector.load %arg13[%c0_24, %c0_25, %c0_26] : memref<2x80x1xf32, #tpu.memory_space<vmem>>, vector<2x80x1xf32>
      tpu.vector_store %arg13[%c0_24, %c0_25, %c0_26], %57 {strides = array<i32>} : memref<2x80x1xf32, #tpu.memory_space<vmem>>, vector<2x80x1xf32>,
      %c0_27 = arith.constant 0 : index
      %c0_28 = arith.constant 0 : index
      %c0_29 = arith.constant 0 : index
      %59 = vector.load %arg14[%c0_27, %c0_28, %c0_29] : memref<2x80x16xf32, #tpu.memory_space<vmem>>, vector<2x80x16xf32>
      %60 = vector.broadcast %45 : vector<2x80x1xf32> to vector<2x80x16xf32>
      %61 = arith.mulf %60, %59 : vector<2x80x16xf32>
      %62 = arith.truncf %52 : vector<2x80x80xf32> to vector<2x80x80xbf16>
      "tpu.trace_start"() <{level = 10 : i32, message = "hqk,khd->hqd"}> : () -> ()
      %cst_30 = arith.constant dense<0.000000e+00> : vector<2x80x16xf32>
      %63 = tpu.matmul %62, %28, %cst_30 {dimension_numbers = #tpu.dot_dimension_numbers<[2], [0], [1], [2], [0, 0, 0, 1, 1, 2], [0], [1]>} : vector<2x80x80xbf16>, vector<80x2x16xbf16>, vector<2x80x16xf32> -> vector<2x80x16xf32>
      "tpu.trace_stop"() : () -> ()
      %64 = arith.addf %61, %63 : vector<2x80x16xf32>
      %c0_31 = arith.constant 0 : index
      %c0_32 = arith.constant 0 : index
      %c0_33 = arith.constant 0 : index
      %65 = vector.load %arg14[%c0_31, %c0_32, %c0_33] : memref<2x80x16xf32, #tpu.memory_space<vmem>>, vector<2x80x16xf32>
      tpu.vector_store %arg14[%c0_31, %c0_32, %c0_33], %64 {strides = array<i32>} : memref<2x80x16xf32, #tpu.memory_space<vmem>>, vector<2x80x16xf32>,
      %c0_34 = arith.constant 0 : index
      %c0_35 = arith.constant 0 : index
      %c0_36 = arith.constant 0 : index
      %66 = vector.load %arg12[%c0_34, %c0_35, %c0_36] : memref<2x80x1xf32, #tpu.memory_space<vmem>>, vector<2x80x1xf32>
      tpu.vector_store %arg12[%c0_34, %c0_35, %c0_36], %43 {strides = array<i32>} : memref<2x80x1xf32, #tpu.memory_space<vmem>>, vector<2x80x1xf32>,
    } else {
    }
    %c0_i32_3 = arith.constant 0 : i32
    %20 = arith.cmpi eq, %arg1, %c0_i32_3 : i32
    %21 = arith.extui %20 : i1 to i32
    %c0_i32_4 = arith.constant 0 : i32
    %22 = arith.cmpi ne, %21, %c0_i32_4 : i32
    scf.if %22 {
      %c0 = arith.constant 0 : index
      %c0_5 = arith.constant 0 : index
      %c0_6 = arith.constant 0 : index
      %23 = vector.load %arg13[%c0, %c0_5, %c0_6] : memref<2x80x1xf32, #tpu.memory_space<vmem>>, vector<2x80x1xf32>
      %cst = arith.constant 0.000000e+00 : f32
      %24 = vector.broadcast %cst : f32 to vector<2x80x1xf32>
      %25 = arith.cmpf oeq, %23, %24 : vector<2x80x1xf32>
      %cst_7 = arith.constant 1.000000e+00 : f32
      %26 = vector.broadcast %cst_7 : f32 to vector<2x80x1xf32>
      %27 = arith.select %25, %26, %23 : vector<2x80x1xi1>, vector<2x80x1xf32>
      %28 = tpu.reciprocal %27 {approx = true} : vector<2x80x1xf32> -> vector<2x80x1xf32>
      %c0_8 = arith.constant 0 : index
      %c0_9 = arith.constant 0 : index
      %c0_10 = arith.constant 0 : index
      %29 = vector.load %arg14[%c0_8, %c0_9, %c0_10] : memref<2x80x16xf32, #tpu.memory_space<vmem>>, vector<2x80x16xf32>
      %30 = vector.broadcast %28 : vector<2x80x1xf32> to vector<2x80x16xf32>
      %31 = arith.mulf %29, %30 : vector<2x80x16xf32>
      %32 = vector.extract_strided_slice %31 {offsets = [0, 0, 0], sizes = [1, 80, 16], strides = [1, 1, 1]} : vector<2x80x16xf32> to vector<1x80x16xf32>
      %33 = vector.shape_cast %32 : vector<1x80x16xf32> to vector<80x16xf32>
      %34 = vector.extract_strided_slice %31 {offsets = [1, 0, 0], sizes = [1, 80, 16], strides = [1, 1, 1]} : vector<2x80x16xf32> to vector<1x80x16xf32>
      %35 = vector.shape_cast %34 : vector<1x80x16xf32> to vector<80x16xf32>
      %36 = tpu.concatenate %33, %35 in 1 : vector<80x16xf32>, vector<80x16xf32> -> vector<80x32xf32>
      %37 = arith.truncf %36 : vector<80x32xf32> to vector<80x32xbf16>
      %c0_11 = arith.constant 0 : index
      %c0_12 = arith.constant 0 : index
      %38 = vector.load %arg11[%c0_11, %c0_12] : memref<80x32xbf16, #tpu.memory_space<vmem>>, vector<80x32xbf16>
      tpu.vector_store %arg11[%c0_11, %c0_12], %37 {strides = array<i32>} : memref<80x32xbf16, #tpu.memory_space<vmem>>, vector<80x32xbf16>,
    } else {
    }
    return
  }
  func.func @transform_0(%arg0: i32, %arg1: i32, %arg2: memref<1xi32, #tpu.memory_space<smem>>, %arg3: memref<1xi32, #tpu.memory_space<smem>>, %arg4: memref<1xi32, #tpu.memory_space<smem>>, %arg5: memref<1xi32, #tpu.memory_space<smem>>) -> (i32, i32) {
    %c0_i32 = arith.constant 0 : i32
    %c0_i32_0 = arith.constant 0 : i32
    return %arg0, %c0_i32 : i32, i32
  }
  func.func @transform_1(%arg0: i32, %arg1: i32, %arg2: memref<1xi32, #tpu.memory_space<smem>>, %arg3: memref<1xi32, #tpu.memory_space<smem>>, %arg4: memref<1xi32, #tpu.memory_space<smem>>, %arg5: memref<1xi32, #tpu.memory_space<smem>>) -> (i32, i32) {
    %c0_i32 = arith.constant 0 : i32
    %c0_i32_0 = arith.constant 0 : i32
    return %arg1, %c0_i32 : i32, i32
  }
  func.func @transform_2(%arg0: i32, %arg1: i32, %arg2: memref<1xi32, #tpu.memory_space<smem>>, %arg3: memref<1xi32, #tpu.memory_space<smem>>, %arg4: memref<1xi32, #tpu.memory_space<smem>>, %arg5: memref<1xi32, #tpu.memory_space<smem>>) -> (i32, i32) {
    %c0_i32 = arith.constant 0 : i32
    %c0_i32_0 = arith.constant 0 : i32
    return %arg1, %c0_i32 : i32, i32
  }
  func.func @transform_3(%arg0: i32, %arg1: i32, %arg2: memref<1xi32, #tpu.memory_space<smem>>, %arg3: memref<1xi32, #tpu.memory_space<smem>>, %arg4: memref<1xi32, #tpu.memory_space<smem>>, %arg5: memref<1xi32, #tpu.memory_space<smem>>) -> (i32, i32) {
    %c0_i32 = arith.constant 0 : i32
    %c0_i32_0 = arith.constant 0 : i32
    return %arg0, %c0_i32 : i32, i32
  }
  func.func @transform_4(%arg0: i32, %arg1: i32, %arg2: memref<1xi32, #tpu.memory_space<smem>>, %arg3: memref<1xi32, #tpu.memory_space<smem>>, %arg4: memref<1xi32, #tpu.memory_space<smem>>, %arg5: memref<1xi32, #tpu.memory_space<smem>>) -> (i32, i32) {
    %c0_i32 = arith.constant 0 : i32
    %c0_i32_0 = arith.constant 0 : i32
    return %c0_i32, %arg1 : i32, i32
  }
  func.func @transform_5(%arg0: i32, %arg1: i32, %arg2: memref<1xi32, #tpu.memory_space<smem>>, %arg3: memref<1xi32, #tpu.memory_space<smem>>, %arg4: memref<1xi32, #tpu.memory_space<smem>>, %arg5: memref<1xi32, #tpu.memory_space<smem>>) -> (i32, i32) {
    %c0_i32 = arith.constant 0 : i32
    %c0_i32_0 = arith.constant 0 : i32
    return %arg0, %c0_i32 : i32, i32
  }
}

module attributes {stable_mosaic.version = 11 : i64} {
  func.func @_qk_prep_kernel(%arg0: i32, %arg1: memref<16x32xbf16, #tpu.memory_space<vmem>>, %arg2: memref<16x32xbf16, #tpu.memory_space<vmem>>, %arg3: memref<16x16xf32, #tpu.memory_space<vmem>>, %arg4: memref<16x16xf32, #tpu.memory_space<vmem>>, %arg5: memref<1x16xf32, #tpu.memory_space<vmem>>, %arg6: memref<1x16xf32, #tpu.memory_space<vmem>>, %arg7: memref<1x16xf32, #tpu.memory_space<vmem>>, %arg8: memref<1x16xf32, #tpu.memory_space<vmem>>, %arg9: memref<16x32xbf16, #tpu.memory_space<vmem>>, %arg10: memref<16x32xbf16, #tpu.memory_space<vmem>>) attributes {dimension_semantics = [#tpu.dimension_semantics<parallel>], iteration_bounds = array<i64: 5>, scalar_prefetch = 0 : i64, scratch_operands = 0 : i64, tpu.core_type = #tpu.core_type<tc>, window_params = [{transform_indices = @transform_0, window_bounds = array<i64: 16, 32>}, {transform_indices = @transform_1, window_bounds = array<i64: 16, 32>}, {transform_indices = @transform_2, window_bounds = array<i64: 16, 16>}, {transform_indices = @transform_3, window_bounds = array<i64: 16, 16>}, {pipeline_mode = #tpu.pipeline_mode<synchronous>, transform_indices = @transform_4, window_bounds = array<i64: 1, 16>}, {pipeline_mode = #tpu.pipeline_mode<synchronous>, transform_indices = @transform_5, window_bounds = array<i64: 1, 16>}, {pipeline_mode = #tpu.pipeline_mode<synchronous>, transform_indices = @transform_6, window_bounds = array<i64: 1, 16>}, {pipeline_mode = #tpu.pipeline_mode<synchronous>, transform_indices = @transform_7, window_bounds = array<i64: 1, 16>}, {transform_indices = @transform_8, window_bounds = array<i64: 16, 32>}, {transform_indices = @transform_9, window_bounds = array<i64: 16, 32>}]} {
    %c0 = arith.constant 0 : index
    %c0_0 = arith.constant 0 : index
    %0 = vector.load %arg3[%c0, %c0_0] : memref<16x16xf32, #tpu.memory_space<vmem>>, vector<16x16xf32>
    %1 = vector.shape_cast %0 : vector<16x16xf32> to vector<16x1x16xf32>
    %c0_1 = arith.constant 0 : index
    %c0_2 = arith.constant 0 : index
    %2 = vector.load %arg4[%c0_1, %c0_2] : memref<16x16xf32, #tpu.memory_space<vmem>>, vector<16x16xf32>
    %3 = vector.shape_cast %2 : vector<16x16xf32> to vector<16x1x16xf32>
    %c0_3 = arith.constant 0 : index
    %c0_4 = arith.constant 0 : index
    %4 = vector.load %arg1[%c0_3, %c0_4] : memref<16x32xbf16, #tpu.memory_space<vmem>>, vector<16x32xbf16>
    %5 = arith.extf %4 : vector<16x32xbf16> to vector<16x32xf32>
    %6 = vector.shape_cast %5 : vector<16x32xf32> to vector<16x2x16xf32>
    %cst = arith.constant dense<0.000000e+00> : vector<16x2xf32>
    %7 = vector.multi_reduction <add>, %6, %cst [2] : vector<16x2x16xf32> to vector<16x2xf32>
    %8 = vector.shape_cast %7 : vector<16x2xf32> to vector<16x2x1xf32>
    %cst_5 = arith.constant 1.600000e+01 : f32
    %9 = vector.broadcast %cst_5 : f32 to vector<16x2x1xf32>
    %10 = arith.divf %8, %9 : vector<16x2x1xf32>
    %11 = vector.broadcast %10 : vector<16x2x1xf32> to vector<16x2x16xf32>
    %12 = arith.subf %6, %11 : vector<16x2x16xf32>
    %13 = arith.mulf %12, %12 : vector<16x2x16xf32>
    %cst_6 = arith.constant dense<0.000000e+00> : vector<16x2xf32>
    %14 = vector.multi_reduction <add>, %13, %cst_6 [2] : vector<16x2x16xf32> to vector<16x2xf32>
    %15 = vector.shape_cast %14 : vector<16x2xf32> to vector<16x2x1xf32>
    %cst_7 = arith.constant 1.600000e+01 : f32
    %16 = vector.broadcast %cst_7 : f32 to vector<16x2x1xf32>
    %17 = arith.divf %15, %16 : vector<16x2x1xf32>
    %18 = vector.broadcast %10 : vector<16x2x1xf32> to vector<16x2x16xf32>
    %19 = arith.subf %6, %18 : vector<16x2x16xf32>
    %cst_8 = arith.constant 9.99999974E-6 : f32
    %20 = vector.broadcast %cst_8 : f32 to vector<16x2x1xf32>
    %21 = arith.addf %17, %20 : vector<16x2x1xf32>
    %22 = math.rsqrt %21 : vector<16x2x1xf32>
    %23 = vector.broadcast %22 : vector<16x2x1xf32> to vector<16x2x16xf32>
    %24 = arith.mulf %19, %23 : vector<16x2x16xf32>
    %c0_9 = arith.constant 0 : index
    %c0_10 = arith.constant 0 : index
    %25 = vector.load %arg5[%c0_9, %c0_10] : memref<1x16xf32, #tpu.memory_space<vmem>>, vector<1x16xf32>
    %26 = vector.shape_cast %25 : vector<1x16xf32> to vector<1x1x16xf32>
    %27 = vector.broadcast %26 : vector<1x1x16xf32> to vector<16x2x16xf32>
    %28 = arith.mulf %24, %27 : vector<16x2x16xf32>
    %c0_11 = arith.constant 0 : index
    %c0_12 = arith.constant 0 : index
    %29 = vector.load %arg6[%c0_11, %c0_12] : memref<1x16xf32, #tpu.memory_space<vmem>>, vector<1x16xf32>
    %30 = vector.shape_cast %29 : vector<1x16xf32> to vector<1x1x16xf32>
    %31 = vector.broadcast %30 : vector<1x1x16xf32> to vector<16x2x16xf32>
    %32 = arith.addf %28, %31 : vector<16x2x16xf32>
    %33 = vector.extract_strided_slice %32 {offsets = [0, 0, 8], sizes = [16, 2, 8], strides = [1, 1, 1]} : vector<16x2x16xf32> to vector<16x2x8xf32>
    %34 = vector.extract_strided_slice %32 {offsets = [0, 0, 0], sizes = [16, 2, 8], strides = [1, 1, 1]} : vector<16x2x16xf32> to vector<16x2x8xf32>
    %35 = tpu.concatenate %33, %34 in 2 : vector<16x2x8xf32>, vector<16x2x8xf32> -> vector<16x2x16xf32>
    %36 = vector.broadcast %1 : vector<16x1x16xf32> to vector<16x2x16xf32>
    %37 = arith.mulf %32, %36 : vector<16x2x16xf32>
    %38 = vector.broadcast %3 : vector<16x1x16xf32> to vector<16x2x16xf32>
    %39 = arith.mulf %35, %38 : vector<16x2x16xf32>
    %40 = arith.addf %37, %39 : vector<16x2x16xf32>
    %cst_13 = arith.constant 2.500000e-01 : f32
    %41 = vector.broadcast %cst_13 : f32 to vector<16x2x16xf32>
    %42 = arith.mulf %40, %41 : vector<16x2x16xf32>
    %43 = vector.shape_cast %42 : vector<16x2x16xf32> to vector<16x32xf32>
    %44 = arith.truncf %43 : vector<16x32xf32> to vector<16x32xbf16>
    %c0_14 = arith.constant 0 : index
    %c0_15 = arith.constant 0 : index
    %45 = vector.load %arg9[%c0_14, %c0_15] : memref<16x32xbf16, #tpu.memory_space<vmem>>, vector<16x32xbf16>
    tpu.vector_store %arg9[%c0_14, %c0_15], %44 {strides = array<i32>} : memref<16x32xbf16, #tpu.memory_space<vmem>>, vector<16x32xbf16>,
    %c0_16 = arith.constant 0 : index
    %c0_17 = arith.constant 0 : index
    %46 = vector.load %arg2[%c0_16, %c0_17] : memref<16x32xbf16, #tpu.memory_space<vmem>>, vector<16x32xbf16>
    %47 = arith.extf %46 : vector<16x32xbf16> to vector<16x32xf32>
    %48 = vector.shape_cast %47 : vector<16x32xf32> to vector<16x2x16xf32>
    %cst_18 = arith.constant dense<0.000000e+00> : vector<16x2xf32>
    %49 = vector.multi_reduction <add>, %48, %cst_18 [2] : vector<16x2x16xf32> to vector<16x2xf32>
    %50 = vector.shape_cast %49 : vector<16x2xf32> to vector<16x2x1xf32>
    %cst_19 = arith.constant 1.600000e+01 : f32
    %51 = vector.broadcast %cst_19 : f32 to vector<16x2x1xf32>
    %52 = arith.divf %50, %51 : vector<16x2x1xf32>
    %53 = vector.broadcast %52 : vector<16x2x1xf32> to vector<16x2x16xf32>
    %54 = arith.subf %48, %53 : vector<16x2x16xf32>
    %55 = arith.mulf %54, %54 : vector<16x2x16xf32>
    %cst_20 = arith.constant dense<0.000000e+00> : vector<16x2xf32>
    %56 = vector.multi_reduction <add>, %55, %cst_20 [2] : vector<16x2x16xf32> to vector<16x2xf32>
    %57 = vector.shape_cast %56 : vector<16x2xf32> to vector<16x2x1xf32>
    %cst_21 = arith.constant 1.600000e+01 : f32
    %58 = vector.broadcast %cst_21 : f32 to vector<16x2x1xf32>
    %59 = arith.divf %57, %58 : vector<16x2x1xf32>
    %60 = vector.broadcast %52 : vector<16x2x1xf32> to vector<16x2x16xf32>
    %61 = arith.subf %48, %60 : vector<16x2x16xf32>
    %cst_22 = arith.constant 9.99999974E-6 : f32
    %62 = vector.broadcast %cst_22 : f32 to vector<16x2x1xf32>
    %63 = arith.addf %59, %62 : vector<16x2x1xf32>
    %64 = math.rsqrt %63 : vector<16x2x1xf32>
    %65 = vector.broadcast %64 : vector<16x2x1xf32> to vector<16x2x16xf32>
    %66 = arith.mulf %61, %65 : vector<16x2x16xf32>
    %c0_23 = arith.constant 0 : index
    %c0_24 = arith.constant 0 : index
    %67 = vector.load %arg7[%c0_23, %c0_24] : memref<1x16xf32, #tpu.memory_space<vmem>>, vector<1x16xf32>
    %68 = vector.shape_cast %67 : vector<1x16xf32> to vector<1x1x16xf32>
    %69 = vector.broadcast %68 : vector<1x1x16xf32> to vector<16x2x16xf32>
    %70 = arith.mulf %66, %69 : vector<16x2x16xf32>
    %c0_25 = arith.constant 0 : index
    %c0_26 = arith.constant 0 : index
    %71 = vector.load %arg8[%c0_25, %c0_26] : memref<1x16xf32, #tpu.memory_space<vmem>>, vector<1x16xf32>
    %72 = vector.shape_cast %71 : vector<1x16xf32> to vector<1x1x16xf32>
    %73 = vector.broadcast %72 : vector<1x1x16xf32> to vector<16x2x16xf32>
    %74 = arith.addf %70, %73 : vector<16x2x16xf32>
    %75 = vector.extract_strided_slice %74 {offsets = [0, 0, 8], sizes = [16, 2, 8], strides = [1, 1, 1]} : vector<16x2x16xf32> to vector<16x2x8xf32>
    %76 = vector.extract_strided_slice %74 {offsets = [0, 0, 0], sizes = [16, 2, 8], strides = [1, 1, 1]} : vector<16x2x16xf32> to vector<16x2x8xf32>
    %77 = tpu.concatenate %75, %76 in 2 : vector<16x2x8xf32>, vector<16x2x8xf32> -> vector<16x2x16xf32>
    %78 = vector.broadcast %1 : vector<16x1x16xf32> to vector<16x2x16xf32>
    %79 = arith.mulf %74, %78 : vector<16x2x16xf32>
    %80 = vector.broadcast %3 : vector<16x1x16xf32> to vector<16x2x16xf32>
    %81 = arith.mulf %77, %80 : vector<16x2x16xf32>
    %82 = arith.addf %79, %81 : vector<16x2x16xf32>
    %cst_27 = arith.constant 1.000000e+00 : f32
    %83 = vector.broadcast %cst_27 : f32 to vector<16x2x16xf32>
    %84 = arith.mulf %82, %83 : vector<16x2x16xf32>
    %85 = vector.shape_cast %84 : vector<16x2x16xf32> to vector<16x32xf32>
    %86 = arith.truncf %85 : vector<16x32xf32> to vector<16x32xbf16>
    %c0_28 = arith.constant 0 : index
    %c0_29 = arith.constant 0 : index
    %87 = vector.load %arg10[%c0_28, %c0_29] : memref<16x32xbf16, #tpu.memory_space<vmem>>, vector<16x32xbf16>
    tpu.vector_store %arg10[%c0_28, %c0_29], %86 {strides = array<i32>} : memref<16x32xbf16, #tpu.memory_space<vmem>>, vector<16x32xbf16>,
    return
  }
  func.func @transform_0(%arg0: i32) -> (i32, i32) {
    %c0_i32 = arith.constant 0 : i32
    %c0_i32_0 = arith.constant 0 : i32
    return %arg0, %c0_i32 : i32, i32
  }
  func.func @transform_1(%arg0: i32) -> (i32, i32) {
    %c0_i32 = arith.constant 0 : i32
    %c0_i32_0 = arith.constant 0 : i32
    return %arg0, %c0_i32 : i32, i32
  }
  func.func @transform_2(%arg0: i32) -> (i32, i32) {
    %c0_i32 = arith.constant 0 : i32
    %c0_i32_0 = arith.constant 0 : i32
    return %arg0, %c0_i32 : i32, i32
  }
  func.func @transform_3(%arg0: i32) -> (i32, i32) {
    %c0_i32 = arith.constant 0 : i32
    %c0_i32_0 = arith.constant 0 : i32
    return %arg0, %c0_i32 : i32, i32
  }
  func.func @transform_4(%arg0: i32) -> (i32, i32) {
    %c0_i32 = arith.constant 0 : i32
    %c0_i32_0 = arith.constant 0 : i32
    %c0_i32_1 = arith.constant 0 : i32
    return %c0_i32, %c0_i32_0 : i32, i32
  }
  func.func @transform_5(%arg0: i32) -> (i32, i32) {
    %c0_i32 = arith.constant 0 : i32
    %c0_i32_0 = arith.constant 0 : i32
    %c0_i32_1 = arith.constant 0 : i32
    return %c0_i32, %c0_i32_0 : i32, i32
  }
  func.func @transform_6(%arg0: i32) -> (i32, i32) {
    %c0_i32 = arith.constant 0 : i32
    %c0_i32_0 = arith.constant 0 : i32
    %c0_i32_1 = arith.constant 0 : i32
    return %c0_i32, %c0_i32_0 : i32, i32
  }
  func.func @transform_7(%arg0: i32) -> (i32, i32) {
    %c0_i32 = arith.constant 0 : i32
    %c0_i32_0 = arith.constant 0 : i32
    %c0_i32_1 = arith.constant 0 : i32
    return %c0_i32, %c0_i32_0 : i32, i32
  }
  func.func @transform_8(%arg0: i32) -> (i32, i32) {
    %c0_i32 = arith.constant 0 : i32
    %c0_i32_0 = arith.constant 0 : i32
    return %arg0, %c0_i32 : i32, i32
  }
  func.func @transform_9(%arg0: i32) -> (i32, i32) {
    %c0_i32 = arith.constant 0 : i32
    %c0_i32_0 = arith.constant 0 : i32
    return %arg0, %c0_i32 : i32, i32
  }
}

module attributes {stable_mosaic.version = 11 : i64} {
  func.func @_mm_kernel(%arg0: i32, %arg1: i32, %arg2: memref<80x32xbf16, #tpu.memory_space<vmem>>, %arg3: memref<32x32xbf16, #tpu.memory_space<vmem>>, %arg4: memref<32x32xbf16, #tpu.memory_space<vmem>>, %arg5: memref<32x32xbf16, #tpu.memory_space<vmem>>, %arg6: memref<80x32xbf16, #tpu.memory_space<vmem>>, %arg7: memref<80x32xbf16, #tpu.memory_space<vmem>>, %arg8: memref<80x32xbf16, #tpu.memory_space<vmem>>) attributes {dimension_semantics = [#tpu.dimension_semantics<parallel>, #tpu.dimension_semantics<parallel>], iteration_bounds = array<i64: 1, 1>, scalar_prefetch = 0 : i64, scratch_operands = 0 : i64, tpu.core_type = #tpu.core_type<tc>, window_params = [{transform_indices = @transform_0, window_bounds = array<i64: 80, 32>}, {transform_indices = @transform_1, window_bounds = array<i64: 32, 32>}, {transform_indices = @transform_2, window_bounds = array<i64: 32, 32>}, {transform_indices = @transform_3, window_bounds = array<i64: 32, 32>}, {transform_indices = @transform_4, window_bounds = array<i64: 80, 32>}, {transform_indices = @transform_5, window_bounds = array<i64: 80, 32>}, {transform_indices = @transform_6, window_bounds = array<i64: 80, 32>}]} {
    %c0 = arith.constant 0 : index
    %c0_0 = arith.constant 0 : index
    %0 = vector.load %arg2[%c0, %c0_0] : memref<80x32xbf16, #tpu.memory_space<vmem>>, vector<80x32xbf16>
    %c0_1 = arith.constant 0 : index
    %c0_2 = arith.constant 0 : index
    %1 = vector.load %arg3[%c0_1, %c0_2] : memref<32x32xbf16, #tpu.memory_space<vmem>>, vector<32x32xbf16>
    %cst = arith.constant dense<0.000000e+00> : vector<80x32xf32>
    %2 = tpu.matmul %0, %1, %cst {dimension_numbers = #tpu.dot_dimension_numbers<[1], [0], [0], [1], [0, 0, 1, 1], [], []>} : vector<80x32xbf16>, vector<32x32xbf16>, vector<80x32xf32> -> vector<80x32xf32>
    %3 = arith.truncf %2 : vector<80x32xf32> to vector<80x32xbf16>
    %c0_3 = arith.constant 0 : index
    %c0_4 = arith.constant 0 : index
    %4 = vector.load %arg6[%c0_3, %c0_4] : memref<80x32xbf16, #tpu.memory_space<vmem>>, vector<80x32xbf16>
    tpu.vector_store %arg6[%c0_3, %c0_4], %3 {strides = array<i32>} : memref<80x32xbf16, #tpu.memory_space<vmem>>, vector<80x32xbf16>,
    %c0_5 = arith.constant 0 : index
    %c0_6 = arith.constant 0 : index
    %5 = vector.load %arg4[%c0_5, %c0_6] : memref<32x32xbf16, #tpu.memory_space<vmem>>, vector<32x32xbf16>
    %cst_7 = arith.constant dense<0.000000e+00> : vector<80x32xf32>
    %6 = tpu.matmul %0, %5, %cst_7 {dimension_numbers = #tpu.dot_dimension_numbers<[1], [0], [0], [1], [0, 0, 1, 1], [], []>} : vector<80x32xbf16>, vector<32x32xbf16>, vector<80x32xf32> -> vector<80x32xf32>
    %7 = arith.truncf %6 : vector<80x32xf32> to vector<80x32xbf16>
    %c0_8 = arith.constant 0 : index
    %c0_9 = arith.constant 0 : index
    %8 = vector.load %arg7[%c0_8, %c0_9] : memref<80x32xbf16, #tpu.memory_space<vmem>>, vector<80x32xbf16>
    tpu.vector_store %arg7[%c0_8, %c0_9], %7 {strides = array<i32>} : memref<80x32xbf16, #tpu.memory_space<vmem>>, vector<80x32xbf16>,
    %c0_10 = arith.constant 0 : index
    %c0_11 = arith.constant 0 : index
    %9 = vector.load %arg5[%c0_10, %c0_11] : memref<32x32xbf16, #tpu.memory_space<vmem>>, vector<32x32xbf16>
    %cst_12 = arith.constant dense<0.000000e+00> : vector<80x32xf32>
    %10 = tpu.matmul %0, %9, %cst_12 {dimension_numbers = #tpu.dot_dimension_numbers<[1], [0], [0], [1], [0, 0, 1, 1], [], []>} : vector<80x32xbf16>, vector<32x32xbf16>, vector<80x32xf32> -> vector<80x32xf32>
    %11 = arith.truncf %10 : vector<80x32xf32> to vector<80x32xbf16>
    %c0_13 = arith.constant 0 : index
    %c0_14 = arith.constant 0 : index
    %12 = vector.load %arg8[%c0_13, %c0_14] : memref<80x32xbf16, #tpu.memory_space<vmem>>, vector<80x32xbf16>
    tpu.vector_store %arg8[%c0_13, %c0_14], %11 {strides = array<i32>} : memref<80x32xbf16, #tpu.memory_space<vmem>>, vector<80x32xbf16>,
    return
  }
  func.func @transform_0(%arg0: i32, %arg1: i32) -> (i32, i32) {
    %c0_i32 = arith.constant 0 : i32
    %c0_i32_0 = arith.constant 0 : i32
    return %arg1, %c0_i32 : i32, i32
  }
  func.func @transform_1(%arg0: i32, %arg1: i32) -> (i32, i32) {
    %c0_i32 = arith.constant 0 : i32
    %c0_i32_0 = arith.constant 0 : i32
    return %c0_i32, %arg0 : i32, i32
  }
  func.func @transform_2(%arg0: i32, %arg1: i32) -> (i32, i32) {
    %c0_i32 = arith.constant 0 : i32
    %c0_i32_0 = arith.constant 0 : i32
    return %c0_i32, %arg0 : i32, i32
  }
  func.func @transform_3(%arg0: i32, %arg1: i32) -> (i32, i32) {
    %c0_i32 = arith.constant 0 : i32
    %c0_i32_0 = arith.constant 0 : i32
    return %c0_i32, %arg0 : i32, i32
  }
  func.func @transform_4(%arg0: i32, %arg1: i32) -> (i32, i32) {
    %c0_i32 = arith.constant 0 : i32
    return %arg1, %arg0 : i32, i32
  }
  func.func @transform_5(%arg0: i32, %arg1: i32) -> (i32, i32) {
    %c0_i32 = arith.constant 0 : i32
    return %arg1, %arg0 : i32, i32
  }
  func.func @transform_6(%arg0: i32, %arg1: i32) -> (i32, i32) {
    %c0_i32 = arith.constant 0 : i32
    return %arg1, %arg0 : i32, i32
  }
}

module attributes {stable_mosaic.version = 11 : i64} {
  func.func @_mm_kernel(%arg0: i32, %arg1: i32, %arg2: memref<80x32xbf16, #tpu.memory_space<vmem>>, %arg3: memref<80x32xbf16, #tpu.memory_space<vmem>>, %arg4: memref<8x32xf32, #tpu.memory_space<vmem>>, %arg5: memref<80x1xi32, #tpu.memory_space<vmem>>, %arg6: memref<32x32xbf16, #tpu.memory_space<vmem>>, %arg7: memref<80x32xbf16, #tpu.memory_space<vmem>>) attributes {dimension_semantics = [#tpu.dimension_semantics<parallel>, #tpu.dimension_semantics<parallel>], iteration_bounds = array<i64: 1, 1>, scalar_prefetch = 0 : i64, scratch_operands = 0 : i64, tpu.core_type = #tpu.core_type<tc>, window_params = [{transform_indices = @transform_0, window_bounds = array<i64: 80, 32>}, {transform_indices = @transform_1, window_bounds = array<i64: 80, 32>}, {transform_indices = @transform_2, window_bounds = array<i64: 8, 32>}, {transform_indices = @transform_3, window_bounds = array<i64: 80, 1>}, {transform_indices = @transform_4, window_bounds = array<i64: 32, 32>}, {transform_indices = @transform_5, window_bounds = array<i64: 80, 32>}]} {
    %c0 = arith.constant 0 : index
    %c0_0 = arith.constant 0 : index
    %0 = vector.load %arg2[%c0, %c0_0] : memref<80x32xbf16, #tpu.memory_space<vmem>>, vector<80x32xbf16>
    %c0_1 = arith.constant 0 : index
    %c0_2 = arith.constant 0 : index
    %1 = vector.load %arg5[%c0_1, %c0_2] : memref<80x1xi32, #tpu.memory_space<vmem>>, vector<80x1xi32>
    %2 = tpu.iota {dimensions = array<i32: 1>} : vector<80x8xi32>
    %3 = vector.broadcast %1 : vector<80x1xi32> to vector<80x8xi32>
    %4 = arith.cmpi eq, %3, %2 : vector<80x8xi32>
    %5 = arith.extui %4 : vector<80x8xi1> to vector<80x8xi32>
    %6 = arith.sitofp %5 : vector<80x8xi32> to vector<80x8xf32>
    %c0_3 = arith.constant 0 : index
    %c0_4 = arith.constant 0 : index
    %7 = vector.load %arg4[%c0_3, %c0_4] : memref<8x32xf32, #tpu.memory_space<vmem>>, vector<8x32xf32>
    %cst = arith.constant dense<0.000000e+00> : vector<80x32xf32>
    %8 = tpu.matmul %6, %7, %cst {dimension_numbers = #tpu.dot_dimension_numbers<[1], [0], [0], [1], [0, 0, 1, 1], [], []>} : vector<80x8xf32>, vector<8x32xf32>, vector<80x32xf32> -> vector<80x32xf32>
    %c0_5 = arith.constant 0 : index
    %c0_6 = arith.constant 0 : index
    %9 = vector.load %arg6[%c0_5, %c0_6] : memref<32x32xbf16, #tpu.memory_space<vmem>>, vector<32x32xbf16>
    %cst_7 = arith.constant dense<0.000000e+00> : vector<80x32xf32>
    %10 = tpu.matmul %0, %9, %cst_7 {dimension_numbers = #tpu.dot_dimension_numbers<[1], [0], [0], [1], [0, 0, 1, 1], [], []>} : vector<80x32xbf16>, vector<32x32xbf16>, vector<80x32xf32> -> vector<80x32xf32>
    %c0_8 = arith.constant 0 : index
    %c0_9 = arith.constant 0 : index
    %11 = vector.load %arg3[%c0_8, %c0_9] : memref<80x32xbf16, #tpu.memory_space<vmem>>, vector<80x32xbf16>
    %12 = arith.extf %11 : vector<80x32xbf16> to vector<80x32xf32>
    %13 = arith.mulf %8, %10 : vector<80x32xf32>
    %14 = arith.addf %12, %13 : vector<80x32xf32>
    %15 = arith.truncf %14 : vector<80x32xf32> to vector<80x32xbf16>
    %c0_10 = arith.constant 0 : index
    %c0_11 = arith.constant 0 : index
    %16 = vector.load %arg7[%c0_10, %c0_11] : memref<80x32xbf16, #tpu.memory_space<vmem>>, vector<80x32xbf16>
    tpu.vector_store %arg7[%c0_10, %c0_11], %15 {strides = array<i32>} : memref<80x32xbf16, #tpu.memory_space<vmem>>, vector<80x32xbf16>,
    return
  }
  func.func @transform_0(%arg0: i32, %arg1: i32) -> (i32, i32) {
    %c0_i32 = arith.constant 0 : i32
    %c0_i32_0 = arith.constant 0 : i32
    return %arg1, %c0_i32 : i32, i32
  }
  func.func @transform_1(%arg0: i32, %arg1: i32) -> (i32, i32) {
    %c0_i32 = arith.constant 0 : i32
    return %arg1, %arg0 : i32, i32
  }
  func.func @transform_2(%arg0: i32, %arg1: i32) -> (i32, i32) {
    %c0_i32 = arith.constant 0 : i32
    %c0_i32_0 = arith.constant 0 : i32
    return %c0_i32, %arg0 : i32, i32
  }
  func.func @transform_3(%arg0: i32, %arg1: i32) -> (i32, i32) {
    %c0_i32 = arith.constant 0 : i32
    %c0_i32_0 = arith.constant 0 : i32
    return %arg1, %c0_i32 : i32, i32
  }
  func.func @transform_4(%arg0: i32, %arg1: i32) -> (i32, i32) {
    %c0_i32 = arith.constant 0 : i32
    %c0_i32_0 = arith.constant 0 : i32
    return %c0_i32, %arg0 : i32, i32
  }
  func.func @transform_5(%arg0: i32, %arg1: i32) -> (i32, i32) {
    %c0_i32 = arith.constant 0 : i32
    return %arg1, %arg0 : i32, i32
  }
}

module attributes {stable_mosaic.version = 11 : i64} {
  func.func @_mm_kernel(%arg0: i32, %arg1: i32, %arg2: memref<80x32xbf16, #tpu.memory_space<vmem>>, %arg3: memref<32x64xbf16, #tpu.memory_space<vmem>>, %arg4: memref<1x64xf32, #tpu.memory_space<vmem>>, %arg5: memref<80x64xbf16, #tpu.memory_space<vmem>>) attributes {dimension_semantics = [#tpu.dimension_semantics<parallel>, #tpu.dimension_semantics<parallel>], iteration_bounds = array<i64: 1, 1>, scalar_prefetch = 0 : i64, scratch_operands = 0 : i64, tpu.core_type = #tpu.core_type<tc>, window_params = [{transform_indices = @transform_0, window_bounds = array<i64: 80, 32>}, {transform_indices = @transform_1, window_bounds = array<i64: 32, 64>}, {transform_indices = @transform_2, window_bounds = array<i64: 1, 64>}, {transform_indices = @transform_3, window_bounds = array<i64: 80, 64>}]} {
    %c0 = arith.constant 0 : index
    %c0_0 = arith.constant 0 : index
    %0 = vector.load %arg2[%c0, %c0_0] : memref<80x32xbf16, #tpu.memory_space<vmem>>, vector<80x32xbf16>
    %c0_1 = arith.constant 0 : index
    %c0_2 = arith.constant 0 : index
    %1 = vector.load %arg3[%c0_1, %c0_2] : memref<32x64xbf16, #tpu.memory_space<vmem>>, vector<32x64xbf16>
    %cst = arith.constant dense<0.000000e+00> : vector<80x64xf32>
    %2 = tpu.matmul %0, %1, %cst {dimension_numbers = #tpu.dot_dimension_numbers<[1], [0], [0], [1], [0, 0, 1, 1], [], []>} : vector<80x32xbf16>, vector<32x64xbf16>, vector<80x64xf32> -> vector<80x64xf32>
    %c0_3 = arith.constant 0 : index
    %c0_4 = arith.constant 0 : index
    %3 = vector.load %arg4[%c0_3, %c0_4] : memref<1x64xf32, #tpu.memory_space<vmem>>, vector<1x64xf32>
    %4 = vector.broadcast %3 : vector<1x64xf32> to vector<80x64xf32>
    %5 = arith.addf %2, %4 : vector<80x64xf32>
    %cst_5 = arith.constant 5.000000e-01 : f32
    %6 = vector.broadcast %cst_5 : f32 to vector<80x64xf32>
    %7 = arith.mulf %6, %5 : vector<80x64xf32>
    %cst_6 = arith.constant 4.471500e-02 : f32
    %8 = vector.broadcast %cst_6 : f32 to vector<80x64xf32>
    %9 = arith.mulf %8, %5 : vector<80x64xf32>
    %10 = arith.mulf %9, %5 : vector<80x64xf32>
    %11 = arith.mulf %10, %5 : vector<80x64xf32>
    %12 = arith.addf %5, %11 : vector<80x64xf32>
    %cst_7 = arith.constant 0.797884583 : f32
    %13 = vector.broadcast %cst_7 : f32 to vector<80x64xf32>
    %14 = arith.mulf %13, %12 : vector<80x64xf32>
    %15 = math.tanh %14 : vector<80x64xf32>
    %cst_8 = arith.constant 1.000000e+00 : f32
    %16 = vector.broadcast %cst_8 : f32 to vector<80x64xf32>
    %17 = arith.addf %16, %15 : vector<80x64xf32>
    %18 = arith.mulf %7, %17 : vector<80x64xf32>
    %19 = arith.truncf %18 : vector<80x64xf32> to vector<80x64xbf16>
    %c0_9 = arith.constant 0 : index
    %c0_10 = arith.constant 0 : index
    %20 = vector.load %arg5[%c0_9, %c0_10] : memref<80x64xbf16, #tpu.memory_space<vmem>>, vector<80x64xbf16>
    tpu.vector_store %arg5[%c0_9, %c0_10], %19 {strides = array<i32>} : memref<80x64xbf16, #tpu.memory_space<vmem>>, vector<80x64xbf16>,
    return
  }
  func.func @transform_0(%arg0: i32, %arg1: i32) -> (i32, i32) {
    %c0_i32 = arith.constant 0 : i32
    %c0_i32_0 = arith.constant 0 : i32
    return %arg1, %c0_i32 : i32, i32
  }
  func.func @transform_1(%arg0: i32, %arg1: i32) -> (i32, i32) {
    %c0_i32 = arith.constant 0 : i32
    %c0_i32_0 = arith.constant 0 : i32
    return %c0_i32, %arg0 : i32, i32
  }
  func.func @transform_2(%arg0: i32, %arg1: i32) -> (i32, i32) {
    %c0_i32 = arith.constant 0 : i32
    %c0_i32_0 = arith.constant 0 : i32
    return %c0_i32, %arg0 : i32, i32
  }
  func.func @transform_3(%arg0: i32, %arg1: i32) -> (i32, i32) {
    %c0_i32 = arith.constant 0 : i32
    return %arg1, %arg0 : i32, i32
  }
}

module attributes {stable_mosaic.version = 11 : i64} {
  func.func @_mm_kernel(%arg0: i32, %arg1: i32, %arg2: memref<80x64xbf16, #tpu.memory_space<vmem>>, %arg3: memref<80x32xbf16, #tpu.memory_space<vmem>>, %arg4: memref<8x32xf32, #tpu.memory_space<vmem>>, %arg5: memref<80x1xi32, #tpu.memory_space<vmem>>, %arg6: memref<64x32xbf16, #tpu.memory_space<vmem>>, %arg7: memref<1x32xf32, #tpu.memory_space<vmem>>, %arg8: memref<80x32xbf16, #tpu.memory_space<vmem>>) attributes {dimension_semantics = [#tpu.dimension_semantics<parallel>, #tpu.dimension_semantics<parallel>], iteration_bounds = array<i64: 1, 1>, scalar_prefetch = 0 : i64, scratch_operands = 0 : i64, tpu.core_type = #tpu.core_type<tc>, window_params = [{transform_indices = @transform_0, window_bounds = array<i64: 80, 64>}, {transform_indices = @transform_1, window_bounds = array<i64: 80, 32>}, {transform_indices = @transform_2, window_bounds = array<i64: 8, 32>}, {transform_indices = @transform_3, window_bounds = array<i64: 80, 1>}, {transform_indices = @transform_4, window_bounds = array<i64: 64, 32>}, {transform_indices = @transform_5, window_bounds = array<i64: 1, 32>}, {transform_indices = @transform_6, window_bounds = array<i64: 80, 32>}]} {
    %c0 = arith.constant 0 : index
    %c0_0 = arith.constant 0 : index
    %0 = vector.load %arg2[%c0, %c0_0] : memref<80x64xbf16, #tpu.memory_space<vmem>>, vector<80x64xbf16>
    %c0_1 = arith.constant 0 : index
    %c0_2 = arith.constant 0 : index
    %1 = vector.load %arg5[%c0_1, %c0_2] : memref<80x1xi32, #tpu.memory_space<vmem>>, vector<80x1xi32>
    %2 = tpu.iota {dimensions = array<i32: 1>} : vector<80x8xi32>
    %3 = vector.broadcast %1 : vector<80x1xi32> to vector<80x8xi32>
    %4 = arith.cmpi eq, %3, %2 : vector<80x8xi32>
    %5 = arith.extui %4 : vector<80x8xi1> to vector<80x8xi32>
    %6 = arith.sitofp %5 : vector<80x8xi32> to vector<80x8xf32>
    %c0_3 = arith.constant 0 : index
    %c0_4 = arith.constant 0 : index
    %7 = vector.load %arg4[%c0_3, %c0_4] : memref<8x32xf32, #tpu.memory_space<vmem>>, vector<8x32xf32>
    %cst = arith.constant dense<0.000000e+00> : vector<80x32xf32>
    %8 = tpu.matmul %6, %7, %cst {dimension_numbers = #tpu.dot_dimension_numbers<[1], [0], [0], [1], [0, 0, 1, 1], [], []>} : vector<80x8xf32>, vector<8x32xf32>, vector<80x32xf32> -> vector<80x32xf32>
    %c0_5 = arith.constant 0 : index
    %c0_6 = arith.constant 0 : index
    %9 = vector.load %arg6[%c0_5, %c0_6] : memref<64x32xbf16, #tpu.memory_space<vmem>>, vector<64x32xbf16>
    %cst_7 = arith.constant dense<0.000000e+00> : vector<80x32xf32>
    %10 = tpu.matmul %0, %9, %cst_7 {dimension_numbers = #tpu.dot_dimension_numbers<[1], [0], [0], [1], [0, 0, 1, 1], [], []>} : vector<80x64xbf16>, vector<64x32xbf16>, vector<80x32xf32> -> vector<80x32xf32>
    %c0_8 = arith.constant 0 : index
    %c0_9 = arith.constant 0 : index
    %11 = vector.load %arg7[%c0_8, %c0_9] : memref<1x32xf32, #tpu.memory_space<vmem>>, vector<1x32xf32>
    %12 = vector.broadcast %11 : vector<1x32xf32> to vector<80x32xf32>
    %13 = arith.addf %10, %12 : vector<80x32xf32>
    %c0_10 = arith.constant 0 : index
    %c0_11 = arith.constant 0 : index
    %14 = vector.load %arg3[%c0_10, %c0_11] : memref<80x32xbf16, #tpu.memory_space<vmem>>, vector<80x32xbf16>
    %15 = arith.extf %14 : vector<80x32xbf16> to vector<80x32xf32>
    %16 = arith.mulf %8, %13 : vector<80x32xf32>
    %17 = arith.addf %15, %16 : vector<80x32xf32>
    %18 = arith.truncf %17 : vector<80x32xf32> to vector<80x32xbf16>
    %c0_12 = arith.constant 0 : index
    %c0_13 = arith.constant 0 : index
    %19 = vector.load %arg8[%c0_12, %c0_13] : memref<80x32xbf16, #tpu.memory_space<vmem>>, vector<80x32xbf16>
    tpu.vector_store %arg8[%c0_12, %c0_13], %18 {strides = array<i32>} : memref<80x32xbf16, #tpu.memory_space<vmem>>, vector<80x32xbf16>,
    return
  }
  func.func @transform_0(%arg0: i32, %arg1: i32) -> (i32, i32) {
    %c0_i32 = arith.constant 0 : i32
    %c0_i32_0 = arith.constant 0 : i32
    return %arg1, %c0_i32 : i32, i32
  }
  func.func @transform_1(%arg0: i32, %arg1: i32) -> (i32, i32) {
    %c0_i32 = arith.constant 0 : i32
    return %arg1, %arg0 : i32, i32
  }
  func.func @transform_2(%arg0: i32, %arg1: i32) -> (i32, i32) {
    %c0_i32 = arith.constant 0 : i32
    %c0_i32_0 = arith.constant 0 : i32
    return %c0_i32, %arg0 : i32, i32
  }
  func.func @transform_3(%arg0: i32, %arg1: i32) -> (i32, i32) {
    %c0_i32 = arith.constant 0 : i32
    %c0_i32_0 = arith.constant 0 : i32
    return %arg1, %c0_i32 : i32, i32
  }
  func.func @transform_4(%arg0: i32, %arg1: i32) -> (i32, i32) {
    %c0_i32 = arith.constant 0 : i32
    %c0_i32_0 = arith.constant 0 : i32
    return %c0_i32, %arg0 : i32, i32
  }
  func.func @transform_5(%arg0: i32, %arg1: i32) -> (i32, i32) {
    %c0_i32 = arith.constant 0 : i32
    %c0_i32_0 = arith.constant 0 : i32
    return %c0_i32, %arg0 : i32, i32
  }
  func.func @transform_6(%arg0: i32, %arg1: i32) -> (i32, i32) {
    %c0_i32 = arith.constant 0 : i32
    return %arg1, %arg0 : i32, i32
  }
}

module attributes {stable_mosaic.version = 11 : i64} {
  func.func @_mm_kernel(%arg0: i32, %arg1: i32, %arg2: memref<80x32xbf16, #tpu.memory_space<vmem>>, %arg3: memref<32x16xbf16, #tpu.memory_space<vmem>>, %arg4: memref<1x16xf32, #tpu.memory_space<vmem>>, %arg5: memref<80x16xf32, #tpu.memory_space<vmem>>) attributes {dimension_semantics = [#tpu.dimension_semantics<parallel>, #tpu.dimension_semantics<parallel>], iteration_bounds = array<i64: 1, 1>, scalar_prefetch = 0 : i64, scratch_operands = 0 : i64, tpu.core_type = #tpu.core_type<tc>, window_params = [{transform_indices = @transform_0, window_bounds = array<i64: 80, 32>}, {transform_indices = @transform_1, window_bounds = array<i64: 32, 16>}, {transform_indices = @transform_2, window_bounds = array<i64: 1, 16>}, {transform_indices = @transform_3, window_bounds = array<i64: 80, 16>}]} {
    %c0 = arith.constant 0 : index
    %c0_0 = arith.constant 0 : index
    %0 = vector.load %arg2[%c0, %c0_0] : memref<80x32xbf16, #tpu.memory_space<vmem>>, vector<80x32xbf16>
    %c0_1 = arith.constant 0 : index
    %c0_2 = arith.constant 0 : index
    %1 = vector.load %arg3[%c0_1, %c0_2] : memref<32x16xbf16, #tpu.memory_space<vmem>>, vector<32x16xbf16>
    %cst = arith.constant dense<0.000000e+00> : vector<80x16xf32>
    %2 = tpu.matmul %0, %1, %cst {dimension_numbers = #tpu.dot_dimension_numbers<[1], [0], [0], [1], [0, 0, 1, 1], [], []>} : vector<80x32xbf16>, vector<32x16xbf16>, vector<80x16xf32> -> vector<80x16xf32>
    %c0_3 = arith.constant 0 : index
    %c0_4 = arith.constant 0 : index
    %3 = vector.load %arg4[%c0_3, %c0_4] : memref<1x16xf32, #tpu.memory_space<vmem>>, vector<1x16xf32>
    %4 = vector.broadcast %3 : vector<1x16xf32> to vector<80x16xf32>
    %5 = arith.addf %2, %4 : vector<80x16xf32>
    %c0_5 = arith.constant 0 : index
    %c0_6 = arith.constant 0 : index
    %6 = vector.load %arg5[%c0_5, %c0_6] : memref<80x16xf32, #tpu.memory_space<vmem>>, vector<80x16xf32>
    tpu.vector_store %arg5[%c0_5, %c0_6], %5 {strides = array<i32>} : memref<80x16xf32, #tpu.memory_space<vmem>>, vector<80x16xf32>,
    return
  }
  func.func @transform_0(%arg0: i32, %arg1: i32) -> (i32, i32) {
    %c0_i32 = arith.constant 0 : i32
    %c0_i32_0 = arith.constant 0 : i32
    return %arg1, %c0_i32 : i32, i32
  }
  func.func @transform_1(%arg0: i32, %arg1: i32) -> (i32, i32) {
    %c0_i32 = arith.constant 0 : i32
    %c0_i32_0 = arith.constant 0 : i32
    return %c0_i32, %arg0 : i32, i32
  }
  func.func @transform_2(%arg0: i32, %arg1: i32) -> (i32, i32) {
    %c0_i32 = arith.constant 0 : i32
    %c0_i32_0 = arith.constant 0 : i32
    return %c0_i32, %arg0 : i32, i32
  }
  func.func @transform_3(%arg0: i32, %arg1: i32) -> (i32, i32) {
    %c0_i32 = arith.constant 0 : i32
    return %arg1, %arg0 : i32, i32
  }
}

</mosaic_0001>

<bundles_post_ra>
// kernel: _forward.36
= control target key start
LH: loop header
LB: loop body
LE: loop exit
PB: predicated region body
PF: predicated region fallthrough
CT: control target
= control target key end

     0   :  { %v130_v0 = vmov 0.0   ;;  %vm131_vm0 = vmmov 0   ;;  %vm45_vm1 = vcmask 261120   ;;  %vm98_vm2 = vcmask 257024   ;;  %s170_s1 = inlined_call_operand.vmem [shape: bf16[32,32], index: 1, kind: input, shape index: {}]   ;;  %s171_s0 = inlined_call_operand.vmem [shape: bf16[16,32], index: 0, kind: input, shape index: {}]   ;;  %s172_s2 = inlined_call_operand.vmem [shape: f32[1,32], index: 2, kind: input, shape index: {}]   ;;  %s173_s3 = inlined_call_operand.vmem [shape: bf16[16,32], index: 3, kind: output, shape index: {}]  }
   0x1   :  { %117 = vmatprep.subr.bf16.mxu0 %v130_v0  ;;  %v127_v1 = vld [vmem:[%s170_s1] sm:$0xff]   ;;  %121 = vmatprep.mubr.msk.bf16.mxu0 %vm131_vm0, %v130_v0  ;;  %v128_v2 = vld [vmem:[%s170_s1 + $0x8] sm:$0xff]  }
   0x2   :  { %118 = vmatpush3.bf16.msra.mxu0 %v127_v1  ;;  %v129_v3 = vld [vmem:[%s171_s0] sm:$0xff]  }
   0x3   :  { %119 = vmatprep.subr.bf16.mxu0 %v130_v0  ;;  %v105_v4 = vld [vmem:[%s172_s2] ss:$0 sm:$0xff] }
   0x6   :  { %120 = vmatpush3.bf16.msra.mxu0 %v128_v2 }
   0x9   :  { %122 = vmatmul.mubr.msk.bf16.vlgmr.msra.gmra.mrb[0].mxu0 %vm45_vm1, %v129_v3 }
  0xdc   :  { %v83_v5 = vpop.f32.mrb[0].mxu0 }
  0xdd   :  { %v84_v6 = vadd.f32 %v105_v4, %v83_v5  ;;  %v123_v7 = vpop.f32.mrb[1].mxu0 }
  0xde   :  { %v86_v8 = vpop.f32.mrb[2].mxu0 }
  0xdf   :  { %v112_v9 = vpack.c.bf16 %v84_v6, %v84_v6  ;;  %v87_v10 = vadd.f32 %v105_v4, %v86_v8  ;;  %v124_v11 = vpop.f32.mrb[3].mxu0 }
  0xe1   :  { %99 = vst.msk [vmem:[%s173_s3] sm:$0xf] %vm98_vm2, %v112_v9  ;;  %v113_v12 = vpack.c.bf16 %v87_v10, %v87_v10 }
  0xe3   :  { %100 = vst.msk [vmem:[%s173_s3 + $0x4] sm:$0xf] %vm98_vm2, %v113_v12 }

// kernel: _forward.37
= control target key start
LH: loop header
LB: loop body
LE: loop exit
PB: predicated region body
PF: predicated region fallthrough
CT: control target
= control target key end

     0   :  { %vm58_vm0 = vcmask 130048   ;;  %vm168_vm1 = vcmask 257024   ;;  %s299_s1 = inlined_call_operand.vmem [shape: bf16[16,32], index: 1, kind: input, shape index: {}]   ;;  %s300_s0 = inlined_call_operand.vmem [shape: bf16[64,16], index: 0, kind: input, shape index: {}]   ;;  %s301_s2 = inlined_call_operand.vmem [shape: f32[1,32], index: 2, kind: input, shape index: {}]   ;;  %s302_s3 = inlined_call_operand.vmem [shape: bf16[64,32], index: 3, kind: output, shape index: {}]  }
   0x1   :  { %v224_v0 = vld [vmem:[%s299_s1] sm:$0xff]   ;;  %v226_v2 = vld [vmem:[%s300_s0 + $0x10] sm:$0xff]   ;;  %v227_v3 = vld [vmem:[%s300_s0 + $0x8] sm:$0xff]  }
   0x2   :  { %v225_v1 = vld [vmem:[%s300_s0] sm:$0xff]   ;;  %212 = vmatprep.subr.bf16.mxu0 %v224_v0  ;;  %222 = vmatprep.subr.bf16.mxu1 %v224_v0  ;;  %v228_v4 = vld [vmem:[%s300_s0 + $0x18] sm:$0xff]  }
   0x3   :  { %213 = vmatpush3.bf16.msra.mxu0 %v224_v0  ;;  %223 = vmatpush3.bf16.msra.mxu1 %v224_v0  ;;  %v181_v5 = vld [vmem:[%s301_s2] ss:$0 sm:$0xff] }
   0x4   :  { %214 = vmatprep.mubr.msk.bf16.mxu0 %vm58_vm0, %v225_v1  ;;  %218 = vmatprep.mubr.msk.bf16.mxu1 %vm58_vm0, %v226_v2 }
   0x6   :  { %215 = vmatmul.mubr.msk.bf16.vlgmr.msra.gmra.mrb[0].mxu0 %vm58_vm0, %v227_v3  ;;  %219 = vmatmul.mubr.msk.bf16.vlgmr.msra.gmra.mrb[0].mxu1 %vm58_vm0, %v228_v4 }
  0xd9   :  { %v216_v6 = vpop.f32.mrb[0].mxu0  ;;  %v220_v7 = vpop.f32.mrb[0].mxu1 }
  0xda   :  { %v114_v8 = vadd.f32 %v216_v6, %v181_v5  ;;  %v130_v9 = vadd.f32 %v220_v7, %v181_v5  ;;  %v105_v10 = vpop.f32.mrb[1].mxu0  ;;  %v121_v11 = vpop.f32.mrb[1].mxu1 }
  0xdb   :  { %v106_v12 = vadd.f32 %v181_v5, %v105_v10  ;;  %v122_v13 = vadd.f32 %v181_v5, %v121_v11  ;;  %v217_v14 = vpop.f32.mrb[2].mxu0  ;;  %v221_v15 = vpop.f32.mrb[2].mxu1 }
  0xdc   :  { %v201_v16 = vpack.c.bf16 %v114_v8, %v114_v8  ;;  %v205_v17 = vpack.c.bf16 %v130_v9, %v130_v9  ;;  %v117_v18 = vadd.f32 %v217_v14, %v181_v5  ;;  %v133_v19 = vadd.f32 %v221_v15, %v181_v5  ;;  %v108_v20 = vpop.f32.mrb[3].mxu0  ;;  %v124_v21 = vpop.f32.mrb[3].mxu1 }
  0xdd   :  { %v199_v22 = vpack.c.bf16 %v106_v12, %v106_v12  ;;  %v203_v23 = vpack.c.bf16 %v122_v13, %v122_v13  ;;  %v109_v24 = vadd.f32 %v181_v5, %v108_v20  ;;  %v125_v25 = vadd.f32 %v181_v5, %v124_v21 }
  0xde   :  { %171 = vst.msk [vmem:[%s302_s3 + $0x8] sm:$0xf] %vm168_vm1, %v201_v16  ;;  %175 = vst.msk [vmem:[%s302_s3 + $0x18] sm:$0xf] %vm168_vm1, %v205_v17  ;;  %v202_v26 = vpack.c.bf16 %v117_v18, %v117_v18  ;;  %v206_v27 = vpack.c.bf16 %v133_v19, %v133_v19 }
  0xdf   :  { %169 = vst.msk [vmem:[%s302_s3] sm:$0xf] %vm168_vm1, %v199_v22  ;;  %173 = vst.msk [vmem:[%s302_s3 + $0x10] sm:$0xf] %vm168_vm1, %v203_v23  ;;  %v200_v28 = vpack.c.bf16 %v109_v24, %v109_v24  ;;  %v204_v29 = vpack.c.bf16 %v125_v25, %v125_v25 }
  0xe0   :  { %172 = vst.msk [vmem:[%s302_s3 + $0xc] sm:$0xf] %vm168_vm1, %v202_v26  ;;  %176 = vst.msk [vmem:[%s302_s3 + $0x1c] sm:$0xf] %vm168_vm1, %v206_v27 }
  0xe1   :  { %170 = vst.msk [vmem:[%s302_s3 + $0x4] sm:$0xf] %vm168_vm1, %v200_v28  ;;  %174 = vst.msk [vmem:[%s302_s3 + $0x14] sm:$0xf] %vm168_vm1, %v204_v29 }

// kernel: _forward.38
= control target key start
LH: loop header
LB: loop body
LE: loop exit
PB: predicated region body
PF: predicated region fallthrough
CT: control target
= control target key end

     0   :  { %v775_v0 = vmov 0   ;;  %vm43_vm0 = vcmask 261120   ;;  %v219_v38 = vlaneseq  ;;  %vm282_vm1 = vcmask 64512   ;;  %s1116_s1 = inlined_call_operand.vmem [shape: s32[80,1], index: 1, kind: input, shape index: {}]   ;;  %s1117_s4 = inlined_call_operand.vmem [shape: f32[8,32], index: 4, kind: input, shape index: {}]   ;;  %s1118_s5 = inlined_call_operand.vmem [shape: f32[8,32], index: 5, kind: input, shape index: {}]   ;;  %s1119_s0 = inlined_call_operand.vmem [shape: bf16[80,32], index: 0, kind: input, shape index: {}]   ;;  %s1120_s2 = inlined_call_operand.vmem [shape: f32[1,32], index: 2, kind: input, shape index: {}]   ;;  %s1121_s3 = inlined_call_operand.vmem [shape: f32[1,32], index: 3, kind: input, shape index: {}]   ;;  %s1122_s6 = inlined_call_operand.vmem [shape: bf16[80,32], index: 6, kind: output, shape index: {}]  }
   0x1   :  { %754 = vset.pattern.permute.xlu1 %v775_v0  ;;  %753 = vset.pattern.permute.xlu0 %v775_v0  ;;  %v211_v1 = vld [vmem:[%s1116_s1 + $0x10] sm:$0xff]  ;;  %v209_v2 = vld [vmem:[%s1116_s1] sm:$0xff]  ;;  %v212_v3 = vld [vmem:[%s1116_s1 + $0x18] sm:$0xff]  ;;  %v776_v42 = vmov 0.0   ;;  %vm604_vm12 = vcmask 257024  }
   0x2   :  { %228 = vperm.xlu1 %754, %v211_v1   ;;  %222 = vperm.xlu0 %753, %v209_v2   ;;  %v210_v4 = vld [vmem:[%s1116_s1 + $0x8] sm:$0xff]  ;;  %v281_v5 = vld [vmem:[%s1117_s4] sm:$0xff]  ;;  %v216_v9 = vld [vmem:[%s1116_s1 + $0x38] sm:$0xff]  ;;  %v220_v39 = vand.u32 127, %v219_v38 }
   0x3   :  { %v428_v6 = vld [vmem:[%s1118_s5] sm:$0xff]  ;;  %v214_v7 = vld [vmem:[%s1116_s1 + $0x28] sm:$0xff]  ;;  %717 = vmatprep.subr.mxu0 %v281_v5  ;;  %v215_v10 = vld [vmem:[%s1116_s1 + $0x30] sm:$0xff] }
   0x4   :  { %v213_v8 = vld [vmem:[%s1116_s1 + $0x20] sm:$0xff]  ;;  %734 = vmatprep.subr.mxu1 %v428_v6  ;;  %718 = vmatpush3.msra.mxu0 %v281_v5  ;;  %v218_v11 = vld [vmem:[%s1116_s1 + $0x48] sm:$0xff]  ;;  %v867_v19 = vld [vmem:[%s1119_s0 + $0x10] sm:$0xff]  }
   0x5   :  { %735 = vmatpush3.msra.mxu1 %v428_v6  ;;  %v217_v12 = vld [vmem:[%s1116_s1 + $0x40] sm:$0xff]  ;;  %v857_v15 = vld [vmem:[%s1119_s0 + $0x8] sm:$0xff]   ;;  %v681_v23 = vunpack.c.l.bf16 %v867_v19  ;;  %v880_v24 = vld [vmem:[%s1119_s0 + $0x18] sm:$0xff]   ;;  %v682_v26 = vunpack.c.h.bf16 %v867_v19 }
   0x6   :  { %231 = vperm.xlu1 %754, %v212_v3   ;;  %225 = vperm.xlu0 %753, %v210_v4   ;;  %v851_v13 = vld [vmem:[%s1119_s0] sm:$0xff]   ;;  %v677_v17 = vunpack.c.l.bf16 %v857_v15  ;;  %v678_v21 = vunpack.c.h.bf16 %v857_v15  ;;  %v685_v28 = vunpack.c.l.bf16 %v880_v24  ;;  %v686_v31 = vunpack.c.h.bf16 %v880_v24 }
   0x7   :  { %v673_v14 = vunpack.c.l.bf16 %v851_v13  ;;  %v674_v18 = vunpack.c.h.bf16 %v851_v13  ;;  %v56_v27 = vsel %vm43_vm0, %v681_v23, 0.0  ;;  %v893_v29 = vld [vmem:[%s1119_s0 + $0x20] sm:$0xff]   ;;  %v59_v30 = vsel %vm43_vm0, %v682_v26, 0.0 }
   0x8   :  { %v50_v20 = vsel %vm43_vm0, %v677_v17, 0.0  ;;  %v53_v25 = vsel %vm43_vm0, %v678_v21, 0.0  ;;  %v62_v32 = vsel %vm43_vm0, %v685_v28, 0.0  ;;  %v689_v33 = vunpack.c.l.bf16 %v893_v29 }
   0x9   :  { %v44_v16 = vsel %vm43_vm0, %v673_v14, 0.0  ;;  %v47_v22 = vsel %vm43_vm0, %v674_v18, 0.0  ;;  %v65_v34 = vsel %vm43_vm0, %v686_v31, 0.0  ;;  %v690_v35 = vunpack.c.h.bf16 %v893_v29 }
   0xa   :  { %237 = vperm.xlu1 %754, %v214_v7   ;;  %234 = vperm.xlu0 %753, %v213_v8   ;;  %v68_v36 = vsel %vm43_vm0, %v689_v33, 0.0 }
   0xb   :  { %v71_v37 = vsel %vm43_vm0, %v690_v35, 0.0 }
   0xe   :  { %243 = vperm.xlu1 %754, %v216_v9   ;;  %240 = vperm.xlu0 %753, %v215_v10  }
  0x12   :  { %249 = vperm.xlu1 %754, %v218_v11   ;;  %246 = vperm.xlu0 %753, %v217_v12  }
  0x31   :  { %45 = vadd.xlane.f32.xlu0 %v44_v16 }
  0x35   :  { %51 = vadd.xlane.f32.xlu0 %v50_v20 }
  0x36   :  { %48 = vadd.xlane.f32.xlu1 %v47_v22 }
  0x39   :  { %54 = vadd.xlane.f32.xlu0 %v53_v25 }
  0x3a   :  { %57 = vadd.xlane.f32.xlu1 %v56_v27 }
  0x3d   :  { %60 = vadd.xlane.f32.xlu0 %v59_v30 }
  0x3e   :  { %63 = vadd.xlane.f32.xlu1 %v62_v32 }
  0x41   :  { %66 = vadd.xlane.f32.xlu0 %v65_v34 }
  0x42   :  { %69 = vadd.xlane.f32.xlu1 %v68_v36 }
  0x45   :  { %72 = vadd.xlane.f32.xlu0 %v71_v37 }
  0x81   :  { %v229_v40 = vpop.permute.xlu1 %228  ;;  %v223_v41 = vpop.permute.xlu0 %222 }
  0x82   :  { %vm251_vm2 = vcmp.eq.s32.totalorder %v223_v41, %v220_v39  ;;  %vm253_vm3 = vcmp.eq.s32.totalorder %v229_v40, %v220_v39 }
  0x83   :  { %v621_v43 = vsel %vm251_vm2, 1.0, %v776_v42  ;;  %v623_v47 = vsel %vm253_vm3, 1.0, %v776_v42 }
  0x84   :  { %719 = vmatprep.mubr.msk.f32.mxu0 %vm282_vm1, %v621_v43  ;;  %736 = vmatprep.mubr.msk.f32.mxu1 %vm282_vm1, %v621_v43 }
  0x85   :  { %v232_v44 = vpop.permute.xlu1 %231  ;;  %v226_v45 = vpop.permute.xlu0 %225 }
  0x86   :  { %vm252_vm4 = vcmp.eq.s32.totalorder %v226_v45, %v220_v39  ;;  %vm254_vm5 = vcmp.eq.s32.totalorder %v232_v44, %v220_v39 }
  0x87   :  { %v622_v46 = vsel %vm252_vm4, 1.0, %v776_v42  ;;  %v624_v50 = vsel %vm254_vm5, 1.0, %v776_v42 }
  0x88   :  { %720 = vmatmul.mubr.msk.f32.vlgmr.msra.gmra.mrb[0].mxu0 %vm282_vm1, %v622_v46  ;;  %737 = vmatmul.mubr.msk.f32.vlgmr.msra.gmra.mrb[0].mxu1 %vm282_vm1, %v622_v46 }
  0x89   :  { %v238_v48 = vpop.permute.xlu1 %237  ;;  %722 = vmatprep.mubr.msk.f32.mxu0 %vm282_vm1, %v623_v47  ;;  %739 = vmatprep.mubr.msk.f32.mxu1 %vm282_vm1, %v623_v47  ;;  %v235_v49 = vpop.permute.xlu0 %234 }
  0x8a   :  { %vm255_vm6 = vcmp.eq.s32.totalorder %v235_v49, %v220_v39  ;;  %vm256_vm7 = vcmp.eq.s32.totalorder %v238_v48, %v220_v39 }
  0x8b   :  { %v625_v51 = vsel %vm255_vm6, 1.0, %v776_v42  ;;  %v626_v54 = vsel %vm256_vm7, 1.0, %v776_v42 }
  0x8c   :  { %723 = vmatmul.mubr.msk.f32.gmra.mrb[2].mxu0 %vm282_vm1, %v624_v50  ;;  %740 = vmatmul.mubr.msk.f32.gmra.mrb[2].mxu1 %vm282_vm1, %v624_v50 }
  0x8d   :  { %v244_v52 = vpop.permute.xlu1 %243  ;;  %725 = vmatprep.mubr.msk.f32.mxu0 %vm282_vm1, %v625_v51  ;;  %742 = vmatprep.mubr.msk.f32.mxu1 %vm282_vm1, %v625_v51  ;;  %v241_v53 = vpop.permute.xlu0 %240 }
  0x8e   :  { %vm257_vm8 = vcmp.eq.s32.totalorder %v241_v53, %v220_v39  ;;  %vm258_vm9 = vcmp.eq.s32.totalorder %v244_v52, %v220_v39 }
  0x8f   :  { %v627_v55 = vsel %vm257_vm8, 1.0, %v776_v42  ;;  %v628_v58 = vsel %vm258_vm9, 1.0, %v776_v42 }
  0x90   :  { %726 = vmatmul.mubr.msk.f32.gmra.mrb[4].mxu0 %vm282_vm1, %v626_v54  ;;  %743 = vmatmul.mubr.msk.f32.gmra.mrb[4].mxu1 %vm282_vm1, %v626_v54 }
  0x91   :  { %v250_v56 = vpop.permute.xlu1 %249  ;;  %728 = vmatprep.mubr.msk.f32.mxu0 %vm282_vm1, %v627_v55  ;;  %745 = vmatprep.mubr.msk.f32.mxu1 %vm282_vm1, %v627_v55  ;;  %v247_v57 = vpop.permute.xlu0 %246 }
  0x92   :  { %vm259_vm10 = vcmp.eq.s32.totalorder %v247_v57, %v220_v39  ;;  %vm260_vm11 = vcmp.eq.s32.totalorder %v250_v56, %v220_v39 }
  0x93   :  { %v629_v59 = vsel %vm259_vm10, 1.0, %v776_v42  ;;  %v630_v60 = vsel %vm260_vm11, 1.0, %v776_v42 }
  0x94   :  { %729 = vmatmul.mubr.msk.f32.gmra.mrb[6].mxu0 %vm282_vm1, %v628_v58  ;;  %746 = vmatmul.mubr.msk.f32.gmra.mrb[6].mxu1 %vm282_vm1, %v628_v58 }
  0x95   :  { %731 = vmatprep.mubr.msk.f32.mxu0 %vm282_vm1, %v629_v59  ;;  %748 = vmatprep.mubr.msk.f32.mxu1 %vm282_vm1, %v629_v59 }
  0x98   :  { %732 = vmatmul.mubr.msk.f32.gmra.mrb[8].mxu0 %vm282_vm1, %v630_v60  ;;  %749 = vmatmul.mubr.msk.f32.gmra.mrb[8].mxu1 %vm282_vm1, %v630_v60 }
  0xbe   :  { %v46_v61 = vpop.xlane.xlu0 %45 }
  0xbf   :  { %v75_v62 = vmul.f32 0.03125, %v46_v61 }
  0xc1   :  { %v935_v63 = vsub.f32 %v673_v14, %v75_v62 }
  0xc2   :  { %v52_v0 = vpop.xlane.xlu0 %51 }
  0xc3   :  { %v77_v1 = vmul.f32 0.03125, %v52_v0  ;;  %v49_v2 = vpop.xlane.xlu1 %48  ;;  %v95_v3 = vmul.f32 %v935_v63, %v935_v63 }
  0xc4   :  { %v76_v4 = vmul.f32 0.03125, %v49_v2 }
  0xc5   :  { %v941_v5 = vsub.f32 %v677_v17, %v77_v1  ;;  %v105_v6 = vsel %vm43_vm0, %v95_v3, 0.0 }
  0xc6   :  { %v946_v7 = vsub.f32 %v674_v18, %v76_v4  ;;  %106 = vadd.xlane.f32.xlu1 %v105_v6  ;;  %v55_v8 = vpop.xlane.xlu0 %54 }
  0xc7   :  { %v58_v9 = vpop.xlane.xlu1 %57  ;;  %v78_v10 = vmul.f32 0.03125, %v55_v8  ;;  %v97_v11 = vmul.f32 %v941_v5, %v941_v5 }
  0xc8   :  { %v79_v12 = vmul.f32 0.03125, %v58_v9  ;;  %v96_v14 = vmul.f32 %v946_v7, %v946_v7 }
  0xc9   :  { %v954_v16 = vsub.f32 %v678_v21, %v78_v10  ;;  %v111_v17 = vsel %vm43_vm0, %v97_v11, 0.0 }
  0xca   :  { %v959_v13 = vsub.f32 %v681_v23, %v79_v12  ;;  %112 = vadd.xlane.f32.xlu1 %v111_v17  ;;  %v108_v18 = vsel %vm43_vm0, %v96_v14, 0.0  ;;  %v61_v20 = vpop.xlane.xlu0 %60  ;;  %v1014_v12 = vld [vmem:[%s1120_s2] ss:$0 sm:$0xff] }
  0xcb   :  { %v64_v22 = vpop.xlane.xlu1 %63  ;;  %109 = vadd.xlane.f32.xlu0 %v108_v18  ;;  %v80_v25 = vmul.f32 0.03125, %v61_v20  ;;  %v98_v27 = vmul.f32 %v954_v16, %v954_v16  ;;  %v1019_v18 = vld [vmem:[%s1121_s3] ss:$0 sm:$0xff] }
  0xcc   :  { %v81_v30 = vmul.f32 0.03125, %v64_v22  ;;  %v99_v15 = vmul.f32 %v959_v13, %v959_v13 }
  0xcd   :  { %v968_v21 = vsub.f32 %v682_v26, %v80_v25  ;;  %v114_v23 = vsel %vm43_vm0, %v98_v27, 0.0 }
  0xce   :  { %v973_v32 = vsub.f32 %v685_v28, %v81_v30  ;;  %v117_v34 = vsel %vm43_vm0, %v99_v15, 0.0  ;;  %v67_v36 = vpop.xlane.xlu0 %66 }
  0xcf   :  { %v70_v37 = vpop.xlane.xlu1 %69  ;;  %118 = vadd.xlane.f32.xlu1 %v117_v34  ;;  %115 = vadd.xlane.f32.xlu0 %v114_v23  ;;  %v82_v38 = vmul.f32 0.03125, %v67_v36  ;;  %v100_v39 = vmul.f32 %v968_v21, %v968_v21 }
  0xd0   :  { %v83_v40 = vmul.f32 0.03125, %v70_v37  ;;  %v101_v19 = vmul.f32 %v973_v32, %v973_v32 }
  0xd1   :  { %v982_v26 = vsub.f32 %v686_v31, %v82_v38  ;;  %v120_v28 = vsel %vm43_vm0, %v100_v39, 0.0 }
  0xd2   :  { %v987_v41 = vsub.f32 %v689_v33, %v83_v40  ;;  %v123_v42 = vsel %vm43_vm0, %v101_v19, 0.0  ;;  %v73_v43 = vpop.xlane.xlu0 %72 }
  0xd3   :  { %124 = vadd.xlane.f32.xlu1 %v123_v42  ;;  %121 = vadd.xlane.f32.xlu0 %v120_v28  ;;  %v84_v44 = vmul.f32 0.03125, %v73_v43  ;;  %v102_v45 = vmul.f32 %v982_v26, %v982_v26 }
  0xd4   :  { %v103_v24 = vmul.f32 %v987_v41, %v987_v41 }
  0xd5   :  { %v996_v31 = vsub.f32 %v690_v35, %v84_v44  ;;  %v126_v46 = vsel %vm43_vm0, %v102_v45, 0.0 }
  0xd6   :  { %v129_v33 = vsel %vm43_vm0, %v103_v24, 0.0 }
  0xd7   :  { %130 = vadd.xlane.f32.xlu1 %v129_v33  ;;  %127 = vadd.xlane.f32.xlu0 %v126_v46  ;;  %v104_v47 = vmul.f32 %v996_v31, %v996_v31 }
  0xd9   :  { %v132_v48 = vsel %vm43_vm0, %v104_v47, 0.0 }
  0xdb   :  { %133 = vadd.xlane.f32.xlu0 %v132_v48 }
 0x153   :  { %v107_v49 = vpop.xlane.xlu1 %106 }
 0x154   :  { %v135_v50 = vmul.f32 0.03125, %v107_v49 }
 0x156   :  { %v145_v51 = vadd.f32 1e-05, %v135_v50 }
 0x157   :  { %v113_v52 = vpop.xlane.xlu1 %112 }
 0x158   :  { %755 = vrsqrt.f32 %v145_v51  ;;  %v137_v29 = vmul.f32 0.03125, %v113_v52  ;;  %v110_v35 = vpop.xlane.xlu0 %109 }
 0x159   :  { %v136_v53 = vmul.f32 0.03125, %v110_v35 }
 0x15a   :  { %v147_v54 = vadd.f32 1e-05, %v137_v29 }
 0x15b   :  { %v146_v55 = vadd.f32 1e-05, %v136_v53  ;;  %v1003_v56 = vpop.f32.mrb[0].mxu0  ;;  %v1005_v57 = vpop.f32.mrb[0].mxu1 }
 0x15c   :  { %757 = vrsqrt.f32 %v147_v54  ;;  %v379_v58 = vpop.f32.mrb[1].mxu0  ;;  %v495_v59 = vpop.f32.mrb[1].mxu1 }
 0x15d   :  { %759 = vrsqrt.f32 %v146_v55  ;;  %v119_v60 = vpop.xlane.xlu1 %118  ;;  %v116_v61 = vpop.xlane.xlu0 %115 }
 0x15e   :  { %v139_v62 = vmul.f32 0.03125, %v119_v60  ;;  %v138_v0 = vmul.f32 0.03125, %v116_v61 }
 0x15f   :  { %v1007_v1 = vpop.f32.mrb[2].mxu0  ;;  %v1009_v2 = vpop.f32.mrb[2].mxu1 }
 0x160   :  { %v149_v3 = vadd.f32 1e-05, %v139_v62  ;;  %v148_v4 = vadd.f32 1e-05, %v138_v0  ;;  %v389_v6 = vpop.f32.mrb[3].mxu0  ;;  %v505_v8 = vpop.f32.mrb[3].mxu1 }
 0x161   :  { %v125_v9 = vpop.xlane.xlu1 %124  ;;  %v122_v10 = vpop.xlane.xlu0 %121 }
 0x162   :  { %v756_v11 = vpop.eup %755  ;;  %761 = vrsqrt.f32 %v149_v3  ;;  %v141_v14 = vmul.f32 0.03125, %v125_v9  ;;  %v140_v17 = vmul.f32 0.03125, %v122_v10 }
 0x163   :  { %v165_v20 = vmul.f32 %v756_v11, %v935_v63  ;;  %763 = vrsqrt.f32 %v148_v4  ;;  %v1022_v22 = vpop.f32.mrb[4].mxu0  ;;  %v1024_v25 = vpop.f32.mrb[4].mxu1 }
 0x164   :  { %v151_v27 = vadd.f32 1e-05, %v141_v14  ;;  %v150_v30 = vadd.f32 1e-05, %v140_v17  ;;  %v399_v15 = vpop.f32.mrb[5].mxu0  ;;  %v1026_v23 = vpop.f32.mrb[5].mxu1 }
 0x165   :  { %v182_v34 = vmul.f32 %v1014_v12, %v165_v20  ;;  %v131_v36 = vpop.xlane.xlu1 %130  ;;  %v128_v37 = vpop.xlane.xlu0 %127 }
 0x166   :  { %v758_v38 = vpop.eup %757  ;;  %765 = vrsqrt.f32 %v151_v27  ;;  %v143_v39 = vmul.f32 0.03125, %v131_v36  ;;  %v142_v40 = vmul.f32 0.03125, %v128_v37 }
 0x167   :  { %v760_v19 = vpop.eup %759  ;;  %v199_v63 = vadd.f32 %v1019_v18, %v182_v34  ;;  %v167_v28 = vmul.f32 %v758_v38, %v941_v5  ;;  %767 = vrsqrt.f32 %v150_v30  ;;  %v1031_v42 = vpop.f32.mrb[6].mxu0 }
 0x168   :  { %v1033_v43 = vpop.f32.mrb[6].mxu1  ;;  %v166_v44 = vmul.f32 %v760_v19, %v946_v7  ;;  %v153_v45 = vadd.f32 1e-05, %v143_v39  ;;  %v152_v24 = vadd.f32 1e-05, %v142_v40  ;;  %v409_v46 = vpop.f32.mrb[7].mxu0 }
 0x169   :  { %v525_v33 = vpop.f32.mrb[7].mxu1  ;;  %v544_v47 = vmul.f32 %v379_v58, %v199_v63  ;;  %v184_v48 = vmul.f32 %v1014_v12, %v167_v28  ;;  %v134_v49 = vpop.xlane.xlu0 %133 }
 0x16a   :  { %v183_v50 = vmul.f32 %v1014_v12, %v166_v44  ;;  %769 = vrsqrt.f32 %v153_v45  ;;  %v144_v51 = vmul.f32 0.03125, %v134_v49 }
 0x16b   :  { %v554_v5 = vadd.f32 %v544_v47, %v495_v59  ;;  %v201_v52 = vadd.f32 %v1019_v18, %v184_v48  ;;  %771 = vrsqrt.f32 %v152_v24  ;;  %v1039_v29 = vpop.f32.mrb[8].mxu0  ;;  %v1041_v35 = vpop.f32.mrb[8].mxu1 }
 0x16c   :  { %v762_v7 = vpop.eup %761  ;;  %v200_v53 = vadd.f32 %v1019_v18, %v183_v50  ;;  %v154_v54 = vadd.f32 1e-05, %v144_v51  ;;  %v419_v55 = vpop.f32.mrb[9].mxu0 }
 0x16d   :  { %v535_v58 = vpop.f32.mrb[9].mxu1  ;;  %v764_v60 = vpop.eup %763  ;;  %v661_v61 = vpack.c.bf16 %v554_v5, %v554_v5  ;;  %v546_v62 = vmul.f32 %v389_v6, %v201_v52  ;;  %v169_v0 = vmul.f32 %v762_v7, %v959_v13 }
 0x16e   :  { %v545_v59 = vmul.f32 %v1003_v56, %v200_v53  ;;  %v168_v3 = vmul.f32 %v764_v60, %v954_v16  ;;  %773 = vrsqrt.f32 %v154_v54 }
 0x16f   :  { %605 = vst.msk [vmem:[%s1122_s6] sm:$0xf] %vm604_vm12, %v661_v61  ;;  %v556_v4 = vadd.f32 %v546_v62, %v505_v8  ;;  %v186_v9 = vmul.f32 %v1014_v12, %v169_v0 }
 0x170   :  { %v766_v10 = vpop.eup %765  ;;  %v555_v11 = vadd.f32 %v1005_v57, %v545_v59  ;;  %v185_v6 = vmul.f32 %v1014_v12, %v168_v3 }
 0x171   :  { %v768_v14 = vpop.eup %767  ;;  %v663_v13 = vpack.c.bf16 %v556_v4, %v556_v4  ;;  %v203_v56 = vadd.f32 %v1019_v18, %v186_v9  ;;  %v171_v16 = vmul.f32 %v766_v10, %v973_v32 }
 0x172   :  { %v662_v17 = vpack.c.bf16 %v555_v11, %v555_v11  ;;  %v202_v20 = vadd.f32 %v1019_v18, %v185_v6  ;;  %v170_v27 = vmul.f32 %v768_v14, %v968_v21 }
 0x173   :  { %607 = vst.msk [vmem:[%s1122_s6 + $0x8] sm:$0xf] %vm604_vm12, %v663_v13  ;;  %v548_v8 = vmul.f32 %v399_v15, %v203_v56  ;;  %v188_v57 = vmul.f32 %v1014_v12, %v171_v16 }
 0x174   :  { %v770_v30 = vpop.eup %769  ;;  %606 = vst.msk [vmem:[%s1122_s6 + $0x4] sm:$0xf] %vm604_vm12, %v662_v17  ;;  %v547_v32 = vmul.f32 %v1007_v1, %v202_v20  ;;  %v187_v34 = vmul.f32 %v1014_v12, %v170_v27 }
 0x175   :  { %v772_v36 = vpop.eup %771  ;;  %v558_v21 = vadd.f32 %v548_v8, %v1026_v23  ;;  %v205_v37 = vadd.f32 %v1019_v18, %v188_v57  ;;  %v173_v38 = vmul.f32 %v770_v30, %v987_v41 }
 0x176   :  { %v557_v15 = vadd.f32 %v1009_v2, %v547_v32  ;;  %v204_v39 = vadd.f32 %v1019_v18, %v187_v34  ;;  %v172_v40 = vmul.f32 %v772_v36, %v982_v26 }
 0x177   :  { %v665_v19 = vpack.c.bf16 %v558_v21, %v558_v21  ;;  %v550_v63 = vmul.f32 %v409_v46, %v205_v37  ;;  %v190_v28 = vmul.f32 %v1014_v12, %v173_v38 }
 0x178   :  { %v774_v1 = vpop.eup %773  ;;  %v664_v44 = vpack.c.bf16 %v557_v15, %v557_v15  ;;  %v549_v45 = vmul.f32 %v1022_v22, %v204_v39  ;;  %v189_v23 = vmul.f32 %v1014_v12, %v172_v40 }
 0x179   :  { %609 = vst.msk [vmem:[%s1122_s6 + $0x10] sm:$0xf] %vm604_vm12, %v665_v19  ;;  %v560_v41 = vadd.f32 %v550_v63, %v525_v33  ;;  %v174_v2 = vmul.f32 %v774_v1, %v996_v31  ;;  %v207_v26 = vadd.f32 %v1019_v18, %v190_v28 }
 0x17a   :  { %608 = vst.msk [vmem:[%s1122_s6 + $0xc] sm:$0xf] %vm604_vm12, %v664_v44  ;;  %v559_v24 = vadd.f32 %v1024_v25, %v549_v45  ;;  %v206_v22 = vadd.f32 %v1019_v18, %v189_v23 }
 0x17b   :  { %v667_v46 = vpack.c.bf16 %v560_v41, %v560_v41  ;;  %v191_v47 = vmul.f32 %v1014_v12, %v174_v2  ;;  %v552_v48 = vmul.f32 %v419_v55, %v207_v26 }
 0x17c   :  { %v666_v49 = vpack.c.bf16 %v559_v24, %v559_v24  ;;  %v551_v33 = vmul.f32 %v1031_v42, %v206_v22 }
 0x17d   :  { %611 = vst.msk [vmem:[%s1122_s6 + $0x18] sm:$0xf] %vm604_vm12, %v667_v46  ;;  %v208_v31 = vadd.f32 %v1019_v18, %v191_v47  ;;  %v562_v50 = vadd.f32 %v552_v48, %v535_v58 }
 0x17e   :  { %610 = vst.msk [vmem:[%s1122_s6 + $0x14] sm:$0xf] %vm604_vm12, %v666_v49  ;;  %v561_v25 = vadd.f32 %v1033_v43, %v551_v33 }
 0x17f   :  { %v553_v12 = vmul.f32 %v1039_v29, %v208_v31  ;;  %v669_v51 = vpack.c.bf16 %v562_v50, %v562_v50 }
 0x180   :  { %v668_v5 = vpack.c.bf16 %v561_v25, %v561_v25 }
 0x181   :  { %v563_v42 = vadd.f32 %v1041_v35, %v553_v12  ;;  %613 = vst.msk [vmem:[%s1122_s6 + $0x20] sm:$0xf] %vm604_vm12, %v669_v51 }
 0x182   :  { %612 = vst.msk [vmem:[%s1122_s6 + $0x1c] sm:$0xf] %vm604_vm12, %v668_v5 }
 0x183   :  { %v670_v18 = vpack.c.bf16 %v563_v42, %v563_v42 }
 0x185   :  { %614 = vst.msk [vmem:[%s1122_s6 + $0x24] sm:$0xf] %vm604_vm12, %v670_v18 }

// kernel: _forward.39
= control target key start
LH: loop header
LB: loop body
LE: loop exit
PB: predicated region body
PF: predicated region fallthrough
CT: control target
= control target key end

     0   :  { %v698_v0 = vmov 0.0   ;;  %vm699_vm0 = vmmov 0   ;;  %vm72_vm1 = vcmask 261120   ;;  %vm201_vm2 = vcmask 257024   ;;  %s918_s1 = inlined_call_operand.vmem [shape: bf16[32,32], index: 1, kind: input, shape index: {}]   ;;  %s919_s0 = inlined_call_operand.vmem [shape: bf16[80,32], index: 0, kind: input, shape index: {}]   ;;  %s920_s3 = inlined_call_operand.vmem [shape: bf16[32,32], index: 3, kind: input, shape index: {}]   ;;  %s921_s2 = inlined_call_operand.vmem [shape: bf16[32,32], index: 2, kind: input, shape index: {}]   ;;  %s922_s4 = inlined_call_operand.vmem [shape: bf16[80,32], index: 4, kind: output, shape index: {0}]   ;;  %s923_s5 = inlined_call_operand.vmem [shape: bf16[80,32], index: 5, kind: output, shape index: {1}]   ;;  %s924_s6 = inlined_call_operand.vmem [shape: bf16[80,32], index: 6, kind: output, shape index: {2}]  }
   0x1   :  { %609 = vmatprep.subr.bf16.mxu0 %v698_v0  ;;  %v687_v1 = vld [vmem:[%s918_s1] sm:$0xff]   ;;  %681 = vmatprep.subr.bf16.mxu1 %v698_v0  ;;  %v688_v2 = vld [vmem:[%s918_s1 + $0x8] sm:$0xff]   ;;  %v691_v4 = vld [vmem:[%s919_s0 + $0x18] sm:$0xff]  }
   0x2   :  { %613 = vmatprep.mubr.msk.bf16.mxu0 %vm699_vm0, %v698_v0  ;;  %625 = vmatprep.mubr.msk.bf16.mxu1 %vm699_vm0, %v698_v0  ;;  %v689_v3 = vld [vmem:[%s919_s0] sm:$0xff]   ;;  %v694_v7 = vld [vmem:[%s920_s3 + $0x8] sm:$0xff]   ;;  %v696_v11 = vld [vmem:[%s919_s0 + $0x10] sm:$0xff]  }
   0x3   :  { %610 = vmatpush3.bf16.msra.mxu0 %v687_v1  ;;  %683 = vmatpush3.bf16.msra.mxu1 %v687_v1  ;;  %v690_v5 = vld [vmem:[%s920_s3] sm:$0xff]   ;;  %v697_v8 = vld [vmem:[%s921_s2 + $0x8] sm:$0xff]  }
   0x4   :  { %611 = vmatprep.subr.bf16.mxu0 %v698_v0  ;;  %682 = vmatprep.subr.bf16.mxu1 %v698_v0  ;;  %v693_v6 = vld [vmem:[%s921_s2] sm:$0xff]   ;;  %v692_v9 = vld [vmem:[%s919_s0 + $0x8] sm:$0xff]  }
   0x5   :  { %v695_v10 = vld [vmem:[%s919_s0 + $0x20] sm:$0xff]  }
   0x7   :  { %612 = vmatpush3.bf16.msra.mxu0 %v688_v2  ;;  %684 = vmatpush3.bf16.msra.mxu1 %v688_v2 }
   0x8   :  { %657 = vmatprep.subr.bf16.mxu0 %v698_v0  ;;  %633 = vmatprep.subr.bf16.mxu1 %v698_v0 }
   0xa   :  { %614 = vmatmul.mubr.msk.bf16.vlgmr.msra.gmra.mrb[0].mxu0 %vm72_vm1, %v689_v3  ;;  %626 = vmatmul.mubr.msk.bf16.vlgmr.msra.gmra.mrb[0].mxu1 %vm72_vm1, %v691_v4 }
   0xb   :  { %658 = vmatpush3.bf16.msra.mxu0 %v690_v5  ;;  %617 = vmatprep.mubr.msk.bf16.mxu0 %vm699_vm0, %v698_v0 }
   0xc   :  { %634 = vmatpush3.bf16.msra.mxu1 %v693_v6  ;;  %659 = vmatprep.subr.bf16.mxu0 %v698_v0 }
   0xd   :  { %629 = vmatprep.mubr.msk.bf16.mxu1 %vm699_vm0, %v698_v0  ;;  %635 = vmatprep.subr.bf16.mxu1 %v698_v0 }
   0xf   :  { %660 = vmatpush3.bf16.msra.mxu0 %v694_v7 }
  0x10   :  { %636 = vmatpush3.bf16.msra.mxu1 %v697_v8 }
  0x12   :  { %618 = vmatmul.mubr.msk.bf16.gmra.mrb[4].mxu0 %vm72_vm1, %v692_v9  ;;  %630 = vmatmul.mubr.msk.bf16.gmra.mrb[4].mxu1 %vm72_vm1, %v695_v10 }
  0x13   :  { %621 = vmatprep.mubr.msk.bf16.mxu0 %vm699_vm0, %v698_v0  ;;  %637 = vmatprep.mubr.msk.bf16.mxu1 %vm699_vm0, %v698_v0 }
  0x1a   :  { %622 = vmatmul.mubr.msk.bf16.gmra.mrb[8].mxu0 %vm72_vm1, %v696_v11  ;;  %638 = vmatmul.mubr.msk.bf16.vlgmr.msra.gmra.mrb[8].mxu1 %vm72_vm1, %v689_v3 }
  0x1b   :  { %661 = vmatprep.mubr.msk.bf16.mxu0 %vm699_vm0, %v698_v0  ;;  %641 = vmatprep.mubr.msk.bf16.mxu1 %vm699_vm0, %v698_v0 }
  0x22   :  { %662 = vmatmul.mubr.msk.bf16.vlgmr.msra.gmra.mrb[12].mxu0 %vm72_vm1, %v689_v3  ;;  %642 = vmatmul.mubr.msk.bf16.gmra.mrb[12].mxu1 %vm72_vm1, %v692_v9 }
  0x23   :  { %665 = vmatprep.mubr.msk.bf16.mxu0 %vm699_vm0, %v698_v0  ;;  %645 = vmatprep.mubr.msk.bf16.mxu1 %vm699_vm0, %v698_v0 }
  0x2a   :  { %666 = vmatmul.mubr.msk.bf16.gmra.mrb[16].mxu0 %vm72_vm1, %v692_v9  ;;  %646 = vmatmul.mubr.msk.bf16.gmra.mrb[16].mxu1 %vm72_vm1, %v696_v11 }
  0x2b   :  { %669 = vmatprep.mubr.msk.bf16.mxu0 %vm699_vm0, %v698_v0  ;;  %649 = vmatprep.mubr.msk.bf16.mxu1 %vm699_vm0, %v698_v0 }
  0x32   :  { %670 = vmatmul.mubr.msk.bf16.gmra.mrb[20].mxu0 %vm72_vm1, %v696_v11  ;;  %650 = vmatmul.mubr.msk.bf16.gmra.mrb[20].mxu1 %vm72_vm1, %v691_v4 }
  0x33   :  { %673 = vmatprep.mubr.msk.bf16.mxu0 %vm699_vm0, %v698_v0  ;;  %653 = vmatprep.mubr.msk.bf16.mxu1 %vm699_vm0, %v698_v0 }
  0x3a   :  { %674 = vmatmul.mubr.msk.bf16.gmra.mrb[24].mxu0 %vm72_vm1, %v691_v4  ;;  %654 = vmatmul.mubr.msk.bf16.gmra.mrb[24].mxu1 %vm72_vm1, %v695_v10 }
  0x3b   :  { %677 = vmatprep.mubr.msk.bf16.mxu0 %vm699_vm0, %v698_v0 }
  0x42   :  { %678 = vmatmul.mubr.msk.bf16.gmra.mrb[28].mxu0 %vm72_vm1, %v695_v10 }
  0xdd   :  { %v122_v12 = vpop.f32.mrb[0].mxu0  ;;  %v146_v13 = vpop.f32.mrb[0].mxu1 }
  0xde   :  { %v558_v14 = vpack.c.bf16 %v122_v12, %v122_v12  ;;  %v615_v15 = vpop.f32.mrb[1].mxu0  ;;  %v564_v16 = vpack.c.bf16 %v146_v13, %v146_v13  ;;  %v627_v17 = vpop.f32.mrb[1].mxu1 }
  0xdf   :  { %v125_v18 = vpop.f32.mrb[2].mxu0  ;;  %v149_v19 = vpop.f32.mrb[2].mxu1 }
  0xe0   :  { %202 = vst.msk [vmem:[%s922_s4] sm:$0xf] %vm201_vm2, %v558_v14  ;;  %v559_v20 = vpack.c.bf16 %v125_v18, %v125_v18  ;;  %v616_v21 = vpop.f32.mrb[3].mxu0  ;;  %208 = vst.msk [vmem:[%s922_s4 + $0x18] sm:$0xf] %vm201_vm2, %v564_v16  ;;  %v565_v22 = vpack.c.bf16 %v149_v19, %v149_v19  ;;  %v628_v23 = vpop.f32.mrb[3].mxu1 }
  0xe2   :  { %203 = vst.msk [vmem:[%s922_s4 + $0x4] sm:$0xf] %vm201_vm2, %v559_v20  ;;  %209 = vst.msk [vmem:[%s922_s4 + $0x1c] sm:$0xf] %vm201_vm2, %v565_v22 }
  0xe5   :  { %v130_v24 = vpop.f32.mrb[4].mxu0  ;;  %v154_v25 = vpop.f32.mrb[4].mxu1 }
  0xe6   :  { %v560_v26 = vpack.c.bf16 %v130_v24, %v130_v24  ;;  %v619_v27 = vpop.f32.mrb[5].mxu0  ;;  %v566_v28 = vpack.c.bf16 %v154_v25, %v154_v25  ;;  %v631_v29 = vpop.f32.mrb[5].mxu1 }
  0xe7   :  { %v133_v30 = vpop.f32.mrb[6].mxu0  ;;  %v157_v31 = vpop.f32.mrb[6].mxu1 }
  0xe8   :  { %204 = vst.msk [vmem:[%s922_s4 + $0x8] sm:$0xf] %vm201_vm2, %v560_v26  ;;  %v561_v32 = vpack.c.bf16 %v133_v30, %v133_v30  ;;  %v620_v33 = vpop.f32.mrb[7].mxu0  ;;  %210 = vst.msk [vmem:[%s922_s4 + $0x20] sm:$0xf] %vm201_vm2, %v566_v28  ;;  %v567_v34 = vpack.c.bf16 %v157_v31, %v157_v31  ;;  %v632_v35 = vpop.f32.mrb[7].mxu1 }
  0xea   :  { %205 = vst.msk [vmem:[%s922_s4 + $0xc] sm:$0xf] %vm201_vm2, %v561_v32  ;;  %211 = vst.msk [vmem:[%s922_s4 + $0x24] sm:$0xf] %vm201_vm2, %v567_v34 }
  0xed   :  { %v138_v36 = vpop.f32.mrb[8].mxu0  ;;  %v262_v37 = vpop.f32.mrb[8].mxu1 }
  0xee   :  { %v562_v38 = vpack.c.bf16 %v138_v36, %v138_v36  ;;  %v623_v39 = vpop.f32.mrb[9].mxu0  ;;  %v568_v40 = vpack.c.bf16 %v262_v37, %v262_v37  ;;  %v639_v41 = vpop.f32.mrb[9].mxu1 }
  0xef   :  { %v141_v42 = vpop.f32.mrb[10].mxu0  ;;  %v265_v43 = vpop.f32.mrb[10].mxu1 }
  0xf0   :  { %206 = vst.msk [vmem:[%s922_s4 + $0x10] sm:$0xf] %vm201_vm2, %v562_v38  ;;  %v563_v44 = vpack.c.bf16 %v141_v42, %v141_v42  ;;  %v624_v45 = vpop.f32.mrb[11].mxu0  ;;  %341 = vst.msk [vmem:[%s923_s5] sm:$0xf] %vm201_vm2, %v568_v40  ;;  %v569_v46 = vpack.c.bf16 %v265_v43, %v265_v43  ;;  %v640_v47 = vpop.f32.mrb[11].mxu1 }
  0xf2   :  { %207 = vst.msk [vmem:[%s922_s4 + $0x14] sm:$0xf] %vm201_vm2, %v563_v44  ;;  %342 = vst.msk [vmem:[%s923_s5 + $0x4] sm:$0xf] %vm201_vm2, %v569_v46 }
  0xf5   :  { %v401_v48 = vpop.f32.mrb[12].mxu0  ;;  %v270_v49 = vpop.f32.mrb[12].mxu1 }
  0xf6   :  { %v578_v50 = vpack.c.bf16 %v401_v48, %v401_v48  ;;  %v663_v51 = vpop.f32.mrb[13].mxu0  ;;  %v570_v52 = vpack.c.bf16 %v270_v49, %v270_v49  ;;  %v643_v53 = vpop.f32.mrb[13].mxu1 }
  0xf7   :  { %v404_v54 = vpop.f32.mrb[14].mxu0  ;;  %v273_v55 = vpop.f32.mrb[14].mxu1 }
  0xf8   :  { %480 = vst.msk [vmem:[%s924_s6] sm:$0xf] %vm201_vm2, %v578_v50  ;;  %v579_v56 = vpack.c.bf16 %v404_v54, %v404_v54  ;;  %v664_v57 = vpop.f32.mrb[15].mxu0  ;;  %343 = vst.msk [vmem:[%s923_s5 + $0x8] sm:$0xf] %vm201_vm2, %v570_v52  ;;  %v571_v58 = vpack.c.bf16 %v273_v55, %v273_v55  ;;  %v644_v59 = vpop.f32.mrb[15].mxu1 }
  0xfa   :  { %481 = vst.msk [vmem:[%s924_s6 + $0x4] sm:$0xf] %vm201_vm2, %v579_v56  ;;  %344 = vst.msk [vmem:[%s923_s5 + $0xc] sm:$0xf] %vm201_vm2, %v571_v58 }
  0xfd   :  { %v409_v60 = vpop.f32.mrb[16].mxu0  ;;  %v278_v61 = vpop.f32.mrb[16].mxu1 }
  0xfe   :  { %v580_v62 = vpack.c.bf16 %v409_v60, %v409_v60  ;;  %v667_v63 = vpop.f32.mrb[17].mxu0  ;;  %v572_v0 = vpack.c.bf16 %v278_v61, %v278_v61  ;;  %v647_v1 = vpop.f32.mrb[17].mxu1 }
  0xff   :  { %v412_v2 = vpop.f32.mrb[18].mxu0  ;;  %v281_v3 = vpop.f32.mrb[18].mxu1 }
 0x100   :  { %482 = vst.msk [vmem:[%s924_s6 + $0x8] sm:$0xf] %vm201_vm2, %v580_v62  ;;  %v581_v4 = vpack.c.bf16 %v412_v2, %v412_v2  ;;  %v668_v5 = vpop.f32.mrb[19].mxu0  ;;  %345 = vst.msk [vmem:[%s923_s5 + $0x10] sm:$0xf] %vm201_vm2, %v572_v0  ;;  %v573_v6 = vpack.c.bf16 %v281_v3, %v281_v3  ;;  %v648_v7 = vpop.f32.mrb[19].mxu1 }
 0x102   :  { %483 = vst.msk [vmem:[%s924_s6 + $0xc] sm:$0xf] %vm201_vm2, %v581_v4  ;;  %346 = vst.msk [vmem:[%s923_s5 + $0x14] sm:$0xf] %vm201_vm2, %v573_v6 }
 0x105   :  { %v417_v8 = vpop.f32.mrb[20].mxu0  ;;  %v286_v9 = vpop.f32.mrb[20].mxu1 }
 0x106   :  { %v582_v10 = vpack.c.bf16 %v417_v8, %v417_v8  ;;  %v671_v11 = vpop.f32.mrb[21].mxu0  ;;  %v574_v12 = vpack.c.bf16 %v286_v9, %v286_v9  ;;  %v651_v13 = vpop.f32.mrb[21].mxu1 }
 0x107   :  { %v420_v14 = vpop.f32.mrb[22].mxu0  ;;  %v289_v15 = vpop.f32.mrb[22].mxu1 }
 0x108   :  { %484 = vst.msk [vmem:[%s924_s6 + $0x10] sm:$0xf] %vm201_vm2, %v582_v10  ;;  %v583_v16 = vpack.c.bf16 %v420_v14, %v420_v14  ;;  %v672_v17 = vpop.f32.mrb[23].mxu0  ;;  %347 = vst.msk [vmem:[%s923_s5 + $0x18] sm:$0xf] %vm201_vm2, %v574_v12  ;;  %v575_v18 = vpack.c.bf16 %v289_v15, %v289_v15  ;;  %v652_v19 = vpop.f32.mrb[23].mxu1 }
 0x10a   :  { %485 = vst.msk [vmem:[%s924_s6 + $0x14] sm:$0xf] %vm201_vm2, %v583_v16  ;;  %348 = vst.msk [vmem:[%s923_s5 + $0x1c] sm:$0xf] %vm201_vm2, %v575_v18 }
 0x10d   :  { %v425_v20 = vpop.f32.mrb[24].mxu0  ;;  %v294_v21 = vpop.f32.mrb[24].mxu1 }
 0x10e   :  { %v584_v22 = vpack.c.bf16 %v425_v20, %v425_v20  ;;  %v675_v23 = vpop.f32.mrb[25].mxu0  ;;  %v576_v24 = vpack.c.bf16 %v294_v21, %v294_v21  ;;  %v655_v25 = vpop.f32.mrb[25].mxu1 }
 0x10f   :  { %v428_v26 = vpop.f32.mrb[26].mxu0  ;;  %v297_v27 = vpop.f32.mrb[26].mxu1 }
 0x110   :  { %486 = vst.msk [vmem:[%s924_s6 + $0x18] sm:$0xf] %vm201_vm2, %v584_v22  ;;  %v585_v28 = vpack.c.bf16 %v428_v26, %v428_v26  ;;  %v676_v29 = vpop.f32.mrb[27].mxu0  ;;  %349 = vst.msk [vmem:[%s923_s5 + $0x20] sm:$0xf] %vm201_vm2, %v576_v24  ;;  %v577_v30 = vpack.c.bf16 %v297_v27, %v297_v27  ;;  %v656_v31 = vpop.f32.mrb[27].mxu1 }
 0x112   :  { %487 = vst.msk [vmem:[%s924_s6 + $0x1c] sm:$0xf] %vm201_vm2, %v585_v28  ;;  %350 = vst.msk [vmem:[%s923_s5 + $0x24] sm:$0xf] %vm201_vm2, %v577_v30 }
 0x115   :  { %v433_v32 = vpop.f32.mrb[28].mxu0 }
 0x116   :  { %v586_v33 = vpack.c.bf16 %v433_v32, %v433_v32  ;;  %v679_v34 = vpop.f32.mrb[29].mxu0 }
 0x117   :  { %v436_v35 = vpop.f32.mrb[30].mxu0 }
 0x118   :  { %488 = vst.msk [vmem:[%s924_s6 + $0x20] sm:$0xf] %vm201_vm2, %v586_v33  ;;  %v587_v36 = vpack.c.bf16 %v436_v35, %v436_v35  ;;  %v680_v37 = vpop.f32.mrb[31].mxu0 }
 0x11a   :  { %489 = vst.msk [vmem:[%s924_s6 + $0x24] sm:$0xf] %vm201_vm2, %v587_v36 }

// kernel: _forward.40
= control target key start
LH: loop header
LB: loop body
LE: loop exit
PB: predicated region body
PF: predicated region fallthrough
CT: control target
= control target key end

     0   :  { %s2524_s30 = smov 0   ;;  %s3738_s0 = inlined_call_operand.vmem [shape: bf16[80,32], index: 0, kind: input, shape index: {}]   ;;  %s3739_s1 = inlined_call_operand.vmem [shape: bf16[80,32], index: 1, kind: input, shape index: {}]   ;;  %s3740_s2 = inlined_call_operand.vmem [shape: f32[80,16], index: 2, kind: input, shape index: {}]   ;;  %s3741_s3 = inlined_call_operand.vmem [shape: f32[80,16], index: 3, kind: input, shape index: {}]   ;;  %s3742_s4 = inlined_call_operand.vmem [shape: f32[1,16], index: 4, kind: input, shape index: {}]   ;;  %s3743_s5 = inlined_call_operand.vmem [shape: f32[1,16], index: 5, kind: input, shape index: {}]   ;;  %s3744_s6 = inlined_call_operand.vmem [shape: f32[1,16], index: 6, kind: input, shape index: {}]   ;;  %s3745_s7 = inlined_call_operand.vmem [shape: f32[1,16], index: 7, kind: input, shape index: {}]   ;;  %s3746_s8 = inlined_call_operand.vmem [shape: bf16[80,32], index: 8, kind: output, shape index: {0}]   ;;  %s3747_s9 = inlined_call_operand.vmem [shape: bf16[80,32], index: 9, kind: output, shape index: {1}]  }
   0x1 LB: > { %s2315_s10 = sadd.s32 4294967295, %s2464_s30   ;;  %p2319_p0 = scmp.ge.s32.totalorder %s2464_s30, 1  ;;  %s2464_s30 = sphi %s2524_s30, %s20_s30  }
   0x2   : > { %p324_p1 = scmp.lt.s32.totalorder %s2464_s30, 6 }
   0x4   : > { %p325_p2 = pnand %p2319_p0, %p324_p1 }
   0x6   : > { %328 = sbr.rel (%p325_p2) target bundleno = 874 (0x36a), region = 52 }
   0xd   : > { %s2320_s11 = sshll.u32 %s2315_s10, 1  ;;  %s2466_s19 = smov 112   ;;  %v424_v8 = vlaneseq  ;;  %v2467_v9 = vmov 1983009808   ;;  %v2468_v13 = vmov 1934713408  }
   0xe   : > { %p381_p3 = scmp.lt.s32.totalorder %s2320_s11, 9  ;;  %v634_v10 = vunpack.c.l.s4 %v2467_v9  ;;  %v665_v14 = vunpack.c.l.s4 %v2468_v13  ;;  %vm764_vm0 = vcmask 123904   ;;  %v2469_v42 = vmov 0.0   ;;  %s2470_s24 = smov 120  }
   0xf   : > { %v2554_v11 = vshrl.u32 %v424_v8, 7  ;;  %s2471_s25 = smov 8   ;;  %vm1132_vm1 = vcmask 64512   ;;  %vm1481_vm2 = vcmask 130048   ;;  %vm1492_vm3 = vcmask 257024  }
  0x10   : > { %s3774_s11 = smov (!%p381_p3, %s2320_s11), 9  ;;  %v635_v12 = vunpack.c.0.s8 %v634_v10  ;;  %v666_v16 = vunpack.c.0.s8 %v665_v14 }
  0x11   : > { %s2535_s12 = sshll.u32 %s3774_s11, 2  ;;  %s2325_s10 = sshll.u32 %s3774_s11, 3 }
  0x12   : > { %s384_s15 = scalar_lea.vmem %s3738_s0, %s2535_s12  ;;  %s390_s18 = scalar_lea.vmem %s3739_s1, %s2535_s12  ;;  %v2557_v15 = vsub.s32 %v635_v12, %v2554_v11  ;;  %v2571_v24 = vsub.s32 %v666_v16, %v2554_v11 }
  0x13   : > { %v2347_v0 = vld [vmem:[%s384_s15] sm:$0xff]   ;;  %s396_s15 = scalar_lea.vmem %s3740_s2, %s2325_s10  ;;  %s2473_s11 = smov 16  }
  0x14   : > { %v2351_v1 = vld [vmem:[%s390_s18] sm:$0xff]   ;;  %v2545_v2 = vunpack.c.l.bf16 %v2347_v0  ;;  %v2349_v3 = vunpack.c.h.bf16 %v2347_v0  ;;  %3756 = vst [vmem:[#allocation2_spill] sm:$0xff] %v2571_v24  ;;  %s402_s18 = scalar_lea.vmem %s3741_s3, %s2325_s10  ;;  %s408_s21 = scalar_lea.vmem %s3746_s8, %s2535_s12 }
  0x15   : > { %v2547_v4 = vunpack.c.l.bf16 %v2351_v1  ;;  %v2549_v5 = vunpack.c.h.bf16 %v2351_v1 }
  0x16   : > { %v2370_v6 = vpack.i.bf16 %v2349_v3, %v2545_v2  ;;  %v705_v18 = vrot.slane %v2349_v3, %v2557_v15  ;;  %v639_v21 = vrot.slane %v2545_v2, %v2557_v15  ;;  %v698_v48 = vcombine.high %v2349_v3, %v2469_v42 }
  0x17   : > { %v2375_v7 = vpack.i.bf16 %v2549_v5, %v2547_v4  ;;  %v1514_v28 = vrot.slane %v2547_v4, %v2557_v15  ;;  %v1580_v37 = vrot.slane %v2549_v5, %v2557_v15  ;;  %v1507_v0 = vcombine.high %v2547_v4, %v2469_v42 }
  0x18   : > { %2371 = vrot.lane.b32.xlu0 %v2370_v6, %s2466_s19  ;;  %v712_v59 = vrot.slane %v698_v48, %v2557_v15  ;;  %v1573_v16 = vcombine.high %v2549_v5, %v2469_v42 }
  0x19   : > { %v1521_v8 = vrot.slane %v1507_v0, %v2557_v15 }
  0x1c   : > { %2376 = vrot.lane.b32.xlu0 %v2375_v7, %s2466_s19 }
  0x8a   : > { %v2559_v17 = vpop.permute.xlu0 %2371 }
  0x8b   : > { %v2374_v19 = vunpack.i.h.bf16 %v2559_v17  ;;  %v2373_v20 = vunpack.i.l.bf16 %v2559_v17 }
  0x8d   : > { %v720_v22 = vrot.slane %v2374_v19, %v2557_v15  ;;  %v654_v23 = vrot.slane %v2373_v20, %v2557_v15  ;;  %v713_v49 = vcombine.high %v2374_v19, %v2469_v42 }
  0x8e   : > { %v2377_v25 = vpop.permute.xlu0 %2376 }
  0x8f   : > { %v729_v26 = vcombine.high %v705_v18, %v720_v22  ;;  %v2379_v27 = vunpack.i.h.bf16 %v2377_v25  ;;  %v2378_v29 = vunpack.i.l.bf16 %v2377_v25  ;;  %v663_v30 = vcombine.high %v639_v21, %v654_v23 }
  0x90   : > { %v662_v31 = vcombine.low %v639_v21, %v654_v23  ;;  %v728_v33 = vcombine.low %v705_v18, %v720_v22  ;;  %v727_v56 = vrot.slane %v713_v49, %v2557_v15  ;;  %v632_v23 = vcombine.high %v2545_v2, %v2469_v42 }
  0x91   : > { %v2576_v32 = vrot.slane %v729_v26, %v2571_v24  ;;  %v1529_v34 = vrot.slane %v2378_v29, %v2557_v15  ;;  %v2580_v35 = vrot.slane %v663_v30, %v2571_v24  ;;  %v1595_v38 = vrot.slane %v2379_v27, %v2557_v15 }
  0x92   : > { %v2583_v36 = vrot.slane %v662_v31, %v2571_v24  ;;  %v2597_v45 = vrot.slane %v728_v33, %v2571_v24  ;;  %v1522_v62 = vcombine.high %v2378_v29, %v2469_v42  ;;  %v744_v6 = vcombine.low %v712_v59, %v727_v56 }
  0x93   : > { %v1537_v39 = vcombine.low %v1514_v28, %v1529_v34  ;;  %v1538_v40 = vcombine.high %v1514_v28, %v1529_v34  ;;  %v771_v41 = vsel %vm764_vm0, %v2580_v35, 0.0  ;;  %v2592_v43 = vcombine.high %v2576_v32, %v2469_v42 }
  0x94   : > { %772 = vadd.xlane.f32.xlu0 %v771_v41  ;;  %v765_v44 = vsel %vm764_vm0, %v2583_v36, 0.0  ;;  %v1603_v50 = vcombine.low %v1580_v37, %v1595_v38  ;;  %v789_v53 = vsel %vm764_vm0, %v2597_v45, 0.0  ;;  %v1604_v57 = vcombine.high %v1580_v37, %v1595_v38 }
  0x95   : > { %766 = vadd.xlane.f32.xlu1 %v765_v44  ;;  %v2600_v46 = vrot.slane %v1537_v39, %v2571_v24  ;;  %v2603_v47 = vrot.slane %v1538_v40, %v2571_v24  ;;  %v798_v51 = vsel %vm764_vm0, %v2592_v43, 0.0  ;;  %v795_v60 = vsel %vm764_vm0, %v2576_v32, 0.0 }
  0x96   : > { %v2623_v58 = vrot.slane %v1603_v50, %v2571_v24  ;;  %v2640_v3 = vrot.slane %v1604_v57, %v2571_v24  ;;  %v1536_v7 = vrot.slane %v1522_v62, %v2557_v15  ;;  %v2651_v10 = vrot.slane %v744_v6, %v2571_v24 }
  0x97   : > { %v2611_v52 = vcombine.high %v2600_v46, %v2469_v42  ;;  %v2619_v55 = vcombine.high %v2603_v47, %v2469_v42  ;;  %v1639_v63 = vsel %vm764_vm0, %v2600_v46, 0.0  ;;  %v745_v12 = vcombine.high %v712_v59, %v727_v56 }
  0x98   : > { %799 = vadd.xlane.f32.xlu0 %v798_v51  ;;  %v2637_v1 = vcombine.high %v2623_v58, %v2469_v42  ;;  %v2648_v4 = vcombine.high %v2640_v3, %v2469_v42  ;;  %v1645_v13 = vsel %vm764_vm0, %v2603_v47, 0.0  ;;  %v1588_v14 = vcombine.high %v2379_v27, %v2469_v42 }
  0x99   : > { %790 = vadd.xlane.f32.xlu1 %v789_v53  ;;  %v1642_v54 = vsel %vm764_vm0, %v2611_v52, 0.0  ;;  %v1648_v61 = vsel %vm764_vm0, %v2619_v55, 0.0  ;;  %v2662_v19 = vcombine.high %v2651_v10, %v2469_v42  ;;  %v2665_v21 = vrot.slane %v745_v12, %v2571_v24 }
  0x9a   : > { %v1666_v9 = vsel %vm764_vm0, %v2637_v1, 0.0  ;;  %v1672_v18 = vsel %vm764_vm0, %v2648_v4, 0.0  ;;  %v1553_v22 = vcombine.low %v1521_v8, %v1536_v7  ;;  %v647_v25 = vcombine.high %v2373_v20, %v2469_v42 }
  0x9b   : > { %v1663_v5 = vsel %vm764_vm0, %v2623_v58, 0.0  ;;  %v1602_v26 = vrot.slane %v1588_v14, %v2557_v15  ;;  %v1587_v27 = vrot.slane %v1573_v16, %v2557_v15  ;;  %v804_v28 = vsel %vm764_vm0, %v2662_v19, 0.0 }
  0x9c   : > { %1643 = vadd.xlane.f32.xlu0 %v1642_v54  ;;  %v2680_v29 = vcombine.high %v2665_v21, %v2469_v42  ;;  %v2683_v2 = vrot.slane %v1553_v22, %v2571_v24  ;;  %v1554_v17 = vcombine.high %v1521_v8, %v1536_v7  ;;  %v661_v20 = vrot.slane %v647_v25, %v2557_v15 }
  0x9d   : > { %796 = vadd.xlane.f32.xlu1 %v795_v60  ;;  %v1669_v30 = vsel %vm764_vm0, %v2640_v3, 0.0  ;;  %v2690_v31 = vcombine.high %v2583_v36, %v2469_v42  ;;  %v646_v33 = vrot.slane %v632_v23, %v2557_v15  ;;  %v1619_v39 = vcombine.low %v1587_v27, %v1602_v26 }
  0x9e   : > { %v810_v34 = vsel %vm764_vm0, %v2680_v29, 0.0  ;;  %v2697_v37 = vcombine.high %v2683_v2, %v2469_v42  ;;  %v2700_v38 = vrot.slane %v1554_v17, %v2571_v24  ;;  %v2706_v41 = vcombine.high %v2580_v35, %v2469_v42 }
  0x9f   : > { %v768_v40 = vsel %vm764_vm0, %v2690_v31, 0.0  ;;  %v678_v44 = vcombine.low %v646_v33, %v661_v20  ;;  %v2715_v50 = vrot.slane %v1619_v39, %v2571_v24  ;;  %v1620_v51 = vcombine.high %v1587_v27, %v1602_v26 }
  0xa0   : > { %1649 = vadd.xlane.f32.xlu0 %v1648_v61  ;;  %v1654_v48 = vsel %vm764_vm0, %v2697_v37, 0.0  ;;  %v2712_v49 = vcombine.high %v2700_v38, %v2469_v42  ;;  %v774_v53 = vsel %vm764_vm0, %v2706_v41, 0.0  ;;  %v679_v56 = vcombine.high %v646_v33, %v661_v20 }
  0xa1   : > { %1640 = vadd.xlane.f32.xlu1 %v1639_v63  ;;  %v2720_v54 = vrot.slane %v678_v44, %v2571_v24  ;;  %v2726_v59 = vcombine.high %v2715_v50, %v2469_v42  ;;  %v2729_v60 = vrot.slane %v1620_v51, %v2571_v24  ;;  %v2746_v7 = vcombine.high %v2597_v45, %v2469_v42 }
  0xa2   : > { %v1660_v57 = vsel %vm764_vm0, %v2712_v49, 0.0  ;;  %v2734_v62 = vrot.slane %v679_v56, %v2571_v24  ;;  %v801_v12 = vsel %vm764_vm0, %v2651_v10, 0.0  ;;  %v1651_v14 = vsel %vm764_vm0, %v2683_v2, 0.0 }
  0xa3   : > { %v777_v61 = vsel %vm764_vm0, %v2720_v54, 0.0  ;;  %v1678_v63 = vsel %vm764_vm0, %v2726_v59, 0.0  ;;  %v2740_v0 = vcombine.high %v2729_v60, %v2469_v42  ;;  %v1657_v16 = vsel %vm764_vm0, %v2700_v38, 0.0 }
  0xa4   : > { %1667 = vadd.xlane.f32.xlu0 %v1666_v9  ;;  %v783_v6 = vsel %vm764_vm0, %v2734_v62, 0.0  ;;  %v792_v9 = vsel %vm764_vm0, %v2746_v7, 0.0  ;;  %v1681_v22 = vsel %vm764_vm0, %v2729_v60, 0.0  ;;  %v2766_v23 = vcombine.high %v2720_v54, %v2469_v42 }
  0xa5   : > { %1646 = vadd.xlane.f32.xlu1 %v1645_v13  ;;  %v1684_v8 = vsel %vm764_vm0, %v2740_v0, 0.0  ;;  %v807_v13 = vsel %vm764_vm0, %v2665_v21, 0.0 }
  0xa6   : > { %v780_v25 = vsel %vm764_vm0, %v2766_v23, 0.0 }
  0xa8   : > { %1673 = vadd.xlane.f32.xlu0 %v1672_v18  ;;  %v1675_v18 = vsel %vm764_vm0, %v2715_v50, 0.0 }
  0xa9   : > { %1664 = vadd.xlane.f32.xlu1 %v1663_v5  ;;  %v2772_v5 = vcombine.high %v2734_v62, %v2469_v42 }
  0xab   : > { %v786_v26 = vsel %vm764_vm0, %v2772_v5, 0.0 }
  0xac   : > { %805 = vadd.xlane.f32.xlu0 %v804_v28 }
  0xad   : > { %1670 = vadd.xlane.f32.xlu1 %v1669_v30 }
  0xb0   : > { %811 = vadd.xlane.f32.xlu0 %v810_v34 }
  0xb1   : > { %769 = vadd.xlane.f32.xlu1 %v768_v40 }
  0xb4   : > { %1655 = vadd.xlane.f32.xlu0 %v1654_v48 }
  0xb5   : > { %775 = vadd.xlane.f32.xlu1 %v774_v53 }
  0xb8   : > { %1661 = vadd.xlane.f32.xlu0 %v1660_v57 }
  0xb9   : > { %778 = vadd.xlane.f32.xlu1 %v777_v61 }
  0xbc   : > { %1679 = vadd.xlane.f32.xlu0 %v1678_v63 }
  0xbd   : > { %784 = vadd.xlane.f32.xlu1 %v783_v6 }
  0xc0   : > { %1685 = vadd.xlane.f32.xlu0 %v1684_v8 }
  0xc1   : > { %793 = vadd.xlane.f32.xlu1 %v792_v9 }
  0xc5   : > { %802 = vadd.xlane.f32.xlu1 %v801_v12 }
  0xc9   : > { %808 = vadd.xlane.f32.xlu1 %v807_v13 }
  0xcd   : > { %1652 = vadd.xlane.f32.xlu1 %v1651_v14 }
  0xd1   : > { %1658 = vadd.xlane.f32.xlu1 %v1657_v16 }
  0xd5   : > { %1676 = vadd.xlane.f32.xlu1 %v1675_v18 }
  0xd9   : > { %1682 = vadd.xlane.f32.xlu1 %v1681_v22 }
  0xdd   : > { %781 = vadd.xlane.f32.xlu1 %v780_v25 }
  0xe1   : > { %787 = vadd.xlane.f32.xlu1 %v786_v26 }
 0x121   : > { %v773_v27 = vpop.xlane.xlu0 %772 }
 0x122   : > { %v816_v28 = vmul.f32 0.0625, %v773_v27  ;;  %v767_v17 = vpop.xlane.xlu1 %766 }
 0x123   : > { %v814_v20 = vmul.f32 0.0625, %v767_v17 }
 0x124   : > { %v2777_v30 = vsub.f32 %v2580_v35, %v816_v28 }
 0x125   : > { %v2780_v33 = vsub.f32 %v2583_v36, %v814_v20 }
 0x126   : > { %v791_v34 = vpop.xlane.xlu1 %790  ;;  %v848_v48 = vmul.f32 %v2777_v30, %v2777_v30 }
 0x127   : > { %v822_v39 = vmul.f32 0.0625, %v791_v34  ;;  %v846_v42 = vmul.f32 %v2780_v33, %v2780_v33 }
 0x128   : > { %v868_v36 = vsel %vm764_vm0, %v848_v48, 0.0 }
 0x129   : > { %v2785_v40 = vsub.f32 %v2597_v45, %v822_v39  ;;  %v862_v44 = vsel %vm764_vm0, %v846_v42, 0.0  ;;  %v800_v42 = vpop.xlane.xlu0 %799 }
 0x12a   : > { %v797_v51 = vpop.xlane.xlu1 %796  ;;  %863 = vadd.xlane.f32.xlu1 %v862_v44 }
 0x12b   : > { %v824_v35 = vmul.f32 0.0625, %v797_v51  ;;  %v854_v56 = vmul.f32 %v2785_v40, %v2785_v40 }
 0x12d   : > { %v2791_v53 = vsub.f32 %v2576_v32, %v824_v35  ;;  %v886_v63 = vsel %vm764_vm0, %v854_v56, 0.0 }
 0x12e   : > { %v1641_v57 = vpop.xlane.xlu1 %1640  ;;  %869 = vadd.xlane.f32.xlu1 %v868_v36 }
 0x12f   : > { %v1687_v45 = vmul.f32 0.0625, %v1641_v57  ;;  %v856_v6 = vmul.f32 %v2791_v53, %v2791_v53 }
 0x131   : > { %v2797_v61 = vsub.f32 %v2600_v46, %v1687_v45  ;;  %v892_v12 = vsel %vm764_vm0, %v856_v6, 0.0  ;;  %v1644_v45 = vpop.xlane.xlu0 %1643 }
 0x132   : > { %v1647_v8 = vpop.xlane.xlu1 %1646  ;;  %887 = vadd.xlane.f32.xlu1 %v886_v63 }
 0x133   : > { %v1689_v32 = vmul.f32 0.0625, %v1647_v8  ;;  %v1719_v13 = vmul.f32 %v2797_v61, %v2797_v61 }
 0x135   : > { %v2803_v9 = vsub.f32 %v2603_v47, %v1689_v32  ;;  %v1735_v18 = vsel %vm764_vm0, %v1719_v13, 0.0 }
 0x136   : > { %v1665_v14 = vpop.xlane.xlu1 %1664  ;;  %893 = vadd.xlane.f32.xlu1 %v892_v12  ;;  %v825_v12 = vmul.f32 0.0625, %v800_v42 }
 0x137   : > { %v1695_v46 = vmul.f32 0.0625, %v1665_v14  ;;  %v1721_v22 = vmul.f32 %v2803_v9, %v2803_v9 }
 0x139   : > { %v2809_v16 = vsub.f32 %v2623_v58, %v1695_v46  ;;  %v1741_v27 = vsel %vm764_vm0, %v1721_v22, 0.0  ;;  %v1650_v46 = vpop.xlane.xlu0 %1649 }
 0x13a   : > { %v1671_v25 = vpop.xlane.xlu1 %1670  ;;  %1736 = vadd.xlane.f32.xlu1 %v1735_v18 }
 0x13b   : > { %v1697_v47 = vmul.f32 0.0625, %v1671_v25  ;;  %v1727_v28 = vmul.f32 %v2809_v16, %v2809_v16  ;;  %v1688_v25 = vmul.f32 0.0625, %v1644_v45 }
 0x13d   : > { %v2815_v26 = vsub.f32 %v2640_v3, %v1697_v47  ;;  %v1759_v34 = vsel %vm764_vm0, %v1727_v28, 0.0  ;;  %v2848_v47 = vsub.f32 %v2592_v43, %v825_v12  ;;  %v1668_v42 = vpop.xlane.xlu0 %1667 }
 0x13e   : > { %v770_v17 = vpop.xlane.xlu1 %769  ;;  %1742 = vadd.xlane.f32.xlu1 %v1741_v27 }
 0x13f   : > { %v815_v58 = vmul.f32 0.0625, %v770_v17  ;;  %v1729_v39 = vmul.f32 %v2815_v26, %v2815_v26 }
 0x141   : > { %v2821_v20 = vsub.f32 %v2690_v31, %v815_v58  ;;  %v1765_v31 = vsel %vm764_vm0, %v1729_v39, 0.0  ;;  %v1690_v39 = vmul.f32 0.0625, %v1650_v46  ;;  %v1674_v45 = vpop.xlane.xlu0 %1673 }
 0x142   : > { %v776_v44 = vpop.xlane.xlu1 %775  ;;  %1760 = vadd.xlane.f32.xlu1 %v1759_v34  ;;  %v2857_v34 = vsub.f32 %v2611_v52, %v1688_v25  ;;  %v1698_v12 = vmul.f32 0.0625, %v1674_v45 }
 0x143   : > { %v817_v3 = vmul.f32 0.0625, %v776_v44  ;;  %v847_v48 = vmul.f32 %v2821_v20, %v2821_v20 }
 0x144   : > { %v1720_v52 = vmul.f32 %v2857_v34, %v2857_v34 }
 0x145   : > { %v2829_v51 = vsub.f32 %v2706_v41, %v817_v3  ;;  %v865_v35 = vsel %vm764_vm0, %v847_v48, 0.0  ;;  %v806_v25 = vpop.xlane.xlu0 %805 }
 0x146   : > { %866 = vadd.xlane.f32.xlu0 %v865_v35  ;;  %v779_v36 = vpop.xlane.xlu1 %778  ;;  %1766 = vadd.xlane.f32.xlu1 %v1765_v31  ;;  %v2868_v31 = vsub.f32 %v2619_v55, %v1690_v39 }
 0x147   : > { %v818_v56 = vmul.f32 0.0625, %v779_v36  ;;  %v849_v57 = vmul.f32 %v2829_v51, %v2829_v51  ;;  %v1696_v36 = vmul.f32 0.0625, %v1668_v42 }
 0x149   : > { %v2836_v63 = vsub.f32 %v2720_v54, %v818_v56  ;;  %v871_v6 = vsel %vm764_vm0, %v849_v57, 0.0 }
 0x14a   : > { %872 = vadd.xlane.f32.xlu0 %v871_v6  ;;  %v785_v41 = vpop.xlane.xlu1 %784 }
 0x14b   : > { %v820_v8 = vmul.f32 0.0625, %v785_v41  ;;  %v850_v32 = vmul.f32 %v2836_v63, %v2836_v63 }
 0x14d   : > { %v2842_v13 = vsub.f32 %v2734_v62, %v820_v8  ;;  %v874_v14 = vsel %vm764_vm0, %v850_v32, 0.0  ;;  %v1738_v8 = vsel %vm764_vm0, %v1720_v52, 0.0  ;;  %v1722_v32 = vmul.f32 %v2868_v31, %v2868_v31 }
 0x14e   : > { %v794_v18 = vpop.xlane.xlu1 %793  ;;  %875 = vadd.xlane.f32.xlu1 %v874_v14 }
 0x14f   : > { %v823_v22 = vmul.f32 0.0625, %v794_v18  ;;  %v852_v54 = vmul.f32 %v2842_v13, %v2842_v13 }
 0x151   : > { %v2851_v27 = vsub.f32 %v2746_v7, %v823_v22  ;;  %v880_v28 = vsel %vm764_vm0, %v852_v54, 0.0  ;;  %v857_v7 = vmul.f32 %v2848_v47, %v2848_v47 }
 0x152   : > { %v803_v62 = vpop.xlane.xlu1 %802  ;;  %881 = vadd.xlane.f32.xlu1 %v880_v28  ;;  %v1744_v28 = vsel %vm764_vm0, %v1722_v32, 0.0 }
 0x153   : > { %v826_v17 = vmul.f32 0.0625, %v803_v62  ;;  %v855_v58 = vmul.f32 %v2851_v27, %v2851_v27  ;;  %v895_v56 = vsel %vm764_vm0, %v857_v7, 0.0  ;;  %v2893_v62 = vsub.f32 %v2648_v4, %v1698_v12 }
 0x155   : > { %v2860_v44 = vsub.f32 %v2651_v10, %v826_v17  ;;  %v889_v43 = vsel %vm764_vm0, %v855_v58, 0.0  ;;  %v1730_v7 = vmul.f32 %v2893_v62, %v2893_v62 }
 0x156   : > { %890 = vadd.xlane.f32.xlu0 %v889_v43  ;;  %v809_v3 = vpop.xlane.xlu1 %808 }
 0x157   : > { %v828_v48 = vmul.f32 0.0625, %v809_v3  ;;  %v858_v35 = vmul.f32 %v2860_v44, %v2860_v44  ;;  %v812_v3 = vpop.xlane.xlu0 %811 }
 0x159   : > { %v2873_v10 = vsub.f32 %v2665_v21, %v828_v48  ;;  %v898_v57 = vsel %vm764_vm0, %v858_v35, 0.0  ;;  %v2883_v21 = vsub.f32 %v2637_v1, %v1696_v36 }
 0x15a   : > { %896 = vadd.xlane.f32.xlu0 %v895_v56  ;;  %v1653_v6 = vpop.xlane.xlu1 %1652  ;;  %899 = vadd.xlane.f32.xlu1 %v898_v57 }
 0x15b   : > { %v1691_v41 = vmul.f32 0.0625, %v1653_v6  ;;  %v860_v55 = vmul.f32 %v2873_v10, %v2873_v10  ;;  %v1728_v17 = vmul.f32 %v2883_v21, %v2883_v21 }
 0x15d   : > { %v2886_v14 = vsub.f32 %v2683_v2, %v1691_v41  ;;  %v904_v46 = vsel %vm764_vm0, %v860_v55, 0.0  ;;  %v1762_v4 = vsel %vm764_vm0, %v1728_v17, 0.0  ;;  %v1656_v41 = vpop.xlane.xlu0 %1655  ;;  %v827_v55 = vmul.f32 0.0625, %v806_v25 }
 0x15e   : > { %1739 = vadd.xlane.f32.xlu0 %v1738_v8  ;;  %v1659_v18 = vpop.xlane.xlu1 %1658  ;;  %905 = vadd.xlane.f32.xlu1 %v904_v46  ;;  %v1692_v17 = vmul.f32 0.0625, %v1656_v41 }
 0x15f   : > { %v1693_v22 = vmul.f32 0.0625, %v1659_v18  ;;  %v1723_v54 = vmul.f32 %v2886_v14, %v2886_v14  ;;  %v2926_v18 = vsub.f32 %v2662_v19, %v827_v55 }
 0x161   : > { %v2896_v1 = vsub.f32 %v2700_v38, %v1693_v22  ;;  %v1747_v2 = vsel %vm764_vm0, %v1723_v54, 0.0  ;;  %v829_v22 = vmul.f32 0.0625, %v812_v3  ;;  %v859_v19 = vmul.f32 %v2926_v18, %v2926_v18 }
 0x162   : > { %1745 = vadd.xlane.f32.xlu0 %v1744_v28  ;;  %v1677_v58 = vpop.xlane.xlu1 %1676  ;;  %1748 = vadd.xlane.f32.xlu1 %v1747_v2  ;;  %v1662_v28 = vpop.xlane.xlu0 %1661 }
 0x163   : > { %v1699_v39 = vmul.f32 0.0625, %v1677_v58  ;;  %v1725_v42 = vmul.f32 %v2896_v1, %v2896_v1  ;;  %v2935_v2 = vsub.f32 %v2680_v29, %v829_v22 }
 0x165   : > { %v2904_v43 = vsub.f32 %v2715_v50, %v1699_v39  ;;  %v1753_v38 = vsel %vm764_vm0, %v1725_v42, 0.0  ;;  %v1768_v50 = vsel %vm764_vm0, %v1730_v7, 0.0  ;;  %v1694_v42 = vmul.f32 0.0625, %v1662_v28 }
 0x166   : > { %1763 = vadd.xlane.f32.xlu0 %v1762_v4  ;;  %v1683_v48 = vpop.xlane.xlu1 %1682  ;;  %1754 = vadd.xlane.f32.xlu1 %v1753_v38  ;;  %v1680_v39 = vpop.xlane.xlu0 %1679  ;;  %v901_v4 = vsel %vm764_vm0, %v859_v19, 0.0  ;;  %v861_v38 = vmul.f32 %v2935_v2, %v2935_v2 }
 0x167   : > { %v1701_v35 = vmul.f32 0.0625, %v1683_v48  ;;  %v1731_v52 = vmul.f32 %v2904_v43, %v2904_v43  ;;  %v2947_v29 = vsub.f32 %v2712_v49, %v1694_v42  ;;  %v1700_v7 = vmul.f32 0.0625, %v1680_v39  ;;  %v2971_v39 = vld [vmem:[%s3742_s4] ss:$0 sm:$0xff] }
 0x168   : > { %v907_v3 = vsel %vm764_vm0, %v861_v38, 0.0  ;;  %v2977_v38 = vld [vmem:[%s3743_s5] ss:$0 sm:$0xff] }
 0x169   : > { %v2913_v36 = vsub.f32 %v2729_v60, %v1701_v35  ;;  %v1771_v56 = vsel %vm764_vm0, %v1731_v52, 0.0 }
 0x16a   : > { %1769 = vadd.xlane.f32.xlu0 %v1768_v50  ;;  %1772 = vadd.xlane.f32.xlu1 %v1771_v56  ;;  %v782_v57 = vpop.xlane.xlu1 %781  ;;  %v1686_v35 = vpop.xlane.xlu0 %1685  ;;  %v1726_v56 = vmul.f32 %v2947_v29, %v2947_v29 }
 0x16b   : > { %v819_v45 = vmul.f32 0.0625, %v782_v57  ;;  %v1733_v6 = vmul.f32 %v2913_v36, %v2913_v36  ;;  %v1702_v52 = vmul.f32 0.0625, %v1686_v35 }
 0x16c   : > { %v1756_v57 = vsel %vm764_vm0, %v1726_v56, 0.0 }
 0x16d   : > { %v2920_v8 = vsub.f32 %v2766_v23, %v819_v45  ;;  %v1777_v32 = vsel %vm764_vm0, %v1733_v6, 0.0  ;;  %v2959_v49 = vsub.f32 %v2740_v0, %v1702_v52 }
 0x16e   : > { %1778 = vadd.xlane.f32.xlu1 %v1777_v32  ;;  %v788_v60 = vpop.xlane.xlu1 %787 }
 0x16f   : > { %v821_v12 = vmul.f32 0.0625, %v788_v60  ;;  %v851_v46 = vmul.f32 %v2920_v8, %v2920_v8 }
 0x171   : > { %v2929_v54 = vsub.f32 %v2772_v5, %v821_v12  ;;  %v877_v25 = vsel %vm764_vm0, %v851_v46, 0.0  ;;  %v2941_v5 = vsub.f32 %v2697_v37, %v1692_v17  ;;  %v2953_v37 = vsub.f32 %v2726_v59, %v1700_v7 }
 0x172   : > { %878 = vadd.xlane.f32.xlu0 %v877_v25  ;;  %v1734_v59 = vmul.f32 %v2959_v49, %v2959_v49 }
 0x173   : > { %v853_v23 = vmul.f32 %v2929_v54, %v2929_v54  ;;  %v1724_v48 = vmul.f32 %v2941_v5, %v2941_v5  ;;  %v1732_v45 = vmul.f32 %v2953_v37, %v2953_v37 }
 0x174   : > { %v1780_v41 = vsel %vm764_vm0, %v1734_v59, 0.0 }
 0x175   : > { %v883_v58 = vsel %vm764_vm0, %v853_v23, 0.0  ;;  %v1750_v50 = vsel %vm764_vm0, %v1724_v48, 0.0  ;;  %v1774_v6 = vsel %vm764_vm0, %v1732_v45, 0.0 }
 0x176   : > { %884 = vadd.xlane.f32.xlu0 %v883_v58 }
 0x17a   : > { %902 = vadd.xlane.f32.xlu0 %v901_v4 }
 0x17e   : > { %908 = vadd.xlane.f32.xlu0 %v907_v3 }
 0x182   : > { %1751 = vadd.xlane.f32.xlu0 %v1750_v50 }
 0x186   : > { %1757 = vadd.xlane.f32.xlu0 %v1756_v57 }
 0x18a   : > { %1775 = vadd.xlane.f32.xlu0 %v1774_v6 }
 0x18e   : > { %1781 = vadd.xlane.f32.xlu0 %v1780_v41 }
 0x1b7   : > { %v864_v55 = vpop.xlane.xlu1 %863 }
 0x1b8   : > { %v910_v32 = vmul.f32 0.0625, %v864_v55 }
 0x1ba   : > { %v926_v60 = vadd.f32 1e-05, %v910_v32 }
 0x1bb   : > { %v870_v0 = vpop.xlane.xlu1 %869 }
 0x1bc   : > { %2394 = vrsqrt.f32 %v926_v60  ;;  %v912_v12 = vmul.f32 0.0625, %v870_v0 }
 0x1be   : > { %v928_v46 = vadd.f32 1e-05, %v912_v12 }
 0x1bf   : > { %v888_v22 = vpop.xlane.xlu1 %887 }
 0x1c0   : > { %2396 = vrsqrt.f32 %v928_v46  ;;  %v918_v25 = vmul.f32 0.0625, %v888_v22 }
 0x1c2   : > { %v934_v28 = vadd.f32 1e-05, %v918_v25 }
 0x1c3   : > { %v894_v23 = vpop.xlane.xlu1 %893 }
 0x1c4   : > { %2398 = vrsqrt.f32 %v934_v28  ;;  %v920_v17 = vmul.f32 0.0625, %v894_v23 }
 0x1c6   : > { %v2395_v58 = vpop.eup %2394  ;;  %v936_v19 = vadd.f32 1e-05, %v920_v17 }
 0x1c7   : > { %v1737_v42 = vpop.xlane.xlu1 %1736  ;;  %v958_v4 = vmul.f32 %v2395_v58, %v2780_v33 }
 0x1c8   : > { %2400 = vrsqrt.f32 %v936_v19  ;;  %v1783_v56 = vmul.f32 0.0625, %v1737_v42 }
 0x1c9   : > { %v981_v7 = vmul.f32 %v2971_v39, %v958_v4 }
 0x1ca   : > { %v2397_v3 = vpop.eup %2396  ;;  %v1799_v41 = vadd.f32 1e-05, %v1783_v56 }
 0x1cb   : > { %v1743_v48 = vpop.xlane.xlu1 %1742  ;;  %v2981_v35 = vadd.f32 %v2977_v38, %v981_v7  ;;  %v960_v52 = vmul.f32 %v2397_v3, %v2777_v30 }
 0x1cc   : > { %v1785_v55 = vmul.f32 0.0625, %v1743_v48  ;;  %2402 = vrsqrt.f32 %v1799_v41 }
 0x1cd   : > { %1036 = vrot.lane.b32.xlu1 %v2981_v35, %s2470_s24  ;;  %v983_v33 = vmul.f32 %v2971_v39, %v960_v52 }
 0x1ce   : > { %v2399_v50 = vpop.eup %2398  ;;  %v1801_v12 = vadd.f32 1e-05, %v1785_v55 }
 0x1cf   : > { %v2988_v57 = vadd.f32 %v2977_v38, %v983_v33  ;;  %v966_v45 = vmul.f32 %v2399_v50, %v2785_v40  ;;  %v1761_v6 = vpop.xlane.xlu1 %1760  ;;  %v3014_v33 = vld [vmem:[%s3744_s6] ss:$0 sm:$0xff] }
 0x1d0   : > { %v1791_v46 = vmul.f32 0.0625, %v1761_v6  ;;  %2404 = vrsqrt.f32 %v1801_v12 }
 0x1d1   : > { %1040 = vrot.lane.b32.xlu1 %v2988_v57, %s2470_s24  ;;  %v989_v59 = vmul.f32 %v2971_v39, %v966_v45 }
 0x1d2   : > { %v2401_v30 = vpop.eup %2400  ;;  %v1807_v17 = vadd.f32 1e-05, %v1791_v46 }
 0x1d3   : > { %v867_v32 = vpop.xlane.xlu0 %866  ;;  %v2995_v60 = vadd.f32 %v2977_v38, %v989_v59  ;;  %v968_v0 = vmul.f32 %v2401_v30, %v2791_v53  ;;  %v1767_v22 = vpop.xlane.xlu1 %1766 }
 0x1d4   : > { %v1793_v53 = vmul.f32 0.0625, %v1767_v22  ;;  %v911_v4 = vmul.f32 0.0625, %v867_v32  ;;  %v3024_v32 = vld [vmem:[%s3745_s7] ss:$0 sm:$0xff] }
 0x1d5   : > { %1052 = vrot.lane.b32.xlu0 %v2995_v60, %s2470_s24  ;;  %v991_v40 = vmul.f32 %v2971_v39, %v968_v0 }
 0x1d6   : > { %v1809_v19 = vadd.f32 1e-05, %v1793_v53  ;;  %v2403_v42 = vpop.eup %2402  ;;  %v927_v56 = vadd.f32 1e-05, %v911_v4 }
 0x1d7   : > { %v873_v25 = vpop.xlane.xlu0 %872  ;;  %v3002_v28 = vadd.f32 %v2977_v38, %v991_v40  ;;  %v1831_v3 = vmul.f32 %v2403_v42, %v2797_v61 }
 0x1d8   : > { %v913_v23 = vmul.f32 0.0625, %v873_v25 }
 0x1d9   : > { %1056 = vrot.lane.b32.xlu0 %v3002_v28, %s2470_s24  ;;  %v1854_v30 = vmul.f32 %v3014_v33, %v1831_v3 }
 0x1da   : > { %v929_v58 = vadd.f32 1e-05, %v913_v23  ;;  %v2405_v48 = vpop.eup %2404 }
 0x1db   : > { %v1833_v61 = vmul.f32 %v2405_v48, %v2803_v9  ;;  %v876_v40 = vpop.xlane.xlu1 %875  ;;  %v3033_v9 = vadd.f32 %v3024_v32, %v1854_v30 }
 0x1dc   : > { %2406 = vrsqrt.f32 %v929_v58  ;;  %v914_v4 = vmul.f32 0.0625, %v876_v40 }
 0x1dd   : > { %1084 = vrot.lane.b32.xlu0 %v2981_v35, %s2471_s25  ;;  %2408 = vrsqrt.f32 %v1807_v17  ;;  %v1856_v22 = vmul.f32 %v3014_v33, %v1833_v61 }
 0x1de   : > { %2410 = vrsqrt.f32 %v1809_v19 }
 0x1df   : > { %v3042_v53 = vadd.f32 %v3024_v32, %v1856_v22  ;;  %v882_v42 = vpop.xlane.xlu1 %881 }
 0x1e1   : > { %1088 = vrot.lane.b32.xlu0 %v2988_v57, %s2471_s25 }
 0x1e3   : > { %v891_v7 = vpop.xlane.xlu0 %890 }
 0x1e4   : > { %v919_v52 = vmul.f32 0.0625, %v891_v7 }
 0x1e5   : > { %1100 = vrot.lane.b32.xlu0 %v2995_v60, %s2471_s25 }
 0x1e6   : > { %v2407_v50 = vpop.eup %2406  ;;  %v935_v45 = vadd.f32 1e-05, %v919_v52 }
 0x1e7   : > { %v897_v6 = vpop.xlane.xlu0 %896  ;;  %v961_v59 = vmul.f32 %v2407_v50, %v2829_v51  ;;  %v2409_v41 = vpop.eup %2408 }
 0x1e8   : > { %2412 = vrsqrt.f32 %v935_v45  ;;  %v921_v55 = vmul.f32 0.0625, %v897_v6  ;;  %v1839_v25 = vmul.f32 %v2409_v41, %v2809_v16  ;;  %v2411_v23 = vpop.eup %2410  ;;  %v930_v45 = vadd.f32 1e-05, %v914_v4 }
 0x1e9   : > { %1104 = vrot.lane.b32.xlu0 %v3002_v28, %s2471_s25  ;;  %v984_v0 = vmul.f32 %v2971_v39, %v961_v59  ;;  %2414 = vrsqrt.f32 %v927_v56  ;;  %v1841_v19 = vmul.f32 %v2411_v23, %v2815_v26  ;;  %v900_v56 = vpop.xlane.xlu1 %899  ;;  %v916_v6 = vmul.f32 0.0625, %v882_v42 }
 0x1ea   : > { %v937_v51 = vadd.f32 1e-05, %v921_v55  ;;  %v1862_v58 = vmul.f32 %v3014_v33, %v1839_v25 }
 0x1eb   : > { %v1740_v12 = vpop.xlane.xlu0 %1739  ;;  %v3030_v46 = vadd.f32 %v2977_v38, %v984_v0  ;;  %v1864_v52 = vmul.f32 %v3014_v33, %v1841_v19 }
 0x1ec   : > { %2416 = vrsqrt.f32 %v937_v51  ;;  %v1784_v7 = vmul.f32 0.0625, %v1740_v12  ;;  %v3049_v3 = vadd.f32 %v3024_v32, %v1862_v58  ;;  %v932_v51 = vadd.f32 1e-05, %v916_v6 }
 0x1ed   : > { %1042 = vrot.lane.b32.xlu1 %v3030_v46, %s2470_s24  ;;  %1909 = vrot.lane.b32.xlu0 %v3033_v9, %s2470_s24  ;;  %2418 = vrsqrt.f32 %v930_v45  ;;  %v922_v12 = vmul.f32 0.0625, %v900_v56  ;;  %v906_v25 = vpop.xlane.xlu1 %905 }
 0x1ee   : > { %v1800_v61 = vadd.f32 1e-05, %v1784_v7  ;;  %v924_v42 = vmul.f32 0.0625, %v906_v25 }
 0x1ef   : > { %v1746_v17 = vpop.xlane.xlu0 %1745  ;;  %v938_v19 = vadd.f32 1e-05, %v922_v12 }
 0x1f0   : > { %v1786_v41 = vmul.f32 0.0625, %v1746_v17  ;;  %2420 = vrsqrt.f32 %v1800_v61 }
 0x1f1   : > { %1913 = vrot.lane.b32.xlu0 %v3042_v53, %s2470_s24  ;;  %2422 = vrsqrt.f32 %v932_v51 }
 0x1f2   : > { %v2413_v16 = vpop.eup %2412  ;;  %v1802_v23 = vadd.f32 1e-05, %v1786_v41 }
 0x1f3   : > { %v967_v48 = vmul.f32 %v2413_v16, %v2851_v27  ;;  %v2415_v50 = vpop.eup %2414  ;;  %v1764_v59 = vpop.xlane.xlu0 %1763  ;;  %v3060_v27 = vadd.f32 %v3024_v32, %v1864_v52 }
 0x1f4   : > { %v959_v40 = vmul.f32 %v2415_v50, %v2821_v20  ;;  %v1792_v17 = vmul.f32 0.0625, %v1764_v59  ;;  %2424 = vrsqrt.f32 %v1802_v23 }
 0x1f5   : > { %1925 = vrot.lane.b32.xlu0 %v3049_v3, %s2470_s24  ;;  %v990_v26 = vmul.f32 %v2971_v39, %v967_v48  ;;  %2426 = vrsqrt.f32 %v938_v19  ;;  %v940_v48 = vadd.f32 1e-05, %v924_v42 }
 0x1f6   : > { %v2417_v30 = vpop.eup %2416  ;;  %v982_v20 = vmul.f32 %v2971_v39, %v959_v40  ;;  %v1808_v4 = vadd.f32 1e-05, %v1792_v17 }
 0x1f7   : > { %v3057_v55 = vadd.f32 %v2977_v38, %v990_v26  ;;  %v969_v0 = vmul.f32 %v2417_v30, %v2848_v47  ;;  %v1770_v58 = vpop.xlane.xlu0 %1769  ;;  %v2419_v50 = vpop.eup %2418 }
 0x1f8   : > { %v1794_v16 = vmul.f32 0.0625, %v1770_v58  ;;  %v3078_v7 = vadd.f32 %v2977_v38, %v982_v20  ;;  %2428 = vrsqrt.f32 %v1808_v4  ;;  %v962_v59 = vmul.f32 %v2419_v50, %v2836_v63  ;;  %v1749_v30 = vpop.xlane.xlu1 %1748 }
 0x1f9   : > { %1054 = vrot.lane.b32.xlu1 %v3057_v55, %s2470_s24  ;;  %1929 = vrot.lane.b32.xlu0 %v3060_v27, %s2470_s24  ;;  %v992_v22 = vmul.f32 %v2971_v39, %v969_v0  ;;  %2430 = vrsqrt.f32 %v940_v48  ;;  %v1787_v42 = vmul.f32 0.0625, %v1749_v30 }
 0x1fa   : > { %v1810_v52 = vadd.f32 1e-05, %v1794_v16  ;;  %v2421_v56 = vpop.eup %2420  ;;  %v985_v51 = vmul.f32 %v2971_v39, %v962_v59 }
 0x1fb   : > { %v3070_v47 = vadd.f32 %v2977_v38, %v992_v22  ;;  %v2423_v45 = vpop.eup %2422  ;;  %v1832_v6 = vmul.f32 %v2421_v56, %v2857_v34 }
 0x1fc   : > { %2432 = vrsqrt.f32 %v1810_v52  ;;  %v964_v41 = vmul.f32 %v2423_v45, %v2842_v13  ;;  %v1755_v63 = vpop.xlane.xlu1 %1754  ;;  %v3108_v58 = vadd.f32 %v2977_v38, %v985_v51  ;;  %v1803_v45 = vadd.f32 1e-05, %v1787_v42 }
 0x1fd   : > { %1058 = vrot.lane.b32.xlu1 %v3070_v47, %s2470_s24  ;;  %1957 = vrot.lane.b32.xlu0 %v3033_v9, %s2471_s25  ;;  %v1855_v40 = vmul.f32 %v3014_v33, %v1832_v6  ;;  %v1789_v6 = vmul.f32 0.0625, %v1755_v63 }
 0x1fe   : > { %v2425_v26 = vpop.eup %2424  ;;  %v987_v22 = vmul.f32 %v2971_v39, %v964_v41  ;;  %2434 = vrsqrt.f32 %v1803_v45 }
 0x1ff   : > { %v879_v61 = vpop.xlane.xlu0 %878  ;;  %v2427_v0 = vpop.eup %2426  ;;  %v1834_v34 = vmul.f32 %v2425_v26, %v2868_v31  ;;  %v3105_v17 = vadd.f32 %v3024_v32, %v1855_v40 }
 0x200   : > { %v970_v25 = vmul.f32 %v2427_v0, %v2860_v44  ;;  %v915_v44 = vmul.f32 0.0625, %v879_v61  ;;  %v3117_v4 = vadd.f32 %v2977_v38, %v987_v22  ;;  %v1773_v56 = vpop.xlane.xlu1 %1772  ;;  %v1805_v0 = vadd.f32 1e-05, %v1789_v6 }
 0x201   : > { %1086 = vrot.lane.b32.xlu1 %v3078_v7, %s2471_s25  ;;  %1961 = vrot.lane.b32.xlu0 %v3042_v53, %s2471_s25  ;;  %v1857_v31 = vmul.f32 %v3014_v33, %v1834_v34  ;;  %v1795_v40 = vmul.f32 0.0625, %v1773_v56 }
 0x202   : > { %v2429_v12 = vpop.eup %2428  ;;  %v993_v16 = vmul.f32 %v2971_v39, %v970_v25  ;;  %v931_v26 = vadd.f32 1e-05, %v915_v44 }
 0x203   : > { %v2431_v13 = vpop.eup %2430  ;;  %v885_v23 = vpop.xlane.xlu0 %884  ;;  %v1840_v20 = vmul.f32 %v2429_v12, %v2883_v21  ;;  %v3121_v48 = vadd.f32 %v3024_v32, %v1857_v31 }
 0x204   : > { %v972_v50 = vmul.f32 %v2431_v13, %v2873_v10  ;;  %v917_v30 = vmul.f32 0.0625, %v885_v23  ;;  %v3134_v41 = vadd.f32 %v2977_v38, %v993_v16  ;;  %v1779_v51 = vpop.xlane.xlu1 %1778  ;;  %2436 = vrsqrt.f32 %v931_v26 }
 0x205   : > { %1090 = vrot.lane.b32.xlu1 %v3030_v46, %s2471_s25  ;;  %1973 = vrot.lane.b32.xlu0 %v3049_v3, %s2471_s25  ;;  %v1863_v52 = vmul.f32 %v3014_v33, %v1840_v20  ;;  %2438 = vrsqrt.f32 %v1805_v0  ;;  %v1811_v13 = vadd.f32 1e-05, %v1795_v40  ;;  %v1797_v23 = vmul.f32 0.0625, %v1779_v51 }
 0x206   : > { %v2433_v19 = vpop.eup %2432  ;;  %v933_v34 = vadd.f32 1e-05, %v917_v30 }
 0x207   : > { %v1842_v21 = vmul.f32 %v2433_v19, %v2893_v62  ;;  %v903_v59 = vpop.xlane.xlu0 %902  ;;  %v3131_v61 = vadd.f32 %v3024_v32, %v1863_v52  ;;  %v995_v62 = vmul.f32 %v2971_v39, %v972_v50  ;;  %v1813_v19 = vadd.f32 1e-05, %v1797_v23 }
 0x208   : > { %v923_v12 = vmul.f32 0.0625, %v903_v59  ;;  %2440 = vrsqrt.f32 %v933_v34  ;;  %v2435_v44 = vpop.eup %2434 }
 0x209   : > { %1102 = vrot.lane.b32.xlu1 %v3057_v55, %s2471_s25  ;;  %1977 = vrot.lane.b32.xlu0 %v3060_v27, %s2471_s25  ;;  %v1865_v10 = vmul.f32 %v3014_v33, %v1842_v21  ;;  %v3146_v25 = vadd.f32 %v2977_v38, %v995_v62  ;;  %2442 = vrsqrt.f32 %v1811_v13  ;;  %v1835_v50 = vmul.f32 %v2435_v44, %v2886_v14 }
 0x20a   : > { %v939_v31 = vadd.f32 1e-05, %v923_v12 }
 0x20b   : > { %v909_v63 = vpop.xlane.xlu0 %908  ;;  %v3143_v22 = vadd.f32 %v3024_v32, %v1865_v10  ;;  %v1858_v30 = vmul.f32 %v3014_v33, %v1835_v50 }
 0x20c   : > { %v925_v20 = vmul.f32 0.0625, %v909_v63  ;;  %2444 = vrsqrt.f32 %v939_v31 }
 0x20d   : > { %1106 = vrot.lane.b32.xlu1 %v3070_v47, %s2471_s25  ;;  %1038 = vrot.lane.b32.xlu0 %v3078_v7, %s2470_s24  ;;  %2446 = vrsqrt.f32 %v1813_v19  ;;  %v3180_v51 = vadd.f32 %v3024_v32, %v1858_v30 }
 0x20e   : > { %v941_v42 = vadd.f32 1e-05, %v925_v20  ;;  %v2437_v16 = vpop.eup %2436 }
 0x20f   : > { %v2439_v52 = vpop.eup %2438  ;;  %v963_v21 = vmul.f32 %v2437_v16, %v2920_v8  ;;  %v1752_v45 = vpop.xlane.xlu0 %1751 }
 0x210   : > { %2448 = vrsqrt.f32 %v941_v42  ;;  %v1837_v6 = vmul.f32 %v2439_v52, %v2896_v1 }
 0x211   : > { %1911 = vrot.lane.b32.xlu1 %v3105_v17, %s2470_s24  ;;  %1044 = vrot.lane.b32.xlu0 %v3108_v58, %s2470_s24  ;;  %v986_v26 = vmul.f32 %v2971_v39, %v963_v21  ;;  %v2472_v21 = vmov 1966171168  }
 0x212   : > { %v2441_v56 = vpop.eup %2440  ;;  %v1860_v14 = vmul.f32 %v3014_v33, %v1837_v6  ;;  %v422_v50 = vunpack.c.l.s4 %v2472_v21 }
 0x213   : > { %v2443_v59 = vpop.eup %2442  ;;  %v965_v10 = vmul.f32 %v2441_v56, %v2929_v54  ;;  %v1758_v1 = vpop.xlane.xlu0 %1757  ;;  %v3177_v40 = vadd.f32 %v2977_v38, %v986_v26 }
 0x214   : > { %v1843_v62 = vmul.f32 %v2443_v59, %v2904_v43  ;;  %v1788_v43 = vmul.f32 0.0625, %v1752_v45  ;;  %v3189_v63 = vadd.f32 %v3024_v32, %v1860_v14  ;;  %v1790_v44 = vmul.f32 0.0625, %v1758_v1 }
 0x215   : > { %1915 = vrot.lane.b32.xlu1 %v3121_v48, %s2470_s24  ;;  %1048 = vrot.lane.b32.xlu0 %v3117_v4, %s2470_s24  ;;  %v988_v54 = vmul.f32 %v2971_v39, %v965_v10 }
 0x216   : > { %v2445_v8 = vpop.eup %2444  ;;  %v1866_v13 = vmul.f32 %v3014_v33, %v1843_v62  ;;  %v1804_v42 = vadd.f32 1e-05, %v1788_v43  ;;  %v1806_v56 = vadd.f32 1e-05, %v1790_v44  ;;  %v3240_v62 = vld [vmem:[%s402_s18] sm:$0xff] }
 0x217   : > { %v2447_v0 = vpop.eup %2446  ;;  %v971_v34 = vmul.f32 %v2445_v8, %v2926_v18  ;;  %v3193_v23 = vadd.f32 %v2977_v38, %v988_v54  ;;  %v1776_v19 = vpop.xlane.xlu0 %1775  ;;  %v3238_v8 = vld [vmem:[%s396_s15] sm:$0xff] }
 0x218   : > { %v1845_v20 = vmul.f32 %v2447_v0, %v2913_v36  ;;  %v3206_v52 = vadd.f32 %v3024_v32, %v1866_v13  ;;  %2450 = vrsqrt.f32 %v1804_v42  ;;  %v1796_v45 = vmul.f32 0.0625, %v1776_v19  ;;  %v3268_v19 = vld [vmem:[%s402_s18 + $0x8] sm:$0xff] }
 0x219   : > { %1927 = vrot.lane.b32.xlu1 %v3131_v61, %s2470_s24  ;;  %1060 = vrot.lane.b32.xlu0 %v3134_v41, %s2470_s24  ;;  %v994_v31 = vmul.f32 %v2971_v39, %v971_v34  ;;  %2452 = vrsqrt.f32 %v1806_v56  ;;  %v3256_v13 = vsub.s32 0, %v2554_v11 }
 0x21a   : > { %v2449_v12 = vpop.eup %2448  ;;  %v1868_v36 = vmul.f32 %v3014_v33, %v1845_v20  ;;  %v1812_v30 = vadd.f32 1e-05, %v1796_v45  ;;  %v3266_v20 = vld [vmem:[%s396_s15 + $0x8] sm:$0xff] }
 0x21b   : > { %v973_v18 = vmul.f32 %v2449_v12, %v2935_v2  ;;  %v3203_v16 = vadd.f32 %v2977_v38, %v994_v31  ;;  %v1782_v6 = vpop.xlane.xlu0 %1781 }
 0x21c   : > { %v3218_v26 = vadd.f32 %v3024_v32, %v1868_v36  ;;  %v1798_v10 = vmul.f32 0.0625, %v1782_v6  ;;  %2454 = vrsqrt.f32 %v1812_v30 }
 0x21d   : > { %1931 = vrot.lane.b32.xlu1 %v3143_v22, %s2470_s24  ;;  %1064 = vrot.lane.b32.xlu0 %v3146_v25, %s2470_s24  ;;  %v996_v2 = vmul.f32 %v2971_v39, %v973_v18  ;;  %v423_v39 = vunpack.c.0.s8 %v422_v50 }
 0x21e   : > { %3758 = vst [vmem:[#allocation4_spill] sm:$0xff] %v3218_v26  ;;  %v1814_v14 = vadd.f32 1e-05, %v1798_v10 }
 0x21f   : > { %v3215_v59 = vadd.f32 %v2977_v38, %v996_v2  ;;  %v3232_v38 = vsub.s32 %v423_v39, %v2554_v11 }
 0x220   : > { %2456 = vrsqrt.f32 %v1814_v14 }
 0x221   : > { %1959 = vrot.lane.b32.xlu1 %v3105_v17, %s2471_s25  ;;  %1092 = vrot.lane.b32.xlu0 %v3108_v58, %s2471_s25  ;;  %3757 = vst [vmem:[#allocation3_spill] sm:$0xff] %v3215_v59  ;;  %v3244_v1 = vrot.slane %v3238_v8, %v3232_v38  ;;  %v3252_v54 = vrot.slane %v3240_v62, %v3232_v38 }
 0x222   : > { %v2451_v0 = vpop.eup %2450  ;;  %v3277_v21 = vrot.slane %v3266_v20, %v3232_v38  ;;  %v3288_v45 = vrot.slane %v3268_v19, %v3232_v38 }
 0x223   : > { %v1836_v12 = vmul.f32 %v2451_v0, %v2941_v5  ;;  %v2453_v43 = vpop.eup %2452  ;;  %v443_v31 = vrot.slane %v3244_v1, %v3232_v38  ;;  %v545_v18 = vrot.slane %v3252_v54, %v3232_v38 }
 0x224   : > { %v1838_v42 = vmul.f32 %v2453_v43, %v2947_v29  ;;  %v492_v43 = vrot.slane %v3277_v21, %v3232_v38 }
 0x225   : > { %1963 = vrot.lane.b32.xlu1 %v3121_v48, %s2471_s25  ;;  %1096 = vrot.lane.b32.xlu0 %v3117_v4, %s2471_s25  ;;  %v1859_v11 = vmul.f32 %v3014_v33, %v1836_v12  ;;  %v3273_v2 = vrot.slane %v443_v31, %v3256_v13  ;;  %v465_v36 = vcombine.high %v443_v31, %v443_v31 }
 0x226   : > { %v2455_v44 = vpop.eup %2454  ;;  %v3284_v56 = vrot.slane %v545_v18, %v3256_v13  ;;  %v567_v29 = vcombine.high %v545_v18, %v545_v18  ;;  %v1861_v30 = vmul.f32 %v3014_v33, %v1838_v42  ;;  %v3318_v24 = vrot.slane %v492_v43, %v3256_v13 }
 0x227   : > { %v3291_v39 = vadd.f32 %v3024_v32, %v1859_v11  ;;  %v1844_v10 = vmul.f32 %v2455_v44, %v2953_v37  ;;  %v3297_v12 = vrot.slane %v465_v36, %v3256_v13  ;;  %v1229_v31 = vmul.f32 %v3273_v2, %v2981_v35 }
 0x228   : > { %v3307_v11 = vrot.slane %v567_v29, %v3256_v13  ;;  %v594_v37 = vrot.slane %v3288_v45, %v3232_v38  ;;  %v514_v29 = vcombine.high %v492_v43, %v492_v43  ;;  %v1237_v43 = vmul.f32 %v3318_v24, %v2995_v60 }
 0x229   : > { %1975 = vrot.lane.b32.xlu1 %v3131_v61, %s2471_s25  ;;  %1108 = vrot.lane.b32.xlu0 %v3134_v41, %s2471_s25  ;;  %3759 = vst [vmem:[#allocation5_spill] sm:$0xff] %v3291_v39  ;;  %v2021_v60 = vmul.f32 %v3033_v9, %v3273_v2 }
 0x22a   : > { %v2457_v14 = vpop.eup %2456 }
 0x22b   : > { %v1846_v35 = vmul.f32 %v2457_v14, %v2959_v49 }
 0x22d   : > { %1979 = vrot.lane.b32.xlu1 %v3143_v22, %s2471_s25  ;;  %1112 = vrot.lane.b32.xlu0 %v3146_v25, %s2471_s25 }
 0x231   : > { %1046 = vrot.lane.b32.xlu1 %v3177_v40, %s2470_s24  ;;  %1917 = vrot.lane.b32.xlu0 %v3180_v51, %s2470_s24 }
 0x235   : > { %1050 = vrot.lane.b32.xlu1 %v3193_v23, %s2470_s24  ;;  %1921 = vrot.lane.b32.xlu0 %v3189_v63, %s2470_s24 }
 0x239   : > { %1062 = vrot.lane.b32.xlu1 %v3203_v16, %s2470_s24  ;;  %1933 = vrot.lane.b32.xlu0 %v3206_v52, %s2470_s24 }
 0x23d   : > { %1066 = vrot.lane.b32.xlu1 %v3215_v59, %s2470_s24  ;;  %1937 = vrot.lane.b32.xlu0 %v3218_v26, %s2470_s24 }
 0x23f   : > { %v1037_v50 = vpop.permute.xlu1 %1036 }
 0x241   : > { %1094 = vrot.lane.b32.xlu1 %v3177_v40, %s2471_s25  ;;  %1965 = vrot.lane.b32.xlu0 %v3180_v51, %s2471_s25 }
 0x243   : > { %v1041_v42 = vpop.permute.xlu1 %1040 }
 0x245   : > { %1098 = vrot.lane.b32.xlu1 %v3193_v23, %s2471_s25  ;;  %1969 = vrot.lane.b32.xlu0 %v3189_v63, %s2471_s25 }
 0x247   : > { %v1053_v34 = vpop.permute.xlu0 %1052 }
 0x249   : > { %1110 = vrot.lane.b32.xlu1 %v3203_v16, %s2471_s25  ;;  %1981 = vrot.lane.b32.xlu0 %v3206_v52, %s2471_s25 }
 0x24b   : > { %v1057_v5 = vpop.permute.xlu0 %1056 }
 0x24d   : > { %1114 = vrot.lane.b32.xlu1 %v3215_v59, %s2471_s25  ;;  %1985 = vrot.lane.b32.xlu0 %v3218_v26, %s2471_s25  ;;  %v1231_v59 = vmul.f32 %v3297_v12, %v2988_v57 }
 0x24f   : > { %v1085_v6 = vpop.permute.xlu0 %1084 }
 0x250   : > { %v1133_v0 = vsel %vm1132_vm1, %v1037_v50, %v1085_v6  ;;  %v3312_v50 = vadd.f32 %v3024_v32, %v1861_v30  ;;  %v1867_v6 = vmul.f32 %v3014_v33, %v1844_v10  ;;  %v3326_v30 = vrot.slane %v594_v37, %v3256_v13 }
 0x251   : > { %v1325_v18 = vmul.f32 %v3284_v56, %v1133_v0  ;;  %1919 = vrot.lane.b32.xlu1 %v3291_v39, %s2470_s24  ;;  %v616_v10 = vcombine.high %v594_v37, %v594_v37 }
 0x252   : > { %3760 = vst [vmem:[#allocation6_spill] sm:$0xff] %v3312_v50  ;;  %v3329_v14 = vadd.f32 %v3024_v32, %v1867_v6 }
 0x253   : > { %v1341_v44 = vadd.f32 %v1325_v18, %v1229_v31  ;;  %v1089_v36 = vpop.permute.xlu0 %1088  ;;  %v1869_v18 = vmul.f32 %v3014_v33, %v1846_v35 }
 0x254   : > { %v1135_v0 = vsel %vm1132_vm1, %v1041_v42, %v1089_v36  ;;  %3761 = vst [vmem:[#allocation7_spill] sm:$0xff] %v3329_v14  ;;  %v3336_v42 = vrot.slane %v514_v29, %v3256_v13 }
 0x255   : > { %v1327_v26 = vmul.f32 %v3307_v11, %v1135_v0  ;;  %1923 = vrot.lane.b32.xlu1 %v3312_v50, %s2470_s24  ;;  %v3338_v36 = vmul.f32 0.25, %v1341_v44  ;;  %v3351_v37 = vadd.f32 %v3024_v32, %v1869_v18 }
 0x256   : > { %v1239_v6 = vmul.f32 %v3336_v42, %v3002_v28 }
 0x257   : > { %v1343_v31 = vadd.f32 %v1327_v26, %v1231_v59  ;;  %v1101_v49 = vpop.permute.xlu0 %1100  ;;  %v3346_v26 = vrot.slane %v616_v10, %v3256_v13  ;;  %3762 = vst [vmem:[#allocation8_spill] sm:$0xff] %v3351_v37 }
 0x258   : > { %v1141_v57 = vsel %vm1132_vm1, %v1053_v34, %v1101_v49 }
 0x259   : > { %v3340_v0 = vmul.f32 0.25, %v1343_v31  ;;  %v1333_v59 = vmul.f32 %v3326_v30, %v1141_v57  ;;  %1935 = vrot.lane.b32.xlu1 %v3329_v14, %s2470_s24  ;;  %v435_v57 = vcombine.high %v3244_v1, %v3244_v1  ;;  %v586_v1 = vcombine.high %v3288_v45, %v3288_v45 }
 0x25a   : > { %v2023_v45 = vmul.f32 %v3042_v53, %v3297_v12 }
 0x25b   : > { %v1349_v33 = vadd.f32 %v1333_v59, %v1237_v43  ;;  %v1105_v34 = vpop.permute.xlu0 %1104  ;;  %v537_v43 = vcombine.high %v3252_v54, %v3252_v54 }
 0x25c   : > { %v1143_v44 = vsel %vm1132_vm1, %v1057_v5, %v1105_v34 }
 0x25d   : > { %v1335_v35 = vmul.f32 %v3346_v26, %v1143_v44  ;;  %1939 = vrot.lane.b32.xlu1 %v3351_v37, %s2470_s24  ;;  %v3359_v31 = vmul.f32 0.25, %v1349_v33  ;;  %v559_v34 = vrot.slane %v537_v43, %v3232_v38  ;;  %v457_v44 = vrot.slane %v435_v57, %v3232_v38  ;;  %s414_s24 = scalar_lea.vmem %s3747_s9, %s2535_s12 }
 0x25f   : > { %v1351_v29 = vadd.f32 %v1335_v35, %v1239_v6  ;;  %v1910_v10 = vpop.permute.xlu0 %1909  ;;  %v1043_v28 = vpop.permute.xlu1 %1042  ;;  %v467_v54 = vcombine.high %v457_v44, %v457_v44 }
 0x261   : > { %v3361_v49 = vmul.f32 0.25, %v1351_v29  ;;  %1967 = vrot.lane.b32.xlu1 %v3291_v39, %s2471_s25  ;;  %v484_v29 = vcombine.high %v3277_v21, %v3277_v21 }
 0x263   : > { %v1914_v5 = vpop.permute.xlu0 %1913  ;;  %v506_v39 = vrot.slane %v484_v29, %v3232_v38 }
 0x265   : > { %1971 = vrot.lane.b32.xlu1 %v3312_v50, %s2471_s25  ;;  %v516_v29 = vcombine.high %v506_v39, %v506_v39 }
 0x267   : > { %v1926_v18 = vpop.permute.xlu0 %1925 }
 0x269   : > { %1983 = vrot.lane.b32.xlu1 %v3329_v14, %s2471_s25  ;;  %v569_v14 = vcombine.high %v559_v34, %v559_v34 }
 0x26b   : > { %v1930_v59 = vpop.permute.xlu0 %1929  ;;  %v1055_v33 = vpop.permute.xlu1 %1054  ;;  %v3399_v2 = vrot.slane %v569_v14, %v3256_v13 }
 0x26d   : > { %1987 = vrot.lane.b32.xlu1 %v3351_v37, %s2471_s25 }
 0x26f   : > { %v1958_v6 = vpop.permute.xlu0 %1957  ;;  %v1059_v35 = vpop.permute.xlu1 %1058 }
 0x270   : > { %v2005_v32 = vsel %vm1132_vm1, %v1910_v10, %v1958_v6  ;;  %v3392_v10 = vrot.slane %v467_v54, %v3256_v13  ;;  %v608_v6 = vrot.slane %v586_v1, %v3232_v38 }
 0x271   : > { %v2037_v37 = vmul.f32 %v2005_v32, %v3284_v56 }
 0x272   : > { %v1232_v53 = vmul.f32 %v3392_v10, %v3030_v46  ;;  %v618_v1 = vcombine.high %v608_v6, %v608_v6  ;;  %v1156_v46 = vrot.slane %v457_v44, %v3256_v13 }
 0x273   : > { %v3387_v43 = vadd.f32 %v2037_v37, %v2021_v60  ;;  %v1962_v57 = vpop.permute.xlu0 %1961  ;;  %v1087_v50 = vpop.permute.xlu1 %1086  ;;  %v2029_v60 = vmul.f32 %v3049_v3, %v3318_v24 }
 0x274   : > { %v2007_v21 = vsel %vm1132_vm1, %v1914_v5, %v1962_v57  ;;  %v3406_v5 = vrot.slane %v506_v39, %v3256_v13  ;;  %v3435_v44 = vrot.slane %v618_v1, %v3256_v13 }
 0x275   : > { %v2039_v9 = vmul.f32 %v2007_v21, %v3307_v11  ;;  %v3413_v11 = vrot.slane %v608_v6, %v3256_v13 }
 0x277   : > { %v3401_v56 = vadd.f32 %v2039_v9, %v2023_v45  ;;  %v1974_v37 = vpop.permute.xlu0 %1973  ;;  %v1091_v32 = vpop.permute.xlu1 %1090  ;;  %v2031_v9 = vmul.f32 %v3060_v27, %v3336_v42  ;;  %v1230_v27 = vmul.f32 %v1156_v46, %v3078_v7  ;;  %v420_v7 = vcombine.high %v3238_v8, %v3238_v8 }
 0x278   : > { %v2013_v54 = vsel %vm1132_vm1, %v1926_v18, %v1974_v37  ;;  %v1136_v12 = vsel %vm1132_vm1, %v1043_v28, %v1091_v32  ;;  %v3423_v28 = vrot.slane %v516_v29, %v3256_v13  ;;  %v1252_v32 = vrot.slane %v559_v34, %v3256_v13 }
 0x279   : > { %v2069_v14 = vcombine.low %v3387_v43, %v3401_v56  ;;  %v2045_v24 = vmul.f32 %v2013_v54, %v3326_v30  ;;  %v1328_v3 = vmul.f32 %v3399_v2, %v1136_v12  ;;  %v1238_v30 = vmul.f32 %v3406_v5, %v3057_v55 }
 0x27a   : > { %v1240_v34 = vmul.f32 %v3423_v28, %v3070_v47  ;;  %v3763_v8 = vcombine.low %v3338_v36, %v3340_v0  ;;  %v2024_v36 = vmul.f32 %v3121_v48, %v3392_v10 }
 0x27b   : > { %v3419_v57 = vadd.f32 %v2045_v24, %v2029_v60  ;;  %v1344_v39 = vadd.f32 %v1328_v3, %v1232_v53  ;;  %v1978_v18 = vpop.permute.xlu0 %1977  ;;  %v1103_v21 = vpop.permute.xlu1 %1102 }
 0x27c   : > { %v2015_v45 = vsel %vm1132_vm1, %v1930_v59, %v1978_v18  ;;  %v1142_v6 = vsel %vm1132_vm1, %v1055_v33, %v1103_v21 }
 0x27d   : > { %v2047_v60 = vmul.f32 %v2015_v45, %v3346_v26  ;;  %v1334_v37 = vmul.f32 %v3413_v11, %v1142_v6 }
 0x27f   : > { %v3437_v29 = vadd.f32 %v2047_v60, %v2031_v9  ;;  %v1350_v59 = vadd.f32 %v1334_v37, %v1238_v30  ;;  %v1039_v54 = vpop.permute.xlu0 %1038  ;;  %v1107_v53 = vpop.permute.xlu1 %1106  ;;  %v3452_v37 = vrot.slane %v420_v7, %v3232_v38 }
 0x280   : > { %v1134_v55 = vsel %vm1132_vm1, %v1039_v54, %v1087_v50  ;;  %v1144_v42 = vsel %vm1132_vm1, %v1059_v35, %v1107_v53  ;;  %v522_v50 = vcombine.high %v3240_v62, %v3240_v62  ;;  %v1360_v35 = vmul.f32 0.25, %v1344_v39 }
 0x281   : > { %v2119_v26 = vcombine.low %v3419_v57, %v3437_v29  ;;  %v1326_v33 = vmul.f32 %v1252_v32, %v1134_v55  ;;  %v1336_v12 = vmul.f32 %v3435_v44, %v1144_v42  ;;  %v1366_v21 = vmul.f32 0.25, %v1350_v59 }
 0x282   : > { %v3455_v54 = vrot.slane %v522_v50, %v3232_v38  ;;  %v3461_v53 = vrot.slane %v3763_v8, %v2557_v15  ;;  %v3764_v62 = vcombine.low %v3359_v31, %v3361_v49  ;;  %v450_v31 = vrot.slane %v3452_v37, %v3232_v38 }
 0x283   : > { %v1342_v24 = vadd.f32 %v1326_v33, %v1230_v27  ;;  %v1352_v3 = vadd.f32 %v1336_v12, %v1240_v34  ;;  %v1045_v1 = vpop.permute.xlu0 %1044  ;;  %v1912_v18 = vpop.permute.xlu1 %1911  ;;  %v469_v33 = vcombine.high %v3266_v20, %v3266_v20  ;;  %v571_v34 = vcombine.high %v3268_v19, %v3268_v19 }
 0x284   : > { %v3467_v39 = vrot.slane %v3764_v62, %v2557_v15  ;;  %v552_v49 = vrot.slane %v3455_v54, %v3232_v38 }
 0x285   : > { %v1358_v45 = vmul.f32 0.25, %v1342_v24  ;;  %v1368_v9 = vmul.f32 0.25, %v1352_v3  ;;  %v466_v3 = vcombine.high %v450_v31, %v450_v31  ;;  %v3488_v7 = vrot.slane %v469_v33, %v3232_v38 }
 0x286   : > { %v3491_v50 = vrot.slane %v552_v49, %v3256_v13  ;;  %v3494_v20 = vrot.slane %v571_v34, %v3232_v38 }
 0x287   : > { %v1381_v30 = vcombine.low %v1358_v45, %v1360_v35  ;;  %v1431_v6 = vcombine.low %v1366_v21, %v1368_v9  ;;  %v1049_v60 = vpop.permute.xlu0 %1048  ;;  %v1916_v47 = vpop.permute.xlu1 %1915  ;;  %v568_v35 = vcombine.high %v552_v49, %v552_v49  ;;  %v3497_v21 = vrot.slane %v450_v31, %v3256_v13 }
 0x288   : > { %v3500_v19 = vrot.slane %v466_v3, %v3256_v13  ;;  %v499_v62 = vrot.slane %v3488_v7, %v3232_v38  ;;  %v601_v34 = vrot.slane %v3494_v20, %v3232_v38 }
 0x289   : > { %v3470_v59 = vrot.slane %v1381_v30, %v2557_v15  ;;  %v3473_v27 = vrot.slane %v1431_v6, %v2557_v15  ;;  %v2022_v6 = vmul.f32 %v3105_v17, %v1156_v46  ;;  %v3509_v31 = vrot.slane %v568_v35, %v3256_v13 }
 0x28a   : > { %v1233_v3 = vmul.f32 %v3497_v21, %v3108_v58  ;;  %v1235_v17 = vmul.f32 %v3500_v19, %v3117_v4  ;;  %v617_v35 = vcombine.high %v601_v34, %v601_v34  ;;  %v3527_v4 = vrot.slane %v499_v62, %v3256_v13 }
 0x28b   : > { %v1405_v55 = vcombine.low %v3461_v53, %v3470_v59  ;;  %v1061_v0 = vpop.permute.xlu0 %1060  ;;  %v1928_v42 = vpop.permute.xlu1 %1927 }
 0x28f   : > { %v1065_v12 = vpop.permute.xlu0 %1064  ;;  %v1932_v24 = vpop.permute.xlu1 %1931 }
 0x293   : > { %v1093_v45 = vpop.permute.xlu0 %1092  ;;  %v1960_v9 = vpop.permute.xlu1 %1959 }
 0x294   : > { %v1137_v30 = vsel %vm1132_vm1, %v1045_v1, %v1093_v45  ;;  %v2006_v8 = vsel %vm1132_vm1, %v1912_v18, %v1960_v9  ;;  %v515_v45 = vcombine.high %v499_v62, %v499_v62 }
 0x295   : > { %v1329_v33 = vmul.f32 %v3491_v50, %v1137_v30  ;;  %v2038_v49 = vmul.f32 %v2006_v8, %v1252_v32 }
 0x297   : > { %v2054_v1 = vadd.f32 %v2038_v49, %v2022_v6  ;;  %v1097_v46 = vpop.permute.xlu0 %1096  ;;  %v1964_v18 = vpop.permute.xlu1 %1963  ;;  %v1345_v9 = vadd.f32 %v1329_v33, %v1233_v3  ;;  %v3524_v6 = vrot.slane %v601_v34, %v3256_v13 }
 0x298   : > { %v1139_v30 = vsel %vm1132_vm1, %v1049_v60, %v1097_v46  ;;  %v2008_v32 = vsel %vm1132_vm1, %v1916_v47, %v1964_v18  ;;  %v2030_v60 = vmul.f32 %v3131_v61, %v3406_v5  ;;  %v3532_v46 = vrot.slane %v515_v45, %v3256_v13 }
 0x299   : > { %v1331_v8 = vmul.f32 %v3509_v31, %v1139_v30  ;;  %v2040_v58 = vmul.f32 %v2008_v32, %v3399_v2  ;;  %v3534_v18 = vmul.f32 0.25, %v1345_v9  ;;  %v3539_v2 = vrot.slane %v617_v35, %v3256_v13 }
 0x29a   : > { %v1241_v5 = vmul.f32 %v3527_v4, %v3134_v41  ;;  %v1243_v43 = vmul.f32 %v3532_v46, %v3146_v25 }
 0x29b   : > { %v1347_v49 = vadd.f32 %v1331_v8, %v1235_v17  ;;  %v2056_v33 = vadd.f32 %v2040_v58, %v2024_v36  ;;  %v1109_v3 = vpop.permute.xlu0 %1108  ;;  %v1976_v47 = vpop.permute.xlu1 %1975 }
 0x29c   : > { %v1145_v48 = vsel %vm1132_vm1, %v1061_v0, %v1109_v3  ;;  %v2014_v10 = vsel %vm1132_vm1, %v1928_v42, %v1976_v47  ;;  %v3551_v0 = vrot.slane %v2069_v14, %v2557_v15  ;;  %v2032_v14 = vmul.f32 %v3143_v22, %v3423_v28 }
 0x29d   : > { %v3541_v62 = vmul.f32 0.25, %v1347_v49  ;;  %v2077_v36 = vcombine.low %v2054_v1, %v2056_v33  ;;  %v1337_v34 = vmul.f32 %v3524_v6, %v1145_v48  ;;  %v2046_v61 = vmul.f32 %v2014_v10, %v3413_v11 }
 0x29e   : > { %v3578_v22 = vrot.slane %v2119_v26, %v2557_v15  ;;  %v436_v10 = vcombine.high %v3452_v37, %v3452_v37 }
 0x29f   : > { %v1389_v42 = vcombine.low %v3534_v18, %v3541_v62  ;;  %v3556_v17 = vrot.slane %v2077_v36, %v2557_v15  ;;  %v2062_v1 = vadd.f32 %v2046_v61, %v2030_v60  ;;  %v1113_v45 = vpop.permute.xlu0 %1112  ;;  %v1980_v9 = vpop.permute.xlu1 %1979  ;;  %v1353_v32 = vadd.f32 %v1337_v34, %v1241_v5  ;;  %v3767_v62 = vld [vmem:[#allocation2_spill] sm:$0xff] }
 0x2a0   : > { %v1147_v11 = vsel %vm1132_vm1, %v1065_v12, %v1113_v45  ;;  %v2016_v30 = vsel %vm1132_vm1, %v1932_v24, %v1980_v9  ;;  %v464_v57 = vrot.slane %v436_v10, %v3232_v38  ;;  %v587_v9 = vcombine.high %v3494_v20, %v3494_v20 }
 0x2a1   : > { %v2101_v41 = vcombine.low %v3551_v0, %v3556_v17  ;;  %v1339_v56 = vmul.f32 %v3539_v2, %v1147_v11  ;;  %v2048_v35 = vmul.f32 %v2016_v30, %v3435_v44  ;;  %v3568_v33 = vmul.f32 0.25, %v1353_v32 }
 0x2a2   : > { %v538_v44 = vcombine.high %v3455_v54, %v3455_v54  ;;  %v468_v5 = vcombine.high %v464_v57, %v464_v57  ;;  %v3599_v11 = vrot.slane %v464_v57, %v3256_v13  ;;  %v615_v20 = vrot.slane %v587_v9, %v3232_v38 }
 0x2a3   : > { %v1355_v8 = vadd.f32 %v1339_v56, %v1243_v43  ;;  %v1918_v58 = vpop.permute.xlu0 %1917  ;;  %v1047_v49 = vpop.permute.xlu1 %1046  ;;  %v2064_v12 = vadd.f32 %v2048_v35, %v2032_v14 }
 0x2a4   : > { %v566_v61 = vrot.slane %v538_v44, %v3232_v38  ;;  %v3604_v56 = vrot.slane %v468_v5, %v3256_v13  ;;  %v619_v5 = vcombine.high %v615_v20, %v615_v20 }
 0x2a5   : > { %v3570_v24 = vmul.f32 0.25, %v1355_v8  ;;  %v2127_v3 = vcombine.low %v2062_v1, %v2064_v12  ;;  %v485_v1 = vcombine.high %v3488_v7, %v3488_v7  ;;  %v2025_v12 = vmul.f32 %v3180_v51, %v3497_v21 }
 0x2a6   : > { %v3594_v54 = vrot.slane %v566_v61, %v3256_v13  ;;  %v570_v45 = vcombine.high %v566_v61, %v566_v61  ;;  %v1236_v57 = vmul.f32 %v3604_v56, %v3193_v23 }
 0x2a7   : > { %v1439_v60 = vcombine.low %v3568_v33, %v3570_v24  ;;  %v1922_v25 = vpop.permute.xlu0 %1921  ;;  %v1051_v47 = vpop.permute.xlu1 %1050  ;;  %v3581_v28 = vrot.slane %v2127_v3, %v2557_v15  ;;  %v513_v7 = vrot.slane %v485_v1, %v3232_v38  ;;  %v2027_v3 = vmul.f32 %v3189_v63, %v3500_v19 }
 0x2a8   : > { %v3609_v35 = vrot.slane %v570_v45, %v3256_v13 }
 0x2a9   : > { %v2151_v48 = vcombine.low %v3578_v22, %v3581_v28  ;;  %v517_v8 = vcombine.high %v513_v7, %v513_v7  ;;  %v3633_v45 = vrot.slane %v513_v7, %v3256_v13  ;;  %v2033_v7 = vmul.f32 %v3206_v52, %v3527_v4 }
 0x2aa   : > { %v1446_v53 = vrot.slane %v1439_v60, %v2557_v15 }
 0x2ab   : > { %v1934_v36 = vpop.permute.xlu0 %1933  ;;  %v1063_v34 = vpop.permute.xlu1 %1062 }
 0x2af   : > { %v1938_v29 = vpop.permute.xlu0 %1937  ;;  %v1067_v26 = vpop.permute.xlu1 %1066 }
 0x2b3   : > { %v1966_v37 = vpop.permute.xlu0 %1965  ;;  %v1095_v30 = vpop.permute.xlu1 %1094 }
 0x2b4   : > { %v2009_v32 = vsel %vm1132_vm1, %v1918_v58, %v1966_v37  ;;  %v1138_v43 = vsel %vm1132_vm1, %v1047_v49, %v1095_v30  ;;  %v1234_v49 = vmul.f32 %v3599_v11, %v3177_v40  ;;  %v3626_v40 = vrot.slane %v615_v20, %v3256_v13 }
 0x2b5   : > { %v1330_v14 = vmul.f32 %v3594_v54, %v1138_v43  ;;  %v2041_v58 = vmul.f32 %v2009_v32, %v3491_v50  ;;  %v3641_v37 = vrot.slane %v619_v5, %v3256_v13 }
 0x2b7   : > { %v1970_v44 = vpop.permute.xlu0 %1969  ;;  %v1099_v10 = vpop.permute.xlu1 %1098  ;;  %v1346_v1 = vadd.f32 %v1330_v14, %v1234_v49  ;;  %v3628_v21 = vadd.f32 %v2041_v58, %v2025_v12  ;;  %v1396_v49 = vrot.slane %v1389_v42, %v2557_v15  ;;  %v3668_v42 = vrot.slane %v1405_v55, %v3767_v62 }
 0x2b8   : > { %v2011_v61 = vsel %vm1132_vm1, %v1922_v25, %v1970_v44  ;;  %v1140_v38 = vsel %vm1132_vm1, %v1051_v47, %v1099_v10  ;;  %v3766_v44 = vld [vmem:[#allocation3_spill] sm:$0xff] }
 0x2b9   : > { %v2043_v51 = vmul.f32 %v2011_v61, %v3509_v31  ;;  %v1332_v50 = vmul.f32 %v3609_v35, %v1140_v38  ;;  %v3638_v31 = vrot.slane %v517_v8, %v3256_v13  ;;  %v1362_v30 = vmul.f32 0.25, %v1346_v1  ;;  %v3765_v13 = vld [vmem:[#allocation4_spill] sm:$0xff] }
 0x2ba   : > { %v2035_v12 = vmul.f32 %v3765_v13, %v3532_v46 }
 0x2bb   : > { %v3630_v63 = vadd.f32 %v2043_v51, %v2027_v3  ;;  %v1348_v19 = vadd.f32 %v1332_v50, %v1236_v57  ;;  %v1982_v25 = vpop.permute.xlu0 %1981  ;;  %v1111_v23 = vpop.permute.xlu1 %1110  ;;  %v1244_v52 = vmul.f32 %v3638_v31, %v3766_v44 }
 0x2bc   : > { %v2017_v47 = vsel %vm1132_vm1, %v1934_v36, %v1982_v25  ;;  %v1146_v9 = vsel %vm1132_vm1, %v1063_v34, %v1111_v23  ;;  %v1242_v34 = vmul.f32 %v3633_v45, %v3203_v16  ;;  %v3768_v25 = vcombine.low %v3467_v39, %v3473_v27  ;;  %v3769_v39 = vld [vmem:[#allocation5_spill] sm:$0xff] }
 0x2bd   : > { %v2085_v32 = vcombine.low %v3628_v21, %v3630_v63  ;;  %v1364_v43 = vmul.f32 0.25, %v1348_v19  ;;  %v1338_v14 = vmul.f32 %v3626_v40, %v1146_v9  ;;  %v2049_v36 = vmul.f32 %v2017_v47, %v3524_v6 }
 0x2be   : > { %v1462_v23 = vrot.slane %v3768_v25, %v3767_v62  ;;  %v2026_v27 = vmul.f32 %v3769_v39, %v3599_v11 }
 0x2bf   : > { %v1397_v20 = vcombine.low %v1362_v30, %v1364_v43  ;;  %v1986_v8 = vpop.permute.xlu0 %1985  ;;  %v1115_v58 = vpop.permute.xlu1 %1114  ;;  %v1354_v16 = vadd.f32 %v1338_v14, %v1242_v34  ;;  %v2065_v57 = vadd.f32 %v2049_v36, %v2033_v7  ;;  %v3770_v36 = vld [vmem:[#allocation6_spill] sm:$0xff]  ;;  %v2092_v44 = vrot.slane %v2085_v32, %v2557_v15 }
 0x2c0   : > { %v2019_v3 = vsel %vm1132_vm1, %v1938_v29, %v1986_v8  ;;  %v1148_v6 = vsel %vm1132_vm1, %v1067_v26, %v1115_v58  ;;  %v2028_v34 = vmul.f32 %v3770_v36, %v3604_v56  ;;  %v3771_v56 = vld [vmem:[#allocation7_spill] sm:$0xff]  ;;  %v2108_v32 = vrot.slane %v2101_v41, %v3767_v62 }
 0x2c1   : > { %v1404_v4 = vrot.slane %v1397_v20, %v2557_v15  ;;  %v2051_v10 = vmul.f32 %v2019_v3, %v3539_v2  ;;  %v1340_v46 = vmul.f32 %v3641_v37, %v1148_v6  ;;  %v1370_v29 = vmul.f32 0.25, %v1354_v16 }
 0x2c2   : > { %v2034_v16 = vmul.f32 %v3771_v56, %v3633_v45 }
 0x2c3   : > { %v1413_v61 = vcombine.low %v1396_v49, %v1404_v4  ;;  %v2067_v38 = vadd.f32 %v2051_v10, %v2035_v12  ;;  %v1356_v5 = vadd.f32 %v1340_v46, %v1244_v52  ;;  %v1920_v18 = vpop.permute.xlu1 %1919 }
 0x2c5   : > { %v2135_v26 = vcombine.low %v2065_v57, %v2067_v38  ;;  %v1372_v1 = vmul.f32 0.25, %v1356_v5  ;;  %v3671_v51 = vrot.slane %v1413_v61, %v3767_v62 }
 0x2c7   : > { %v1447_v2 = vcombine.low %v1370_v29, %v1372_v1  ;;  %v1924_v50 = vpop.permute.xlu1 %1923  ;;  %v1422_v21 = vcombine.high %v3668_v42, %v3671_v51  ;;  %v1421_v63 = vcombine.low %v3668_v42, %v3671_v51  ;;  %v2142_v45 = vrot.slane %v2135_v26, %v2557_v15 }
 0x2c9   : > { %v1454_v59 = vrot.slane %v1447_v2, %v2557_v15 }
 0x2cb   : > { %v1463_v55 = vcombine.low %v1446_v53, %v1454_v59  ;;  %v1936_v19 = vpop.permute.xlu1 %1935 }
 0x2cd   : > { %v1470_v47 = vrot.slane %v1463_v55, %v3767_v62 }
 0x2cf   : > { %v1940_v9 = vpop.permute.xlu1 %1939  ;;  %v1472_v30 = vcombine.high %v1462_v23, %v1470_v47  ;;  %v1471_v43 = vcombine.low %v1462_v23, %v1470_v47 }
 0x2d1   : > { %v2380_v14 = vpack.i.bf16 %v1472_v30, %v1422_v21 }
 0x2d3   : > { %2381 = vrot.lane.b32.xlu0 %v2380_v14, %s2473_s11  ;;  %v1968_v33 = vpop.permute.xlu1 %1967 }
 0x2d4   : > { %v2010_v24 = vsel %vm1132_vm1, %v1920_v18, %v1968_v33 }
 0x2d5   : > { %v2042_v60 = vmul.f32 %v2010_v24, %v3594_v54 }
 0x2d7   : > { %v1972_v7 = vpop.permute.xlu1 %1971  ;;  %v2058_v13 = vadd.f32 %v2042_v60, %v2026_v27 }
 0x2d8   : > { %v2012_v20 = vsel %vm1132_vm1, %v1924_v50, %v1972_v7 }
 0x2d9   : > { %v2044_v8 = vmul.f32 %v2012_v20, %v3609_v35  ;;  %v3772_v35 = vld [vmem:[#allocation8_spill] sm:$0xff] }
 0x2da   : > { %v2036_v10 = vmul.f32 %v3772_v35, %v3638_v31 }
 0x2db   : > { %v2060_v12 = vadd.f32 %v2044_v8, %v2028_v34  ;;  %v1984_v58 = vpop.permute.xlu1 %1983 }
 0x2dc   : > { %v2018_v49 = vsel %vm1132_vm1, %v1936_v19, %v1984_v58 }
 0x2dd   : > { %v2093_v3 = vcombine.low %v2058_v13, %v2060_v12  ;;  %v2050_v52 = vmul.f32 %v2018_v49, %v3626_v40 }
 0x2df   : > { %v2100_v54 = vrot.slane %v2093_v3, %v2557_v15  ;;  %v1988_v6 = vpop.permute.xlu1 %1987  ;;  %v2066_v61 = vadd.f32 %v2050_v52, %v2034_v16 }
 0x2e0   : > { %v2020_v11 = vsel %vm1132_vm1, %v1940_v9, %v1988_v6 }
 0x2e1   : > { %v2109_v4 = vcombine.low %v2092_v44, %v2100_v54  ;;  %v2052_v46 = vmul.f32 %v2020_v11, %v3641_v37  ;;  %v2158_v37 = vrot.slane %v2151_v48, %v3767_v62 }
 0x2e3   : > { %v2068_v57 = vadd.f32 %v2052_v46, %v2036_v10  ;;  %v2116_v40 = vrot.slane %v2109_v4, %v3767_v62 }
 0x2e5   : > { %v2143_v38 = vcombine.low %v2066_v61, %v2068_v57  ;;  %v2118_v5 = vcombine.high %v2108_v32, %v2116_v40  ;;  %v2117_v18 = vcombine.low %v2108_v32, %v2116_v40 }
 0x2e7   : > { %v2150_v42 = vrot.slane %v2143_v38, %v2557_v15 }
 0x2e9   : > { %v2159_v31 = vcombine.low %v2142_v45, %v2150_v42 }
 0x2eb   : > { %v2166_v29 = vrot.slane %v2159_v31, %v3767_v62 }
 0x2ed   : > { %v2168_v0 = vcombine.high %v2158_v37, %v2166_v29  ;;  %v2167_v17 = vcombine.low %v2158_v37, %v2166_v29 }
 0x2ef   : > { %v2385_v41 = vpack.i.bf16 %v2168_v0, %v2118_v5 }
 0x2f1   : > { %2386 = vrot.lane.b32.xlu1 %v2385_v41, %s2473_s11 }
 0x345   : > { %v2382_v1 = vpop.permute.xlu0 %2381 }
 0x346   : > { %v2384_v51 = vunpack.i.h.bf16 %v2382_v1  ;;  %v2383_v26 = vunpack.i.l.bf16 %v2382_v1 }
 0x348   : > { %v1482_v15 = vsel %vm1481_vm2, %v1421_v63, %v2383_v26  ;;  %v1483_v22 = vsel %vm1481_vm2, %v1471_v43, %v2384_v51 }
 0x349   : > { %v2342_v28 = vpack.c.bf16 %v1482_v15, %v1482_v15  ;;  %v2343_v48 = vpack.c.bf16 %v1483_v22, %v1483_v22 }
 0x34b   : > { %1493 = vst.msk [vmem:[%s408_s21] sm:$0xf] %vm1492_vm3, %v2342_v28  ;;  %1494 = vst.msk [vmem:[%s408_s21 + $0x4] sm:$0xf] %vm1492_vm3, %v2343_v48 }
 0x363   : > { %v2387_v62 = vpop.permute.xlu1 %2386 }
 0x364   : > { %v2389_v2 = vunpack.i.h.bf16 %v2387_v62  ;;  %v2388_v50 = vunpack.i.l.bf16 %v2387_v62 }
 0x366   : > { %v2177_v21 = vsel %vm1481_vm2, %v2117_v18, %v2388_v50  ;;  %v2178_v53 = vsel %vm1481_vm2, %v2167_v17, %v2389_v2 }
 0x367   : > { %v2344_v63 = vpack.c.bf16 %v2177_v21, %v2177_v21  ;;  %v2345_v59 = vpack.c.bf16 %v2178_v53, %v2178_v53 }
 0x369   : > { %2187 = vst.msk [vmem:[%s414_s24] sm:$0xf] %vm1492_vm3, %v2344_v63  ;;  %2188 = vst.msk [vmem:[%s414_s24 + $0x4] sm:$0xf] %vm1492_vm3, %v2345_v59 }
 0x36a PF: > { %s20_s30 = sadd.s32 1, %s2464_s30  }
 0x36b   : > { %p17_p4 = scmp.ge.s32.totalorder %s20_s30, 7  }
 0x36d   :  { %19 = sbr.rel (!%p17_p4) target bundleno = 1 (0x1), region = 103 }

// kernel: _forward.44
= control target key start
LH: loop header
LB: loop body
LE: loop exit
PB: predicated region body
PF: predicated region fallthrough
CT: control target
= control target key end

     0   :  { %v404_v0 = vmov 0.0   ;;  %vm405_vm0 = vmmov 0   ;;  %vm73_vm1 = vcmask 261120   ;;  %vm292_vm2 = vcmask 519168   ;;  %s577_s1 = inlined_call_operand.vmem [shape: bf16[32,64], index: 1, kind: input, shape index: {}]   ;;  %s578_s0 = inlined_call_operand.vmem [shape: bf16[80,32], index: 0, kind: input, shape index: {}]   ;;  %s579_s2 = inlined_call_operand.vmem [shape: f32[1,64], index: 2, kind: input, shape index: {}]   ;;  %s580_s3 = inlined_call_operand.vmem [shape: bf16[80,64], index: 3, kind: output, shape index: {}]  }
   0x1   :  { %347 = vmatprep.subr.bf16.mxu0 %v404_v0  ;;  %371 = vmatprep.subr.bf16.mxu1 %v404_v0  ;;  %v377_v1 = vld [vmem:[%s577_s1] sm:$0xff]   ;;  %v378_v2 = vld [vmem:[%s577_s1 + $0x8] sm:$0xff]   ;;  %v380_v4 = vld [vmem:[%s578_s0 + $0x18] sm:$0xff]  }
   0x2   :  { %351 = vmatprep.mubr.msk.bf16.mxu0 %vm405_vm0, %v404_v0  ;;  %363 = vmatprep.mubr.msk.bf16.mxu1 %vm405_vm0, %v404_v0  ;;  %v379_v3 = vld [vmem:[%s578_s0] sm:$0xff]   ;;  %v381_v5 = vld [vmem:[%s578_s0 + $0x8] sm:$0xff]   ;;  %v383_v7 = vld [vmem:[%s578_s0 + $0x10] sm:$0xff]  }
   0x3   :  { %348 = vmatpush3.bf16.msra.mxu0 %v377_v1  ;;  %373 = vmatpush3.bf16.msra.mxu1 %v377_v1  ;;  %v382_v6 = vld [vmem:[%s578_s0 + $0x20] sm:$0xff]  }
   0x4   :  { %349 = vmatprep.subr.bf16.mxu0 %v404_v0  ;;  %372 = vmatprep.subr.bf16.mxu1 %v404_v0  ;;  %v455_v8 = vld [vmem:[%s579_s2] ss:$0 sm:$0xff] }
   0x7   :  { %350 = vmatpush3.bf16.msra.mxu0 %v378_v2  ;;  %374 = vmatpush3.bf16.msra.mxu1 %v378_v2 }
   0xa   :  { %352 = vmatmul.mubr.msk.bf16.vlgmr.msra.gmra.mrb[0].mxu0 %vm73_vm1, %v379_v3  ;;  %364 = vmatmul.mubr.msk.bf16.vlgmr.msra.gmra.mrb[0].mxu1 %vm73_vm1, %v380_v4 }
   0xb   :  { %355 = vmatprep.mubr.msk.bf16.mxu0 %vm405_vm0, %v404_v0  ;;  %367 = vmatprep.mubr.msk.bf16.mxu1 %vm405_vm0, %v404_v0 }
  0x12   :  { %356 = vmatmul.mubr.msk.bf16.gmra.mrb[4].mxu0 %vm73_vm1, %v381_v5  ;;  %368 = vmatmul.mubr.msk.bf16.gmra.mrb[4].mxu1 %vm73_vm1, %v382_v6 }
  0x13   :  { %359 = vmatprep.mubr.msk.bf16.mxu0 %vm405_vm0, %v404_v0 }
  0x1a   :  { %360 = vmatmul.mubr.msk.bf16.gmra.mrb[8].mxu0 %vm73_vm1, %v383_v7 }
  0xdd   :  { %v123_v9 = vpop.f32.mrb[0].mxu0  ;;  %v147_v10 = vpop.f32.mrb[0].mxu1 }
  0xde   :  { %v458_v11 = vadd.f32 %v455_v8, %v123_v9  ;;  %v461_v12 = vadd.f32 %v455_v8, %v147_v10  ;;  %v353_v13 = vpop.f32.mrb[1].mxu0  ;;  %v365_v14 = vpop.f32.mrb[1].mxu1 }
  0xdf   :  { %v126_v15 = vpop.f32.mrb[2].mxu0  ;;  %v150_v16 = vpop.f32.mrb[2].mxu1 }
  0xe0   :  { %v172_v17 = vmul.f32 0.044715, %v458_v11  ;;  %v178_v18 = vmul.f32 0.044715, %v461_v12  ;;  %v466_v19 = vadd.f32 %v455_v8, %v126_v15  ;;  %v469_v20 = vadd.f32 %v455_v8, %v150_v16  ;;  %v354_v21 = vpop.f32.mrb[3].mxu0  ;;  %v366_v22 = vpop.f32.mrb[3].mxu1 }
  0xe2   :  { %v182_v23 = vmul.f32 %v172_v17, %v458_v11  ;;  %v188_v24 = vmul.f32 %v178_v18, %v461_v12  ;;  %v173_v25 = vmul.f32 0.044715, %v466_v19  ;;  %v179_v26 = vmul.f32 0.044715, %v469_v20 }
  0xe4   :  { %v192_v27 = vmul.f32 %v182_v23, %v458_v11  ;;  %v198_v28 = vmul.f32 %v188_v24, %v461_v12  ;;  %v183_v29 = vmul.f32 %v173_v25, %v466_v19  ;;  %v189_v30 = vmul.f32 %v179_v26, %v469_v20 }
  0xe5   :  { %v131_v31 = vpop.f32.mrb[4].mxu0  ;;  %v155_v32 = vpop.f32.mrb[4].mxu1  ;;  %v162_v25 = vmul.f32 0.5, %v458_v11 }
  0xe6   :  { %v202_v33 = vadd.f32 %v192_v27, %v458_v11  ;;  %v208_v34 = vadd.f32 %v198_v28, %v461_v12  ;;  %v482_v35 = vadd.f32 %v455_v8, %v131_v31  ;;  %v485_v36 = vadd.f32 %v455_v8, %v155_v32  ;;  %v357_v37 = vpop.f32.mrb[5].mxu0  ;;  %v369_v38 = vpop.f32.mrb[5].mxu1 }
  0xe7   :  { %v193_v39 = vmul.f32 %v183_v29, %v466_v19  ;;  %v199_v40 = vmul.f32 %v189_v30, %v469_v20  ;;  %v134_v41 = vpop.f32.mrb[6].mxu0  ;;  %v158_v42 = vpop.f32.mrb[6].mxu1  ;;  %v168_v28 = vmul.f32 0.5, %v461_v12  ;;  %v163_v11 = vmul.f32 0.5, %v466_v19 }
  0xe8   :  { %v212_v43 = vmul.f32 0.7978846, %v202_v33  ;;  %v218_v44 = vmul.f32 0.7978846, %v208_v34  ;;  %v174_v47 = vmul.f32 0.044715, %v482_v35  ;;  %v494_v51 = vadd.f32 %v455_v8, %v134_v41 }
  0xe9   :  { %v203_v45 = vadd.f32 %v193_v39, %v466_v19  ;;  %v209_v46 = vadd.f32 %v199_v40, %v469_v20  ;;  %v180_v48 = vmul.f32 0.044715, %v485_v36  ;;  %v358_v49 = vpop.f32.mrb[7].mxu0  ;;  %v370_v50 = vpop.f32.mrb[7].mxu1  ;;  %v497_v52 = vadd.f32 %v455_v8, %v158_v42 }
  0xea   :  { %384 = vtanh.f32 %v212_v43  ;;  %v184_v55 = vmul.f32 %v174_v47, %v482_v35  ;;  %v175_v57 = vmul.f32 0.044715, %v494_v51  ;;  %v169_v41 = vmul.f32 0.5, %v469_v20 }
  0xeb   :  { %386 = vtanh.f32 %v218_v44  ;;  %v213_v53 = vmul.f32 0.7978846, %v203_v45  ;;  %v219_v54 = vmul.f32 0.7978846, %v209_v46  ;;  %v190_v56 = vmul.f32 %v180_v48, %v485_v36 }
  0xec   :  { %v194_v58 = vmul.f32 %v184_v55, %v482_v35  ;;  %v181_v59 = vmul.f32 0.044715, %v497_v52  ;;  %v185_v62 = vmul.f32 %v175_v57, %v494_v51  ;;  %v164_v49 = vmul.f32 0.5, %v482_v35 }
  0xed   :  { %388 = vtanh.f32 %v213_v53  ;;  %v139_v60 = vpop.f32.mrb[8].mxu0  ;;  %v200_v61 = vmul.f32 %v190_v56, %v485_v36  ;;  %v170_v53 = vmul.f32 0.5, %v485_v36 }
  0xee   :  { %390 = vtanh.f32 %v219_v54  ;;  %v507_v63 = vadd.f32 %v455_v8, %v139_v60  ;;  %v361_v0 = vpop.f32.mrb[9].mxu0  ;;  %v204_v1 = vadd.f32 %v194_v58, %v482_v35  ;;  %v191_v2 = vmul.f32 %v181_v59, %v497_v52 }
  0xef   :  { %v142_v3 = vpop.f32.mrb[10].mxu0  ;;  %v210_v4 = vadd.f32 %v200_v61, %v485_v36  ;;  %v195_v5 = vmul.f32 %v185_v62, %v494_v51  ;;  %v165_v59 = vmul.f32 0.5, %v494_v51  ;;  %v171_v62 = vmul.f32 0.5, %v497_v52 }
  0xf0   :  { %v176_v6 = vmul.f32 0.044715, %v507_v63  ;;  %v362_v7 = vpop.f32.mrb[11].mxu0  ;;  %v214_v9 = vmul.f32 0.7978846, %v204_v1  ;;  %v201_v10 = vmul.f32 %v191_v2, %v497_v52  ;;  %v516_v13 = vadd.f32 %v455_v8, %v142_v3 }
  0xf1   :  { %v220_v14 = vmul.f32 0.7978846, %v210_v4  ;;  %v205_v15 = vadd.f32 %v195_v5, %v494_v51  ;;  %v166_v3 = vmul.f32 0.5, %v507_v63 }
  0xf2   :  { %v186_v16 = vmul.f32 %v176_v6, %v507_v63  ;;  %392 = vtanh.f32 %v214_v9  ;;  %v211_v17 = vadd.f32 %v201_v10, %v497_v52  ;;  %v177_v18 = vmul.f32 0.044715, %v516_v13 }
  0xf3   :  { %394 = vtanh.f32 %v220_v14  ;;  %v215_v22 = vmul.f32 0.7978846, %v205_v15  ;;  %v167_v7 = vmul.f32 0.5, %v516_v13 }
  0xf4   :  { %v385_v21 = vpop.eup %384  ;;  %v196_v23 = vmul.f32 %v186_v16, %v507_v63  ;;  %v221_v26 = vmul.f32 0.7978846, %v211_v17  ;;  %v187_v27 = vmul.f32 %v177_v18, %v516_v13 }
  0xf5   :  { %v387_v24 = vpop.eup %386  ;;  %v232_v8 = vadd.f32 1.0, %v385_v21  ;;  %396 = vtanh.f32 %v215_v22 }
  0xf6   :  { %v238_v29 = vadd.f32 1.0, %v387_v24  ;;  %v206_v30 = vadd.f32 %v196_v23, %v507_v63  ;;  %398 = vtanh.f32 %v221_v26  ;;  %v197_v33 = vmul.f32 %v187_v27, %v516_v13 }
  0xf7   :  { %v389_v31 = vpop.eup %388  ;;  %v242_v32 = vmul.f32 %v232_v8, %v162_v25 }
  0xf8   :  { %v391_v34 = vpop.eup %390  ;;  %v248_v37 = vmul.f32 %v238_v29, %v168_v28  ;;  %v233_v38 = vadd.f32 1.0, %v389_v31  ;;  %v216_v39 = vmul.f32 0.7978846, %v206_v30  ;;  %v207_v42 = vadd.f32 %v197_v33, %v516_v13 }
  0xf9   :  { %v330_v40 = vpack.c.bf16 %v242_v32, %v242_v32  ;;  %v239_v12 = vadd.f32 1.0, %v391_v34 }
  0xfa   :  { %v336_v43 = vpack.c.bf16 %v248_v37, %v248_v37  ;;  %v243_v44 = vmul.f32 %v233_v38, %v163_v11  ;;  %400 = vtanh.f32 %v216_v39  ;;  %v217_v46 = vmul.f32 0.7978846, %v207_v42 }
  0xfb   :  { %293 = vst.msk [vmem:[%s580_s3] sm:$0xf] %vm292_vm2, %v330_v40  ;;  %v249_v45 = vmul.f32 %v239_v12, %v169_v41 }
  0xfc   :  { %299 = vst.msk [vmem:[%s580_s3 + $0x18] sm:$0xf] %vm292_vm2, %v336_v43  ;;  %v331_v19 = vpack.c.bf16 %v243_v44, %v243_v44  ;;  %v393_v20 = vpop.eup %392  ;;  %402 = vtanh.f32 %v217_v46 }
  0xfd   :  { %v337_v47 = vpack.c.bf16 %v249_v45, %v249_v45  ;;  %v395_v48 = vpop.eup %394  ;;  %v234_v50 = vadd.f32 1.0, %v393_v20 }
  0xfe   :  { %294 = vst.msk [vmem:[%s580_s3 + $0x4] sm:$0xf] %vm292_vm2, %v331_v19  ;;  %v240_v54 = vadd.f32 1.0, %v395_v48 }
  0xff   :  { %300 = vst.msk [vmem:[%s580_s3 + $0x1c] sm:$0xf] %vm292_vm2, %v337_v47  ;;  %v397_v55 = vpop.eup %396  ;;  %v244_v56 = vmul.f32 %v234_v50, %v164_v49 }
 0x100   :  { %v399_v57 = vpop.eup %398  ;;  %v250_v58 = vmul.f32 %v240_v54, %v170_v53  ;;  %v235_v60 = vadd.f32 1.0, %v397_v55 }
 0x101   :  { %v332_v61 = vpack.c.bf16 %v244_v56, %v244_v56  ;;  %v241_v35 = vadd.f32 1.0, %v399_v57 }
 0x102   :  { %v338_v0 = vpack.c.bf16 %v250_v58, %v250_v58  ;;  %v245_v1 = vmul.f32 %v235_v60, %v165_v59 }
 0x103   :  { %295 = vst.msk [vmem:[%s580_s3 + $0x8] sm:$0xf] %vm292_vm2, %v332_v61  ;;  %v251_v36 = vmul.f32 %v241_v35, %v171_v62 }
 0x104   :  { %v401_v2 = vpop.eup %400  ;;  %301 = vst.msk [vmem:[%s580_s3 + $0x20] sm:$0xf] %vm292_vm2, %v338_v0  ;;  %v333_v51 = vpack.c.bf16 %v245_v1, %v245_v1 }
 0x105   :  { %v236_v4 = vadd.f32 1.0, %v401_v2  ;;  %v339_v52 = vpack.c.bf16 %v251_v36, %v251_v36 }
 0x106   :  { %v403_v5 = vpop.eup %402  ;;  %296 = vst.msk [vmem:[%s580_s3 + $0xc] sm:$0xf] %vm292_vm2, %v333_v51 }
 0x107   :  { %v246_v6 = vmul.f32 %v236_v4, %v166_v3  ;;  %302 = vst.msk [vmem:[%s580_s3 + $0x24] sm:$0xf] %vm292_vm2, %v339_v52  ;;  %v237_v9 = vadd.f32 1.0, %v403_v5 }
 0x109   :  { %v334_v10 = vpack.c.bf16 %v246_v6, %v246_v6  ;;  %v247_v14 = vmul.f32 %v237_v9, %v167_v7 }
 0x10b   :  { %297 = vst.msk [vmem:[%s580_s3 + $0x10] sm:$0xf] %vm292_vm2, %v334_v10  ;;  %v335_v63 = vpack.c.bf16 %v247_v14, %v247_v14 }
 0x10d   :  { %298 = vst.msk [vmem:[%s580_s3 + $0x14] sm:$0xf] %vm292_vm2, %v335_v63 }

// kernel: _forward.42
= control target key start
LH: loop header
LB: loop body
LE: loop exit
PB: predicated region body
PF: predicated region fallthrough
CT: control target
= control target key end

     0   :  { %v626_v0 = vmov 0   ;;  %v627_v5 = vmov 0.0   ;;  %vm628_vm0 = vmmov 0   ;;  %vm291_vm1 = vcmask 261120   ;;  %s810_s3 = inlined_call_operand.vmem [shape: s32[80,1], index: 3, kind: input, shape index: {}]   ;;  %s811_s4 = inlined_call_operand.vmem [shape: bf16[32,32], index: 4, kind: input, shape index: {}]   ;;  %s812_s2 = inlined_call_operand.vmem [shape: f32[8,32], index: 2, kind: input, shape index: {}]   ;;  %s813_s0 = inlined_call_operand.vmem [shape: bf16[80,32], index: 0, kind: input, shape index: {}]   ;;  %s814_s1 = inlined_call_operand.vmem [shape: bf16[80,32], index: 1, kind: input, shape index: {}]   ;;  %s815_s5 = inlined_call_operand.vmem [shape: bf16[80,32], index: 5, kind: output, shape index: {}]  }
   0x1   :  { %618 = vset.pattern.permute.xlu1 %v626_v0  ;;  %617 = vset.pattern.permute.xlu0 %v626_v0  ;;  %v33_v1 = vld [vmem:[%s810_s3 + $0x10] sm:$0xff]  ;;  %v31_v2 = vld [vmem:[%s810_s3] sm:$0xff]  ;;  %v34_v3 = vld [vmem:[%s810_s3 + $0x18] sm:$0xff]  ;;  %v41_v19 = vlaneseq  ;;  %vm104_vm2 = vcmask 64512   ;;  %vm460_vm13 = vcmask 257024  }
   0x2   :  { %50 = vperm.xlu1 %618, %v33_v1   ;;  %44 = vperm.xlu0 %617, %v31_v2   ;;  %v32_v4 = vld [vmem:[%s810_s3 + $0x8] sm:$0xff]  ;;  %v619_v7 = vld [vmem:[%s811_s4] sm:$0xff]   ;;  %v38_v11 = vld [vmem:[%s810_s3 + $0x38] sm:$0xff] }
   0x3   :  { %610 = vmatprep.subr.bf16.mxu1 %v627_v5  ;;  %594 = vmatprep.mubr.msk.bf16.mxu1 %vm628_vm0, %v627_v5  ;;  %v36_v6 = vld [vmem:[%s810_s3 + $0x28] sm:$0xff]  ;;  %v35_v8 = vld [vmem:[%s810_s3 + $0x20] sm:$0xff]  ;;  %v37_v12 = vld [vmem:[%s810_s3 + $0x30] sm:$0xff]  ;;  %v42_v20 = vand.u32 127, %v41_v19 }
   0x4   :  { %612 = vmatpush3.bf16.msra.mxu1 %v619_v7  ;;  %v620_v9 = vld [vmem:[%s811_s4 + $0x8] sm:$0xff]   ;;  %v103_v10 = vld [vmem:[%s812_s2] sm:$0xff]  ;;  %v622_v16 = vld [vmem:[%s813_s0 + $0x10] sm:$0xff]  }
   0x5   :  { %611 = vmatprep.subr.bf16.mxu1 %v627_v5  ;;  %569 = vmatprep.subr.mxu0 %v103_v10  ;;  %v621_v13 = vld [vmem:[%s813_s0 + $0x8] sm:$0xff]   ;;  %v39_v15 = vld [vmem:[%s810_s3 + $0x40] sm:$0xff]  ;;  %v623_v17 = vld [vmem:[%s813_s0 + $0x18] sm:$0xff]  }
   0x6   :  { %53 = vperm.xlu1 %618, %v34_v3   ;;  %47 = vperm.xlu0 %617, %v32_v4   ;;  %v40_v14 = vld [vmem:[%s810_s3 + $0x48] sm:$0xff]  ;;  %v624_v18 = vld [vmem:[%s813_s0 + $0x20] sm:$0xff]   ;;  %v548_v0 = vld [vmem:[%s814_s1 + $0x10] sm:$0xff]  }
   0x7   :  { %570 = vmatpush3.msra.mxu0 %v103_v10  ;;  %v625_v41 = vld [vmem:[%s813_s0] sm:$0xff]   ;;  %v547_v59 = vld [vmem:[%s814_s1 + $0x8] sm:$0xff]  }
   0x8   :  { %613 = vmatpush3.bf16.msra.mxu1 %v620_v9  ;;  %586 = vmatprep.subr.bf16.mxu0 %v627_v5  ;;  %v534_v61 = vunpack.c.h.bf16 %v547_v59  ;;  %v533_v63 = vunpack.c.l.bf16 %v547_v59 }
   0xa   :  { %59 = vperm.xlu1 %618, %v36_v6   ;;  %56 = vperm.xlu0 %617, %v35_v8   ;;  %v537_v8 = vunpack.c.l.bf16 %v548_v0 }
   0xb   :  { %595 = vmatmul.mubr.msk.bf16.vlgmr.msra.gmra.mrb[0].mxu1 %vm291_vm1, %v621_v13 }
   0xc   :  { %598 = vmatprep.mubr.msk.bf16.mxu1 %vm628_vm0, %v627_v5 }
   0xe   :  { %65 = vperm.xlu1 %618, %v38_v11   ;;  %62 = vperm.xlu0 %617, %v37_v12  }
  0x12   :  { %71 = vperm.xlu1 %618, %v40_v14   ;;  %68 = vperm.xlu0 %617, %v39_v15  }
  0x13   :  { %599 = vmatmul.mubr.msk.bf16.gmra.mrb[4].mxu1 %vm291_vm1, %v622_v16 }
  0x14   :  { %602 = vmatprep.mubr.msk.bf16.mxu1 %vm628_vm0, %v627_v5 }
  0x1b   :  { %603 = vmatmul.mubr.msk.bf16.gmra.mrb[8].mxu1 %vm291_vm1, %v623_v17 }
  0x1c   :  { %606 = vmatprep.mubr.msk.bf16.mxu1 %vm628_vm0, %v627_v5 }
  0x23   :  { %607 = vmatmul.mubr.msk.bf16.gmra.mrb[12].mxu1 %vm291_vm1, %v624_v18 }
  0x81   :  { %v51_v21 = vpop.permute.xlu1 %50  ;;  %v45_v22 = vpop.permute.xlu0 %44 }
  0x82   :  { %vm73_vm3 = vcmp.eq.s32.totalorder %v45_v22, %v42_v20  ;;  %vm75_vm4 = vcmp.eq.s32.totalorder %v51_v21, %v42_v20 }
  0x83   :  { %v475_v23 = vsel %vm73_vm3, 1.0, %v627_v5  ;;  %v477_v26 = vsel %vm75_vm4, 1.0, %v627_v5 }
  0x84   :  { %571 = vmatprep.mubr.msk.f32.mxu0 %vm104_vm2, %v475_v23 }
  0x85   :  { %v54_v24 = vpop.permute.xlu1 %53  ;;  %v48_v25 = vpop.permute.xlu0 %47 }
  0x86   :  { %vm74_vm5 = vcmp.eq.s32.totalorder %v48_v25, %v42_v20  ;;  %vm76_vm6 = vcmp.eq.s32.totalorder %v54_v24, %v42_v20 }
  0x87   :  { %v476_v27 = vsel %vm74_vm5, 1.0, %v627_v5  ;;  %v478_v30 = vsel %vm76_vm6, 1.0, %v627_v5 }
  0x88   :  { %572 = vmatmul.mubr.msk.f32.vlgmr.msra.gmra.mrb[0].mxu0 %vm104_vm2, %v476_v27 }
  0x89   :  { %587 = vmatpush3.bf16.msra.mxu0 %v619_v7  ;;  %v60_v28 = vpop.permute.xlu1 %59  ;;  %v57_v29 = vpop.permute.xlu0 %56  ;;  %574 = vmatprep.mubr.msk.f32.mxu0 %vm104_vm2, %v477_v26 }
  0x8a   :  { %vm77_vm7 = vcmp.eq.s32.totalorder %v57_v29, %v42_v20  ;;  %588 = vmatprep.subr.bf16.mxu0 %v627_v5  ;;  %vm78_vm8 = vcmp.eq.s32.totalorder %v60_v28, %v42_v20 }
  0x8b   :  { %v479_v31 = vsel %vm77_vm7, 1.0, %v627_v5  ;;  %v480_v34 = vsel %vm78_vm8, 1.0, %v627_v5 }
  0x8c   :  { %575 = vmatmul.mubr.msk.f32.gmra.mrb[2].mxu0 %vm104_vm2, %v478_v30 }
  0x8d   :  { %v66_v32 = vpop.permute.xlu1 %65  ;;  %v63_v33 = vpop.permute.xlu0 %62  ;;  %577 = vmatprep.mubr.msk.f32.mxu0 %vm104_vm2, %v479_v31  ;;  %589 = vmatpush3.bf16.msra.mxu0 %v620_v9  ;;  %v549_v9 = vld [vmem:[%s814_s1 + $0x18] sm:$0xff]   ;;  %v528_v31 = vld [vmem:[%s814_s1] sm:$0xff]  }
  0x8e   :  { %vm79_vm9 = vcmp.eq.s32.totalorder %v63_v33, %v42_v20  ;;  %vm80_vm10 = vcmp.eq.s32.totalorder %v66_v32, %v42_v20  ;;  %v542_v16 = vunpack.c.h.bf16 %v549_v9  ;;  %v541_v19 = vunpack.c.l.bf16 %v549_v9 }
  0x8f   :  { %v481_v35 = vsel %vm79_vm9, 1.0, %v627_v5  ;;  %v482_v38 = vsel %vm80_vm10, 1.0, %v627_v5 }
  0x90   :  { %578 = vmatmul.mubr.msk.f32.gmra.mrb[4].mxu0 %vm104_vm2, %v480_v34 }
  0x91   :  { %v72_v36 = vpop.permute.xlu1 %71  ;;  %v69_v37 = vpop.permute.xlu0 %68  ;;  %580 = vmatprep.mubr.msk.f32.mxu0 %vm104_vm2, %v481_v35 }
  0x92   :  { %vm81_vm11 = vcmp.eq.s32.totalorder %v69_v37, %v42_v20  ;;  %vm82_vm12 = vcmp.eq.s32.totalorder %v72_v36, %v42_v20  ;;  %v550_v20 = vld [vmem:[%s814_s1 + $0x20] sm:$0xff]  }
  0x93   :  { %v483_v39 = vsel %vm81_vm11, 1.0, %v627_v5  ;;  %v484_v40 = vsel %vm82_vm12, 1.0, %v627_v5  ;;  %v546_v27 = vunpack.c.h.bf16 %v550_v20  ;;  %v545_v30 = vunpack.c.l.bf16 %v550_v20 }
  0x94   :  { %581 = vmatmul.mubr.msk.f32.gmra.mrb[6].mxu0 %vm104_vm2, %v482_v38  ;;  %v529_v38 = vunpack.c.l.bf16 %v528_v31 }
  0x95   :  { %583 = vmatprep.mubr.msk.f32.mxu0 %vm104_vm2, %v483_v39 }
  0x98   :  { %584 = vmatmul.mubr.msk.f32.gmra.mrb[8].mxu0 %vm104_vm2, %v484_v40 }
  0x99   :  { %590 = vmatprep.mubr.msk.bf16.mxu0 %vm628_vm0, %v627_v5  ;;  %v538_v5 = vunpack.c.h.bf16 %v548_v0 }
  0x9c   :  { %591 = vmatmul.mubr.msk.bf16.vlgmr.msra.gmra.mrb[12].mxu0 %vm291_vm1, %v625_v41 }
  0xde   :  { %v349_v42 = vpop.f32.mrb[0].mxu1 }
  0xdf   :  { %v596_v43 = vpop.f32.mrb[1].mxu1 }
  0xe0   :  { %v352_v44 = vpop.f32.mrb[2].mxu1 }
  0xe1   :  { %v597_v45 = vpop.f32.mrb[3].mxu1 }
  0xe6   :  { %v357_v46 = vpop.f32.mrb[4].mxu1 }
  0xe7   :  { %v600_v47 = vpop.f32.mrb[5].mxu1 }
  0xe8   :  { %v360_v48 = vpop.f32.mrb[6].mxu1 }
  0xe9   :  { %v601_v49 = vpop.f32.mrb[7].mxu1 }
  0xee   :  { %v365_v50 = vpop.f32.mrb[8].mxu1 }
  0xef   :  { %v604_v51 = vpop.f32.mrb[9].mxu1 }
  0xf0   :  { %v368_v52 = vpop.f32.mrb[10].mxu1 }
  0xf1   :  { %v605_v53 = vpop.f32.mrb[11].mxu1 }
  0xf6   :  { %v373_v54 = vpop.f32.mrb[12].mxu1 }
  0xf7   :  { %v608_v55 = vpop.f32.mrb[13].mxu1 }
  0xf8   :  { %v376_v56 = vpop.f32.mrb[14].mxu1 }
  0xf9   :  { %v609_v57 = vpop.f32.mrb[15].mxu1 }
 0x15b   :  { %v752_v58 = vpop.f32.mrb[0].mxu0 }
 0x15c   :  { %v201_v60 = vpop.f32.mrb[1].mxu0 }
 0x15f   :  { %v576_v62 = vpop.f32.mrb[2].mxu0 }
 0x160   :  { %v403_v1 = vmul.f32 %v576_v62, %v352_v44  ;;  %v211_v2 = vpop.f32.mrb[3].mxu0  ;;  %v530_v44 = vunpack.c.h.bf16 %v528_v31 }
 0x161   :  { %v402_v3 = vmul.f32 %v349_v42, %v211_v2 }
 0x162   :  { %v413_v4 = vadd.f32 %v534_v61, %v403_v1 }
 0x163   :  { %v412_v6 = vadd.f32 %v533_v63, %v402_v3  ;;  %v579_v7 = vpop.f32.mrb[4].mxu0 }
 0x164   :  { %v520_v10 = vpack.c.bf16 %v413_v4, %v413_v4  ;;  %v405_v11 = vmul.f32 %v579_v7, %v360_v48  ;;  %v221_v12 = vpop.f32.mrb[5].mxu0 }
 0x165   :  { %v519_v13 = vpack.c.bf16 %v412_v6, %v412_v6  ;;  %v404_v14 = vmul.f32 %v357_v46, %v221_v12 }
 0x166   :  { %464 = vst.msk [vmem:[%s815_s5 + $0xc] sm:$0xf] %vm460_vm13, %v520_v10  ;;  %v415_v15 = vadd.f32 %v538_v5, %v405_v11 }
 0x167   :  { %463 = vst.msk [vmem:[%s815_s5 + $0x8] sm:$0xf] %vm460_vm13, %v519_v13  ;;  %v414_v17 = vadd.f32 %v537_v8, %v404_v14  ;;  %v582_v18 = vpop.f32.mrb[6].mxu0 }
 0x168   :  { %v522_v21 = vpack.c.bf16 %v415_v15, %v415_v15  ;;  %v407_v22 = vmul.f32 %v582_v18, %v368_v52  ;;  %v231_v23 = vpop.f32.mrb[7].mxu0 }
 0x169   :  { %v521_v24 = vpack.c.bf16 %v414_v17, %v414_v17  ;;  %v406_v25 = vmul.f32 %v365_v50, %v231_v23 }
 0x16a   :  { %466 = vst.msk [vmem:[%s815_s5 + $0x14] sm:$0xf] %vm460_vm13, %v522_v21  ;;  %v417_v26 = vadd.f32 %v542_v16, %v407_v22 }
 0x16b   :  { %465 = vst.msk [vmem:[%s815_s5 + $0x10] sm:$0xf] %vm460_vm13, %v521_v24  ;;  %v416_v28 = vadd.f32 %v541_v19, %v406_v25  ;;  %v585_v29 = vpop.f32.mrb[8].mxu0 }
 0x16c   :  { %v524_v32 = vpack.c.bf16 %v417_v26, %v417_v26  ;;  %v409_v33 = vmul.f32 %v585_v29, %v376_v56  ;;  %v241_v34 = vpop.f32.mrb[9].mxu0 }
 0x16d   :  { %v523_v35 = vpack.c.bf16 %v416_v28, %v416_v28  ;;  %v408_v36 = vmul.f32 %v373_v54, %v241_v34 }
 0x16e   :  { %468 = vst.msk [vmem:[%s815_s5 + $0x1c] sm:$0xf] %vm460_vm13, %v524_v32  ;;  %v419_v37 = vadd.f32 %v546_v27, %v409_v33 }
 0x16f   :  { %467 = vst.msk [vmem:[%s815_s5 + $0x18] sm:$0xf] %vm460_vm13, %v523_v35  ;;  %v418_v39 = vadd.f32 %v545_v30, %v408_v36  ;;  %v341_v40 = vpop.f32.mrb[12].mxu0 }
 0x170   :  { %v526_v41 = vpack.c.bf16 %v419_v37, %v419_v37  ;;  %v400_v42 = vmul.f32 %v341_v40, %v201_v60  ;;  %v592_v43 = vpop.f32.mrb[13].mxu0 }
 0x171   :  { %v525_v45 = vpack.c.bf16 %v418_v39, %v418_v39  ;;  %v344_v46 = vpop.f32.mrb[14].mxu0 }
 0x172   :  { %470 = vst.msk [vmem:[%s815_s5 + $0x24] sm:$0xf] %vm460_vm13, %v526_v41  ;;  %v410_v47 = vadd.f32 %v529_v38, %v400_v42  ;;  %v401_v48 = vmul.f32 %v752_v58, %v344_v46  ;;  %v593_v49 = vpop.f32.mrb[15].mxu0 }
 0x173   :  { %469 = vst.msk [vmem:[%s815_s5 + $0x20] sm:$0xf] %vm460_vm13, %v525_v45 }
 0x174   :  { %v517_v50 = vpack.c.bf16 %v410_v47, %v410_v47  ;;  %v411_v51 = vadd.f32 %v530_v44, %v401_v48 }
 0x176   :  { %461 = vst.msk [vmem:[%s815_s5] sm:$0xf] %vm460_vm13, %v517_v50  ;;  %v518_v52 = vpack.c.bf16 %v411_v51, %v411_v51 }
 0x178   :  { %462 = vst.msk [vmem:[%s815_s5 + $0x4] sm:$0xf] %vm460_vm13, %v518_v52 }

// kernel: _forward.41
= control target key start
LH: loop header
LB: loop body
LE: loop exit
PB: predicated region body
PF: predicated region fallthrough
CT: control target
= control target key end

     0   :  { %vm33_vm0 = vcmask 7168   ;;  %vm74_vm1 = vcmask 130048   ;;  %v2216_v0 = vmov -inf   ;;  %v2217_v1 = vmov 0.0   ;;  %s3442_s0 = inlined_call_operand.<no memory space> [shape: s32[1], index: 0, kind: input, shape index: {}, may-alias: {0,2}]   ;;  %s3443_s1 = inlined_call_operand.<no memory space> [shape: s32[1], index: 1, kind: input, shape index: {}, may-alias: {1,3}]   ;;  %s3444_s2 = inlined_call_operand.<no memory space> [shape: s32[1], index: 2, kind: input, shape index: {}, may-alias: {0,2}]   ;;  %s3445_s3 = inlined_call_operand.<no memory space> [shape: s32[1], index: 3, kind: input, shape index: {}, may-alias: {1,3}]   ;;  %s3446_s4 = inlined_call_operand.vmem [shape: bf16[80,32], index: 4, kind: input, shape index: {}]   ;;  %s3447_s5 = inlined_call_operand.vmem [shape: bf16[80,32], index: 5, kind: input, shape index: {}]   ;;  %s3448_s6 = inlined_call_operand.vmem [shape: bf16[80,32], index: 6, kind: input, shape index: {}]   ;;  %s3449_s7 = inlined_call_operand.vmem [shape: s32[80,1], index: 7, kind: input, shape index: {}]   ;;  %s3450_s8 = inlined_call_operand.vmem [shape: s32[1,80], index: 8, kind: input, shape index: {}]   ;;  %s3451_s9 = inlined_call_operand.vmem [shape: bf16[80,32], index: 9, kind: output, shape index: {}]  }
   0x1   :  { %34 = vst.msk [vmem:[#allocation2] sm:$0xff] %vm33_vm0, %v2216_v0  ;;  %35 = vst.msk [vmem:[#allocation2 + $0x8] sm:$0xff] %vm33_vm0, %v2216_v0  ;;  %p97_p0 = scmp.le.s32.totalorder %s3442_s0, %s3445_s3  ;;  %p100_p1 = scmp.le.s32.totalorder %s3444_s2, %s3443_s1 }
   0x2   :  { %36 = vst.msk [vmem:[#allocation2 + $0x10] sm:$0xff] %vm33_vm0, %v2216_v0  ;;  %37 = vst.msk [vmem:[#allocation2 + $0x18] sm:$0xff] %vm33_vm0, %v2216_v0  ;;  %p103_p3 = scmp.ge.s32.totalorder %s3445_s3, 0 }
   0x3   :  { %38 = vst.msk [vmem:[#allocation2 + $0x20] sm:$0xff] %vm33_vm0, %v2216_v0  ;;  %39 = vst.msk [vmem:[#allocation2 + $0x28] sm:$0xff] %vm33_vm0, %v2216_v0  ;;  %p101_p2 = pnand %p100_p1, %p97_p0 }
   0x4   :  { %40 = vst.msk [vmem:[#allocation2 + $0x30] sm:$0xff] %vm33_vm0, %v2216_v0  ;;  %41 = vst.msk [vmem:[#allocation2 + $0x38] sm:$0xff] %vm33_vm0, %v2216_v0 }
   0x5   :  { %42 = vst.msk [vmem:[#allocation2 + $0x40] sm:$0xff] %vm33_vm0, %v2216_v0  ;;  %43 = vst.msk [vmem:[#allocation2 + $0x48] sm:$0xff] %vm33_vm0, %v2216_v0  ;;  %p102_p4 = pneg %p101_p2 }
   0x6   :  { %44 = vst.msk [vmem:[#allocation2 + $0x50] sm:$0xff] %vm33_vm0, %v2216_v0  ;;  %45 = vst.msk [vmem:[#allocation2 + $0x58] sm:$0xff] %vm33_vm0, %v2216_v0 }
   0x7   :  { %46 = vst.msk [vmem:[#allocation2 + $0x60] sm:$0xff] %vm33_vm0, %v2216_v0  ;;  %47 = vst.msk [vmem:[#allocation2 + $0x68] sm:$0xff] %vm33_vm0, %v2216_v0  ;;  %p104_p5 = pnand %p103_p3, %p102_p4 }
   0x8   :  { %48 = vst.msk [vmem:[#allocation2 + $0x70] sm:$0xff] %vm33_vm0, %v2216_v0  ;;  %49 = vst.msk [vmem:[#allocation2 + $0x78] sm:$0xff] %vm33_vm0, %v2216_v0 }
   0x9   :  { %50 = vst.msk [vmem:[#allocation2 + $0x80] sm:$0xff] %vm33_vm0, %v2216_v0  ;;  %51 = vst.msk [vmem:[#allocation2 + $0x88] sm:$0xff] %vm33_vm0, %v2216_v0 }
   0xa   :  { %52 = vst.msk [vmem:[#allocation2 + $0x90] sm:$0xff] %vm33_vm0, %v2216_v0  ;;  %53 = vst.msk [vmem:[#allocation2 + $0x98] sm:$0xff] %vm33_vm0, %v2216_v0 }
   0xb   :  { %54 = vst.msk [vmem:[#allocation3] sm:$0xff] %vm33_vm0, %v2217_v1  ;;  %55 = vst.msk [vmem:[#allocation3 + $0x8] sm:$0xff] %vm33_vm0, %v2217_v1 }
   0xc   :  { %56 = vst.msk [vmem:[#allocation3 + $0x10] sm:$0xff] %vm33_vm0, %v2217_v1  ;;  %57 = vst.msk [vmem:[#allocation3 + $0x18] sm:$0xff] %vm33_vm0, %v2217_v1 }
   0xd   :  { %58 = vst.msk [vmem:[#allocation3 + $0x20] sm:$0xff] %vm33_vm0, %v2217_v1  ;;  %59 = vst.msk [vmem:[#allocation3 + $0x28] sm:$0xff] %vm33_vm0, %v2217_v1 }
   0xe   :  { %60 = vst.msk [vmem:[#allocation3 + $0x30] sm:$0xff] %vm33_vm0, %v2217_v1  ;;  %61 = vst.msk [vmem:[#allocation3 + $0x38] sm:$0xff] %vm33_vm0, %v2217_v1 }
   0xf   :  { %62 = vst.msk [vmem:[#allocation3 + $0x40] sm:$0xff] %vm33_vm0, %v2217_v1  ;;  %63 = vst.msk [vmem:[#allocation3 + $0x48] sm:$0xff] %vm33_vm0, %v2217_v1 }
  0x10   :  { %64 = vst.msk [vmem:[#allocation3 + $0x50] sm:$0xff] %vm33_vm0, %v2217_v1  ;;  %65 = vst.msk [vmem:[#allocation3 + $0x58] sm:$0xff] %vm33_vm0, %v2217_v1 }
  0x11   :  { %66 = vst.msk [vmem:[#allocation3 + $0x60] sm:$0xff] %vm33_vm0, %v2217_v1  ;;  %67 = vst.msk [vmem:[#allocation3 + $0x68] sm:$0xff] %vm33_vm0, %v2217_v1 }
  0x12   :  { %68 = vst.msk [vmem:[#allocation3 + $0x70] sm:$0xff] %vm33_vm0, %v2217_v1  ;;  %69 = vst.msk [vmem:[#allocation3 + $0x78] sm:$0xff] %vm33_vm0, %v2217_v1 }
  0x13   :  { %70 = vst.msk [vmem:[#allocation3 + $0x80] sm:$0xff] %vm33_vm0, %v2217_v1  ;;  %71 = vst.msk [vmem:[#allocation3 + $0x88] sm:$0xff] %vm33_vm0, %v2217_v1 }
  0x14   :  { %72 = vst.msk [vmem:[#allocation3 + $0x90] sm:$0xff] %vm33_vm0, %v2217_v1  ;;  %73 = vst.msk [vmem:[#allocation3 + $0x98] sm:$0xff] %vm33_vm0, %v2217_v1 }
  0x15   :  { %75 = vst.msk [vmem:[#allocation4] sm:$0xff] %vm74_vm1, %v2217_v1  ;;  %76 = vst.msk [vmem:[#allocation4 + $0x8] sm:$0xff] %vm74_vm1, %v2217_v1 }
  0x16   :  { %77 = vst.msk [vmem:[#allocation4 + $0x10] sm:$0xff] %vm74_vm1, %v2217_v1  ;;  %78 = vst.msk [vmem:[#allocation4 + $0x18] sm:$0xff] %vm74_vm1, %v2217_v1 }
  0x17   :  { %79 = vst.msk [vmem:[#allocation4 + $0x20] sm:$0xff] %vm74_vm1, %v2217_v1  ;;  %80 = vst.msk [vmem:[#allocation4 + $0x28] sm:$0xff] %vm74_vm1, %v2217_v1 }
  0x18   :  { %81 = vst.msk [vmem:[#allocation4 + $0x30] sm:$0xff] %vm74_vm1, %v2217_v1  ;;  %82 = vst.msk [vmem:[#allocation4 + $0x38] sm:$0xff] %vm74_vm1, %v2217_v1  ;;  %107 = sbr.rel (%p104_p5) target bundleno = 1099 (0x44b), region = 29 }
  0x19   :  { %83 = vst.msk [vmem:[#allocation4 + $0x40] sm:$0xff] %vm74_vm1, %v2217_v1  ;;  %84 = vst.msk [vmem:[#allocation4 + $0x48] sm:$0xff] %vm74_vm1, %v2217_v1 }
  0x1a   :  { %85 = vst.msk [vmem:[#allocation4 + $0x50] sm:$0xff] %vm74_vm1, %v2217_v1  ;;  %86 = vst.msk [vmem:[#allocation4 + $0x58] sm:$0xff] %vm74_vm1, %v2217_v1 }
  0x1b   :  { %87 = vst.msk [vmem:[#allocation4 + $0x60] sm:$0xff] %vm74_vm1, %v2217_v1  ;;  %88 = vst.msk [vmem:[#allocation4 + $0x68] sm:$0xff] %vm74_vm1, %v2217_v1 }
  0x1c   :  { %89 = vst.msk [vmem:[#allocation4 + $0x70] sm:$0xff] %vm74_vm1, %v2217_v1  ;;  %90 = vst.msk [vmem:[#allocation4 + $0x78] sm:$0xff] %vm74_vm1, %v2217_v1 }
  0x1d   :  { %91 = vst.msk [vmem:[#allocation4 + $0x80] sm:$0xff] %vm74_vm1, %v2217_v1  ;;  %92 = vst.msk [vmem:[#allocation4 + $0x88] sm:$0xff] %vm74_vm1, %v2217_v1 }
  0x1e   :  { %93 = vst.msk [vmem:[#allocation4 + $0x90] sm:$0xff] %vm74_vm1, %v2217_v1  ;;  %94 = vst.msk [vmem:[#allocation4 + $0x98] sm:$0xff] %vm74_vm1, %v2217_v1 }
  0x1f   :  { %v150_v2 = vld [vmem:[%s3447_s5 + $0x8] sm:$0xf]  ;;  %s2218_s0 = smov 112   ;;  %v148_v3 = vld [vmem:[%s3447_s5] sm:$0xf]  ;;  %v3452_v21 = vmov 0.0  }
  0x20   :  { %172 = vrot.lane.b32.xlu1 %v150_v2, %s2218_s0  ;;  %v151_v4 = vld [vmem:[%s3447_s5 + $0xc] sm:$0xf]  ;;  %168 = vrot.lane.b32.xlu0 %v148_v3, %s2218_s0  ;;  %v149_v5 = vld [vmem:[%s3447_s5 + $0x4] sm:$0xf]  ;;  %vm2220_vm2 = vmmov 0   ;;  %v2221_v29 = vmov 0  }
  0x21   :  { %v2380_v6 = vld [vmem:[%s3446_s4 + $0x4] sm:$0xf]  ;;  %v2385_v7 = vld [vmem:[%s3446_s4] sm:$0xf]  ;;  %v2390_v8 = vld [vmem:[%s3446_s4 + $0xc] sm:$0xf]  ;;  %1942 = vmatprep.subr.bf16.mxu0 %v3452_v21  ;;  %1964 = vmatprep.subr.bf16.mxu1 %v3452_v21  ;;  %v1839_v22 = vcombine.low %v148_v3, %v149_v5  ;;  %v1840_v23 = vcombine.low %v150_v2, %v151_v4 }
  0x22   :  { %v2395_v9 = vld [vmem:[%s3446_s4 + $0x8] sm:$0xf]  ;;  %v1849_v10 = vcombine.low %v2385_v7, %v2380_v6  ;;  %v2405_v12 = vld [vmem:[%s3446_s4 + $0x14] sm:$0xf]  ;;  %v2410_v13 = vld [vmem:[%s3446_s4 + $0x10] sm:$0xf]  ;;  %1944 = vmatprep.mubr.msk.bf16.mxu0 %vm2220_vm2, %v3452_v21  ;;  %1966 = vmatprep.mubr.msk.bf16.mxu1 %vm2220_vm2, %v3452_v21 }
  0x23   :  { %v1850_v11 = vcombine.low %v2395_v9, %v2390_v8  ;;  %v153_v14 = vld [vmem:[%s3447_s5 + $0x14] sm:$0xf]  ;;  %v1851_v15 = vcombine.low %v2410_v13, %v2405_v12  ;;  %v152_v16 = vld [vmem:[%s3447_s5 + $0x10] sm:$0xf]  ;;  %v155_v17 = vld [vmem:[%s3447_s5 + $0x1c] sm:$0xf] }
  0x24   :  { %174 = vrot.lane.b32.xlu1 %v151_v4, %s2218_s0  ;;  %170 = vrot.lane.b32.xlu0 %v149_v5, %s2218_s0  ;;  %v154_v18 = vld [vmem:[%s3447_s5 + $0x18] sm:$0xf]  ;;  %v157_v19 = vld [vmem:[%s3447_s5 + $0x24] sm:$0xf]  ;;  %v1841_v24 = vcombine.low %v152_v16, %v153_v14  ;;  %vm622_vm4 = vcmask 654336  }
  0x25   :  { %v156_v20 = vld [vmem:[%s3447_s5 + $0x20] sm:$0xf]  ;;  %v1842_v25 = vcombine.low %v154_v18, %v155_v17  ;;  %v2460_v27 = vld [vmem:[%s3446_s4 + $0x18] sm:$0xf]  ;;  %v512_v34 = vld [vmem:[%s3449_s7 + $0x28] sm:$0xff] }
  0x26   :  { %v1843_v26 = vcombine.low %v156_v20, %v157_v19  ;;  %v2467_v28 = vld [vmem:[%s3446_s4 + $0x20] sm:$0xf]  ;;  %v510_v31 = vld [vmem:[%s3449_s7 + $0x18] sm:$0xff]  ;;  %v516_v41 = vld [vmem:[%s3449_s7 + $0x48] sm:$0xff] }
  0x27   :  { %v507_v30 = vld [vmem:[%s3449_s7] sm:$0xff]  ;;  %v514_v36 = vld [vmem:[%s3449_s7 + $0x38] sm:$0xff]  ;;  %v191_v52 = vld [vmem:[%s3448_s6 + $0xc] sm:$0xf] }
  0x28   :  { %178 = vrot.lane.b32.xlu1 %v153_v14, %s2218_s0  ;;  %176 = vrot.lane.b32.xlu0 %v152_v16, %s2218_s0  ;;  %v115_v50 = vld [vmem:[%s3446_s4 + $0x1c] sm:$0xf]  ;;  %v189_v51 = vld [vmem:[%s3448_s6 + $0x4] sm:$0xf] }
  0x29   :  { %v117_v53 = vld [vmem:[%s3446_s4 + $0x24] sm:$0xf]  ;;  %v508_v55 = vld [vmem:[%s3449_s7 + $0x8] sm:$0xff]  ;;  %v509_v57 = vld [vmem:[%s3449_s7 + $0x10] sm:$0xff]  ;;  %v1852_v4 = vcombine.low %v2460_v27, %v115_v50 }
  0x2a   :  { %v511_v58 = vld [vmem:[%s3449_s7 + $0x20] sm:$0xff]  ;;  %v513_v60 = vld [vmem:[%s3449_s7 + $0x30] sm:$0xff]  ;;  %v190_v1 = vld [vmem:[%s3448_s6 + $0x8] sm:$0xf]  ;;  %v1853_v5 = vcombine.low %v2467_v28, %v117_v53 }
  0x2b   :  { %v188_v62 = vld [vmem:[%s3448_s6] sm:$0xf]  ;;  %v1871_v2 = vcombine.low %v190_v1, %v191_v52  ;;  %v2543_v3 = vld [vmem:[%s3448_s6 + $0x10] sm:$0xf] }
  0x2c   :  { %182 = vrot.lane.b32.xlu1 %v155_v17, %s2218_s0  ;;  %180 = vrot.lane.b32.xlu0 %v154_v18, %s2218_s0  ;;  %v515_v63 = vld [vmem:[%s3449_s7 + $0x40] sm:$0xff]  ;;  %v1870_v0 = vcombine.low %v188_v62, %v189_v51 }
  0x30   :  { %186 = vrot.lane.b32.xlu1 %v157_v19, %s2218_s0  ;;  %184 = vrot.lane.b32.xlu0 %v156_v20, %s2218_s0 }
  0x34   :  { %130 = vrot.lane.b32.xlu1 %v2380_v6, %s2218_s0  ;;  %128 = vrot.lane.b32.xlu0 %v2385_v7, %s2218_s0 }
  0x38   :  { %134 = vrot.lane.b32.xlu1 %v2390_v8, %s2218_s0  ;;  %132 = vrot.lane.b32.xlu0 %v2395_v9, %s2218_s0 }
  0x3c   :  { %138 = vrot.lane.b32.xlu1 %v2405_v12, %s2218_s0  ;;  %136 = vrot.lane.b32.xlu0 %v2410_v13, %s2218_s0 }
  0x5a   :  { %268 = vxpose.xlu0.c.b16.start [1/5] (short) (narrow) %v1839_v22, 16 }
  0x5e   :  { %269 = vxpose.xlu0.c.b16.cont [2/5] (short) (narrow) %v1840_v23, 16 }
  0x62   :  { %270 = vxpose.xlu0.c.b16.cont [3/5] (short) (narrow) %v1841_v24, 16 }
  0x66   :  { %271 = vxpose.xlu0.c.b16.cont [4/5] (short) (narrow) %v1842_v25, 16 }
  0x6a   :  { %272 = vxpose.xlu0.c.b16.end [5/5] (short) (narrow) %v1843_v26, 16 }
  0x73   :  { %140 = vrot.lane.b32.xlu0 %v2460_v27, %s2218_s0 }
  0x74   :  { %2054 = vset.pattern.permute.xlu0 %v2221_v29 }
  0x77   :  { %144 = vrot.lane.b32.xlu0 %v2467_v28, %s2218_s0 }
  0x7b   :  { %519 = vperm.xlu0 %2054, %v507_v30  }
  0x7f   :  { %528 = vperm.xlu0 %2054, %v510_v31  }
  0x83   :  { %534 = vperm.xlu0 %2054, %v512_v34  }
  0x87   :  { %540 = vperm.xlu0 %2054, %v514_v36   ;;  %v2602_v36 = vld [vmem:[%s3450_s8] ss:$0 sm:$0xff] }
  0x8b   :  { %546 = vperm.xlu0 %2054, %v516_v41  }
  0x8f   :  { %210 = vrot.lane.b32.xlu0 %v189_v51, %s2218_s0 }
  0x92   :  { %v173_v32 = vpop.permute.xlu1 %172  ;;  %v169_v33 = vpop.permute.xlu0 %168 }
  0x93   :  { %214 = vrot.lane.b32.xlu0 %v191_v52, %s2218_s0 }
  0x96   :  { %v175_v35 = vpop.permute.xlu1 %174  ;;  %v171_v37 = vpop.permute.xlu0 %170 }
  0x97   :  { %v1844_v38 = vcombine.low %v169_v33, %v171_v37  ;;  %v1845_v39 = vcombine.low %v173_v32, %v175_v35 }
  0x99   :  { %284 = vxpose.xlu1.c.b16.start [1/5] (short) (narrow) %v1844_v38, 16 }
  0x9a   :  { %v179_v40 = vpop.permute.xlu1 %178  ;;  %v177_v42 = vpop.permute.xlu0 %176 }
  0x9b   :  { %v1846_v45 = vcombine.low %v177_v42, %v179_v40 }
  0x9d   :  { %285 = vxpose.xlu1.c.b16.cont [2/5] (short) (narrow) %v1845_v39, 16 }
  0x9e   :  { %v183_v43 = vpop.permute.xlu1 %182  ;;  %v181_v44 = vpop.permute.xlu0 %180 }
  0x9f   :  { %v1847_v46 = vcombine.low %v181_v44, %v183_v43 }
  0xa1   :  { %286 = vxpose.xlu1.c.b16.cont [3/5] (short) (narrow) %v1846_v45, 16 }
  0xa2   :  { %v187_v47 = vpop.permute.xlu1 %186  ;;  %v185_v48 = vpop.permute.xlu0 %184 }
  0xa3   :  { %v1848_v49 = vcombine.low %v185_v48, %v187_v47 }
  0xa5   :  { %287 = vxpose.xlu1.c.b16.cont [4/5] (short) (narrow) %v1847_v46, 16 }
  0xa6   :  { %v129_v54 = vpop.permute.xlu0 %128  ;;  %v131_v6 = vpop.permute.xlu1 %130 }
  0xa9   :  { %288 = vxpose.xlu1.c.b16.end [5/5] (short) (narrow) %v1848_v49, 16 }
  0xaa   :  { %v133_v56 = vpop.permute.xlu0 %132  ;;  %v135_v7 = vpop.permute.xlu1 %134 }
  0xad   :  { %142 = vrot.lane.b32.xlu1 %v115_v50, %s2218_s0 }
  0xae   :  { %2055 = vset.pattern.permute.xlu1 %v2221_v29  ;;  %v137_v59 = vpop.permute.xlu0 %136  ;;  %v139_v8 = vpop.permute.xlu1 %138 }
  0xaf   :  { %v1861_v12 = vcombine.low %v137_v59, %v139_v8 }
  0xb1   :  { %146 = vrot.lane.b32.xlu1 %v117_v53, %s2218_s0 }
  0xb5   :  { %522 = vperm.xlu1 %2055, %v508_v55  }
  0xb9   :  { %525 = vperm.xlu1 %2055, %v509_v57  }
  0xbd   :  { %531 = vperm.xlu1 %2055, %v511_v58  }
  0xc0   :  { %v276_v61 = vpop.trf.xlu0 }
  0xc1   :  { %1943 = vmatpush3.bf16.msra.mxu0 %v276_v61  ;;  %537 = vperm.xlu1 %2055, %v513_v60  }
  0xc2   :  { %1986 = vmatprep.subr.bf16.mxu0 %v3452_v21 }
  0xc4   :  { %1945 = vmatmul.mubr.msk.bf16.vlgmr.msra.gmra.mrb[0].mxu0 %vm74_vm1, %v1849_v10  ;;  %v1859_v10 = vcombine.low %v129_v54, %v131_v6 }
  0xc5   :  { %1948 = vmatprep.mubr.msk.bf16.mxu0 %vm2220_vm2, %v3452_v21  ;;  %543 = vperm.xlu1 %2055, %v515_v63  }
  0xc6   :  { %1987 = vmatpush3.bf16.msra.mxu0 %v1870_v0 }
  0xc7   :  { %1988 = vmatprep.subr.bf16.mxu0 %v3452_v21 }
  0xc9   :  { %208 = vrot.lane.b32.xlu1 %v188_v62, %s2218_s0 }
  0xca   :  { %1989 = vmatpush3.bf16.msra.mxu0 %v1871_v2 }
  0xcb   :  { %1990 = vmatprep.subr.bf16.mxu0 %v3452_v21 }
  0xcc   :  { %1949 = vmatmul.mubr.msk.bf16.gmra.mrb[4].mxu0 %vm74_vm1, %v1850_v11  ;;  %v1860_v11 = vcombine.low %v133_v56, %v135_v7 }
  0xcd   :  { %1952 = vmatprep.mubr.msk.bf16.mxu0 %vm2220_vm2, %v3452_v21  ;;  %212 = vrot.lane.b32.xlu1 %v190_v1, %s2218_s0 }
  0xd1   :  { %216 = vrot.lane.b32.xlu1 %v2543_v3, %s2218_s0 }
  0xd4   :  { %1953 = vmatmul.mubr.msk.bf16.gmra.mrb[8].mxu0 %vm74_vm1, %v1851_v15 }
  0xd5   :  { %1956 = vmatprep.mubr.msk.bf16.mxu0 %vm2220_vm2, %v3452_v21 }
  0xdc   :  { %1957 = vmatmul.mubr.msk.bf16.gmra.mrb[12].mxu0 %vm74_vm1, %v1852_v4 }
  0xdd   :  { %1960 = vmatprep.mubr.msk.bf16.mxu0 %vm2220_vm2, %v3452_v21 }
  0xe4   :  { %1961 = vmatmul.mubr.msk.bf16.gmra.mrb[16].mxu0 %vm74_vm1, %v1853_v5 }
  0xe5   :  { %1996 = vmatprep.mubr.msk.bf16.mxu0 %vm2220_vm2, %v3452_v21  ;;  %v141_v13 = vpop.permute.xlu0 %140 }
  0xe9   :  { %v145_v17 = vpop.permute.xlu0 %144 }
  0xfa   :  { %v2579_v20 = vpop.permute.xlu0 %519 }
  0xfb   :  { %vm552_vm3 = vcmp.eq.s32.totalorder %v2579_v20, %v2602_v36 }
  0xfe   :  { %v2583_v23 = vpop.permute.xlu0 %528 }
  0xff   :  { %v292_v9 = vpop.trf.xlu1  ;;  %vm555_vm7 = vcmp.eq.s32.totalorder %v2583_v23, %v2602_v36 }
 0x100   :  { %1965 = vmatpush3.bf16.msra.mxu1 %v292_v9 }
 0x101   :  { %2016 = vmatprep.subr.bf16.mxu1 %v3452_v21 }
 0x102   :  { %v2587_v25 = vpop.permute.xlu0 %534 }
 0x103   :  { %1967 = vmatmul.mubr.msk.bf16.vlgmr.msra.gmra.mrb[0].mxu1 %vm74_vm1, %v1859_v10  ;;  %vm557_vm9 = vcmp.eq.s32.totalorder %v2587_v25, %v2602_v36 }
 0x104   :  { %1970 = vmatprep.mubr.msk.bf16.mxu1 %vm2220_vm2, %v3452_v21 }
 0x106   :  { %v2591_v27 = vpop.permute.xlu0 %540 }
 0x107   :  { %vm559_vm11 = vcmp.eq.s32.totalorder %v2591_v27, %v2602_v36 }
 0x10a   :  { %v2595_v29 = vpop.permute.xlu0 %546 }
 0x10b   :  { %1971 = vmatmul.mubr.msk.bf16.gmra.mrb[4].mxu1 %vm74_vm1, %v1860_v11  ;;  %3479 = vst [vmem:[#allocation11_spill] sm:$0xff] %v2595_v29  ;;  %vm561_vm13 = vcmp.eq.s32.totalorder %v2595_v29, %v2602_v36  ;;  %v2941_v29 = vld [vmem:[#allocation2 + $0x78] sm:$0xff] }
 0x10c   :  { %1974 = vmatprep.mubr.msk.bf16.mxu1 %vm2220_vm2, %v3452_v21  ;;  %3489 = vst [vmem:[#allocation21_spill] sm:$0xff] %v2941_v29 }
 0x10e   :  { %v211_v31 = vpop.permute.xlu0 %210 }
 0x112   :  { %v215_v34 = vpop.permute.xlu0 %214 }
 0x113   :  { %1975 = vmatmul.mubr.msk.bf16.gmra.mrb[8].mxu1 %vm74_vm1, %v1861_v12 }
 0x114   :  { %1978 = vmatprep.mubr.msk.bf16.mxu1 %vm2220_vm2, %v3452_v21 }
 0x11f   :  { %v143_v14 = vpop.permute.xlu1 %142 }
 0x120   :  { %v1862_v15 = vcombine.low %v141_v13, %v143_v14  ;;  %v2697_v14 = vld [vmem:[%s3448_s6 + $0x14] sm:$0xf] }
 0x122   :  { %1979 = vmatmul.mubr.msk.bf16.gmra.mrb[12].mxu1 %vm74_vm1, %v1862_v15  ;;  %v1872_v15 = vcombine.low %v2543_v3, %v2697_v14 }
 0x123   :  { %v147_v16 = vpop.permute.xlu1 %146  ;;  %1982 = vmatprep.mubr.msk.bf16.mxu1 %vm2220_vm2, %v3452_v21 }
 0x124   :  { %v1863_v18 = vcombine.low %v145_v17, %v147_v16  ;;  %1991 = vmatpush3.bf16.msra.mxu0 %v1872_v15 }
 0x125   :  { %1992 = vmatprep.subr.bf16.mxu0 %v3452_v21 }
 0x12a   :  { %1983 = vmatmul.mubr.msk.bf16.gmra.mrb[16].mxu1 %vm74_vm1, %v1863_v18 }
 0x12b   :  { %2026 = vmatprep.mubr.msk.bf16.mxu1 %vm2220_vm2, %v3452_v21 }
 0x134   :  { %v2577_v19 = vpop.permute.xlu1 %522 }
 0x135   :  { %vm553_vm5 = vcmp.eq.s32.totalorder %v2577_v19, %v2602_v36 }
 0x138   :  { %v2581_v22 = vpop.permute.xlu1 %525 }
 0x139   :  { %vm554_vm6 = vcmp.eq.s32.totalorder %v2581_v22, %v2602_v36 }
 0x13c   :  { %v2585_v24 = vpop.permute.xlu1 %531 }
 0x13d   :  { %vm556_vm8 = vcmp.eq.s32.totalorder %v2585_v24, %v2602_v36 }
 0x140   :  { %v2589_v26 = vpop.permute.xlu1 %537 }
 0x141   :  { %vm558_vm10 = vcmp.eq.s32.totalorder %v2589_v26, %v2602_v36 }
 0x144   :  { %v2593_v28 = vpop.permute.xlu1 %543 }
 0x145   :  { %3478 = vst [vmem:[#allocation10_spill] sm:$0xff] %v2593_v28  ;;  %vm560_vm12 = vcmp.eq.s32.totalorder %v2593_v28, %v2602_v36  ;;  %v943_v36 = vld [vmem:[#allocation3] sm:$0xff] }
 0x148   :  { %v209_v30 = vpop.permute.xlu1 %208 }
 0x149   :  { %v1880_v32 = vcombine.low %v209_v30, %v211_v31 }
 0x14b   :  { %2017 = vmatpush3.bf16.msra.mxu1 %v1880_v32 }
 0x14c   :  { %v213_v33 = vpop.permute.xlu1 %212  ;;  %2018 = vmatprep.subr.bf16.mxu1 %v3452_v21 }
 0x14d   :  { %v1881_v35 = vcombine.low %v213_v33, %v215_v34 }
 0x14f   :  { %2019 = vmatpush3.bf16.msra.mxu1 %v1881_v35 }
 0x150   :  { %2020 = vmatprep.subr.bf16.mxu1 %v3452_v21 }
 0x197   :  { %v365_v37 = vpop.f32.mrb[0].mxu0 }
 0x198   :  { %v2611_v38 = vsel %vm552_vm3, %v365_v37, -1e+30  ;;  %v1946_v39 = vpop.f32.mrb[1].mxu0 }
 0x199   :  { %v368_v40 = vpop.f32.mrb[2].mxu0  ;;  %v623_v41 = vsel %vm622_vm4, %v2611_v38, -inf }
 0x19a   :  { %v2618_v42 = vsel %vm553_vm5, %v368_v40, -1e+30  ;;  %624 = vmax.xlane.f32.xlu1 %v623_v41  ;;  %v1947_v43 = vpop.f32.mrb[3].mxu0  ;;  %v2726_v41 = vld [vmem:[%s3448_s6 + $0x18] sm:$0xf] }
 0x19b   :  { %v626_v44 = vsel %vm622_vm4, %v2618_v42, -inf }
 0x19c   :  { %627 = vmax.xlane.f32.xlu0 %v626_v44 }
 0x19f   :  { %v373_v45 = vpop.f32.mrb[4].mxu0 }
 0x1a0   :  { %v2627_v46 = vsel %vm554_vm6, %v373_v45, -1e+30  ;;  %v1950_v47 = vpop.f32.mrb[5].mxu0  ;;  %v2736_v45 = vld [vmem:[%s3448_s6 + $0x1c] sm:$0xf] }
 0x1a1   :  { %v376_v48 = vpop.f32.mrb[6].mxu0  ;;  %v629_v49 = vsel %vm622_vm4, %v2627_v46, -inf }
 0x1a2   :  { %v2636_v50 = vsel %vm555_vm7, %v376_v48, -1e+30  ;;  %630 = vmax.xlane.f32.xlu0 %v629_v49  ;;  %v1951_v51 = vpop.f32.mrb[7].mxu0  ;;  %v1873_v48 = vcombine.low %v2726_v41, %v2736_v45 }
 0x1a3   :  { %v632_v52 = vsel %vm622_vm4, %v2636_v50, -inf }
 0x1a4   :  { %633 = vmax.xlane.f32.xlu1 %v632_v52  ;;  %1993 = vmatpush3.bf16.msra.mxu0 %v1873_v48  ;;  %v2807_v48 = vld [vmem:[#allocation2 + $0x18] sm:$0xff] }
 0x1a5   :  { %1994 = vmatprep.subr.bf16.mxu0 %v3452_v21 }
 0x1a7   :  { %v381_v53 = vpop.f32.mrb[8].mxu0 }
 0x1a8   :  { %v2645_v54 = vsel %vm556_vm8, %v381_v53, -1e+30  ;;  %v1954_v55 = vpop.f32.mrb[9].mxu0 }
 0x1a9   :  { %v384_v56 = vpop.f32.mrb[10].mxu0  ;;  %v635_v57 = vsel %vm622_vm4, %v2645_v54, -inf }
 0x1aa   :  { %v2654_v58 = vsel %vm557_vm9, %v384_v56, -1e+30  ;;  %636 = vmax.xlane.f32.xlu0 %v635_v57  ;;  %v1955_v59 = vpop.f32.mrb[11].mxu0 }
 0x1ab   :  { %v638_v60 = vsel %vm622_vm4, %v2654_v58, -inf }
 0x1ac   :  { %639 = vmax.xlane.f32.xlu1 %v638_v60 }
 0x1af   :  { %v389_v61 = vpop.f32.mrb[12].mxu0 }
 0x1b0   :  { %v2663_v62 = vsel %vm558_vm10, %v389_v61, -1e+30  ;;  %v1958_v63 = vpop.f32.mrb[13].mxu0 }
 0x1b1   :  { %v392_v0 = vpop.f32.mrb[14].mxu0  ;;  %v641_v1 = vsel %vm622_vm4, %v2663_v62, -inf }
 0x1b2   :  { %v2672_v2 = vsel %vm559_vm11, %v392_v0, -1e+30  ;;  %642 = vmax.xlane.f32.xlu0 %v641_v1  ;;  %v1959_v4 = vpop.f32.mrb[15].mxu0 }
 0x1b3   :  { %v644_v5 = vsel %vm622_vm4, %v2672_v2, -inf }
 0x1b4   :  { %645 = vmax.xlane.f32.xlu1 %v644_v5 }
 0x1b7   :  { %v397_v6 = vpop.f32.mrb[16].mxu0 }
 0x1b8   :  { %v2681_v7 = vsel %vm560_vm12, %v397_v6, -1e+30  ;;  %v1962_v8 = vpop.f32.mrb[17].mxu0 }
 0x1b9   :  { %v400_v9 = vpop.f32.mrb[18].mxu0  ;;  %v647_v10 = vsel %vm622_vm4, %v2681_v7, -inf  ;;  %v2774_v8 = vld [vmem:[%s3448_s6 + $0x20] sm:$0xf] }
 0x1ba   :  { %v2690_v11 = vsel %vm561_vm13, %v400_v9, -1e+30  ;;  %648 = vmax.xlane.f32.xlu0 %v647_v10  ;;  %v1963_v12 = vpop.f32.mrb[19].mxu0  ;;  %v2779_v9 = vld [vmem:[%s3448_s6 + $0x24] sm:$0xf] }
 0x1bb   :  { %v650_v13 = vsel %vm622_vm4, %v2690_v11, -inf  ;;  %v1874_v12 = vcombine.low %v2774_v8, %v2779_v9 }
 0x1bc   :  { %651 = vmax.xlane.f32.xlu1 %v650_v13 }
 0x1bd   :  { %1995 = vmatpush3.bf16.msra.mxu0 %v1874_v12  ;;  %v2864_v12 = vld [vmem:[#allocation2 + $0x40] sm:$0xff] }
 0x1d6   :  { %v468_v16 = vpop.f32.mrb[0].mxu1 }
 0x1d7   :  { %v2705_v17 = vsel %vm552_vm3, %v468_v16, -1e+30  ;;  %v1968_v18 = vpop.f32.mrb[1].mxu1 }
 0x1d8   :  { %v471_v30 = vpop.f32.mrb[2].mxu1  ;;  %v653_v31 = vsel %vm622_vm4, %v2705_v17, -inf  ;;  %v2783_v18 = vpop.permute.xlu1 %216 }
 0x1d9   :  { %v2712_v32 = vsel %vm553_vm5, %v471_v30, -1e+30  ;;  %v1969_v3 = vpop.f32.mrb[3].mxu1  ;;  %654 = vmax.xlane.f32.xlu0 %v653_v31  ;;  %v2785_v30 = vld [vmem:[#allocation2] sm:$0xff] }
 0x1da   :  { %v656_v33 = vsel %vm622_vm4, %v2712_v32, -inf  ;;  %v2787_v3 = vld [vmem:[#allocation2 + $0x8] sm:$0xff] }
 0x1db   :  { %657 = vmax.xlane.f32.xlu1 %v656_v33 }
 0x1de   :  { %v476_v34 = vpop.f32.mrb[4].mxu1 }
 0x1df   :  { %v2719_v35 = vsel %vm554_vm6, %v476_v34, -1e+30  ;;  %v1972_v37 = vpop.f32.mrb[5].mxu1 }
 0x1e0   :  { %v479_v39 = vpop.f32.mrb[6].mxu1  ;;  %v659_v40 = vsel %vm622_vm4, %v2719_v35, -inf }
 0x1e1   :  { %v2731_v43 = vsel %vm555_vm7, %v479_v39, -1e+30  ;;  %v1973_v44 = vpop.f32.mrb[7].mxu1  ;;  %660 = vmax.xlane.f32.xlu0 %v659_v40  ;;  %v2918_v40 = vld [vmem:[#allocation2 + $0x68] sm:$0xff] }
 0x1e2   :  { %v662_v47 = vsel %vm622_vm4, %v2731_v43, -inf  ;;  %v2805_v44 = vld [vmem:[#allocation2 + $0x10] sm:$0xff]  ;;  %3485 = vst [vmem:[#allocation17_spill] sm:$0xff] %v2918_v40 }
 0x1e3   :  { %663 = vmax.xlane.f32.xlu1 %v662_v47 }
 0x1e6   :  { %v484_v49 = vpop.f32.mrb[8].mxu1 }
 0x1e7   :  { %v2746_v51 = vsel %vm556_vm8, %v484_v49, -1e+30  ;;  %v1976_v52 = vpop.f32.mrb[9].mxu1 }
 0x1e8   :  { %v487_v53 = vpop.f32.mrb[10].mxu1  ;;  %v665_v55 = vsel %vm622_vm4, %v2746_v51, -inf }
 0x1e9   :  { %v2753_v56 = vsel %vm557_vm9, %v487_v53, -1e+30  ;;  %v1977_v57 = vpop.f32.mrb[11].mxu1  ;;  %666 = vmax.xlane.f32.xlu0 %v665_v55 }
 0x1ea   :  { %v668_v59 = vsel %vm622_vm4, %v2753_v56, -inf  ;;  %v2866_v57 = vld [vmem:[#allocation2 + $0x48] sm:$0xff] }
 0x1eb   :  { %669 = vmax.xlane.f32.xlu1 %v668_v59  ;;  %v2823_v59 = vld [vmem:[#allocation2 + $0x20] sm:$0xff] }
 0x1f5   :  { %v492_v60 = vpop.f32.mrb[12].mxu1 }
 0x1f6   :  { %v2760_v61 = vsel %vm558_vm10, %v492_v60, -1e+30  ;;  %v1980_v63 = vpop.f32.mrb[13].mxu1 }
 0x1f7   :  { %v495_v0 = vpop.f32.mrb[14].mxu1  ;;  %v671_v1 = vsel %vm622_vm4, %v2760_v61, -inf  ;;  %v2825_v63 = vld [vmem:[#allocation2 + $0x28] sm:$0xff] }
 0x1f8   :  { %v2767_v4 = vsel %vm559_vm11, %v495_v0, -1e+30  ;;  %672 = vmax.xlane.f32.xlu0 %v671_v1  ;;  %v1981_v5 = vpop.f32.mrb[15].mxu1 }
 0x1f9   :  { %v674_v6 = vsel %vm622_vm4, %v2767_v4, -inf }
 0x1fa   :  { %675 = vmax.xlane.f32.xlu1 %v674_v6 }
 0x1fd   :  { %v500_v10 = vpop.f32.mrb[16].mxu1 }
 0x1fe   :  { %v1984_v13 = vpop.f32.mrb[17].mxu1 }
 0x1ff   :  { %v503_v15 = vpop.f32.mrb[18].mxu1  ;;  %v2841_v13 = vld [vmem:[#allocation2 + $0x30] sm:$0xff] }
 0x200   :  { %v1985_v16 = vpop.f32.mrb[19].mxu1 }
 0x227   :  { %v625_v31 = vpop.xlane.xlu1 %624 }
 0x228   :  { %v2790_v33 = vmax.f32 %v2785_v30, %v625_v31  ;;  %v2843_v31 = vld [vmem:[#allocation2 + $0x38] sm:$0xff] }
 0x229   :  { %v628_v34 = vpop.xlane.xlu0 %627 }
 0x22a   :  { %1490 = vst.msk [vmem:[#allocation2] sm:$0xff] %vm33_vm0, %v2790_v33  ;;  %v2797_v39 = vmax.f32 %v2787_v3, %v628_v34  ;;  %765 = vperm.xlu0 %2054, %v2790_v33   ;;  %v3503_v22 = vsub.f32 %v2785_v30, %v2790_v33 }
 0x22c   :  { %1491 = vst.msk [vmem:[#allocation2 + $0x8] sm:$0xff] %vm33_vm0, %v2797_v39  ;;  %770 = vperm.xlu1 %2055, %v2797_v39   ;;  %v3501_v19 = vsub.f32 %v2787_v3, %v2797_v39 }
 0x22f   :  { %v631_v47 = vpop.xlane.xlu0 %630 }
 0x230   :  { %v2810_v49 = vmax.f32 %v2805_v44, %v631_v47 }
 0x231   :  { %v634_v52 = vpop.xlane.xlu1 %633 }
 0x232   :  { %1492 = vst.msk [vmem:[#allocation2 + $0x10] sm:$0xff] %vm33_vm0, %v2810_v49  ;;  %v2817_v55 = vmax.f32 %v2807_v48, %v634_v52 }
 0x234   :  { %1493 = vst.msk [vmem:[#allocation2 + $0x18] sm:$0xff] %vm33_vm0, %v2817_v55 }
 0x237   :  { %v637_v60 = vpop.xlane.xlu0 %636 }
 0x238   :  { %v2828_v0 = vmax.f32 %v2823_v59, %v637_v60 }
 0x239   :  { %v640_v1 = vpop.xlane.xlu1 %639 }
 0x23a   :  { %1494 = vst.msk [vmem:[#allocation2 + $0x20] sm:$0xff] %vm33_vm0, %v2828_v0  ;;  %v2835_v6 = vmax.f32 %v2825_v63, %v640_v1  ;;  %v3504_v23 = vsub.f32 %v2823_v59, %v2828_v0 }
 0x23c   :  { %1495 = vst.msk [vmem:[#allocation2 + $0x28] sm:$0xff] %vm33_vm0, %v2835_v6 }
 0x23f   :  { %v643_v16 = vpop.xlane.xlu0 %642 }
 0x240   :  { %v2846_v34 = vmax.f32 %v2841_v13, %v643_v16  ;;  %v2862_v16 = vsel %vm560_vm12, %v500_v10, -1e+30  ;;  %v2881_v10 = vsel %vm561_vm13, %v503_v15, -1e+30 }
 0x241   :  { %v646_v47 = vpop.xlane.xlu1 %645  ;;  %3480 = vst [vmem:[#allocation12_spill] sm:$0xff] %v2862_v16  ;;  %3481 = vst [vmem:[#allocation13_spill] sm:$0xff] %v2881_v10 }
 0x242   :  { %1496 = vst.msk [vmem:[#allocation2 + $0x30] sm:$0xff] %vm33_vm0, %v2846_v34  ;;  %v2853_v60 = vmax.f32 %v2843_v31, %v646_v47  ;;  %v677_v47 = vsel %vm622_vm4, %v2862_v16, -inf }
 0x244   :  { %1497 = vst.msk [vmem:[#allocation2 + $0x38] sm:$0xff] %vm33_vm0, %v2853_v60 }
 0x247   :  { %v649_v52 = vpop.xlane.xlu0 %648 }
 0x248   :  { %v2869_v5 = vmax.f32 %v2864_v12, %v649_v52  ;;  %v680_v52 = vsel %vm622_vm4, %v2881_v10, -inf }
 0x249   :  { %678 = vmax.xlane.f32.xlu0 %v677_v47  ;;  %v652_v1 = vpop.xlane.xlu1 %651  ;;  %v2896_v47 = vld [vmem:[#allocation2 + $0x58] sm:$0xff] }
 0x24a   :  { %1498 = vst.msk [vmem:[#allocation2 + $0x40] sm:$0xff] %vm33_vm0, %v2869_v5  ;;  %v2876_v37 = vmax.f32 %v2866_v57, %v652_v1  ;;  %v2893_v1 = vld [vmem:[#allocation2 + $0x50] sm:$0xff]  ;;  %3482 = vst [vmem:[#allocation14_spill] sm:$0xff] %v2896_v47  ;;  %v711_v24 = vsub.f32 %v2864_v12, %v2869_v5 }
 0x24c   :  { %1499 = vst.msk [vmem:[#allocation2 + $0x48] sm:$0xff] %vm33_vm0, %v2876_v37 }
 0x250   :  { %681 = vmax.xlane.f32.xlu1 %v680_v52 }
 0x25f   :  { %218 = vrot.lane.b32.xlu0 %v2697_v14, %s2218_s0 }
 0x261   :  { %220 = vrot.lane.b32.xlu1 %v2726_v41, %s2218_s0 }
 0x263   :  { %222 = vrot.lane.b32.xlu0 %v2736_v45, %s2218_s0 }
 0x265   :  { %775 = vperm.xlu1 %2055, %v2810_v49  }
 0x266   :  { %v655_v15 = vpop.xlane.xlu0 %654 }
 0x267   :  { %v2899_v53 = vmax.f32 %v2893_v1, %v655_v15  ;;  %780 = vperm.xlu0 %2054, %v2817_v55   ;;  %v2915_v15 = vld [vmem:[#allocation2 + $0x60] sm:$0xff] }
 0x268   :  { %v658_v52 = vpop.xlane.xlu1 %657  ;;  %3484 = vst [vmem:[#allocation16_spill] sm:$0xff] %v2915_v15 }
 0x269   :  { %1500 = vst.msk [vmem:[#allocation2 + $0x50] sm:$0xff] %vm33_vm0, %v2899_v53  ;;  %v2907_v41 = vmax.f32 %v2896_v47, %v658_v52  ;;  %815 = vperm.xlu1 %2055, %v2899_v53  }
 0x26b   :  { %3483 = vst [vmem:[#allocation15_spill] sm:$0xff] %v2907_v41  ;;  %1501 = vst.msk [vmem:[#allocation2 + $0x58] sm:$0xff] %vm33_vm0, %v2907_v41  ;;  %820 = vperm.xlu0 %2054, %v2907_v41  }
 0x26d   :  { %785 = vperm.xlu1 %2055, %v2828_v0  }
 0x26e   :  { %v661_v14 = vpop.xlane.xlu0 %660 }
 0x26f   :  { %v2921_v52 = vmax.f32 %v2915_v15, %v661_v14  ;;  %790 = vperm.xlu0 %2054, %v2835_v6   ;;  %v2937_v14 = vld [vmem:[#allocation2 + $0x70] sm:$0xff] }
 0x270   :  { %v664_v21 = vpop.xlane.xlu1 %663  ;;  %3488 = vst [vmem:[#allocation20_spill] sm:$0xff] %v2937_v14 }
 0x271   :  { %3486 = vst [vmem:[#allocation18_spill] sm:$0xff] %v2921_v52  ;;  %1502 = vst.msk [vmem:[#allocation2 + $0x60] sm:$0xff] %vm33_vm0, %v2921_v52  ;;  %v2929_v10 = vmax.f32 %v2918_v40, %v664_v21  ;;  %825 = vperm.xlu1 %2055, %v2921_v52   ;;  %v2965_v40 = vld [vmem:[#allocation2 + $0x88] sm:$0xff] }
 0x272   :  { %3493 = vst [vmem:[#allocation25_spill] sm:$0xff] %v2965_v40 }
 0x273   :  { %3487 = vst [vmem:[#allocation19_spill] sm:$0xff] %v2929_v10  ;;  %1503 = vst.msk [vmem:[#allocation2 + $0x68] sm:$0xff] %vm33_vm0, %v2929_v10  ;;  %830 = vperm.xlu0 %2054, %v2929_v10  }
 0x275   :  { %224 = vrot.lane.b32.xlu1 %v2774_v8, %s2218_s0 }
 0x276   :  { %v667_v45 = vpop.xlane.xlu0 %666 }
 0x277   :  { %v2944_v21 = vmax.f32 %v2937_v14, %v667_v45  ;;  %226 = vrot.lane.b32.xlu0 %v2779_v9, %s2218_s0  ;;  %v2963_v9 = vld [vmem:[#allocation2 + $0x80] sm:$0xff]  ;;  %v3516_v26 = vld [vmem:[#allocation20_spill] sm:$0xff] }
 0x278   :  { %v670_v16 = vpop.xlane.xlu1 %669  ;;  %3492 = vst [vmem:[#allocation24_spill] sm:$0xff] %v2963_v9 }
 0x279   :  { %3490 = vst [vmem:[#allocation22_spill] sm:$0xff] %v2944_v21  ;;  %1504 = vst.msk [vmem:[#allocation2 + $0x70] sm:$0xff] %vm33_vm0, %v2944_v21  ;;  %v2953_v10 = vmax.f32 %v2941_v29, %v670_v16  ;;  %835 = vperm.xlu1 %2055, %v2944_v21  }
 0x27b   :  { %3491 = vst [vmem:[#allocation23_spill] sm:$0xff] %v2953_v10  ;;  %1505 = vst.msk [vmem:[#allocation2 + $0x78] sm:$0xff] %vm33_vm0, %v2953_v10  ;;  %840 = vperm.xlu0 %2054, %v2953_v10  }
 0x27d   :  { %795 = vperm.xlu1 %2055, %v2846_v34  }
 0x27f   :  { %800 = vperm.xlu0 %2054, %v2853_v60  }
 0x285   :  { %v673_v45 = vpop.xlane.xlu0 %672 }
 0x286   :  { %v2968_v16 = vmax.f32 %v2963_v9, %v673_v45 }
 0x287   :  { %v676_v28 = vpop.xlane.xlu1 %675 }
 0x288   :  { %3494 = vst [vmem:[#allocation26_spill] sm:$0xff] %v2968_v16  ;;  %1506 = vst.msk [vmem:[#allocation2 + $0x80] sm:$0xff] %vm33_vm0, %v2968_v16  ;;  %v2975_v10 = vmax.f32 %v2965_v40, %v676_v28  ;;  %845 = vperm.xlu1 %2055, %v2968_v16  }
 0x28a   :  { %3495 = vst [vmem:[#allocation27_spill] sm:$0xff] %v2975_v10  ;;  %1507 = vst.msk [vmem:[#allocation2 + $0x88] sm:$0xff] %vm33_vm0, %v2975_v10  ;;  %850 = vperm.xlu0 %2054, %v2975_v10  }
 0x28c   :  { %805 = vperm.xlu1 %2055, %v2869_v5  }
 0x28e   :  { %810 = vperm.xlu0 %2054, %v2876_v37  }
 0x2a9   :  { %v766_v45 = vpop.permute.xlu0 %765 }
 0x2aa   :  { %v863_v8 = vsub.f32 %v2611_v38, %v766_v45  ;;  %v3013_v45 = vld [vmem:[#allocation2 + $0x98] sm:$0xff] }
 0x2ab   :  { %v771_v9 = vpop.permute.xlu1 %770  ;;  %3499 = vst [vmem:[#allocation30_spill] sm:$0xff] %v3013_v45 }
 0x2ac   :  { %v883_v28 = vmul.f32 1.442695, %v863_v8  ;;  %v864_v21 = vsub.f32 %v2618_v42, %v771_v9  ;;  %v3496_v42 = vmov 0.0  }
 0x2ae   :  { %2069 = vpow2.f32 %v883_v28  ;;  %v885_v16 = vmul.f32 1.442695, %v864_v21  ;;  %v3002_v21 = vld [vmem:[#allocation2 + $0x90] sm:$0xff] }
 0x2af   :  { %3497 = vst [vmem:[#allocation28_spill] sm:$0xff] %v3002_v21 }
 0x2b0   :  { %2071 = vpow2.f32 %v885_v16 }
 0x2b8   :  { %v2070_v29 = vpop.eup %2069 }
 0x2b9   :  { %v2990_v10 = vsel %vm552_vm3, %v2070_v29, 0.0 }
 0x2ba   :  { %v2072_v40 = vpop.eup %2071 }
 0x2bb   :  { %v2995_v14 = vsel %vm553_vm5, %v2072_v40, 0.0 }
 0x2bc   :  { %v1224_v38 = vpack.c.bf16 %v2995_v14, %v2990_v10 }
 0x2be   :  { %1997 = vmatmul.mubr.msk.bf16.vlgmr.msra.gmra.mrb[20].mxu0 %vm622_vm4, %v1224_v38 }
 0x2bf   :  { %2000 = vmatprep.mubr.msk.bf16.mxu0 %vm2220_vm2, %v3496_v42 }
 0x2d6   :  { %v679_v8 = vpop.xlane.xlu0 %678 }
 0x2d7   :  { %v3005_v9 = vmax.f32 %v3002_v21, %v679_v8 }
 0x2d9   :  { %3498 = vst [vmem:[#allocation29_spill] sm:$0xff] %v3005_v9  ;;  %1508 = vst.msk [vmem:[#allocation2 + $0x90] sm:$0xff] %vm33_vm0, %v3005_v9  ;;  %855 = vperm.xlu1 %2055, %v3005_v9  }
 0x2da   :  { %v219_v40 = vpop.permute.xlu0 %218 }
 0x2db   :  { %v1882_v16 = vcombine.low %v2783_v18, %v219_v40 }
 0x2dd   :  { %2021 = vmatpush3.bf16.msra.mxu1 %v1882_v16  ;;  %v682_v28 = vpop.xlane.xlu1 %681 }
 0x2de   :  { %v3016_v38 = vmax.f32 %v3013_v45, %v682_v28  ;;  %2022 = vmatprep.subr.bf16.mxu1 %v3496_v42  ;;  %v223_v29 = vpop.permute.xlu0 %222 }
 0x2e0   :  { %3500 = vst [vmem:[#allocation31_spill] sm:$0xff] %v3016_v38  ;;  %1509 = vst.msk [vmem:[#allocation2 + $0x98] sm:$0xff] %vm33_vm0, %v3016_v38  ;;  %860 = vperm.xlu0 %2054, %v3016_v38  }
 0x2e1   :  { %v221_v9 = vpop.permute.xlu1 %220 }
 0x2e2   :  { %v1883_v18 = vcombine.low %v221_v9, %v223_v29 }
 0x2e4   :  { %2023 = vmatpush3.bf16.msra.mxu1 %v1883_v18 }
 0x2e5   :  { %v776_v40 = vpop.permute.xlu1 %775  ;;  %2024 = vmatprep.subr.bf16.mxu1 %v3496_v42 }
 0x2e6   :  { %v865_v16 = vsub.f32 %v2627_v46, %v776_v40  ;;  %v781_v28 = vpop.permute.xlu0 %780 }
 0x2e7   :  { %v866_v21 = vsub.f32 %v2636_v50, %v781_v28 }
 0x2e8   :  { %v887_v41 = vmul.f32 1.442695, %v865_v16 }
 0x2e9   :  { %v889_v47 = vmul.f32 1.442695, %v866_v21  ;;  %v816_v8 = vpop.permute.xlu1 %815 }
 0x2ea   :  { %2073 = vpow2.f32 %v887_v41  ;;  %v873_v45 = vsub.f32 %v2705_v17, %v816_v8  ;;  %v821_v52 = vpop.permute.xlu0 %820 }
 0x2eb   :  { %2075 = vpow2.f32 %v889_v47  ;;  %v874_v38 = vsub.f32 %v2712_v32, %v821_v52 }
 0x2ec   :  { %v903_v9 = vmul.f32 1.442695, %v873_v45 }
 0x2ed   :  { %v905_v29 = vmul.f32 1.442695, %v874_v38  ;;  %v786_v18 = vpop.permute.xlu1 %785 }
 0x2ee   :  { %2077 = vpow2.f32 %v903_v9  ;;  %v867_v15 = vsub.f32 %v2645_v54, %v786_v18  ;;  %v791_v46 = vpop.permute.xlu0 %790 }
 0x2ef   :  { %2079 = vpow2.f32 %v905_v29  ;;  %v868_v50 = vsub.f32 %v2654_v58, %v791_v46 }
 0x2f0   :  { %v891_v40 = vmul.f32 1.442695, %v867_v15 }
 0x2f1   :  { %v893_v21 = vmul.f32 1.442695, %v868_v50  ;;  %v826_v16 = vpop.permute.xlu1 %825 }
 0x2f2   :  { %2081 = vpow2.f32 %v891_v40  ;;  %v875_v17 = vsub.f32 %v2719_v35, %v826_v16  ;;  %v831_v41 = vpop.permute.xlu0 %830 }
 0x2f3   :  { %2083 = vpow2.f32 %v893_v21  ;;  %v876_v32 = vsub.f32 %v2731_v43, %v831_v41  ;;  %v983_v41 = vsel %vm622_vm4, %v2990_v10, 0.0  ;;  %v986_v10 = vsel %vm622_vm4, %v2995_v14, 0.0 }
 0x2f4   :  { %v2074_v47 = vpop.eup %2073  ;;  %v907_v52 = vmul.f32 1.442695, %v875_v17 }
 0x2f5   :  { %v2076_v45 = vpop.eup %2075  ;;  %v909_v38 = vmul.f32 1.442695, %v876_v32  ;;  %v225_v8 = vpop.permute.xlu1 %224  ;;  %v3036_v54 = vsel %vm554_vm6, %v2074_v47, 0.0  ;;  %v725_v47 = vmul.f32 1.442695, %v3501_v19 }
 0x2f6   :  { %2085 = vpow2.f32 %v907_v52  ;;  %v227_v58 = vpop.permute.xlu0 %226  ;;  %v3041_v35 = vsel %vm555_vm7, %v2076_v45, 0.0 }
 0x2f7   :  { %2087 = vpow2.f32 %v909_v38  ;;  %v1884_v15 = vcombine.low %v225_v8, %v227_v58  ;;  %v1225_v43 = vpack.c.bf16 %v3041_v35, %v3036_v54 }
 0x2f8   :  { %v2078_v28 = vpop.eup %2077 }
 0x2f9   :  { %v2080_v9 = vpop.eup %2079  ;;  %v3048_v29 = vsel %vm552_vm3, %v2078_v28, 0.0  ;;  %2001 = vmatmul.mubr.msk.bf16.gmra.mrb[24].mxu0 %vm622_vm4, %v1225_v43  ;;  %v836_v18 = vpop.permute.xlu1 %835  ;;  %2025 = vmatpush3.bf16.msra.mxu1 %v1884_v15  ;;  %v3502_v28 = vsub.f32 %v2805_v44, %v2810_v49 }
 0x2fa   :  { %v3054_v46 = vsel %vm553_vm5, %v2080_v9, 0.0  ;;  %v877_v50 = vsub.f32 %v2746_v51, %v836_v18  ;;  %v841_v40 = vpop.permute.xlu0 %840  ;;  %2004 = vmatprep.mubr.msk.bf16.mxu0 %vm2220_vm2, %v3496_v42 }
 0x2fb   :  { %v1229_v20 = vpack.c.bf16 %v3054_v46, %v3048_v29  ;;  %v878_v21 = vsub.f32 %v2753_v56, %v841_v40  ;;  %v727_v9 = vmul.f32 1.442695, %v3502_v28  ;;  %v731_v40 = vmul.f32 1.442695, %v3504_v23  ;;  %v3511_v28 = vld [vmem:[#allocation18_spill] sm:$0xff] }
 0x2fc   :  { %v2082_v16 = vpop.eup %2081  ;;  %v911_v17 = vmul.f32 1.442695, %v877_v50  ;;  %v723_v50 = vmul.f32 1.442695, %v3503_v22 }
 0x2fd   :  { %v2084_v32 = vpop.eup %2083  ;;  %v913_v51 = vmul.f32 1.442695, %v878_v21  ;;  %984 = vadd.xlane.f32.xlu1 %v983_v41  ;;  %2027 = vmatmul.mubr.msk.bf16.vlgmr.msra.gmra.mrb[20].mxu1 %vm622_vm4, %v1229_v20  ;;  %v796_v52 = vpop.permute.xlu1 %795  ;;  %v3071_v45 = vsel %vm556_vm8, %v2082_v16, 0.0  ;;  %v3505_v16 = vsub.f32 %v2807_v48, %v2817_v55  ;;  %v3506_v48 = vsub.f32 %v2841_v13, %v2846_v34 }
 0x2fe   :  { %2089 = vpow2.f32 %v911_v17  ;;  %v869_v56 = vsub.f32 %v2663_v62, %v796_v52  ;;  %v801_v38 = vpop.permute.xlu0 %800  ;;  %v3079_v3 = vsel %vm557_vm9, %v2084_v32, 0.0  ;;  %2030 = vmatprep.mubr.msk.bf16.mxu1 %vm2220_vm2, %v3496_v42  ;;  %v3507_v52 = vsub.f32 %v2825_v63, %v2835_v6 }
 0x2ff   :  { %2091 = vpow2.f32 %v913_v51  ;;  %v870_v39 = vsub.f32 %v2672_v2, %v801_v38  ;;  %987 = vadd.xlane.f32.xlu0 %v986_v10  ;;  %v1226_v8 = vpack.c.bf16 %v3079_v3, %v3071_v45  ;;  %v729_v17 = vmul.f32 1.442695, %v3505_v16 }
 0x300   :  { %v2086_v62 = vpop.eup %2085  ;;  %v895_v58 = vmul.f32 1.442695, %v869_v56  ;;  %2093 = vpow2.f32 %v725_v47  ;;  %v735_v55 = vmul.f32 1.442695, %v3506_v48  ;;  %v733_v56 = vmul.f32 1.442695, %v3507_v52 }
 0x301   :  { %v2088_v15 = vpop.eup %2087  ;;  %v897_v14 = vmul.f32 1.442695, %v870_v39  ;;  %2005 = vmatmul.mubr.msk.bf16.gmra.mrb[28].mxu0 %vm622_vm4, %v1226_v8  ;;  %v3090_v43 = vsel %vm554_vm6, %v2086_v62, 0.0  ;;  %v739_v63 = vmul.f32 1.442695, %v711_v24  ;;  %v712_v8 = vsub.f32 %v2866_v57, %v2876_v37  ;;  %v3524_v52 = vld [vmem:[#allocation24_spill] sm:$0xff] }
 0x302   :  { %2095 = vpow2.f32 %v895_v58  ;;  %v3095_v2 = vsel %vm555_vm7, %v2088_v15, 0.0  ;;  %2008 = vmatprep.mubr.msk.bf16.mxu0 %vm2220_vm2, %v3496_v42  ;;  %v3509_v62 = vsub.f32 %v2893_v1, %v2899_v53  ;;  %v995_v24 = vsel %vm622_vm4, %v3071_v45, 0.0 }
 0x303   :  { %2097 = vpow2.f32 %v897_v14  ;;  %v1230_v18 = vpack.c.bf16 %v3095_v2, %v3090_v43  ;;  %v741_v37 = vmul.f32 1.442695, %v712_v8 }
 0x304   :  { %2099 = vpow2.f32 %v727_v9  ;;  %v743_v58 = vmul.f32 1.442695, %v3509_v62 }
 0x305   :  { %2031 = vmatmul.mubr.msk.bf16.gmra.mrb[24].mxu1 %vm622_vm4, %v1230_v18  ;;  %2101 = vpow2.f32 %v723_v50 }
 0x306   :  { %2034 = vmatprep.mubr.msk.bf16.mxu1 %vm2220_vm2, %v3496_v42  ;;  %2103 = vpow2.f32 %v731_v40  ;;  %v3513_v40 = vld [vmem:[#allocation14_spill] sm:$0xff] }
 0x307   :  { %v846_v44 = vpop.permute.xlu1 %845 }
 0x308   :  { %v2090_v49 = vpop.eup %2089  ;;  %v879_v20 = vsub.f32 %v2760_v61, %v846_v44  ;;  %v3514_v44 = vld [vmem:[#allocation15_spill] sm:$0xff] }
 0x309   :  { %v2092_v21 = vpop.eup %2091  ;;  %v851_v41 = vpop.permute.xlu0 %850  ;;  %v3120_v30 = vsel %vm556_vm8, %v2090_v49, 0.0  ;;  %v3515_v49 = vsub.f32 %v3513_v40, %v3514_v44 }
 0x30a   :  { %v915_v33 = vmul.f32 1.442695, %v879_v20  ;;  %v880_v59 = vsub.f32 %v2767_v4, %v851_v41  ;;  %v3126_v0 = vsel %vm557_vm9, %v2092_v21, 0.0  ;;  %v3128_v61 = vpop.eup %2093 }
 0x30b   :  { %v806_v32 = vpop.permute.xlu1 %805  ;;  %v1231_v19 = vpack.c.bf16 %v3126_v0, %v3120_v30  ;;  %v745_v20 = vmul.f32 1.442695, %v3515_v49 }
 0x30c   :  { %v2096_v4 = vpop.eup %2095  ;;  %2105 = vpow2.f32 %v915_v33  ;;  %v917_v47 = vmul.f32 1.442695, %v880_v59  ;;  %v871_v25 = vsub.f32 %v2681_v7, %v806_v32 }
 0x30d   :  { %v2098_v51 = vpop.eup %2097  ;;  %2107 = vpow2.f32 %v729_v17  ;;  %v811_v13 = vpop.permute.xlu0 %810  ;;  %2035 = vmatmul.mubr.msk.bf16.gmra.mrb[28].mxu1 %vm622_vm4, %v1231_v19  ;;  %v3145_v5 = vsel %vm558_vm10, %v2096_v4, 0.0  ;;  %v3517_v17 = vld [vmem:[#allocation22_spill] sm:$0xff]  ;;  %v3521_v19 = vld [vmem:[#allocation17_spill] sm:$0xff]  ;;  %v3522_v4 = vld [vmem:[#allocation19_spill] sm:$0xff] }
 0x30e   :  { %2109 = vpow2.f32 %v917_v47  ;;  %v899_v12 = vmul.f32 1.442695, %v871_v25  ;;  %v872_v34 = vsub.f32 %v2690_v11, %v811_v13  ;;  %1111 = vperm.xlu1 %2055, %v3128_v61   ;;  %v3152_v7 = vsel %vm559_vm11, %v2098_v51, 0.0  ;;  %2038 = vmatprep.mubr.msk.bf16.mxu1 %vm2220_vm2, %v3496_v42  ;;  %v3158_v10 = vpop.eup %2099 }
 0x30f   :  { %2111 = vpow2.f32 %v735_v55  ;;  %v1227_v6 = vpack.c.bf16 %v3152_v7, %v3145_v5  ;;  %v3508_v11 = vsub.f32 %v2843_v31, %v2853_v60  ;;  %v3172_v15 = vpop.eup %2101  ;;  %v3510_v60 = vld [vmem:[#allocation16_spill] sm:$0xff]  ;;  %v3518_v41 = vsub.f32 %v3516_v26, %v3517_v17 }
 0x310   :  { %2113 = vpow2.f32 %v899_v12  ;;  %v901_v38 = vmul.f32 1.442695, %v872_v34  ;;  %v3174_v14 = vpop.eup %2103  ;;  %v3512_v9 = vsub.f32 %v3510_v60, %v3511_v28  ;;  %v3523_v47 = vsub.f32 %v3521_v19, %v3522_v4 }
 0x311   :  { %2115 = vpow2.f32 %v733_v56  ;;  %2009 = vmatmul.mubr.msk.bf16.gmra.mrb[32].mxu0 %vm622_vm4, %v1227_v6  ;;  %v737_v39 = vmul.f32 1.442695, %v3508_v11  ;;  %v751_v27 = vmul.f32 1.442695, %v3518_v41  ;;  %v3525_v56 = vld [vmem:[#allocation26_spill] sm:$0xff]  ;;  %v3528_v6 = vld [vmem:[#allocation23_spill] sm:$0xff] }
 0x312   :  { %2117 = vpow2.f32 %v901_v38  ;;  %1116 = vperm.xlu1 %2055, %v3158_v10   ;;  %2012 = vmatprep.mubr.msk.bf16.mxu0 %vm2220_vm2, %v3496_v42  ;;  %v747_v18 = vmul.f32 1.442695, %v3512_v9  ;;  %v749_v25 = vmul.f32 1.442695, %v3523_v47  ;;  %v3526_v13 = vsub.f32 %v3524_v52, %v3525_v56  ;;  %v3534_v41 = vld [vmem:[#allocation13_spill] sm:$0xff] }
 0x313   :  { %2119 = vpow2.f32 %v739_v63  ;;  %v989_v28 = vsel %vm622_vm4, %v3036_v54, 0.0  ;;  %v992_v9 = vsel %vm622_vm4, %v3041_v35, 0.0  ;;  %v3536_v56 = vld [vmem:[#allocation29_spill] sm:$0xff]  ;;  %v1001_v48 = vsel %vm622_vm4, %v3145_v5, 0.0 }
 0x314   :  { %2121 = vpow2.f32 %v737_v39  ;;  %v755_v12 = vmul.f32 1.442695, %v3526_v13 }
 0x315   :  { %1106 = vperm.xlu0 %2054, %v3172_v15   ;;  %2123 = vpow2.f32 %v743_v58 }
 0x316   :  { %v2106_v31 = vpop.eup %2105  ;;  %1126 = vperm.xlu1 %2055, %v3174_v14   ;;  %2125 = vpow2.f32 %v741_v37 }
 0x317   :  { %v3178_v57 = vpop.eup %2107  ;;  %v3189_v22 = vsel %vm558_vm10, %v2106_v31, 0.0  ;;  %2127 = vpow2.f32 %v747_v18  ;;  %v998_v18 = vsel %vm622_vm4, %v3079_v3, 0.0 }
 0x318   :  { %v2110_v53 = vpop.eup %2109  ;;  %2129 = vpow2.f32 %v745_v20  ;;  %v1004_v20 = vsel %vm622_vm4, %v3152_v7, 0.0  ;;  %v1022_v7 = vsel %vm622_vm4, %v3095_v2, 0.0 }
 0x319   :  { %v3183_v1 = vpop.eup %2111  ;;  %1121 = vperm.xlu0 %2054, %v3178_v57   ;;  %v3194_v50 = vsel %vm559_vm11, %v2110_v53, 0.0  ;;  %2131 = vpow2.f32 %v751_v27  ;;  %v3530_v53 = vld [vmem:[#allocation25_spill] sm:$0xff]  ;;  %v1016_v27 = vsel %vm622_vm4, %v3054_v46, 0.0 }
 0x31a   :  { %v2114_v23 = vpop.eup %2113  ;;  %1136 = vperm.xlu1 %2055, %v3183_v1   ;;  %v1232_v21 = vpack.c.bf16 %v3194_v50, %v3189_v22  ;;  %2133 = vpow2.f32 %v749_v25  ;;  %v1034_v46 = vsel %vm622_vm4, %v3194_v50, 0.0 }
 0x31b   :  { %v3202_v16 = vpop.eup %2115  ;;  %v3214_v55 = vsel %vm560_vm12, %v2114_v23, 0.0  ;;  %2135 = vpow2.f32 %v755_v12  ;;  %v3531_v23 = vld [vmem:[#allocation27_spill] sm:$0xff] }
 0x31c   :  { %v2118_v33 = vpop.eup %2117  ;;  %2039 = vmatmul.mubr.msk.bf16.gmra.mrb[32].mxu1 %vm622_vm4, %v1232_v21  ;;  %v3532_v40 = vsub.f32 %v3530_v53, %v3531_v23  ;;  %v3533_v21 = vld [vmem:[#allocation12_spill] sm:$0xff]  ;;  %v1085_v53 = vld [vmem:[#allocation4 + $0x8] sm:$0xff]  ;;  %v1013_v23 = vsel %vm622_vm4, %v3048_v29, 0.0  ;;  %v1025_v29 = vsel %vm622_vm4, %v3120_v30, 0.0 }
 0x31d   :  { %v3208_v59 = vpop.eup %2119  ;;  %1131 = vperm.xlu0 %2054, %v3202_v16   ;;  %v932_v32 = vsel %vm561_vm13, %v2118_v33, 0.0  ;;  %2042 = vmatprep.mubr.msk.bf16.mxu1 %vm2220_vm2, %v3496_v42  ;;  %v3527_v42 = vld [vmem:[#allocation21_spill] sm:$0xff] }
 0x31e   :  { %1146 = vperm.xlu1 %2055, %v3208_v59   ;;  %v1228_v51 = vpack.c.bf16 %v932_v32, %v3214_v55  ;;  %v3229_v34 = vpop.eup %2121  ;;  %v3529_v38 = vsub.f32 %v3527_v42, %v3528_v6  ;;  %v757_v44 = vmul.f32 1.442695, %v3532_v40  ;;  %v1010_v54 = vsel %vm622_vm4, %v932_v32, 0.0  ;;  %v944_v42 = vld [vmem:[#allocation3 + $0x8] sm:$0xff] }
 0x31f   :  { %v3232_v63 = vpop.eup %2123  ;;  %v1028_v32 = vsel %vm622_vm4, %v3126_v0, 0.0  ;;  %v3535_v0 = vld [vmem:[#allocation28_spill] sm:$0xff]  ;;  %v963_v6 = vmul.f32 %v3172_v15, %v943_v36 }
 0x320   :  { %2013 = vmatmul.mubr.msk.bf16.gmra.mrb[36].mxu0 %vm622_vm4, %v1228_v51  ;;  %v753_v11 = vmul.f32 1.442695, %v3529_v38  ;;  %v3239_v39 = vpop.eup %2125  ;;  %v3537_v13 = vsub.f32 %v3535_v0, %v3536_v56  ;;  %v1087_v0 = vld [vmem:[#allocation4 + $0x18] sm:$0xff] }
 0x321   :  { %1141 = vperm.xlu0 %2054, %v3229_v34   ;;  %v3241_v8 = vpop.eup %2127 }
 0x322   :  { %1156 = vperm.xlu1 %2055, %v3232_v63   ;;  %2137 = vpow2.f32 %v753_v11  ;;  %v3245_v62 = vpop.eup %2129  ;;  %v759_v50 = vmul.f32 1.442695, %v3537_v13  ;;  %v1094_v13 = vld [vmem:[#allocation4 + $0x50] sm:$0xff] }
 0x323   :  { %v3247_v58 = vpop.eup %2131  ;;  %2139 = vpow2.f32 %v757_v44 }
 0x324   :  { %v3251_v31 = vpop.eup %2133 }
 0x325   :  { %1151 = vperm.xlu0 %2054, %v3239_v39   ;;  %v3253_v37 = vpop.eup %2135 }
 0x326   :  { %1166 = vperm.xlu1 %2055, %v3241_v8  }
 0x329   :  { %1161 = vperm.xlu0 %2054, %v3245_v62  }
 0x32a   :  { %1176 = vperm.xlu1 %2055, %v3247_v58  }
 0x32c   :  { %v3257_v60 = vpop.eup %2137 }
 0x32d   :  { %1171 = vperm.xlu0 %2054, %v3251_v31   ;;  %v3276_v19 = vpop.eup %2139 }
 0x32e   :  { %1186 = vperm.xlu1 %2055, %v3253_v37  }
 0x331   :  { %1181 = vperm.xlu0 %2054, %v3257_v60  }
 0x350   :  { %990 = vadd.xlane.f32.xlu0 %v989_v28  ;;  %v964_v28 = vmul.f32 %v3128_v61, %v944_v42  ;;  %v1084_v61 = vld [vmem:[#allocation4] sm:$0xff] }
 0x352   :  { %993 = vadd.xlane.f32.xlu1 %v992_v9 }
 0x356   :  { %999 = vadd.xlane.f32.xlu1 %v998_v18  ;;  %v1007_v18 = vsel %vm622_vm4, %v3214_v55, 0.0 }
 0x358   :  { %v856_v49 = vpop.permute.xlu1 %855 }
 0x359   :  { %v881_v26 = vsub.f32 %v3533_v21, %v856_v49 }
 0x35a   :  { %1005 = vadd.xlane.f32.xlu1 %v1004_v20 }
 0x35b   :  { %v919_v35 = vmul.f32 1.442695, %v881_v26  ;;  %v1019_v26 = vsel %vm622_vm4, %v3090_v43, 0.0  ;;  %v3539_v43 = vld [vmem:[#allocation31_spill] sm:$0xff] }
 0x35d   :  { %2141 = vpow2.f32 %v919_v35 }
 0x35e   :  { %1011 = vadd.xlane.f32.xlu1 %v1010_v54 }
 0x35f   :  { %v861_v17 = vpop.permute.xlu0 %860 }
 0x360   :  { %v882_v3 = vsub.f32 %v3534_v41, %v861_v17  ;;  %v1031_v17 = vsel %vm622_vm4, %v3189_v22, 0.0 }
 0x362   :  { %v921_v33 = vmul.f32 1.442695, %v882_v3  ;;  %1017 = vadd.xlane.f32.xlu1 %v1016_v27  ;;  %v3538_v3 = vld [vmem:[#allocation30_spill] sm:$0xff] }
 0x363   :  { %v3540_v27 = vsub.f32 %v3538_v3, %v3539_v43 }
 0x364   :  { %2143 = vpow2.f32 %v921_v33 }
 0x365   :  { %2145 = vpow2.f32 %v759_v50  ;;  %v761_v33 = vmul.f32 1.442695, %v3540_v27 }
 0x366   :  { %1023 = vadd.xlane.f32.xlu1 %v1022_v7  ;;  %1191 = vperm.xlu0 %2054, %v3276_v19  }
 0x367   :  { %v2142_v4 = vpop.eup %2141  ;;  %2147 = vpow2.f32 %v761_v33 }
 0x368   :  { %v941_v2 = vsel %vm560_vm12, %v2142_v4, 0.0 }
 0x369   :  { %v1037_v41 = vsel %vm622_vm4, %v941_v2, 0.0 }
 0x36a   :  { %1029 = vadd.xlane.f32.xlu1 %v1028_v32 }
 0x36e   :  { %v2144_v47 = vpop.eup %2143  ;;  %1035 = vadd.xlane.f32.xlu1 %v1034_v46 }
 0x36f   :  { %v942_v25 = vsel %vm561_vm13, %v2144_v47, 0.0  ;;  %v3296_v12 = vpop.eup %2145 }
 0x370   :  { %v1040_v51 = vsel %vm622_vm4, %v942_v25, 0.0  ;;  %v1233_v52 = vpack.c.bf16 %v942_v25, %v941_v2 }
 0x371   :  { %v3323_v4 = vpop.eup %2147 }
 0x372   :  { %1041 = vadd.xlane.f32.xlu1 %v1040_v51  ;;  %2043 = vmatmul.mubr.msk.bf16.gmra.mrb[36].mxu1 %vm622_vm4, %v1233_v52  ;;  %v1086_v51 = vld [vmem:[#allocation4 + $0x10] sm:$0xff] }
 0x383   :  { %1196 = vperm.xlu1 %2055, %v3296_v12  }
 0x385   :  { %996 = vadd.xlane.f32.xlu0 %v995_v24 }
 0x389   :  { %1002 = vadd.xlane.f32.xlu0 %v1001_v48 }
 0x38a   :  { %v985_v38 = vpop.xlane.xlu1 %984 }
 0x38b   :  { %v1043_v11 = vadd.f32 %v985_v38, %v963_v6  ;;  %v1095_v6 = vld [vmem:[#allocation4 + $0x58] sm:$0xff] }
 0x38c   :  { %v988_v9 = vpop.xlane.xlu0 %987 }
 0x38d   :  { %1064 = vst.msk [vmem:[#allocation3] sm:$0xff] %vm33_vm0, %v1043_v11  ;;  %v1044_v45 = vadd.f32 %v988_v9, %v964_v28  ;;  %1008 = vadd.xlane.f32.xlu0 %v1007_v18 }
 0x38e   :  { %v1112_v5 = vpop.permute.xlu1 %1111 }
 0x38f   :  { %1065 = vst.msk [vmem:[#allocation3 + $0x8] sm:$0xff] %vm33_vm0, %v1044_v45  ;;  %v1205_v40 = vmul.f32 %v1112_v5, %v1085_v53  ;;  %v1088_v45 = vld [vmem:[#allocation4 + $0x20] sm:$0xff] }
 0x391   :  { %1014 = vadd.xlane.f32.xlu0 %v1013_v23  ;;  %v1303_v15 = vpop.f32.mrb[20].mxu0 }
 0x392   :  { %v1998_v44 = vpop.f32.mrb[21].mxu0  ;;  %v1117_v7 = vpop.permute.xlu1 %1116 }
 0x393   :  { %v1306_v49 = vpop.f32.mrb[22].mxu0  ;;  %v1206_v56 = vmul.f32 %v1117_v7, %v1086_v51 }
 0x394   :  { %v1451_v20 = vadd.f32 %v1306_v49, %v1205_v40  ;;  %v1107_v21 = vpop.permute.xlu0 %1106  ;;  %v1999_v55 = vpop.f32.mrb[23].mxu0  ;;  %v1089_v40 = vld [vmem:[#allocation4 + $0x28] sm:$0xff] }
 0x395   :  { %v1204_v54 = vmul.f32 %v1107_v21, %v1084_v61  ;;  %1020 = vadd.xlane.f32.xlu0 %v1019_v26  ;;  %v1096_v55 = vld [vmem:[#allocation4 + $0x60] sm:$0xff] }
 0x396   :  { %1471 = vst.msk [vmem:[#allocation4 + $0x8] sm:$0xff] %vm74_vm1, %v1451_v20  ;;  %v1127_v30 = vpop.permute.xlu1 %1126 }
 0x397   :  { %v1450_v35 = vadd.f32 %v1303_v15, %v1204_v54  ;;  %v1208_v61 = vmul.f32 %v1127_v30, %v1088_v45  ;;  %v1090_v45 = vld [vmem:[#allocation4 + $0x30] sm:$0xff] }
 0x398   :  { %v1122_v32 = vpop.permute.xlu0 %1121 }
 0x399   :  { %1470 = vst.msk [vmem:[#allocation4] sm:$0xff] %vm74_vm1, %v1450_v35  ;;  %1026 = vadd.xlane.f32.xlu0 %v1025_v29  ;;  %v1207_v24 = vmul.f32 %v1122_v32, %v1087_v0 }
 0x39a   :  { %v3326_v47 = vpop.permute.xlu1 %1136 }
 0x39c   :  { %v1132_v46 = vpop.permute.xlu0 %1131 }
 0x39d   :  { %1032 = vadd.xlane.f32.xlu0 %v1031_v17  ;;  %v1209_v54 = vmul.f32 %v1132_v46, %v1089_v40  ;;  %v945_v46 = vld [vmem:[#allocation3 + $0x10] sm:$0xff] }
 0x39e   :  { %v3330_v25 = vpop.permute.xlu1 %1146 }
 0x3a0   :  { %v3328_v22 = vpop.permute.xlu0 %1141 }
 0x3a1   :  { %1038 = vadd.xlane.f32.xlu0 %v1037_v41  ;;  %v1097_v41 = vld [vmem:[#allocation4 + $0x68] sm:$0xff] }
 0x3a2   :  { %v1157_v52 = vpop.permute.xlu1 %1156 }
 0x3a3   :  { %v1214_v11 = vmul.f32 %v1157_v52, %v1094_v13 }
 0x3a4   :  { %v3332_v2 = vpop.permute.xlu0 %1151 }
 0x3a6   :  { %v1167_v28 = vpop.permute.xlu1 %1166 }
 0x3a7   :  { %v1216_v43 = vmul.f32 %v1167_v28, %v1096_v55  ;;  %v950_v55 = vld [vmem:[#allocation3 + $0x38] sm:$0xff] }
 0x3a8   :  { %v1162_v36 = vpop.permute.xlu0 %1161 }
 0x3a9   :  { %v1215_v5 = vmul.f32 %v1162_v36, %v1095_v6  ;;  %v1098_v36 = vld [vmem:[#allocation4 + $0x70] sm:$0xff]  ;;  %v1099_v6 = vld [vmem:[#allocation4 + $0x78] sm:$0xff] }
 0x3aa   :  { %v1177_v35 = vpop.permute.xlu1 %1176 }
 0x3ab   :  { %v1218_v28 = vmul.f32 %v1177_v35, %v1098_v36  ;;  %v956_v36 = vld [vmem:[#allocation3 + $0x68] sm:$0xff] }
 0x3ac   :  { %v1172_v49 = vpop.permute.xlu0 %1171 }
 0x3ad   :  { %v1217_v32 = vmul.f32 %v1172_v49, %v1097_v41  ;;  %v1210_v49 = vmul.f32 %v3326_v47, %v1090_v45 }
 0x3b0   :  { %v1182_v30 = vpop.permute.xlu0 %1181 }
 0x3b7   :  { %1201 = vperm.xlu0 %2054, %v3323_v4  }
 0x3cc   :  { %v1311_v50 = vpop.f32.mrb[24].mxu0 }
 0x3cd   :  { %v1452_v48 = vadd.f32 %v1311_v50, %v1206_v56  ;;  %v2002_v42 = vpop.f32.mrb[25].mxu0  ;;  %v1187_v56 = vpop.permute.xlu1 %1186 }
 0x3ce   :  { %v1314_v38 = vpop.f32.mrb[26].mxu0 }
 0x3cf   :  { %1472 = vst.msk [vmem:[#allocation4 + $0x10] sm:$0xff] %vm74_vm1, %v1452_v48  ;;  %v1453_v9 = vadd.f32 %v1314_v38, %v1207_v24  ;;  %v2003_v18 = vpop.f32.mrb[27].mxu0  ;;  %v946_v24 = vld [vmem:[#allocation3 + $0x18] sm:$0xff]  ;;  %v965_v48 = vmul.f32 %v3158_v10, %v945_v46 }
 0x3d0   :  { %v1411_v53 = vpop.f32.mrb[20].mxu1  ;;  %v948_v18 = vld [vmem:[#allocation3 + $0x28] sm:$0xff] }
 0x3d1   :  { %1473 = vst.msk [vmem:[#allocation4 + $0x18] sm:$0xff] %vm74_vm1, %v1453_v9  ;;  %v1460_v23 = vadd.f32 %v1411_v53, %v1214_v11  ;;  %v2028_v15 = vpop.f32.mrb[21].mxu1  ;;  %v966_v11 = vmul.f32 %v3178_v57, %v946_v24 }
 0x3d2   :  { %v1414_v44 = vpop.f32.mrb[22].mxu1 }
 0x3d3   :  { %1480 = vst.msk [vmem:[#allocation4 + $0x50] sm:$0xff] %vm74_vm1, %v1460_v23  ;;  %v1461_v20 = vadd.f32 %v1414_v44, %v1215_v5  ;;  %v2029_v21 = vpop.f32.mrb[23].mxu1  ;;  %v1219_v23 = vmul.f32 %v1182_v30, %v1099_v6  ;;  %v1091_v44 = vld [vmem:[#allocation4 + $0x38] sm:$0xff] }
 0x3d4   :  { %v1319_v26 = vpop.f32.mrb[28].mxu0  ;;  %v1211_v35 = vmul.f32 %v3328_v22, %v1091_v44  ;;  %v954_v30 = vld [vmem:[#allocation3 + $0x58] sm:$0xff] }
 0x3d5   :  { %1481 = vst.msk [vmem:[#allocation4 + $0x58] sm:$0xff] %vm74_vm1, %v1461_v20  ;;  %v1454_v29 = vadd.f32 %v1319_v26, %v1208_v61  ;;  %v2006_v17 = vpop.f32.mrb[29].mxu0  ;;  %v968_v61 = vmul.f32 %v3202_v16, %v948_v18  ;;  %v970_v16 = vmul.f32 %v3229_v34, %v950_v55 }
 0x3d6   :  { %v1322_v3 = vpop.f32.mrb[30].mxu0 }
 0x3d7   :  { %1474 = vst.msk [vmem:[#allocation4 + $0x20] sm:$0xff] %vm74_vm1, %v1454_v29  ;;  %v1455_v27 = vadd.f32 %v1322_v3, %v1209_v54  ;;  %v2007_v33 = vpop.f32.mrb[31].mxu0 }
 0x3d8   :  { %v1419_v7 = vpop.f32.mrb[24].mxu1 }
 0x3d9   :  { %1475 = vst.msk [vmem:[#allocation4 + $0x28] sm:$0xff] %vm74_vm1, %v1455_v27  ;;  %v1462_v51 = vadd.f32 %v1419_v7, %v1216_v43  ;;  %v2032_v52 = vpop.f32.mrb[25].mxu1  ;;  %v952_v27 = vld [vmem:[#allocation3 + $0x48] sm:$0xff]  ;;  %v1100_v7 = vld [vmem:[#allocation4 + $0x80] sm:$0xff] }
 0x3da   :  { %v1422_v0 = vpop.f32.mrb[26].mxu1  ;;  %v972_v22 = vmul.f32 %v3239_v39, %v952_v27  ;;  %v1101_v52 = vld [vmem:[#allocation4 + $0x88] sm:$0xff]  ;;  %v1220_v34 = vmul.f32 %v1187_v56, %v1100_v7 }
 0x3db   :  { %1482 = vst.msk [vmem:[#allocation4 + $0x60] sm:$0xff] %vm74_vm1, %v1462_v51  ;;  %v1463_v13 = vadd.f32 %v1422_v0, %v1217_v32  ;;  %v2033_v50 = vpop.f32.mrb[27].mxu1  ;;  %v974_v0 = vmul.f32 %v3245_v62, %v954_v30  ;;  %v1093_v39 = vld [vmem:[#allocation4 + $0x48] sm:$0xff]  ;;  %v976_v62 = vmul.f32 %v3251_v31, %v956_v36 }
 0x3dd   :  { %1483 = vst.msk [vmem:[#allocation4 + $0x68] sm:$0xff] %vm74_vm1, %v1463_v13  ;;  %v991_v42 = vpop.xlane.xlu0 %990  ;;  %v1092_v13 = vld [vmem:[#allocation4 + $0x40] sm:$0xff] }
 0x3de   :  { %v1045_v38 = vadd.f32 %v991_v42, %v965_v48 }
 0x3df   :  { %v994_v9 = vpop.xlane.xlu1 %993 }
 0x3e0   :  { %1066 = vst.msk [vmem:[#allocation3 + $0x10] sm:$0xff] %vm33_vm0, %v1045_v38  ;;  %v1046_v53 = vadd.f32 %v994_v9, %v966_v11  ;;  %v1427_v5 = vpop.f32.mrb[28].mxu1 }
 0x3e1   :  { %v1464_v15 = vadd.f32 %v1427_v5, %v1218_v28  ;;  %v2036_v40 = vpop.f32.mrb[29].mxu1  ;;  %v1212_v28 = vmul.f32 %v3330_v25, %v1092_v13  ;;  %v1213_v5 = vmul.f32 %v3332_v2, %v1093_v39 }
 0x3e2   :  { %1067 = vst.msk [vmem:[#allocation3 + $0x18] sm:$0xff] %vm33_vm0, %v1046_v53  ;;  %v1430_v10 = vpop.f32.mrb[30].mxu1  ;;  %v958_v53 = vld [vmem:[#allocation3 + $0x78] sm:$0xff] }
 0x3e3   :  { %1484 = vst.msk [vmem:[#allocation4 + $0x70] sm:$0xff] %vm74_vm1, %v1464_v15  ;;  %v1465_v57 = vadd.f32 %v1430_v10, %v1219_v23  ;;  %v2037_v20 = vpop.f32.mrb[31].mxu1  ;;  %v1000_v21 = vpop.xlane.xlu1 %999 }
 0x3e4   :  { %v1048_v26 = vadd.f32 %v1000_v21, %v968_v61  ;;  %v1327_v54 = vpop.f32.mrb[32].mxu0  ;;  %v978_v61 = vmul.f32 %v3257_v60, %v958_v53  ;;  %v962_v21 = vld [vmem:[#allocation3 + $0x98] sm:$0xff]  ;;  %v947_v60 = vld [vmem:[#allocation3 + $0x20] sm:$0xff] }
 0x3e5   :  { %1485 = vst.msk [vmem:[#allocation4 + $0x78] sm:$0xff] %vm74_vm1, %v1465_v57  ;;  %v1456_v29 = vadd.f32 %v1327_v54, %v1210_v49  ;;  %v2010_v17 = vpop.f32.mrb[33].mxu0  ;;  %v1192_v46 = vpop.permute.xlu0 %1191  ;;  %v960_v49 = vld [vmem:[#allocation3 + $0x88] sm:$0xff] }
 0x3e6   :  { %1069 = vst.msk [vmem:[#allocation3 + $0x28] sm:$0xff] %vm33_vm0, %v1048_v26  ;;  %v1330_v41 = vpop.f32.mrb[34].mxu0  ;;  %v1221_v48 = vmul.f32 %v1192_v46, %v1101_v52  ;;  %v980_v2 = vmul.f32 %v3276_v19, %v960_v49  ;;  %v982_v26 = vmul.f32 %v3323_v4, %v962_v21  ;;  %v957_v52 = vld [vmem:[#allocation3 + $0x70] sm:$0xff] }
 0x3e7   :  { %1476 = vst.msk [vmem:[#allocation4 + $0x30] sm:$0xff] %vm74_vm1, %v1456_v29  ;;  %v1457_v47 = vadd.f32 %v1330_v41, %v1211_v35  ;;  %v1006_v3 = vpop.xlane.xlu1 %1005  ;;  %v2011_v43 = vpop.f32.mrb[35].mxu0  ;;  %v967_v29 = vmul.f32 %v3174_v14, %v947_v60  ;;  %v949_v41 = vld [vmem:[#allocation3 + $0x30] sm:$0xff] }
 0x3e8   :  { %v1050_v33 = vadd.f32 %v1006_v3, %v970_v16  ;;  %v969_v19 = vmul.f32 %v3183_v1, %v949_v41  ;;  %v951_v3 = vld [vmem:[#allocation3 + $0x40] sm:$0xff] }
 0x3e9   :  { %1477 = vst.msk [vmem:[#allocation4 + $0x38] sm:$0xff] %vm74_vm1, %v1457_v47  ;;  %v971_v4 = vmul.f32 %v3208_v59, %v951_v3  ;;  %v977_v59 = vmul.f32 %v3247_v58, %v957_v52 }
 0x3ea   :  { %1071 = vst.msk [vmem:[#allocation3 + $0x38] sm:$0xff] %vm33_vm0, %v1050_v33  ;;  %v953_v33 = vld [vmem:[#allocation3 + $0x50] sm:$0xff] }
 0x3eb   :  { %v1012_v32 = vpop.xlane.xlu1 %1011  ;;  %v973_v14 = vmul.f32 %v3232_v63, %v953_v33 }
 0x3ec   :  { %v1052_v51 = vadd.f32 %v1012_v32, %v972_v22  ;;  %v955_v32 = vld [vmem:[#allocation3 + $0x60] sm:$0xff] }
 0x3ed   :  { %v975_v1 = vmul.f32 %v3241_v8, %v955_v32 }
 0x3ee   :  { %1073 = vst.msk [vmem:[#allocation3 + $0x48] sm:$0xff] %vm33_vm0, %v1052_v51 }
 0x3ef   :  { %v1435_v50 = vpop.f32.mrb[32].mxu1  ;;  %v1018_v24 = vpop.xlane.xlu1 %1017 }
 0x3f0   :  { %v1466_v42 = vadd.f32 %v1435_v50, %v1220_v34  ;;  %v1054_v6 = vadd.f32 %v1018_v24, %v974_v0  ;;  %v2040_v38 = vpop.f32.mrb[33].mxu1  ;;  %v959_v0 = vld [vmem:[#allocation3 + $0x80] sm:$0xff]  ;;  %v961_v24 = vld [vmem:[#allocation3 + $0x90] sm:$0xff] }
 0x3f1   :  { %v1438_v11 = vpop.f32.mrb[34].mxu1  ;;  %v979_v63 = vmul.f32 %v3253_v37, %v959_v0  ;;  %v981_v8 = vmul.f32 %v3296_v12, %v961_v24  ;;  %v1103_v38 = vld [vmem:[#allocation4 + $0x98] sm:$0xff] }
 0x3f2   :  { %1486 = vst.msk [vmem:[#allocation4 + $0x80] sm:$0xff] %vm74_vm1, %v1466_v42  ;;  %v1467_v56 = vadd.f32 %v1438_v11, %v1221_v48  ;;  %v2041_v9 = vpop.f32.mrb[35].mxu1 }
 0x3f3   :  { %1075 = vst.msk [vmem:[#allocation3 + $0x58] sm:$0xff] %vm33_vm0, %v1054_v6  ;;  %v1024_v18 = vpop.xlane.xlu1 %1023  ;;  %v1335_v45 = vpop.f32.mrb[36].mxu0  ;;  %v1102_v6 = vld [vmem:[#allocation4 + $0x90] sm:$0xff] }
 0x3f4   :  { %1487 = vst.msk [vmem:[#allocation4 + $0x88] sm:$0xff] %vm74_vm1, %v1467_v56  ;;  %v1056_v23 = vadd.f32 %v1024_v18, %v976_v62  ;;  %v1458_v15 = vadd.f32 %v1335_v45, %v1212_v28  ;;  %v2014_v40 = vpop.f32.mrb[37].mxu0 }
 0x3f5   :  { %v1338_v44 = vpop.f32.mrb[38].mxu0 }
 0x3f6   :  { %1077 = vst.msk [vmem:[#allocation3 + $0x68] sm:$0xff] %vm33_vm0, %v1056_v23  ;;  %v1459_v25 = vadd.f32 %v1338_v44, %v1213_v5  ;;  %v2015_v10 = vpop.f32.mrb[39].mxu0 }
 0x3f7   :  { %1478 = vst.msk [vmem:[#allocation4 + $0x40] sm:$0xff] %vm74_vm1, %v1458_v15  ;;  %v1030_v31 = vpop.xlane.xlu1 %1029 }
 0x3f8   :  { %1479 = vst.msk [vmem:[#allocation4 + $0x48] sm:$0xff] %vm74_vm1, %v1459_v25  ;;  %v1058_v57 = vadd.f32 %v1030_v31, %v978_v61 }
 0x3fa   :  { %1079 = vst.msk [vmem:[#allocation3 + $0x78] sm:$0xff] %vm33_vm0, %v1058_v57 }
 0x3fb   :  { %v1036_v20 = vpop.xlane.xlu1 %1035 }
 0x3fc   :  { %v1060_v55 = vadd.f32 %v1036_v20, %v980_v2 }
 0x3fe   :  { %1081 = vst.msk [vmem:[#allocation3 + $0x88] sm:$0xff] %vm33_vm0, %v1060_v55 }
 0x3ff   :  { %v1042_v54 = vpop.xlane.xlu1 %1041 }
 0x400   :  { %v1062_v35 = vadd.f32 %v1042_v54, %v982_v26 }
 0x402   :  { %1083 = vst.msk [vmem:[#allocation3 + $0x98] sm:$0xff] %vm33_vm0, %v1062_v35 }
 0x403   :  { %v1197_v58 = vpop.permute.xlu1 %1196 }
 0x404   :  { %v1222_v11 = vmul.f32 %v1197_v58, %v1102_v6 }
 0x412   :  { %v997_v17 = vpop.xlane.xlu0 %996 }
 0x413   :  { %v1047_v16 = vadd.f32 %v997_v17, %v967_v29 }
 0x415   :  { %1068 = vst.msk [vmem:[#allocation3 + $0x20] sm:$0xff] %vm33_vm0, %v1047_v16 }
 0x416   :  { %v1003_v47 = vpop.xlane.xlu0 %1002 }
 0x417   :  { %v1049_v43 = vadd.f32 %v1003_v47, %v969_v19 }
 0x419   :  { %1070 = vst.msk [vmem:[#allocation3 + $0x30] sm:$0xff] %vm33_vm0, %v1049_v43 }
 0x41a   :  { %v1009_v27 = vpop.xlane.xlu0 %1008 }
 0x41b   :  { %v1051_v22 = vadd.f32 %v1009_v27, %v971_v4 }
 0x41d   :  { %1072 = vst.msk [vmem:[#allocation3 + $0x40] sm:$0xff] %vm33_vm0, %v1051_v22 }
 0x41e   :  { %v1015_v7 = vpop.xlane.xlu0 %1014 }
 0x41f   :  { %v1053_v30 = vadd.f32 %v1015_v7, %v973_v14 }
 0x421   :  { %1074 = vst.msk [vmem:[#allocation3 + $0x50] sm:$0xff] %vm33_vm0, %v1053_v30 }
 0x422   :  { %v1021_v51 = vpop.xlane.xlu0 %1020 }
 0x423   :  { %v1055_v46 = vadd.f32 %v1021_v51, %v975_v1 }
 0x425   :  { %1076 = vst.msk [vmem:[#allocation3 + $0x60] sm:$0xff] %vm33_vm0, %v1055_v46 }
 0x426   :  { %v1027_v34 = vpop.xlane.xlu0 %1026 }
 0x427   :  { %v1057_v13 = vadd.f32 %v1027_v34, %v977_v59 }
 0x429   :  { %1078 = vst.msk [vmem:[#allocation3 + $0x70] sm:$0xff] %vm33_vm0, %v1057_v13 }
 0x42a   :  { %v1033_v50 = vpop.xlane.xlu0 %1032 }
 0x42b   :  { %v1059_v36 = vadd.f32 %v1033_v50, %v979_v63 }
 0x42d   :  { %1080 = vst.msk [vmem:[#allocation3 + $0x80] sm:$0xff] %vm33_vm0, %v1059_v36 }
 0x42e   :  { %v1039_v48 = vpop.xlane.xlu0 %1038 }
 0x42f   :  { %v1061_v42 = vadd.f32 %v1039_v48, %v981_v8 }
 0x431   :  { %1082 = vst.msk [vmem:[#allocation3 + $0x90] sm:$0xff] %vm33_vm0, %v1061_v42 }
 0x436   :  { %v1202_v39 = vpop.permute.xlu0 %1201 }
 0x437   :  { %v1223_v56 = vmul.f32 %v1202_v39, %v1103_v38 }
 0x445   :  { %v1443_v28 = vpop.f32.mrb[36].mxu1 }
 0x446   :  { %v1468_v9 = vadd.f32 %v1443_v28, %v1222_v11  ;;  %v2044_v37 = vpop.f32.mrb[37].mxu1 }
 0x447   :  { %v1446_v62 = vpop.f32.mrb[38].mxu1 }
 0x448   :  { %1488 = vst.msk [vmem:[#allocation4 + $0x90] sm:$0xff] %vm74_vm1, %v1468_v9  ;;  %v1469_v18 = vadd.f32 %v1446_v62, %v1223_v56  ;;  %v2045_v45 = vpop.f32.mrb[39].mxu1 }
 0x44a   :  { %1489 = vst.msk [vmem:[#allocation4 + $0x98] sm:$0xff] %vm74_vm1, %v1469_v18 }
 0x44b PF:  { %v1525_v12 = vld [vmem:[#allocation3 + $0x60] sm:$0xff]  ;;  %v1523_v53 = vld [vmem:[#allocation3 + $0x50] sm:$0xff]  ;;  %v1526_v5 = vld [vmem:[#allocation3 + $0x68] sm:$0xff]  ;;  %v2222_v23 = vmov 0   ;;  %s2223_s6 = smov 16  }
 0x44c   :  { %2150 = vset.pattern.permute.xlu1 %v2222_v23  ;;  %2149 = vset.pattern.permute.xlu0 %v2222_v23  ;;  %vm1545_vm14 = vcmp.eq.f32.partialorder %v1525_v12, 0.0  ;;  %vm1543_vm15 = vcmp.eq.f32.partialorder %v1523_v53, 0.0  ;;  %vm1546_vm0 = vcmp.eq.f32.partialorder %v1526_v5, 0.0  ;;  %v1524_v15 = vld [vmem:[#allocation3 + $0x58] sm:$0xff]  ;;  %v1527_v44 = vld [vmem:[#allocation3 + $0x70] sm:$0xff]  ;;  %v1530_v49 = vld [vmem:[#allocation3 + $0x88] sm:$0xff] }
 0x44d   :  { %v1528_v40 = vld [vmem:[#allocation3 + $0x78] sm:$0xff]  ;;  %v1565_v25 = vsel %vm1545_vm14, 1.0, %v1525_v12  ;;  %v1563_v10 = vsel %vm1543_vm15, 1.0, %v1523_v53  ;;  %v1566_v61 = vsel %vm1546_vm0, 1.0, %v1526_v5  ;;  %vm1544_vm2 = vcmp.eq.f32.partialorder %v1524_v15, 0.0  ;;  %v1529_v57 = vld [vmem:[#allocation3 + $0x80] sm:$0xff] }
 0x44e   :  { %2176 = vrcp.f32 %v1565_v25  ;;  %v1564_v31 = vsel %vm1544_vm2, 1.0, %v1524_v15  ;;  %vm1548_vm3 = vcmp.eq.f32.partialorder %v1528_v40, 0.0  ;;  %vm1547_vm4 = vcmp.eq.f32.partialorder %v1527_v44, 0.0  ;;  %v1532_v21 = vld [vmem:[#allocation3 + $0x98] sm:$0xff]  ;;  %v1531_v55 = vld [vmem:[#allocation3 + $0x90] sm:$0xff]  ;;  %v1514_v35 = vld [vmem:[#allocation3 + $0x8] sm:$0xff] }
 0x44f   :  { %2178 = vrcp.f32 %v1563_v10  ;;  %v1568_v2 = vsel %vm1548_vm3, 1.0, %v1528_v40  ;;  %v1567_v20 = vsel %vm1547_vm4, 1.0, %v1527_v44  ;;  %vm1550_vm5 = vcmp.eq.f32.partialorder %v1530_v49, 0.0  ;;  %v1513_v29 = vld [vmem:[#allocation3] sm:$0xff]  ;;  %v1516_v3 = vld [vmem:[#allocation3 + $0x18] sm:$0xff]  ;;  %v1515_v43 = vld [vmem:[#allocation3 + $0x10] sm:$0xff] }
 0x450   :  { %2180 = vrcp.f32 %v1566_v61  ;;  %vm1549_vm6 = vcmp.eq.f32.partialorder %v1529_v57, 0.0  ;;  %v1570_v26 = vsel %vm1550_vm5, 1.0, %v1530_v49  ;;  %vm1552_vm7 = vcmp.eq.f32.partialorder %v1532_v21, 0.0  ;;  %v1518_v14 = vld [vmem:[#allocation3 + $0x28] sm:$0xff]  ;;  %v1517_v7 = vld [vmem:[#allocation3 + $0x20] sm:$0xff]  ;;  %v1520_v52 = vld [vmem:[#allocation3 + $0x38] sm:$0xff] }
 0x451   :  { %2182 = vrcp.f32 %v1564_v31  ;;  %v1569_v54 = vsel %vm1549_vm6, 1.0, %v1529_v57  ;;  %vm1551_vm8 = vcmp.eq.f32.partialorder %v1531_v55, 0.0  ;;  %v1572_v41 = vsel %vm1552_vm7, 1.0, %v1532_v21  ;;  %v1519_v46 = vld [vmem:[#allocation3 + $0x30] sm:$0xff]  ;;  %v1522_v63 = vld [vmem:[#allocation3 + $0x48] sm:$0xff]  ;;  %v1521_v50 = vld [vmem:[#allocation3 + $0x40] sm:$0xff] }
 0x452   :  { %2184 = vrcp.f32 %v1568_v2  ;;  %v1571_v19 = vsel %vm1551_vm8, 1.0, %v1531_v55  ;;  %vm1534_vm9 = vcmp.eq.f32.partialorder %v1514_v35, 0.0  ;;  %vm1533_vm10 = vcmp.eq.f32.partialorder %v1513_v29, 0.0  ;;  %v1605_v45 = vld [vmem:[#allocation4 + $0x60] sm:$0xff]  ;;  %v1606_v12 = vld [vmem:[#allocation4 + $0x68] sm:$0xff]  ;;  %v1603_v53 = vld [vmem:[#allocation4 + $0x50] sm:$0xff] }
 0x453   :  { %2186 = vrcp.f32 %v1567_v20  ;;  %v1554_v4 = vsel %vm1534_vm9, 1.0, %v1514_v35  ;;  %v1553_v33 = vsel %vm1533_vm10, 1.0, %v1513_v29  ;;  %vm1536_vm11 = vcmp.eq.f32.partialorder %v1516_v3, 0.0  ;;  %v1604_v5 = vld [vmem:[#allocation4 + $0x58] sm:$0xff]  ;;  %v1607_v49 = vld [vmem:[#allocation4 + $0x70] sm:$0xff] }
 0x454   :  { %2188 = vrcp.f32 %v1570_v26  ;;  %vm1535_vm12 = vcmp.eq.f32.partialorder %v1515_v43, 0.0  ;;  %v1556_v32 = vsel %vm1536_vm11, 1.0, %v1516_v3  ;;  %vm1538_vm13 = vcmp.eq.f32.partialorder %v1518_v14, 0.0  ;;  %v1608_v61 = vld [vmem:[#allocation4 + $0x78] sm:$0xff]  ;;  %v1610_v26 = vld [vmem:[#allocation4 + $0x88] sm:$0xff] }
 0x455   :  { %2190 = vrcp.f32 %v1569_v54  ;;  %v1555_v1 = vsel %vm1535_vm12, 1.0, %v1515_v43  ;;  %vm1537_vm14 = vcmp.eq.f32.partialorder %v1517_v7, 0.0  ;;  %v1558_v59 = vsel %vm1538_vm13, 1.0, %v1518_v14  ;;  %v1609_v54 = vld [vmem:[#allocation4 + $0x80] sm:$0xff] }
 0x456   :  { %2192 = vrcp.f32 %v1572_v41  ;;  %v1557_v0 = vsel %vm1537_vm14, 1.0, %v1517_v7  ;;  %vm1540_vm15 = vcmp.eq.f32.partialorder %v1520_v52, 0.0  ;;  %vm1539_vm0 = vcmp.eq.f32.partialorder %v1519_v46, 0.0 }
 0x457   :  { %2194 = vrcp.f32 %v1571_v19  ;;  %v1560_v24 = vsel %vm1540_vm15, 1.0, %v1520_v52  ;;  %v1559_v8 = vsel %vm1539_vm0, 1.0, %v1519_v46  ;;  %vm1542_vm2 = vcmp.eq.f32.partialorder %v1522_v63, 0.0  ;;  %v1611_v19 = vld [vmem:[#allocation4 + $0x90] sm:$0xff] }
 0x458   :  { %v2177_v60 = vpop.eup %2176  ;;  %2196 = vrcp.f32 %v1554_v4  ;;  %vm1541_vm3 = vcmp.eq.f32.partialorder %v1521_v50, 0.0  ;;  %v1562_v42 = vsel %vm1542_vm2, 1.0, %v1522_v63  ;;  %v1593_v63 = vld [vmem:[#allocation4] sm:$0xff]  ;;  %vm1824_vm4 = vcmask 257024  }
 0x459   :  { %v2179_v17 = vpop.eup %2178  ;;  %1675 = vperm.xlu1 %2150, %v2177_v60   ;;  %2198 = vrcp.f32 %v1553_v33  ;;  %v1561_v58 = vsel %vm1541_vm3, 1.0, %v1521_v50 }
 0x45a   :  { %v2181_v16 = vpop.eup %2180  ;;  %1665 = vperm.xlu0 %2149, %v2179_v17   ;;  %2200 = vrcp.f32 %v1556_v32 }
 0x45b   :  { %v2183_v47 = vpop.eup %2182  ;;  %2202 = vrcp.f32 %v1555_v1 }
 0x45c   :  { %v2185_v27 = vpop.eup %2184  ;;  %2204 = vrcp.f32 %v1558_v59 }
 0x45d   :  { %1680 = vperm.xlu1 %2150, %v2181_v16   ;;  %v2187_v22 = vpop.eup %2186  ;;  %2206 = vrcp.f32 %v1557_v0  ;;  %v1612_v16 = vld [vmem:[#allocation4 + $0x98] sm:$0xff]  ;;  %v1595_v0 = vld [vmem:[#allocation4 + $0x10] sm:$0xff] }
 0x45e   :  { %1670 = vperm.xlu0 %2149, %v2183_v47   ;;  %v2189_v30 = vpop.eup %2188  ;;  %2208 = vrcp.f32 %v1560_v24 }
 0x45f   :  { %v2191_v51 = vpop.eup %2190  ;;  %2210 = vrcp.f32 %v1559_v8 }
 0x460   :  { %v2193_v34 = vpop.eup %2192  ;;  %2212 = vrcp.f32 %v1562_v42 }
 0x461   :  { %1690 = vperm.xlu1 %2150, %v2185_v27   ;;  %v2195_v13 = vpop.eup %2194  ;;  %2214 = vrcp.f32 %v1561_v58 }
 0x462   :  { %1685 = vperm.xlu0 %2149, %v2187_v22   ;;  %v2197_v36 = vpop.eup %2196 }
 0x463   :  { %v2199_v48 = vpop.eup %2198 }
 0x464   :  { %v2201_v6 = vpop.eup %2200 }
 0x465   :  { %1700 = vperm.xlu1 %2150, %v2189_v30   ;;  %v2203_v38 = vpop.eup %2202 }
 0x466   :  { %1695 = vperm.xlu0 %2149, %v2191_v51   ;;  %v2205_v39 = vpop.eup %2204 }
 0x467   :  { %v2207_v11 = vpop.eup %2206 }
 0x468   :  { %v2209_v28 = vpop.eup %2208 }
 0x469   :  { %1710 = vperm.xlu1 %2150, %v2193_v34   ;;  %v2211_v56 = vpop.eup %2210  ;;  %v1596_v34 = vld [vmem:[#allocation4 + $0x18] sm:$0xff] }
 0x46a   :  { %1705 = vperm.xlu0 %2149, %v2195_v13   ;;  %v2213_v9 = vpop.eup %2212  ;;  %v1594_v13 = vld [vmem:[#allocation4 + $0x8] sm:$0xff] }
 0x46b   :  { %v2215_v37 = vpop.eup %2214 }
 0x46d   :  { %1620 = vperm.xlu1 %2150, %v2197_v36  }
 0x46e   :  { %1615 = vperm.xlu0 %2149, %v2199_v48  }
 0x471   :  { %1630 = vperm.xlu1 %2150, %v2201_v6  }
 0x472   :  { %1625 = vperm.xlu0 %2149, %v2203_v38  }
 0x475   :  { %1640 = vperm.xlu1 %2150, %v2205_v39  }
 0x476   :  { %1635 = vperm.xlu0 %2149, %v2207_v11   ;;  %v1598_v11 = vld [vmem:[#allocation4 + $0x28] sm:$0xff] }
 0x479   :  { %1650 = vperm.xlu1 %2150, %v2209_v28   ;;  %v1597_v28 = vld [vmem:[#allocation4 + $0x20] sm:$0xff] }
 0x47a   :  { %1645 = vperm.xlu0 %2149, %v2211_v56  }
 0x47d   :  { %1660 = vperm.xlu1 %2150, %v2213_v9  }
 0x47e   :  { %1655 = vperm.xlu0 %2149, %v2215_v37  }
 0x4d8   :  { %v1676_v62 = vpop.permute.xlu1 %1675 }
 0x4d9   :  { %v1666_v18 = vpop.permute.xlu0 %1665  ;;  %v1725_v15 = vmul.f32 %v1676_v62, %v1605_v45 }
 0x4da   :  { %v1723_v25 = vmul.f32 %v1666_v18, %v1603_v53 }
 0x4dc   :  { %v1681_v23 = vpop.permute.xlu1 %1680 }
 0x4dd   :  { %v1726_v40 = vmul.f32 %v1681_v23, %v1606_v12  ;;  %v1671_v44 = vpop.permute.xlu0 %1670 }
 0x4de   :  { %v1724_v10 = vmul.f32 %v1671_v44, %v1604_v5 }
 0x4df   :  { %v2156_v31 = vpack.i.bf16 %v1726_v40, %v1725_v15 }
 0x4e0   :  { %v2151_v57 = vpack.i.bf16 %v1724_v10, %v1723_v25  ;;  %v1691_v2 = vpop.permute.xlu1 %1690  ;;  %v1600_v25 = vld [vmem:[#allocation4 + $0x38] sm:$0xff]  ;;  %v1599_v10 = vld [vmem:[#allocation4 + $0x30] sm:$0xff] }
 0x4e1   :  { %v1728_v20 = vmul.f32 %v1691_v2, %v1608_v61  ;;  %v1686_v21 = vpop.permute.xlu0 %1685  ;;  %2157 = vrot.lane.b32.xlu1 %v2156_v31, %s2223_s6 }
 0x4e2   :  { %v1727_v55 = vmul.f32 %v1686_v21, %v1607_v49  ;;  %2152 = vrot.lane.b32.xlu0 %v2151_v57, %s2223_s6 }
 0x4e4   :  { %v2161_v35 = vpack.i.bf16 %v1728_v20, %v1727_v55  ;;  %v1701_v60 = vpop.permute.xlu1 %1700 }
 0x4e5   :  { %v1730_v29 = vmul.f32 %v1701_v60, %v1610_v26  ;;  %v1696_v17 = vpop.permute.xlu0 %1695 }
 0x4e6   :  { %v1729_v41 = vmul.f32 %v1696_v17, %v1609_v54  ;;  %2162 = vrot.lane.b32.xlu0 %v2161_v35, %s2223_s6  ;;  %v1602_v54 = vld [vmem:[#allocation4 + $0x48] sm:$0xff]  ;;  %v1601_v35 = vld [vmem:[#allocation4 + $0x40] sm:$0xff] }
 0x4e8   :  { %v2166_v47 = vpack.i.bf16 %v1730_v29, %v1729_v41  ;;  %v1711_v3 = vpop.permute.xlu1 %1710 }
 0x4e9   :  { %v1732_v43 = vmul.f32 %v1711_v3, %v1612_v16  ;;  %v1706_v4 = vpop.permute.xlu0 %1705 }
 0x4ea   :  { %v1731_v27 = vmul.f32 %v1706_v4, %v1611_v19  ;;  %2167 = vrot.lane.b32.xlu1 %v2166_v47, %s2223_s6 }
 0x4ec   :  { %v2171_v33 = vpack.i.bf16 %v1732_v43, %v1731_v27  ;;  %v1621_v22 = vpop.permute.xlu1 %1620 }
 0x4ed   :  { %v1616_v14 = vpop.permute.xlu0 %1615  ;;  %v1714_v6 = vmul.f32 %v1621_v22, %v1594_v13 }
 0x4ee   :  { %2172 = vrot.lane.b32.xlu0 %v2171_v33, %s2223_s6  ;;  %v1713_v58 = vmul.f32 %v1616_v14, %v1593_v63 }
 0x4f0   :  { %v1631_v7 = vpop.permute.xlu1 %1630 }
 0x4f1   :  { %v1626_v32 = vpop.permute.xlu0 %1625  ;;  %v1716_v24 = vmul.f32 %v1631_v7, %v1596_v34 }
 0x4f2   :  { %v1715_v36 = vmul.f32 %v1626_v32, %v1595_v0 }
 0x4f4   :  { %v1641_v30 = vpop.permute.xlu1 %1640 }
 0x4f5   :  { %v1636_v1 = vpop.permute.xlu0 %1635  ;;  %v1718_v23 = vmul.f32 %v1641_v30, %v1598_v11 }
 0x4f6   :  { %v1717_v15 = vmul.f32 %v1636_v1, %v1597_v28 }
 0x4f8   :  { %v1651_v51 = vpop.permute.xlu1 %1650 }
 0x4f9   :  { %v1646_v52 = vpop.permute.xlu0 %1645  ;;  %v1720_v20 = vmul.f32 %v1651_v51, %v1600_v25 }
 0x4fa   :  { %v1719_v21 = vmul.f32 %v1646_v52, %v1599_v10 }
 0x4fc   :  { %v1661_v46 = vpop.permute.xlu1 %1660 }
 0x4fd   :  { %v1656_v59 = vpop.permute.xlu0 %1655  ;;  %v1722_v19 = vmul.f32 %v1661_v46, %v1602_v54 }
 0x4fe   :  { %v1721_v47 = vmul.f32 %v1656_v59, %v1601_v35 }
 0x553   :  { %v2158_v50 = vpop.permute.xlu1 %2157 }
 0x554   :  { %v2160_v8 = vunpack.i.h.bf16 %v2158_v50  ;;  %v2159_v48 = vunpack.i.l.bf16 %v2158_v50  ;;  %v2153_v42 = vpop.permute.xlu0 %2152 }
 0x555   :  { %v2155_v38 = vunpack.i.h.bf16 %v2153_v42  ;;  %v2154_v39 = vunpack.i.l.bf16 %v2153_v42 }
 0x556   :  { %v1777_v56 = vsel %vm74_vm1, %v1716_v24, %v2160_v8  ;;  %v1776_v9 = vsel %vm74_vm1, %v1715_v36, %v2159_v48 }
 0x557   :  { %v1903_v37 = vpack.c.bf16 %v1777_v56, %v1777_v56  ;;  %v1902_v62 = vpack.c.bf16 %v1776_v9, %v1776_v9  ;;  %v1775_v18 = vsel %vm74_vm1, %v1714_v6, %v2155_v38  ;;  %v1774_v45 = vsel %vm74_vm1, %v1713_v58, %v2154_v39 }
 0x558   :  { %v1901_v12 = vpack.c.bf16 %v1775_v18, %v1775_v18  ;;  %v1900_v53 = vpack.c.bf16 %v1774_v45, %v1774_v45  ;;  %v2163_v5 = vpop.permute.xlu0 %2162 }
 0x559   :  { %1828 = vst.msk [vmem:[%s3451_s9 + $0xc] sm:$0xf] %vm1824_vm4, %v1903_v37  ;;  %1827 = vst.msk [vmem:[%s3451_s9 + $0x8] sm:$0xf] %vm1824_vm4, %v1902_v62  ;;  %v2165_v40 = vunpack.i.h.bf16 %v2163_v5  ;;  %v2164_v44 = vunpack.i.l.bf16 %v2163_v5 }
 0x55a   :  { %1826 = vst.msk [vmem:[%s3451_s9 + $0x4] sm:$0xf] %vm1824_vm4, %v1901_v12  ;;  %1825 = vst.msk [vmem:[%s3451_s9] sm:$0xf] %vm1824_vm4, %v1900_v53 }
 0x55b   :  { %v1779_v61 = vsel %vm74_vm1, %v1718_v23, %v2165_v40  ;;  %v1778_v31 = vsel %vm74_vm1, %v1717_v15, %v2164_v44 }
 0x55c   :  { %v1905_v49 = vpack.c.bf16 %v1779_v61, %v1779_v61  ;;  %v1904_v57 = vpack.c.bf16 %v1778_v31, %v1778_v31  ;;  %v2168_v2 = vpop.permute.xlu1 %2167 }
 0x55d   :  { %v2170_v55 = vunpack.i.h.bf16 %v2168_v2  ;;  %v2169_v26 = vunpack.i.l.bf16 %v2168_v2 }
 0x55e   :  { %1830 = vst.msk [vmem:[%s3451_s9 + $0x14] sm:$0xf] %vm1824_vm4, %v1905_v49  ;;  %1829 = vst.msk [vmem:[%s3451_s9 + $0x10] sm:$0xf] %vm1824_vm4, %v1904_v57 }
 0x55f   :  { %v1781_v60 = vsel %vm74_vm1, %v1720_v20, %v2170_v55  ;;  %v1780_v29 = vsel %vm74_vm1, %v1719_v21, %v2169_v26 }
 0x560   :  { %v1907_v17 = vpack.c.bf16 %v1781_v60, %v1781_v60  ;;  %v1906_v41 = vpack.c.bf16 %v1780_v29, %v1780_v29  ;;  %v2173_v16 = vpop.permute.xlu0 %2172 }
 0x561   :  { %v2175_v3 = vunpack.i.h.bf16 %v2173_v16  ;;  %v2174_v43 = vunpack.i.l.bf16 %v2173_v16 }
 0x562   :  { %1832 = vst.msk [vmem:[%s3451_s9 + $0x1c] sm:$0xf] %vm1824_vm4, %v1907_v17  ;;  %1831 = vst.msk [vmem:[%s3451_s9 + $0x18] sm:$0xf] %vm1824_vm4, %v1906_v41 }
 0x563   :  { %v1783_v4 = vsel %vm74_vm1, %v1722_v19, %v2175_v3  ;;  %v1782_v27 = vsel %vm74_vm1, %v1721_v47, %v2174_v43 }
 0x564   :  { %v1909_v33 = vpack.c.bf16 %v1783_v4, %v1783_v4  ;;  %v1908_v22 = vpack.c.bf16 %v1782_v27, %v1782_v27 }
 0x566   :  { %1834 = vst.msk [vmem:[%s3451_s9 + $0x24] sm:$0xf] %vm1824_vm4, %v1909_v33  ;;  %1833 = vst.msk [vmem:[%s3451_s9 + $0x20] sm:$0xf] %vm1824_vm4, %v1908_v22 }

// kernel: _forward.71
= control target key start
LH: loop header
LB: loop body
LE: loop exit
PB: predicated region body
PF: predicated region fallthrough
CT: control target
= control target key end

     0   :  { %v234_v0 = vmov 0.0   ;;  %vm235_vm0 = vmmov 0   ;;  %vm73_vm1 = vcmask 261120   ;;  %vm162_vm2 = vcmask 130048   ;;  %s325_s1 = inlined_call_operand.vmem [shape: bf16[32,16], index: 1, kind: input, shape index: {}]   ;;  %s326_s0 = inlined_call_operand.vmem [shape: bf16[80,32], index: 0, kind: input, shape index: {}]   ;;  %s327_s2 = inlined_call_operand.vmem [shape: f32[1,16], index: 2, kind: input, shape index: {}]   ;;  %s328_s3 = inlined_call_operand.vmem [shape: f32[80,16], index: 3, kind: output, shape index: {}]  }
   0x1   :  { %197 = vmatprep.subr.bf16.mxu0 %v234_v0  ;;  %v227_v1 = vld [vmem:[%s325_s1] sm:$0xff]   ;;  %221 = vmatprep.subr.bf16.mxu1 %v234_v0  ;;  %v228_v2 = vld [vmem:[%s325_s1 + $0x8] sm:$0xff]   ;;  %v230_v4 = vld [vmem:[%s326_s0 + $0x18] sm:$0xff]  }
   0x2   :  { %201 = vmatprep.mubr.msk.bf16.mxu0 %vm235_vm0, %v234_v0  ;;  %213 = vmatprep.mubr.msk.bf16.mxu1 %vm235_vm0, %v234_v0  ;;  %v229_v3 = vld [vmem:[%s326_s0] sm:$0xff]   ;;  %v231_v5 = vld [vmem:[%s326_s0 + $0x8] sm:$0xff]   ;;  %v233_v7 = vld [vmem:[%s326_s0 + $0x10] sm:$0xff]  }
   0x3   :  { %198 = vmatpush3.bf16.msra.mxu0 %v227_v1  ;;  %223 = vmatpush3.bf16.msra.mxu1 %v227_v1  ;;  %v232_v6 = vld [vmem:[%s326_s0 + $0x20] sm:$0xff]  }
   0x4   :  { %199 = vmatprep.subr.bf16.mxu0 %v234_v0  ;;  %222 = vmatprep.subr.bf16.mxu1 %v234_v0  ;;  %v177_v8 = vld [vmem:[%s327_s2] ss:$0 sm:$0xff] }
   0x7   :  { %200 = vmatpush3.bf16.msra.mxu0 %v228_v2  ;;  %224 = vmatpush3.bf16.msra.mxu1 %v228_v2 }
   0xa   :  { %202 = vmatmul.mubr.msk.bf16.vlgmr.msra.gmra.mrb[0].mxu0 %vm73_vm1, %v229_v3  ;;  %214 = vmatmul.mubr.msk.bf16.vlgmr.msra.gmra.mrb[0].mxu1 %vm73_vm1, %v230_v4 }
   0xb   :  { %205 = vmatprep.mubr.msk.bf16.mxu0 %vm235_vm0, %v234_v0  ;;  %217 = vmatprep.mubr.msk.bf16.mxu1 %vm235_vm0, %v234_v0 }
  0x12   :  { %206 = vmatmul.mubr.msk.bf16.gmra.mrb[4].mxu0 %vm73_vm1, %v231_v5  ;;  %218 = vmatmul.mubr.msk.bf16.gmra.mrb[4].mxu1 %vm73_vm1, %v232_v6 }
  0x13   :  { %209 = vmatprep.mubr.msk.bf16.mxu0 %vm235_vm0, %v234_v0 }
  0x1a   :  { %210 = vmatmul.mubr.msk.bf16.gmra.mrb[8].mxu0 %vm73_vm1, %v233_v7 }
  0xdd   :  { %v123_v9 = vpop.f32.mrb[0].mxu0  ;;  %v147_v10 = vpop.f32.mrb[0].mxu1 }
  0xde   :  { %v124_v11 = vadd.f32 %v177_v8, %v123_v9  ;;  %v203_v12 = vpop.f32.mrb[1].mxu0  ;;  %v148_v13 = vadd.f32 %v177_v8, %v147_v10  ;;  %v215_v14 = vpop.f32.mrb[1].mxu1 }
  0xdf   :  { %v126_v15 = vpop.f32.mrb[2].mxu0  ;;  %v150_v16 = vpop.f32.mrb[2].mxu1 }
  0xe0   :  { %163 = vst.msk [vmem:[%s328_s3] sm:$0xff] %vm162_vm2, %v124_v11  ;;  %v127_v17 = vadd.f32 %v177_v8, %v126_v15  ;;  %v204_v18 = vpop.f32.mrb[3].mxu0  ;;  %169 = vst.msk [vmem:[%s328_s3 + $0x30] sm:$0xff] %vm162_vm2, %v148_v13  ;;  %v151_v19 = vadd.f32 %v177_v8, %v150_v16  ;;  %v216_v20 = vpop.f32.mrb[3].mxu1 }
  0xe2   :  { %164 = vst.msk [vmem:[%s328_s3 + $0x8] sm:$0xff] %vm162_vm2, %v127_v17  ;;  %170 = vst.msk [vmem:[%s328_s3 + $0x38] sm:$0xff] %vm162_vm2, %v151_v19 }
  0xe5   :  { %v131_v21 = vpop.f32.mrb[4].mxu0  ;;  %v155_v22 = vpop.f32.mrb[4].mxu1 }
  0xe6   :  { %v132_v23 = vadd.f32 %v177_v8, %v131_v21  ;;  %v207_v24 = vpop.f32.mrb[5].mxu0  ;;  %v156_v25 = vadd.f32 %v177_v8, %v155_v22  ;;  %v219_v26 = vpop.f32.mrb[5].mxu1 }
  0xe7   :  { %v134_v27 = vpop.f32.mrb[6].mxu0  ;;  %v158_v28 = vpop.f32.mrb[6].mxu1 }
  0xe8   :  { %165 = vst.msk [vmem:[%s328_s3 + $0x10] sm:$0xff] %vm162_vm2, %v132_v23  ;;  %v135_v29 = vadd.f32 %v177_v8, %v134_v27  ;;  %v208_v30 = vpop.f32.mrb[7].mxu0  ;;  %171 = vst.msk [vmem:[%s328_s3 + $0x40] sm:$0xff] %vm162_vm2, %v156_v25  ;;  %v159_v31 = vadd.f32 %v177_v8, %v158_v28  ;;  %v220_v32 = vpop.f32.mrb[7].mxu1 }
  0xea   :  { %166 = vst.msk [vmem:[%s328_s3 + $0x18] sm:$0xff] %vm162_vm2, %v135_v29  ;;  %172 = vst.msk [vmem:[%s328_s3 + $0x48] sm:$0xff] %vm162_vm2, %v159_v31 }
  0xed   :  { %v139_v33 = vpop.f32.mrb[8].mxu0 }
  0xee   :  { %v140_v34 = vadd.f32 %v177_v8, %v139_v33  ;;  %v211_v35 = vpop.f32.mrb[9].mxu0 }
  0xef   :  { %v142_v36 = vpop.f32.mrb[10].mxu0 }
  0xf0   :  { %167 = vst.msk [vmem:[%s328_s3 + $0x20] sm:$0xff] %vm162_vm2, %v140_v34  ;;  %v143_v37 = vadd.f32 %v177_v8, %v142_v36  ;;  %v212_v38 = vpop.f32.mrb[11].mxu0 }
  0xf2   :  { %168 = vst.msk [vmem:[%s328_s3 + $0x28] sm:$0xff] %vm162_vm2, %v143_v37 }

// kernel: _forward.45
= control target key start
LH: loop header
LB: loop body
LE: loop exit
PB: predicated region body
PF: predicated region fallthrough
CT: control target
= control target key end

     0   :  { %v667_v0 = vmov 0   ;;  %v668_v5 = vmov 0.0   ;;  %vm669_vm0 = vmmov 0   ;;  %vm317_vm1 = vcmask 523264   ;;  %s891_s3 = inlined_call_operand.vmem [shape: s32[80,1], index: 3, kind: input, shape index: {}]   ;;  %s892_s4 = inlined_call_operand.vmem [shape: bf16[64,32], index: 4, kind: input, shape index: {}]   ;;  %s893_s2 = inlined_call_operand.vmem [shape: f32[8,32], index: 2, kind: input, shape index: {}]   ;;  %s894_s0 = inlined_call_operand.vmem [shape: bf16[80,64], index: 0, kind: input, shape index: {}]   ;;  %s895_s5 = inlined_call_operand.vmem [shape: f32[1,32], index: 5, kind: input, shape index: {}]   ;;  %s896_s1 = inlined_call_operand.vmem [shape: bf16[80,32], index: 1, kind: input, shape index: {}]   ;;  %s897_s6 = inlined_call_operand.vmem [shape: bf16[80,32], index: 6, kind: output, shape index: {}]  }
   0x1   :  { %657 = vset.pattern.permute.xlu1 %v667_v0  ;;  %656 = vset.pattern.permute.xlu0 %v667_v0  ;;  %v36_v1 = vld [vmem:[%s891_s3 + $0x10] sm:$0xff]  ;;  %v34_v2 = vld [vmem:[%s891_s3] sm:$0xff]  ;;  %v37_v3 = vld [vmem:[%s891_s3 + $0x18] sm:$0xff]  ;;  %v44_v20 = vlaneseq  ;;  %vm107_vm2 = vcmask 64512   ;;  %vm486_vm13 = vcmask 257024  }
   0x2   :  { %53 = vperm.xlu1 %657, %v36_v1   ;;  %47 = vperm.xlu0 %656, %v34_v2   ;;  %v35_v4 = vld [vmem:[%s891_s3 + $0x8] sm:$0xff]  ;;  %v658_v7 = vld [vmem:[%s892_s4] sm:$0xff]   ;;  %v41_v10 = vld [vmem:[%s891_s3 + $0x38] sm:$0xff] }
   0x3   :  { %645 = vmatprep.subr.bf16.mxu1 %v668_v5  ;;  %633 = vmatprep.mubr.msk.bf16.mxu1 %vm669_vm0, %v668_v5  ;;  %v39_v6 = vld [vmem:[%s891_s3 + $0x28] sm:$0xff]  ;;  %v38_v8 = vld [vmem:[%s891_s3 + $0x20] sm:$0xff]  ;;  %v40_v11 = vld [vmem:[%s891_s3 + $0x30] sm:$0xff]  ;;  %v45_v21 = vand.u32 127, %v44_v20 }
   0x4   :  { %649 = vmatpush3.bf16.msra.mxu1 %v658_v7  ;;  %v659_v9 = vld [vmem:[%s892_s4 + $0x8] sm:$0xff]   ;;  %v106_v12 = vld [vmem:[%s893_s2] sm:$0xff]  ;;  %v745_v13 = vld [vmem:[%s892_s4 + $0x10] sm:$0xff]  }
   0x5   :  { %646 = vmatprep.subr.bf16.mxu1 %v668_v5  ;;  %600 = vmatprep.subr.mxu0 %v106_v12  ;;  %v43_v14 = vld [vmem:[%s891_s3 + $0x48] sm:$0xff]  ;;  %v42_v15 = vld [vmem:[%s891_s3 + $0x40] sm:$0xff]  ;;  %v661_v16 = vld [vmem:[%s892_s4 + $0x18] sm:$0xff]  }
   0x6   :  { %56 = vperm.xlu1 %657, %v37_v3   ;;  %50 = vperm.xlu0 %656, %v35_v4   ;;  %v662_v17 = vld [vmem:[%s894_s0 + $0x10] sm:$0xff]   ;;  %v663_v18 = vld [vmem:[%s894_s0 + $0x18] sm:$0xff]   ;;  %v664_v19 = vld [vmem:[%s894_s0 + $0x20] sm:$0xff]  }
   0x7   :  { %601 = vmatpush3.msra.mxu0 %v106_v12  ;;  %v665_v42 = vld [vmem:[%s894_s0] sm:$0xff]   ;;  %v666_v43 = vld [vmem:[%s894_s0 + $0x8] sm:$0xff]   ;;  %v577_v60 = vld [vmem:[%s896_s1 + $0x10] sm:$0xff]  }
   0x8   :  { %650 = vmatpush3.bf16.msra.mxu1 %v659_v9  ;;  %617 = vmatprep.subr.bf16.mxu0 %v668_v5  ;;  %v817_v58 = vld [vmem:[%s895_s5] ss:$0 sm:$0xff]  ;;  %v567_v0 = vunpack.c.h.bf16 %v577_v60  ;;  %v566_v2 = vunpack.c.l.bf16 %v577_v60  ;;  %v578_v3 = vld [vmem:[%s896_s1 + $0x18] sm:$0xff]  }
   0x9   :  { %647 = vmatprep.subr.bf16.mxu1 %v668_v5 }
   0xa   :  { %62 = vperm.xlu1 %657, %v39_v6   ;;  %59 = vperm.xlu0 %656, %v38_v8  }
   0xc   :  { %651 = vmatpush3.bf16.msra.mxu1 %v745_v13 }
   0xd   :  { %648 = vmatprep.subr.bf16.mxu1 %v668_v5 }
   0xe   :  { %68 = vperm.xlu1 %657, %v41_v10   ;;  %65 = vperm.xlu0 %656, %v40_v11   ;;  %v571_v10 = vunpack.c.h.bf16 %v578_v3 }
  0x10   :  { %652 = vmatpush3.bf16.msra.mxu1 %v661_v16 }
  0x12   :  { %74 = vperm.xlu1 %657, %v43_v14   ;;  %71 = vperm.xlu0 %656, %v42_v15   ;;  %v579_v14 = vld [vmem:[%s896_s1 + $0x20] sm:$0xff]  }
  0x13   :  { %634 = vmatmul.mubr.msk.bf16.vlgmr.msra.gmra.mrb[0].mxu1 %vm317_vm1, %v662_v17 }
  0x14   :  { %637 = vmatprep.mubr.msk.bf16.mxu1 %vm669_vm0, %v668_v5 }
  0x1b   :  { %638 = vmatmul.mubr.msk.bf16.gmra.mrb[4].mxu1 %vm317_vm1, %v663_v18 }
  0x1c   :  { %641 = vmatprep.mubr.msk.bf16.mxu1 %vm669_vm0, %v668_v5 }
  0x23   :  { %642 = vmatmul.mubr.msk.bf16.gmra.mrb[8].mxu1 %vm317_vm1, %v664_v19 }
  0x81   :  { %v54_v22 = vpop.permute.xlu1 %53  ;;  %v48_v23 = vpop.permute.xlu0 %47 }
  0x82   :  { %vm76_vm3 = vcmp.eq.s32.totalorder %v48_v23, %v45_v21  ;;  %vm78_vm4 = vcmp.eq.s32.totalorder %v54_v22, %v45_v21  ;;  %v575_v23 = vunpack.c.h.bf16 %v579_v14 }
  0x83   :  { %v501_v24 = vsel %vm76_vm3, 1.0, %v668_v5  ;;  %v503_v27 = vsel %vm78_vm4, 1.0, %v668_v5 }
  0x84   :  { %602 = vmatprep.mubr.msk.f32.mxu0 %vm107_vm2, %v501_v24 }
  0x85   :  { %v57_v25 = vpop.permute.xlu1 %56  ;;  %v51_v26 = vpop.permute.xlu0 %50 }
  0x86   :  { %vm77_vm5 = vcmp.eq.s32.totalorder %v51_v26, %v45_v21  ;;  %vm79_vm6 = vcmp.eq.s32.totalorder %v57_v25, %v45_v21  ;;  %v574_v26 = vunpack.c.l.bf16 %v579_v14 }
  0x87   :  { %v502_v28 = vsel %vm77_vm5, 1.0, %v668_v5  ;;  %v504_v31 = vsel %vm79_vm6, 1.0, %v668_v5 }
  0x88   :  { %603 = vmatmul.mubr.msk.f32.vlgmr.msra.gmra.mrb[0].mxu0 %vm107_vm2, %v502_v28 }
  0x89   :  { %618 = vmatpush3.bf16.msra.mxu0 %v658_v7  ;;  %v63_v29 = vpop.permute.xlu1 %62  ;;  %v60_v30 = vpop.permute.xlu0 %59  ;;  %605 = vmatprep.mubr.msk.f32.mxu0 %vm107_vm2, %v503_v27 }
  0x8a   :  { %vm80_vm7 = vcmp.eq.s32.totalorder %v60_v30, %v45_v21  ;;  %619 = vmatprep.subr.bf16.mxu0 %v668_v5  ;;  %vm81_vm8 = vcmp.eq.s32.totalorder %v63_v29, %v45_v21 }
  0x8b   :  { %v505_v32 = vsel %vm80_vm7, 1.0, %v668_v5  ;;  %v506_v35 = vsel %vm81_vm8, 1.0, %v668_v5 }
  0x8c   :  { %606 = vmatmul.mubr.msk.f32.gmra.mrb[2].mxu0 %vm107_vm2, %v504_v31 }
  0x8d   :  { %v69_v33 = vpop.permute.xlu1 %68  ;;  %v66_v34 = vpop.permute.xlu0 %65  ;;  %608 = vmatprep.mubr.msk.f32.mxu0 %vm107_vm2, %v505_v32  ;;  %620 = vmatpush3.bf16.msra.mxu0 %v659_v9  ;;  %v557_v32 = vld [vmem:[%s896_s1] sm:$0xff]  }
  0x8e   :  { %vm82_vm9 = vcmp.eq.s32.totalorder %v66_v34, %v45_v21  ;;  %621 = vmatprep.subr.bf16.mxu0 %v668_v5  ;;  %vm83_vm10 = vcmp.eq.s32.totalorder %v69_v33, %v45_v21 }
  0x8f   :  { %v507_v36 = vsel %vm82_vm9, 1.0, %v668_v5  ;;  %v508_v39 = vsel %vm83_vm10, 1.0, %v668_v5 }
  0x90   :  { %609 = vmatmul.mubr.msk.f32.gmra.mrb[4].mxu0 %vm107_vm2, %v506_v35 }
  0x91   :  { %v75_v37 = vpop.permute.xlu1 %74  ;;  %v72_v38 = vpop.permute.xlu0 %71  ;;  %611 = vmatprep.mubr.msk.f32.mxu0 %vm107_vm2, %v507_v36  ;;  %622 = vmatpush3.bf16.msra.mxu0 %v745_v13  ;;  %v570_v13 = vunpack.c.l.bf16 %v578_v3 }
  0x92   :  { %vm84_vm11 = vcmp.eq.s32.totalorder %v72_v38, %v45_v21  ;;  %623 = vmatprep.subr.bf16.mxu0 %v668_v5  ;;  %vm85_vm12 = vcmp.eq.s32.totalorder %v75_v37, %v45_v21  ;;  %v558_v38 = vunpack.c.l.bf16 %v557_v32 }
  0x93   :  { %v509_v40 = vsel %vm84_vm11, 1.0, %v668_v5  ;;  %v510_v41 = vsel %vm85_vm12, 1.0, %v668_v5 }
  0x94   :  { %612 = vmatmul.mubr.msk.f32.gmra.mrb[6].mxu0 %vm107_vm2, %v508_v39 }
  0x95   :  { %614 = vmatprep.mubr.msk.f32.mxu0 %vm107_vm2, %v509_v40  ;;  %624 = vmatpush3.bf16.msra.mxu0 %v661_v16 }
  0x98   :  { %615 = vmatmul.mubr.msk.f32.gmra.mrb[8].mxu0 %vm107_vm2, %v510_v41 }
  0x99   :  { %625 = vmatprep.mubr.msk.bf16.mxu0 %vm669_vm0, %v668_v5 }
  0x9c   :  { %626 = vmatmul.mubr.msk.bf16.vlgmr.msra.gmra.mrb[12].mxu0 %vm317_vm1, %v665_v42 }
  0x9d   :  { %629 = vmatprep.mubr.msk.bf16.mxu0 %vm669_vm0, %v668_v5 }
  0xa4   :  { %630 = vmatmul.mubr.msk.bf16.gmra.mrb[16].mxu0 %vm317_vm1, %v666_v43 }
  0xe6   :  { %v383_v44 = vpop.f32.mrb[0].mxu1 }
  0xe7   :  { %v635_v45 = vpop.f32.mrb[1].mxu1  ;;  %v384_v63 = vadd.f32 %v817_v58, %v383_v44  ;;  %v559_v44 = vunpack.c.h.bf16 %v557_v32 }
  0xe8   :  { %v386_v46 = vpop.f32.mrb[2].mxu1 }
  0xe9   :  { %v636_v47 = vpop.f32.mrb[3].mxu1  ;;  %v387_v62 = vadd.f32 %v817_v58, %v386_v46 }
  0xee   :  { %v391_v48 = vpop.f32.mrb[4].mxu1 }
  0xef   :  { %v639_v49 = vpop.f32.mrb[5].mxu1  ;;  %v392_v7 = vadd.f32 %v817_v58, %v391_v48  ;;  %v576_v48 = vld [vmem:[%s896_s1 + $0x8] sm:$0xff]  }
  0xf0   :  { %v394_v50 = vpop.f32.mrb[6].mxu1 }
  0xf1   :  { %v640_v51 = vpop.f32.mrb[7].mxu1  ;;  %v395_v6 = vadd.f32 %v817_v58, %v394_v50 }
  0xf6   :  { %v399_v52 = vpop.f32.mrb[8].mxu1 }
  0xf7   :  { %v643_v53 = vpop.f32.mrb[9].mxu1  ;;  %v400_v20 = vadd.f32 %v817_v58, %v399_v52 }
  0xf8   :  { %v402_v54 = vpop.f32.mrb[10].mxu1 }
  0xf9   :  { %v644_v55 = vpop.f32.mrb[11].mxu1  ;;  %v403_v18 = vadd.f32 %v817_v58, %v402_v54  ;;  %v562_v54 = vunpack.c.l.bf16 %v576_v48 }
 0x15b   :  { %v812_v56 = vpop.f32.mrb[0].mxu0 }
 0x15c   :  { %v204_v57 = vpop.f32.mrb[1].mxu0 }
 0x15f   :  { %v819_v59 = vpop.f32.mrb[2].mxu0 }
 0x160   :  { %v824_v61 = vpop.f32.mrb[3].mxu0 }
 0x163   :  { %v610_v1 = vpop.f32.mrb[4].mxu0 }
 0x164   :  { %v431_v4 = vmul.f32 %v610_v1, %v387_v62  ;;  %v224_v5 = vpop.f32.mrb[5].mxu0  ;;  %v563_v62 = vunpack.c.h.bf16 %v576_v48 }
 0x165   :  { %v430_v8 = vmul.f32 %v384_v63, %v224_v5 }
 0x166   :  { %v441_v9 = vadd.f32 %v567_v0, %v431_v4 }
 0x167   :  { %v440_v11 = vadd.f32 %v566_v2, %v430_v8  ;;  %v613_v12 = vpop.f32.mrb[6].mxu0 }
 0x168   :  { %v551_v15 = vpack.c.bf16 %v441_v9, %v441_v9  ;;  %v433_v16 = vmul.f32 %v613_v12, %v395_v6  ;;  %v234_v17 = vpop.f32.mrb[7].mxu0 }
 0x169   :  { %v550_v19 = vpack.c.bf16 %v440_v11, %v440_v11  ;;  %v432_v21 = vmul.f32 %v392_v7, %v234_v17 }
 0x16a   :  { %492 = vst.msk [vmem:[%s897_s6 + $0x14] sm:$0xf] %vm486_vm13, %v551_v15  ;;  %v443_v22 = vadd.f32 %v571_v10, %v433_v16 }
 0x16b   :  { %491 = vst.msk [vmem:[%s897_s6 + $0x10] sm:$0xf] %vm486_vm13, %v550_v19  ;;  %v442_v24 = vadd.f32 %v570_v13, %v432_v21  ;;  %v616_v25 = vpop.f32.mrb[8].mxu0 }
 0x16c   :  { %v553_v27 = vpack.c.bf16 %v443_v22, %v443_v22  ;;  %v435_v28 = vmul.f32 %v616_v25, %v403_v18  ;;  %v244_v29 = vpop.f32.mrb[9].mxu0 }
 0x16d   :  { %v552_v30 = vpack.c.bf16 %v442_v24, %v442_v24  ;;  %v434_v31 = vmul.f32 %v400_v20, %v244_v29 }
 0x16e   :  { %494 = vst.msk [vmem:[%s897_s6 + $0x1c] sm:$0xf] %vm486_vm13, %v553_v27  ;;  %v445_v33 = vadd.f32 %v575_v23, %v435_v28 }
 0x16f   :  { %493 = vst.msk [vmem:[%s897_s6 + $0x18] sm:$0xf] %vm486_vm13, %v552_v30  ;;  %v444_v34 = vadd.f32 %v574_v26, %v434_v31  ;;  %v367_v35 = vpop.f32.mrb[12].mxu0 }
 0x170   :  { %v555_v36 = vpack.c.bf16 %v445_v33, %v445_v33  ;;  %v368_v37 = vadd.f32 %v817_v58, %v367_v35  ;;  %v627_v39 = vpop.f32.mrb[13].mxu0 }
 0x171   :  { %v554_v40 = vpack.c.bf16 %v444_v34, %v444_v34  ;;  %v370_v41 = vpop.f32.mrb[14].mxu0 }
 0x172   :  { %496 = vst.msk [vmem:[%s897_s6 + $0x24] sm:$0xf] %vm486_vm13, %v555_v36  ;;  %v426_v42 = vmul.f32 %v368_v37, %v204_v57  ;;  %v371_v43 = vadd.f32 %v817_v58, %v370_v41  ;;  %v628_v45 = vpop.f32.mrb[15].mxu0 }
 0x173   :  { %495 = vst.msk [vmem:[%s897_s6 + $0x20] sm:$0xf] %vm486_vm13, %v554_v40 }
 0x174   :  { %v436_v46 = vadd.f32 %v558_v38, %v426_v42  ;;  %v427_v47 = vmul.f32 %v812_v56, %v371_v43 }
 0x176   :  { %v546_v49 = vpack.c.bf16 %v436_v46, %v436_v46  ;;  %v437_v50 = vadd.f32 %v559_v44, %v427_v47 }
 0x177   :  { %v375_v51 = vpop.f32.mrb[16].mxu0 }
 0x178   :  { %487 = vst.msk [vmem:[%s897_s6] sm:$0xf] %vm486_vm13, %v546_v49  ;;  %v547_v52 = vpack.c.bf16 %v437_v50, %v437_v50  ;;  %v376_v53 = vadd.f32 %v817_v58, %v375_v51  ;;  %v631_v55 = vpop.f32.mrb[17].mxu0 }
 0x179   :  { %v378_v57 = vpop.f32.mrb[18].mxu0 }
 0x17a   :  { %488 = vst.msk [vmem:[%s897_s6 + $0x4] sm:$0xf] %vm486_vm13, %v547_v52  ;;  %v428_v56 = vmul.f32 %v376_v53, %v824_v61  ;;  %v379_v60 = vadd.f32 %v817_v58, %v378_v57  ;;  %v632_v63 = vpop.f32.mrb[19].mxu0 }
 0x17c   :  { %v438_v0 = vadd.f32 %v562_v54, %v428_v56  ;;  %v429_v1 = vmul.f32 %v819_v59, %v379_v60 }
 0x17e   :  { %v548_v2 = vpack.c.bf16 %v438_v0, %v438_v0  ;;  %v439_v3 = vadd.f32 %v563_v62, %v429_v1 }
 0x180   :  { %489 = vst.msk [vmem:[%s897_s6 + $0x8] sm:$0xf] %vm486_vm13, %v548_v2  ;;  %v549_v4 = vpack.c.bf16 %v439_v3, %v439_v3 }
 0x182   :  { %490 = vst.msk [vmem:[%s897_s6 + $0xc] sm:$0xf] %vm486_vm13, %v549_v4 }

</bundles_post_ra>
